<compile_context>
chip_gen: v5e
topology: v5e:2x2
jax: 0.10.0
libtpu: 0.0.40
codegen_flags: <defaults>
</compile_context>

<pallas_src>
import functools

import jax
import jax.numpy as jnp
import numpy as np
from jax import lax
from jax.experimental import pallas as pl
from jax.experimental.pallas import tpu as pltpu


def _round_up(x: int, m: int) -> int:
    return (x + m - 1) // m * m


# f32 elements per depthwise register-accumulation chunk (~32 KiB = 8 vregs per
# live value, so acc + tap + product stay well inside the 64-vreg file).
_DW_CHUNK_ELEMS = 8 * 1024


def _inverted_residual_kernel(
    x_ref,    # (1, H+2, W+2, Cin)   spatially pre-padded input (resident per batch elem)
    w1_ref,   # (Cin, Chid)          expand 1x1 weight (BN folded)  [unused if !has_expand]
    b1_ref,   # (1, Chid)
    wd_ref,   # (3, 3, Chid)         depthwise 3x3 weight (BN folded)
    bd_ref,   # (1, Chid)
    w3_ref,   # (Chid, Cout)         projection 1x1 weight (BN folded)
    b3_ref,   # (1, Cout)
    o_ref,    # (1, TH, Wo, Cout)    output row-stripe
    yp_ref,   # VMEM scratch (R, W+2, Chid): expanded activation window incl. halo
    y2_ref,   # VMEM scratch (TH, Wo, Chid): depthwise+ReLU6 result (projection LHS)
    *, stride: int, has_expand: bool, use_shortcut: bool, fix_bottom: bool,
):
    _, _Hp, Wp, Cin = x_ref.shape
    R, _, Chid = yp_ref.shape
    _, TH, Wo, Cout = o_ref.shape
    W = Wp - 2

    h = pl.program_id(1)
    # First padded-input row needed by this output row-stripe.
    r0 = pl.multiple_of(h * (TH * stride), TH * stride)

    # ---- expand: 1x1 conv (channel matmul) + BN + ReLU6 -> yp scratch ----
    if has_expand:
        xw = x_ref[0, pl.ds(r0, R), 1:Wp - 1, :]                  # (R, W, Cin) interior cols
        y = jnp.dot(xw.reshape(R * W, Cin), w1_ref[...],
                    preferred_element_type=jnp.float32)
        y = jnp.clip(y + b1_ref[...], 0.0, 6.0)
        yp_ref[:, 1:Wp - 1, :] = y.reshape(R, W, Chid).astype(yp_ref.dtype)
        # The spatial zero-pad lives in x-space; after conv+BN+ReLU6 the pad
        # ring would read relu6(b1) != 0, so zero the thin halo ring explicitly
        # (columns always; top/bottom rows only at the image border).
        zc = jnp.zeros((R, 1, Chid), yp_ref.dtype)
        yp_ref[:, 0:1, :] = zc
        yp_ref[:, Wp - 1:Wp, :] = zc

        @pl.when(h == 0)
        def _():
            yp_ref[0:1, :, :] = jnp.zeros((1, Wp, Chid), yp_ref.dtype)

        if fix_bottom:
            @pl.when(h == pl.num_programs(1) - 1)
            def _():
                yp_ref[R - 1:R, :, :] = jnp.zeros((1, Wp, Chid), yp_ref.dtype)
    else:
        # expand_ratio == 1: depthwise acts directly on x (already zero-padded,
        # so the halo ring is already correct).
        yp_ref[...] = x_ref[0, pl.ds(r0, R), :, :].astype(yp_ref.dtype)

    # ---- depthwise 3x3 (pad=1, stride) + BN + ReLU6, register accumulation ----
    # Bias folded into the accumulator init; one clip; one store per chunk.
    # TODO(synk): for stride==2 the W-axis taps are sublane-strided loads; a
    # de-interleaved (even/odd column) yp layout would keep every tap on the
    # contiguous vld path.
    bdv = bd_ref[...].astype(jnp.float32).reshape(1, 1, Chid)
    thc = max(1, min(TH, _DW_CHUNK_ELEMS // max(Wo * Chid, 1)))
    for c0 in range(0, TH, thc):
        rows = min(thc, TH - c0)
        acc = bdv
        for dh in range(3):
            for dw in range(3):
                if stride == 1:
                    tap = yp_ref[c0 + dh:c0 + dh + rows, dw:dw + Wo, :]
                else:
                    tap = yp_ref[pl.ds(c0 * stride + dh, rows, stride),
                                 pl.ds(dw, Wo, stride), :]
                acc = acc + tap.astype(jnp.float32) * wd_ref[dh, dw, :].astype(jnp.float32)
        y2_ref[c0:c0 + rows] = jnp.clip(acc, 0.0, 6.0).astype(y2_ref.dtype)

    # ---- projection: 1x1 conv + BN (no activation), full-stripe MXU matmul ----
    # The projection LHS follows the activation dtype (exact for f32; with bf16
    # activations this is the intended bf16 MXU path).
    z = jnp.dot(y2_ref[...].reshape(TH * Wo, Chid), w3_ref[...],
                preferred_element_type=jnp.float32)
    z = (z + b3_ref[...]).reshape(TH, Wo, Cout)

    if use_shortcut:
        # stride == 1 here; the residual rows are the window interior.
        xres = x_ref[0, pl.ds(r0 + 1, TH), 1:1 + Wo, :]
        z = z + xres.astype(jnp.float32)

    o_ref[0] = z.astype(o_ref.dtype)


def _physical_vmem_bytes() -> int:
    """Physical VMEM per TensorCore; conservative 64 MiB (v7x) fallback."""
    try:
        info = pltpu.get_tpu_info()
        for name in ("vmem_capacity_bytes", "vmem_size_bytes", "vmem_bytes"):
            v = getattr(info, name, None)
            if v:
                return int(v)
    except Exception:
        pass
    return 64 * 1024 * 1024


def inverted_residual(x, params, *, stride: int, use_shortcut: bool,
                      has_expand: bool = True, lane_multiple: int = 128,
                      row_tile: int | None = None,
                      return_padded_channels: bool = False):
    """Fused MobileNetV2 inverted-residual block.  x: NHWC; returns NHWC.

    The output channel axis is zero-padded (exactly) to `lane_multiple` so the
    final store is lane-dense; it is sliced back unless
    `return_padded_channels=True`.  In a full network you would carry padded
    channels between blocks and skip the per-call pad/slice.  On v6e/v7x
    consider lane_multiple=256 (256-wide MXU) and bf16 inputs/weights.
    """
    N, H, W, Cin = x.shape
    w1, b1, wd, bd, w3, b3 = (params[k] for k in ("w1", "b1", "wd", "bd", "w3", "b3"))
    Chid = wd.shape[2]
    Cout = w3.shape[1]
    Ho = (H - 1) // stride + 1
    Wo = (W - 1) // stride + 1
    Hp, Wp = H + 2, W + 2

    # ---- channel padding policy (exact: zero weights / zero bias) ----
    #  * Cout -> lane multiple: lane-dense output stores.
    #  * Chid -> lane multiple: MXU N/K of both matmuls; hidden act never hits HBM.
    #  * Cin (HBM input) padded only when the residual add needs matching widths;
    #    otherwise it is just the first matmul's K, so leave it unpadded and
    #    avoid inflating the input HBM traffic.
    m = max(1, int(lane_multiple))
    Cout_p = _round_up(Cout, m)
    Cin_x = Cout_p if use_shortcut else Cin
    Chid_k = _round_up(Chid, m) if has_expand else Cin_x

    w1p = jnp.pad(w1, ((0, Cin_x - w1.shape[0]), (0, Chid_k - w1.shape[1])))
    b1p = jnp.pad(b1, ((0, 0), (0, Chid_k - Chid)))
    wdp = jnp.pad(wd, ((0, 0), (0, 0), (0, Chid_k - Chid)))
    bdp = jnp.pad(bd, ((0, 0), (0, Chid_k - Chid)))
    w3p = jnp.pad(w3, ((0, Chid_k - Chid), (0, Cout_p - Cout)))
    b3p = jnp.pad(b3, ((0, 0), (0, Cout_p - Cout)))
    # Spatial halo (+1 each side) and optional channel pad of the input, one
    # fused pass.  TODO(synk): in a full network, carry pre-padded activations
    # between blocks and build the row halo in-kernel to drop this HBM pass.
    xp = jnp.pad(x, ((0, 0), (1, 1), (1, 1), (0, Cin_x - Cin)))

    act_bytes = jnp.dtype(x.dtype).itemsize
    weight_bytes = sum(int(a.size) * jnp.dtype(a.dtype).itemsize
                       for a in (w1p, b1p, wdp, bdp, w3p, b3p))

    # ---- generation-aware VMEM accounting -> output row-tile TH ----
    phys_vmem = _physical_vmem_bytes()
    vmem_limit = min(phys_vmem,
                     max(24 * 1024 * 1024,
                         min(phys_vmem * 3 // 4, 100 * 1024 * 1024)))
    target = (vmem_limit * 7) // 10          # headroom for compiler temporaries

    fixed = (2 * Hp * Wp * Cin_x * act_bytes       # double-buffered resident image
             + 2 * weight_bytes                    # weights (counted x2 to be safe)
             + 3 * Wp * Chid_k * act_bytes)        # yp halo rows
    per_row = (stride * Wp * Chid_k * act_bytes    # yp rows per output row
               + Wo * Chid_k * act_bytes           # y2 scratch
               + 2 * Wo * Cout_p * act_bytes       # double-buffered output stripe
               + 2 * Wo * Chid_k * 4               # f32 depthwise register/spill temps
               + Wo * Cout_p * 4)                  # f32 projection accumulator
    if row_tile is not None:
        cap = max(1, min(int(row_tile), Ho))
    else:
        cap = max(1, min(Ho, (target - fixed) // max(per_row, 1)))
    # Largest divisor of Ho that fits the budget.
    # TODO(synk): a masked short last stripe would avoid collapsing TH when Ho
    # has few divisors and the budget is tight (rare with these budgets).
    TH = max(t for t in range(1, cap + 1) if Ho % t == 0)
    nH = Ho // TH
    R = stride * (TH - 1) + 3                      # padded-input rows per stripe

    # Does the last stripe actually read the bottom zero-pad row?
    fix_bottom = has_expand and (stride * (Ho - 1) == H - 1)

    kernel = functools.partial(
        _inverted_residual_kernel,
        stride=stride, has_expand=has_expand,
        use_shortcut=use_shortcut, fix_bottom=fix_bottom,
    )

    def build(single_buffer_consts: bool):
        def const_spec(arr):
            nd = arr.ndim
            if single_buffer_consts:
                # Grid-invariant weights/biases: single-buffer (saves VMEM).
                return pl.BlockSpec(arr.shape,
                                    lambda n, h, _nd=nd: (0,) * _nd,
                                    pipeline_mode=pl.Buffered(1))
            return pl.BlockSpec(arr.shape, lambda n, h, _nd=nd: (0,) * _nd)

        return pl.pallas_call(
            kernel,
            out_shape=jax.ShapeDtypeStruct((N, Ho, Wo, Cout_p), x.dtype),
            grid_spec=pltpu.PrefetchScalarGridSpec(
                num_scalar_prefetch=0,
                grid=(N, nH),
                in_specs=[
                    # Whole (small) padded input image, resident per batch element.
                    pl.BlockSpec((1, Hp, Wp, Cin_x), lambda n, h: (n, 0, 0, 0)),
                    const_spec(w1p), const_spec(b1p),
                    const_spec(wdp), const_spec(bdp),
                    const_spec(w3p), const_spec(b3p),
                ],
                out_specs=pl.BlockSpec((1, TH, Wo, Cout_p),
                                       lambda n, h: (n, h, 0, 0)),
                scratch_shapes=[
                    pltpu.VMEM((R, Wp, Chid_k), x.dtype),   # expanded window (incl. halo)
                    pltpu.VMEM((TH, Wo, Chid_k), x.dtype),  # depthwise result / proj LHS
                ],
            ),
            compiler_params=pltpu.CompilerParams(
                dimension_semantics=("parallel", "parallel"),
                vmem_limit_bytes=int(vmem_limit),
            ),
        )

    args = (xp, w1p, b1p, wdp, bdp, w3p, b3p)
    try:
        out_p = build(True)(*args)
    except Exception:
        # This JAX version rejects single-buffered specs -> default buffering.
        out_p = build(False)(*args)

    if return_padded_channels or Cout_p == Cout:
        return out_p
    return out_p[..., :Cout]


def make_params(key, in_ch, out_ch, expand_ratio, dtype=jnp.float32):
    """Deterministically build conv + BN params and fold BN (eval mode)."""
    hid = in_ch * expand_ratio
    eps = 1e-5
    ks = jax.random.split(key, 6)

    def bn(k, c):
        kg, kb, km, kv = jax.random.split(k, 4)
        gamma = 1.0 + 0.1 * jax.random.normal(kg, (c,), dtype)
        beta = 0.1 * jax.random.normal(kb, (c,), dtype)
        mean = 0.1 * jax.random.normal(km, (c,), dtype)
        var = jax.random.uniform(kv, (c,), dtype, 0.5, 1.5)
        scale = gamma / jnp.sqrt(var + eps)
        bias = beta - mean * scale
        return scale, bias

    if expand_ratio != 1:
        # expand 1x1 conv: PyTorch weight (hid, in_ch, 1, 1) -> (in_ch, hid)
        w1 = 0.2 * jax.random.normal(ks[0], (in_ch, hid), dtype)
        s1, b1 = bn(ks[1], hid)
        w1f, b1f = w1 * s1[None, :], b1
    else:
        # no expand layer; identity placeholders (unused in the kernel)
        w1f, b1f = jnp.eye(in_ch, dtype=dtype), jnp.zeros((in_ch,), dtype)

    # depthwise 3x3 conv: PyTorch weight (hid, 1, 3, 3) -> (3, 3, hid)
    wd = 0.2 * jax.random.normal(ks[2], (3, 3, hid), dtype)
    sd, bd = bn(ks[3], hid)
    wdf = wd * sd[None, None, :]

    # projection 1x1 conv: PyTorch weight (out_ch, hid, 1, 1) -> (hid, out_ch)
    w3 = 0.2 * jax.random.normal(ks[4], (hid, out_ch), dtype)
    s3, b3 = bn(ks[5], out_ch)
    w3f = w3 * s3[None, :]

    return {
        "w1": w1f, "b1": b1f.reshape(1, hid),
        "wd": wdf, "bd": bd.reshape(1, hid),
        "w3": w3f, "b3": b3.reshape(1, out_ch),
    }


def reference_forward(x, params, *, stride, use_shortcut, has_expand=True):
    """Pure-JAX reference (lax.conv, NHWC) using the same folded params."""
    x32 = x.astype(jnp.float32)
    Chid = params["wd"].shape[2]
    Cout = params["w3"].shape[1]
    dn = ("NHWC", "HWIO", "NHWC")

    y = x32
    if has_expand:
        Cin = params["w1"].shape[0]
        y = lax.conv_general_dilated(
            y, params["w1"].reshape(1, 1, Cin, Chid), (1, 1), "VALID",
            dimension_numbers=dn)
        y = jnp.clip(y + params["b1"][0], 0.0, 6.0)

    wd = params["wd"].reshape(3, 3, 1, Chid)
    y = lax.conv_general_dilated(
        y, wd, (stride, stride), ((1, 1), (1, 1)),
        dimension_numbers=dn, feature_group_count=Chid)
    y = jnp.clip(y + params["bd"][0], 0.0, 6.0)

    z = lax.conv_general_dilated(
        y, params["w3"].reshape(1, 1, Chid, Cout), (1, 1), "VALID",
        dimension_numbers=dn)
    z = z + params["b3"][0]
    if use_shortcut:
        z = z + x32
    return z


if __name__ == "__main__":
    key = jax.random.PRNGKey(0)
    N = 2
    # Config A: InvertedResidual(4, 4, stride=1, expand_ratio=2)  (shortcut).
    # Config B: InvertedResidual(4, 4, stride=1, expand_ratio=1)  (no expand layer).
    configs = [
        dict(in_ch=4, out_ch=4, stride=1, expand_ratio=2, H=16, W=16),
        dict(in_ch=4, out_ch=4, stride=1, expand_ratio=1, H=16, W=16),
    ]

    for cfg in configs:
        kx, kp, key = jax.random.split(key, 3)
        in_ch, out_ch = cfg["in_ch"], cfg["out_ch"]
        stride_, er = cfg["stride"], cfg["expand_ratio"]
        use_shortcut = (stride_ == 1) and (in_ch == out_ch)
        has_expand = er != 1

        x = jax.random.normal(kx, (N, cfg["H"], cfg["W"], in_ch), jnp.float32)  # NHWC
        params = make_params(kp, in_ch, out_ch, er)

        out = inverted_residual(
            x, params, stride=stride_, use_shortcut=use_shortcut,
            has_expand=has_expand)
        out = jax.block_until_ready(out)

        ref = reference_forward(
            x, params, stride=stride_, use_shortcut=use_shortcut,
            has_expand=has_expand)
        np.testing.assert_allclose(np.asarray(out), np.asarray(ref),
                                   rtol=1e-4, atol=1e-4)

    # TODO(synk): training-mode BatchNorm (running-stat updates) is out of scope;
    # the kernel implements inference semantics with BN folded into the convs.
    print("KERNEL_OK")
</pallas_src>

<mosaic_0001>
module attributes {stable_mosaic.version = 11 : i64} {
  func.func @_inverted_residual_kernel(%arg0: i32, %arg1: i32, %arg2: memref<1x18x18x128xf32, #tpu.memory_space<vmem>>, %arg3: memref<128x128xf32, #tpu.memory_space<vmem>>, %arg4: memref<1x128xf32, #tpu.memory_space<vmem>>, %arg5: memref<3x3x128xf32, #tpu.memory_space<vmem>>, %arg6: memref<1x128xf32, #tpu.memory_space<vmem>>, %arg7: memref<128x128xf32, #tpu.memory_space<vmem>>, %arg8: memref<1x128xf32, #tpu.memory_space<vmem>>, %arg9: memref<1x16x16x128xf32, #tpu.memory_space<vmem>>, %arg10: memref<18x18x128xf32, #tpu.memory_space<vmem>>, %arg11: memref<16x16x128xf32, #tpu.memory_space<vmem>>) attributes {dimension_semantics = [#tpu.dimension_semantics<parallel>, #tpu.dimension_semantics<parallel>], iteration_bounds = array<i64: 2, 1>, scalar_prefetch = 0 : i64, scratch_operands = 2 : i64, tpu.core_type = #tpu.core_type<tc>, window_params = [{transform_indices = @transform_0, window_bounds = array<i64: 1, 18, 18, 128>}, {pipeline_mode = #tpu.pipeline_mode<synchronous>, transform_indices = @transform_1, window_bounds = array<i64: 128, 128>}, {pipeline_mode = #tpu.pipeline_mode<synchronous>, transform_indices = @transform_2, window_bounds = array<i64: 1, 128>}, {pipeline_mode = #tpu.pipeline_mode<synchronous>, transform_indices = @transform_3, window_bounds = array<i64: 3, 3, 128>}, {pipeline_mode = #tpu.pipeline_mode<synchronous>, transform_indices = @transform_4, window_bounds = array<i64: 1, 128>}, {pipeline_mode = #tpu.pipeline_mode<synchronous>, transform_indices = @transform_5, window_bounds = array<i64: 128, 128>}, {pipeline_mode = #tpu.pipeline_mode<synchronous>, transform_indices = @transform_6, window_bounds = array<i64: 1, 128>}, {transform_indices = @transform_7, window_bounds = array<i64: 1, 16, 16, 128>}]} {
    %c16_i32 = arith.constant 16 : i32
    %0 = arith.muli %arg1, %c16_i32 : i32
    %1 = tpu.assume_multiple %0, 16 : i32
    %c0 = arith.constant 0 : index
    %2 = arith.index_cast %1 : i32 to index
    %c1 = arith.constant 1 : index
    %c0_0 = arith.constant 0 : index
    %3 = vector.load %arg2[%c0, %2, %c1, %c0_0] : memref<1x18x18x128xf32, #tpu.memory_space<vmem>>, vector<1x18x16x128xf32>
    %4 = vector.shape_cast %3 : vector<1x18x16x128xf32> to vector<18x16x128xf32>
    %5 = vector.shape_cast %4 : vector<18x16x128xf32> to vector<288x128xf32>
    %c0_1 = arith.constant 0 : index
    %c0_2 = arith.constant 0 : index
    %6 = vector.load %arg3[%c0_1, %c0_2] : memref<128x128xf32, #tpu.memory_space<vmem>>, vector<128x128xf32>
    %cst = arith.constant dense<0.000000e+00> : vector<288x128xf32>
    %7 = tpu.matmul %5, %6, %cst {dimension_numbers = #tpu.dot_dimension_numbers<[1], [0], [0], [1], [0, 0, 1, 1], [], []>} : vector<288x128xf32>, vector<128x128xf32>, vector<288x128xf32> -> vector<288x128xf32>
    %c0_3 = arith.constant 0 : index
    %c0_4 = arith.constant 0 : index
    %8 = vector.load %arg4[%c0_3, %c0_4] : memref<1x128xf32, #tpu.memory_space<vmem>>, vector<1x128xf32>
    %9 = vector.broadcast %8 : vector<1x128xf32> to vector<288x128xf32>
    %10 = arith.addf %7, %9 : vector<288x128xf32>
    %cst_5 = arith.constant 0.000000e+00 : f32
    %cst_6 = arith.constant 6.000000e+00 : f32
    %11 = vector.broadcast %cst_5 : f32 to vector<288x128xf32>
    %12 = arith.maximumf %11, %10 : vector<288x128xf32>
    %13 = vector.broadcast %cst_6 : f32 to vector<288x128xf32>
    %14 = arith.minimumf %13, %12 : vector<288x128xf32>
    %15 = vector.shape_cast %14 : vector<288x128xf32> to vector<18x16x128xf32>
    %c0_7 = arith.constant 0 : index
    %c1_8 = arith.constant 1 : index
    %c0_9 = arith.constant 0 : index
    %16 = vector.load %arg10[%c0_7, %c1_8, %c0_9] : memref<18x18x128xf32, #tpu.memory_space<vmem>>, vector<18x16x128xf32>
    tpu.vector_store %arg10[%c0_7, %c1_8, %c0_9], %15 {strides = array<i32>} : memref<18x18x128xf32, #tpu.memory_space<vmem>>, vector<18x16x128xf32>,
    %cst_10 = arith.constant 0.000000e+00 : f32
    %17 = vector.broadcast %cst_10 : f32 to vector<18x1x128xf32>
    %c0_11 = arith.constant 0 : index
    %c0_12 = arith.constant 0 : index
    %c0_13 = arith.constant 0 : index
    %18 = vector.load %arg10[%c0_11, %c0_12, %c0_13] : memref<18x18x128xf32, #tpu.memory_space<vmem>>, vector<18x1x128xf32>
    tpu.vector_store %arg10[%c0_11, %c0_12, %c0_13], %17 {strides = array<i32>} : memref<18x18x128xf32, #tpu.memory_space<vmem>>, vector<18x1x128xf32>,
    %c0_14 = arith.constant 0 : index
    %c17 = arith.constant 17 : index
    %c0_15 = arith.constant 0 : index
    %19 = vector.load %arg10[%c0_14, %c17, %c0_15] : memref<18x18x128xf32, #tpu.memory_space<vmem>>, vector<18x1x128xf32>
    tpu.vector_store %arg10[%c0_14, %c17, %c0_15], %17 {strides = array<i32>} : memref<18x18x128xf32, #tpu.memory_space<vmem>>, vector<18x1x128xf32>,
    %c0_i32 = arith.constant 0 : i32
    %20 = arith.cmpi eq, %arg1, %c0_i32 : i32
    %21 = arith.extui %20 : i1 to i32
    %c0_i32_16 = arith.constant 0 : i32
    %22 = arith.cmpi ne, %21, %c0_i32_16 : i32
    scf.if %22 {
      %cst_262 = arith.constant 0.000000e+00 : f32
      %320 = vector.broadcast %cst_262 : f32 to vector<1x18x128xf32>
      %c0_263 = arith.constant 0 : index
      %c0_264 = arith.constant 0 : index
      %c0_265 = arith.constant 0 : index
      %321 = vector.load %arg10[%c0_263, %c0_264, %c0_265] : memref<18x18x128xf32, #tpu.memory_space<vmem>>, vector<1x18x128xf32>
      tpu.vector_store %arg10[%c0_263, %c0_264, %c0_265], %320 {strides = array<i32>} : memref<18x18x128xf32, #tpu.memory_space<vmem>>, vector<1x18x128xf32>,
    } else {
    }
    %c0_i32_17 = arith.constant 0 : i32
    %23 = arith.cmpi eq, %arg1, %c0_i32_17 : i32
    %24 = arith.extui %23 : i1 to i32
    %c0_i32_18 = arith.constant 0 : i32
    %25 = arith.cmpi ne, %24, %c0_i32_18 : i32
    scf.if %25 {
      %cst_262 = arith.constant 0.000000e+00 : f32
      %320 = vector.broadcast %cst_262 : f32 to vector<1x18x128xf32>
      %c17_263 = arith.constant 17 : index
      %c0_264 = arith.constant 0 : index
      %c0_265 = arith.constant 0 : index
      %321 = vector.load %arg10[%c17_263, %c0_264, %c0_265] : memref<18x18x128xf32, #tpu.memory_space<vmem>>, vector<1x18x128xf32>
      tpu.vector_store %arg10[%c17_263, %c0_264, %c0_265], %320 {strides = array<i32>} : memref<18x18x128xf32, #tpu.memory_space<vmem>>, vector<1x18x128xf32>,
    } else {
    }
    %c0_19 = arith.constant 0 : index
    %c0_20 = arith.constant 0 : index
    %26 = vector.load %arg6[%c0_19, %c0_20] : memref<1x128xf32, #tpu.memory_space<vmem>>, vector<1x128xf32>
    %27 = vector.shape_cast %26 : vector<1x128xf32> to vector<1x1x128xf32>
    %c0_21 = arith.constant 0 : index
    %c0_22 = arith.constant 0 : index
    %c0_23 = arith.constant 0 : index
    %28 = vector.load %arg10[%c0_21, %c0_22, %c0_23] : memref<18x18x128xf32, #tpu.memory_space<vmem>>, vector<4x16x128xf32>
    %c0_24 = arith.constant 0 : index
    %c0_25 = arith.constant 0 : index
    %c0_26 = arith.constant 0 : index
    %29 = vector.load %arg5[%c0_24, %c0_25, %c0_26] : memref<3x3x128xf32, #tpu.memory_space<vmem>>, vector<1x1x128xf32>
    %30 = vector.shape_cast %29 : vector<1x1x128xf32> to vector<128xf32>
    %31 = vector.shape_cast %30 : vector<128xf32> to vector<1x1x128xf32>
    %32 = vector.broadcast %31 : vector<1x1x128xf32> to vector<4x16x128xf32>
    %33 = arith.mulf %28, %32 : vector<4x16x128xf32>
    %34 = vector.broadcast %27 : vector<1x1x128xf32> to vector<4x16x128xf32>
    %35 = arith.addf %34, %33 : vector<4x16x128xf32>
    %c0_27 = arith.constant 0 : index
    %c1_28 = arith.constant 1 : index
    %c0_29 = arith.constant 0 : index
    %36 = vector.load %arg10[%c0_27, %c1_28, %c0_29] : memref<18x18x128xf32, #tpu.memory_space<vmem>>, vector<4x16x128xf32>
    %c0_30 = arith.constant 0 : index
    %c1_31 = arith.constant 1 : index
    %c0_32 = arith.constant 0 : index
    %37 = vector.load %arg5[%c0_30, %c1_31, %c0_32] : memref<3x3x128xf32, #tpu.memory_space<vmem>>, vector<1x1x128xf32>
    %38 = vector.shape_cast %37 : vector<1x1x128xf32> to vector<128xf32>
    %39 = vector.shape_cast %38 : vector<128xf32> to vector<1x1x128xf32>
    %40 = vector.broadcast %39 : vector<1x1x128xf32> to vector<4x16x128xf32>
    %41 = arith.mulf %36, %40 : vector<4x16x128xf32>
    %42 = arith.addf %35, %41 : vector<4x16x128xf32>
    %c0_33 = arith.constant 0 : index
    %c2 = arith.constant 2 : index
    %c0_34 = arith.constant 0 : index
    %43 = vector.load %arg10[%c0_33, %c2, %c0_34] : memref<18x18x128xf32, #tpu.memory_space<vmem>>, vector<4x16x128xf32>
    %c0_35 = arith.constant 0 : index
    %c2_36 = arith.constant 2 : index
    %c0_37 = arith.constant 0 : index
    %44 = vector.load %arg5[%c0_35, %c2_36, %c0_37] : memref<3x3x128xf32, #tpu.memory_space<vmem>>, vector<1x1x128xf32>
    %45 = vector.shape_cast %44 : vector<1x1x128xf32> to vector<128xf32>
    %46 = vector.shape_cast %45 : vector<128xf32> to vector<1x1x128xf32>
    %47 = vector.broadcast %46 : vector<1x1x128xf32> to vector<4x16x128xf32>
    %48 = arith.mulf %43, %47 : vector<4x16x128xf32>
    %49 = arith.addf %42, %48 : vector<4x16x128xf32>
    %c1_38 = arith.constant 1 : index
    %c0_39 = arith.constant 0 : index
    %c0_40 = arith.constant 0 : index
    %50 = vector.load %arg10[%c1_38, %c0_39, %c0_40] : memref<18x18x128xf32, #tpu.memory_space<vmem>>, vector<4x16x128xf32>
    %c1_41 = arith.constant 1 : index
    %c0_42 = arith.constant 0 : index
    %c0_43 = arith.constant 0 : index
    %51 = vector.load %arg5[%c1_41, %c0_42, %c0_43] : memref<3x3x128xf32, #tpu.memory_space<vmem>>, vector<1x1x128xf32>
    %52 = vector.shape_cast %51 : vector<1x1x128xf32> to vector<128xf32>
    %53 = vector.shape_cast %52 : vector<128xf32> to vector<1x1x128xf32>
    %54 = vector.broadcast %53 : vector<1x1x128xf32> to vector<4x16x128xf32>
    %55 = arith.mulf %50, %54 : vector<4x16x128xf32>
    %56 = arith.addf %49, %55 : vector<4x16x128xf32>
    %c1_44 = arith.constant 1 : index
    %c1_45 = arith.constant 1 : index
    %c0_46 = arith.constant 0 : index
    %57 = vector.load %arg10[%c1_44, %c1_45, %c0_46] : memref<18x18x128xf32, #tpu.memory_space<vmem>>, vector<4x16x128xf32>
    %c1_47 = arith.constant 1 : index
    %c1_48 = arith.constant 1 : index
    %c0_49 = arith.constant 0 : index
    %58 = vector.load %arg5[%c1_47, %c1_48, %c0_49] : memref<3x3x128xf32, #tpu.memory_space<vmem>>, vector<1x1x128xf32>
    %59 = vector.shape_cast %58 : vector<1x1x128xf32> to vector<128xf32>
    %60 = vector.shape_cast %59 : vector<128xf32> to vector<1x1x128xf32>
    %61 = vector.broadcast %60 : vector<1x1x128xf32> to vector<4x16x128xf32>
    %62 = arith.mulf %57, %61 : vector<4x16x128xf32>
    %63 = arith.addf %56, %62 : vector<4x16x128xf32>
    %c1_50 = arith.constant 1 : index
    %c2_51 = arith.constant 2 : index
    %c0_52 = arith.constant 0 : index
    %64 = vector.load %arg10[%c1_50, %c2_51, %c0_52] : memref<18x18x128xf32, #tpu.memory_space<vmem>>, vector<4x16x128xf32>
    %c1_53 = arith.constant 1 : index
    %c2_54 = arith.constant 2 : index
    %c0_55 = arith.constant 0 : index
    %65 = vector.load %arg5[%c1_53, %c2_54, %c0_55] : memref<3x3x128xf32, #tpu.memory_space<vmem>>, vector<1x1x128xf32>
    %66 = vector.shape_cast %65 : vector<1x1x128xf32> to vector<128xf32>
    %67 = vector.shape_cast %66 : vector<128xf32> to vector<1x1x128xf32>
    %68 = vector.broadcast %67 : vector<1x1x128xf32> to vector<4x16x128xf32>
    %69 = arith.mulf %64, %68 : vector<4x16x128xf32>
    %70 = arith.addf %63, %69 : vector<4x16x128xf32>
    %c2_56 = arith.constant 2 : index
    %c0_57 = arith.constant 0 : index
    %c0_58 = arith.constant 0 : index
    %71 = vector.load %arg10[%c2_56, %c0_57, %c0_58] : memref<18x18x128xf32, #tpu.memory_space<vmem>>, vector<4x16x128xf32>
    %c2_59 = arith.constant 2 : index
    %c0_60 = arith.constant 0 : index
    %c0_61 = arith.constant 0 : index
    %72 = vector.load %arg5[%c2_59, %c0_60, %c0_61] : memref<3x3x128xf32, #tpu.memory_space<vmem>>, vector<1x1x128xf32>
    %73 = vector.shape_cast %72 : vector<1x1x128xf32> to vector<128xf32>
    %74 = vector.shape_cast %73 : vector<128xf32> to vector<1x1x128xf32>
    %75 = vector.broadcast %74 : vector<1x1x128xf32> to vector<4x16x128xf32>
    %76 = arith.mulf %71, %75 : vector<4x16x128xf32>
    %77 = arith.addf %70, %76 : vector<4x16x128xf32>
    %c2_62 = arith.constant 2 : index
    %c1_63 = arith.constant 1 : index
    %c0_64 = arith.constant 0 : index
    %78 = vector.load %arg10[%c2_62, %c1_63, %c0_64] : memref<18x18x128xf32, #tpu.memory_space<vmem>>, vector<4x16x128xf32>
    %c2_65 = arith.constant 2 : index
    %c1_66 = arith.constant 1 : index
    %c0_67 = arith.constant 0 : index
    %79 = vector.load %arg5[%c2_65, %c1_66, %c0_67] : memref<3x3x128xf32, #tpu.memory_space<vmem>>, vector<1x1x128xf32>
    %80 = vector.shape_cast %79 : vector<1x1x128xf32> to vector<128xf32>
    %81 = vector.shape_cast %80 : vector<128xf32> to vector<1x1x128xf32>
    %82 = vector.broadcast %81 : vector<1x1x128xf32> to vector<4x16x128xf32>
    %83 = arith.mulf %78, %82 : vector<4x16x128xf32>
    %84 = arith.addf %77, %83 : vector<4x16x128xf32>
    %c2_68 = arith.constant 2 : index
    %c2_69 = arith.constant 2 : index
    %c0_70 = arith.constant 0 : index
    %85 = vector.load %arg10[%c2_68, %c2_69, %c0_70] : memref<18x18x128xf32, #tpu.memory_space<vmem>>, vector<4x16x128xf32>
    %c2_71 = arith.constant 2 : index
    %c2_72 = arith.constant 2 : index
    %c0_73 = arith.constant 0 : index
    %86 = vector.load %arg5[%c2_71, %c2_72, %c0_73] : memref<3x3x128xf32, #tpu.memory_space<vmem>>, vector<1x1x128xf32>
    %87 = vector.shape_cast %86 : vector<1x1x128xf32> to vector<128xf32>
    %88 = vector.shape_cast %87 : vector<128xf32> to vector<1x1x128xf32>
    %89 = vector.broadcast %88 : vector<1x1x128xf32> to vector<4x16x128xf32>
    %90 = arith.mulf %85, %89 : vector<4x16x128xf32>
    %91 = arith.addf %84, %90 : vector<4x16x128xf32>
    %cst_74 = arith.constant 0.000000e+00 : f32
    %cst_75 = arith.constant 6.000000e+00 : f32
    %92 = vector.broadcast %cst_74 : f32 to vector<4x16x128xf32>
    %93 = arith.maximumf %92, %91 : vector<4x16x128xf32>
    %94 = vector.broadcast %cst_75 : f32 to vector<4x16x128xf32>
    %95 = arith.minimumf %94, %93 : vector<4x16x128xf32>
    %c0_76 = arith.constant 0 : index
    %c0_77 = arith.constant 0 : index
    %c0_78 = arith.constant 0 : index
    %96 = vector.load %arg11[%c0_76, %c0_77, %c0_78] : memref<16x16x128xf32, #tpu.memory_space<vmem>>, vector<4x16x128xf32>
    tpu.vector_store %arg11[%c0_76, %c0_77, %c0_78], %95 {strides = array<i32>} : memref<16x16x128xf32, #tpu.memory_space<vmem>>, vector<4x16x128xf32>,
    %c4 = arith.constant 4 : index
    %c0_79 = arith.constant 0 : index
    %c0_80 = arith.constant 0 : index
    %97 = vector.load %arg10[%c4, %c0_79, %c0_80] : memref<18x18x128xf32, #tpu.memory_space<vmem>>, vector<4x16x128xf32>
    %c0_81 = arith.constant 0 : index
    %c0_82 = arith.constant 0 : index
    %c0_83 = arith.constant 0 : index
    %98 = vector.load %arg5[%c0_81, %c0_82, %c0_83] : memref<3x3x128xf32, #tpu.memory_space<vmem>>, vector<1x1x128xf32>
    %99 = vector.shape_cast %98 : vector<1x1x128xf32> to vector<128xf32>
    %100 = vector.shape_cast %99 : vector<128xf32> to vector<1x1x128xf32>
    %101 = vector.broadcast %100 : vector<1x1x128xf32> to vector<4x16x128xf32>
    %102 = arith.mulf %97, %101 : vector<4x16x128xf32>
    %103 = vector.broadcast %27 : vector<1x1x128xf32> to vector<4x16x128xf32>
    %104 = arith.addf %103, %102 : vector<4x16x128xf32>
    %c4_84 = arith.constant 4 : index
    %c1_85 = arith.constant 1 : index
    %c0_86 = arith.constant 0 : index
    %105 = vector.load %arg10[%c4_84, %c1_85, %c0_86] : memref<18x18x128xf32, #tpu.memory_space<vmem>>, vector<4x16x128xf32>
    %c0_87 = arith.constant 0 : index
    %c1_88 = arith.constant 1 : index
    %c0_89 = arith.constant 0 : index
    %106 = vector.load %arg5[%c0_87, %c1_88, %c0_89] : memref<3x3x128xf32, #tpu.memory_space<vmem>>, vector<1x1x128xf32>
    %107 = vector.shape_cast %106 : vector<1x1x128xf32> to vector<128xf32>
    %108 = vector.shape_cast %107 : vector<128xf32> to vector<1x1x128xf32>
    %109 = vector.broadcast %108 : vector<1x1x128xf32> to vector<4x16x128xf32>
    %110 = arith.mulf %105, %109 : vector<4x16x128xf32>
    %111 = arith.addf %104, %110 : vector<4x16x128xf32>
    %c4_90 = arith.constant 4 : index
    %c2_91 = arith.constant 2 : index
    %c0_92 = arith.constant 0 : index
    %112 = vector.load %arg10[%c4_90, %c2_91, %c0_92] : memref<18x18x128xf32, #tpu.memory_space<vmem>>, vector<4x16x128xf32>
    %c0_93 = arith.constant 0 : index
    %c2_94 = arith.constant 2 : index
    %c0_95 = arith.constant 0 : index
    %113 = vector.load %arg5[%c0_93, %c2_94, %c0_95] : memref<3x3x128xf32, #tpu.memory_space<vmem>>, vector<1x1x128xf32>
    %114 = vector.shape_cast %113 : vector<1x1x128xf32> to vector<128xf32>
    %115 = vector.shape_cast %114 : vector<128xf32> to vector<1x1x128xf32>
    %116 = vector.broadcast %115 : vector<1x1x128xf32> to vector<4x16x128xf32>
    %117 = arith.mulf %112, %116 : vector<4x16x128xf32>
    %118 = arith.addf %111, %117 : vector<4x16x128xf32>
    %c5 = arith.constant 5 : index
    %c0_96 = arith.constant 0 : index
    %c0_97 = arith.constant 0 : index
    %119 = vector.load %arg10[%c5, %c0_96, %c0_97] : memref<18x18x128xf32, #tpu.memory_space<vmem>>, vector<4x16x128xf32>
    %c1_98 = arith.constant 1 : index
    %c0_99 = arith.constant 0 : index
    %c0_100 = arith.constant 0 : index
    %120 = vector.load %arg5[%c1_98, %c0_99, %c0_100] : memref<3x3x128xf32, #tpu.memory_space<vmem>>, vector<1x1x128xf32>
    %121 = vector.shape_cast %120 : vector<1x1x128xf32> to vector<128xf32>
    %122 = vector.shape_cast %121 : vector<128xf32> to vector<1x1x128xf32>
    %123 = vector.broadcast %122 : vector<1x1x128xf32> to vector<4x16x128xf32>
    %124 = arith.mulf %119, %123 : vector<4x16x128xf32>
    %125 = arith.addf %118, %124 : vector<4x16x128xf32>
    %c5_101 = arith.constant 5 : index
    %c1_102 = arith.constant 1 : index
    %c0_103 = arith.constant 0 : index
    %126 = vector.load %arg10[%c5_101, %c1_102, %c0_103] : memref<18x18x128xf32, #tpu.memory_space<vmem>>, vector<4x16x128xf32>
    %c1_104 = arith.constant 1 : index
    %c1_105 = arith.constant 1 : index
    %c0_106 = arith.constant 0 : index
    %127 = vector.load %arg5[%c1_104, %c1_105, %c0_106] : memref<3x3x128xf32, #tpu.memory_space<vmem>>, vector<1x1x128xf32>
    %128 = vector.shape_cast %127 : vector<1x1x128xf32> to vector<128xf32>
    %129 = vector.shape_cast %128 : vector<128xf32> to vector<1x1x128xf32>
    %130 = vector.broadcast %129 : vector<1x1x128xf32> to vector<4x16x128xf32>
    %131 = arith.mulf %126, %130 : vector<4x16x128xf32>
    %132 = arith.addf %125, %131 : vector<4x16x128xf32>
    %c5_107 = arith.constant 5 : index
    %c2_108 = arith.constant 2 : index
    %c0_109 = arith.constant 0 : index
    %133 = vector.load %arg10[%c5_107, %c2_108, %c0_109] : memref<18x18x128xf32, #tpu.memory_space<vmem>>, vector<4x16x128xf32>
    %c1_110 = arith.constant 1 : index
    %c2_111 = arith.constant 2 : index
    %c0_112 = arith.constant 0 : index
    %134 = vector.load %arg5[%c1_110, %c2_111, %c0_112] : memref<3x3x128xf32, #tpu.memory_space<vmem>>, vector<1x1x128xf32>
    %135 = vector.shape_cast %134 : vector<1x1x128xf32> to vector<128xf32>
    %136 = vector.shape_cast %135 : vector<128xf32> to vector<1x1x128xf32>
    %137 = vector.broadcast %136 : vector<1x1x128xf32> to vector<4x16x128xf32>
    %138 = arith.mulf %133, %137 : vector<4x16x128xf32>
    %139 = arith.addf %132, %138 : vector<4x16x128xf32>
    %c6 = arith.constant 6 : index
    %c0_113 = arith.constant 0 : index
    %c0_114 = arith.constant 0 : index
    %140 = vector.load %arg10[%c6, %c0_113, %c0_114] : memref<18x18x128xf32, #tpu.memory_space<vmem>>, vector<4x16x128xf32>
    %c2_115 = arith.constant 2 : index
    %c0_116 = arith.constant 0 : index
    %c0_117 = arith.constant 0 : index
    %141 = vector.load %arg5[%c2_115, %c0_116, %c0_117] : memref<3x3x128xf32, #tpu.memory_space<vmem>>, vector<1x1x128xf32>
    %142 = vector.shape_cast %141 : vector<1x1x128xf32> to vector<128xf32>
    %143 = vector.shape_cast %142 : vector<128xf32> to vector<1x1x128xf32>
    %144 = vector.broadcast %143 : vector<1x1x128xf32> to vector<4x16x128xf32>
    %145 = arith.mulf %140, %144 : vector<4x16x128xf32>
    %146 = arith.addf %139, %145 : vector<4x16x128xf32>
    %c6_118 = arith.constant 6 : index
    %c1_119 = arith.constant 1 : index
    %c0_120 = arith.constant 0 : index
    %147 = vector.load %arg10[%c6_118, %c1_119, %c0_120] : memref<18x18x128xf32, #tpu.memory_space<vmem>>, vector<4x16x128xf32>
    %c2_121 = arith.constant 2 : index
    %c1_122 = arith.constant 1 : index
    %c0_123 = arith.constant 0 : index
    %148 = vector.load %arg5[%c2_121, %c1_122, %c0_123] : memref<3x3x128xf32, #tpu.memory_space<vmem>>, vector<1x1x128xf32>
    %149 = vector.shape_cast %148 : vector<1x1x128xf32> to vector<128xf32>
    %150 = vector.shape_cast %149 : vector<128xf32> to vector<1x1x128xf32>
    %151 = vector.broadcast %150 : vector<1x1x128xf32> to vector<4x16x128xf32>
    %152 = arith.mulf %147, %151 : vector<4x16x128xf32>
    %153 = arith.addf %146, %152 : vector<4x16x128xf32>
    %c6_124 = arith.constant 6 : index
    %c2_125 = arith.constant 2 : index
    %c0_126 = arith.constant 0 : index
    %154 = vector.load %arg10[%c6_124, %c2_125, %c0_126] : memref<18x18x128xf32, #tpu.memory_space<vmem>>, vector<4x16x128xf32>
    %c2_127 = arith.constant 2 : index
    %c2_128 = arith.constant 2 : index
    %c0_129 = arith.constant 0 : index
    %155 = vector.load %arg5[%c2_127, %c2_128, %c0_129] : memref<3x3x128xf32, #tpu.memory_space<vmem>>, vector<1x1x128xf32>
    %156 = vector.shape_cast %155 : vector<1x1x128xf32> to vector<128xf32>
    %157 = vector.shape_cast %156 : vector<128xf32> to vector<1x1x128xf32>
    %158 = vector.broadcast %157 : vector<1x1x128xf32> to vector<4x16x128xf32>
    %159 = arith.mulf %154, %158 : vector<4x16x128xf32>
    %160 = arith.addf %153, %159 : vector<4x16x128xf32>
    %cst_130 = arith.constant 0.000000e+00 : f32
    %cst_131 = arith.constant 6.000000e+00 : f32
    %161 = vector.broadcast %cst_130 : f32 to vector<4x16x128xf32>
    %162 = arith.maximumf %161, %160 : vector<4x16x128xf32>
    %163 = vector.broadcast %cst_131 : f32 to vector<4x16x128xf32>
    %164 = arith.minimumf %163, %162 : vector<4x16x128xf32>
    %c4_132 = arith.constant 4 : index
    %c0_133 = arith.constant 0 : index
    %c0_134 = arith.constant 0 : index
    %165 = vector.load %arg11[%c4_132, %c0_133, %c0_134] : memref<16x16x128xf32, #tpu.memory_space<vmem>>, vector<4x16x128xf32>
    tpu.vector_store %arg11[%c4_132, %c0_133, %c0_134], %164 {strides = array<i32>} : memref<16x16x128xf32, #tpu.memory_space<vmem>>, vector<4x16x128xf32>,
    %c8 = arith.constant 8 : index
    %c0_135 = arith.constant 0 : index
    %c0_136 = arith.constant 0 : index
    %166 = vector.load %arg10[%c8, %c0_135, %c0_136] : memref<18x18x128xf32, #tpu.memory_space<vmem>>, vector<4x16x128xf32>
    %c0_137 = arith.constant 0 : index
    %c0_138 = arith.constant 0 : index
    %c0_139 = arith.constant 0 : index
    %167 = vector.load %arg5[%c0_137, %c0_138, %c0_139] : memref<3x3x128xf32, #tpu.memory_space<vmem>>, vector<1x1x128xf32>
    %168 = vector.shape_cast %167 : vector<1x1x128xf32> to vector<128xf32>
    %169 = vector.shape_cast %168 : vector<128xf32> to vector<1x1x128xf32>
    %170 = vector.broadcast %169 : vector<1x1x128xf32> to vector<4x16x128xf32>
    %171 = arith.mulf %166, %170 : vector<4x16x128xf32>
    %172 = vector.broadcast %27 : vector<1x1x128xf32> to vector<4x16x128xf32>
    %173 = arith.addf %172, %171 : vector<4x16x128xf32>
    %c8_140 = arith.constant 8 : index
    %c1_141 = arith.constant 1 : index
    %c0_142 = arith.constant 0 : index
    %174 = vector.load %arg10[%c8_140, %c1_141, %c0_142] : memref<18x18x128xf32, #tpu.memory_space<vmem>>, vector<4x16x128xf32>
    %c0_143 = arith.constant 0 : index
    %c1_144 = arith.constant 1 : index
    %c0_145 = arith.constant 0 : index
    %175 = vector.load %arg5[%c0_143, %c1_144, %c0_145] : memref<3x3x128xf32, #tpu.memory_space<vmem>>, vector<1x1x128xf32>
    %176 = vector.shape_cast %175 : vector<1x1x128xf32> to vector<128xf32>
    %177 = vector.shape_cast %176 : vector<128xf32> to vector<1x1x128xf32>
    %178 = vector.broadcast %177 : vector<1x1x128xf32> to vector<4x16x128xf32>
    %179 = arith.mulf %174, %178 : vector<4x16x128xf32>
    %180 = arith.addf %173, %179 : vector<4x16x128xf32>
    %c8_146 = arith.constant 8 : index
    %c2_147 = arith.constant 2 : index
    %c0_148 = arith.constant 0 : index
    %181 = vector.load %arg10[%c8_146, %c2_147, %c0_148] : memref<18x18x128xf32, #tpu.memory_space<vmem>>, vector<4x16x128xf32>
    %c0_149 = arith.constant 0 : index
    %c2_150 = arith.constant 2 : index
    %c0_151 = arith.constant 0 : index
    %182 = vector.load %arg5[%c0_149, %c2_150, %c0_151] : memref<3x3x128xf32, #tpu.memory_space<vmem>>, vector<1x1x128xf32>
    %183 = vector.shape_cast %182 : vector<1x1x128xf32> to vector<128xf32>
    %184 = vector.shape_cast %183 : vector<128xf32> to vector<1x1x128xf32>
    %185 = vector.broadcast %184 : vector<1x1x128xf32> to vector<4x16x128xf32>
    %186 = arith.mulf %181, %185 : vector<4x16x128xf32>
    %187 = arith.addf %180, %186 : vector<4x16x128xf32>
    %c9 = arith.constant 9 : index
    %c0_152 = arith.constant 0 : index
    %c0_153 = arith.constant 0 : index
    %188 = vector.load %arg10[%c9, %c0_152, %c0_153] : memref<18x18x128xf32, #tpu.memory_space<vmem>>, vector<4x16x128xf32>
    %c1_154 = arith.constant 1 : index
    %c0_155 = arith.constant 0 : index
    %c0_156 = arith.constant 0 : index
    %189 = vector.load %arg5[%c1_154, %c0_155, %c0_156] : memref<3x3x128xf32, #tpu.memory_space<vmem>>, vector<1x1x128xf32>
    %190 = vector.shape_cast %189 : vector<1x1x128xf32> to vector<128xf32>
    %191 = vector.shape_cast %190 : vector<128xf32> to vector<1x1x128xf32>
    %192 = vector.broadcast %191 : vector<1x1x128xf32> to vector<4x16x128xf32>
    %193 = arith.mulf %188, %192 : vector<4x16x128xf32>
    %194 = arith.addf %187, %193 : vector<4x16x128xf32>
    %c9_157 = arith.constant 9 : index
    %c1_158 = arith.constant 1 : index
    %c0_159 = arith.constant 0 : index
    %195 = vector.load %arg10[%c9_157, %c1_158, %c0_159] : memref<18x18x128xf32, #tpu.memory_space<vmem>>, vector<4x16x128xf32>
    %c1_160 = arith.constant 1 : index
    %c1_161 = arith.constant 1 : index
    %c0_162 = arith.constant 0 : index
    %196 = vector.load %arg5[%c1_160, %c1_161, %c0_162] : memref<3x3x128xf32, #tpu.memory_space<vmem>>, vector<1x1x128xf32>
    %197 = vector.shape_cast %196 : vector<1x1x128xf32> to vector<128xf32>
    %198 = vector.shape_cast %197 : vector<128xf32> to vector<1x1x128xf32>
    %199 = vector.broadcast %198 : vector<1x1x128xf32> to vector<4x16x128xf32>
    %200 = arith.mulf %195, %199 : vector<4x16x128xf32>
    %201 = arith.addf %194, %200 : vector<4x16x128xf32>
    %c9_163 = arith.constant 9 : index
    %c2_164 = arith.constant 2 : index
    %c0_165 = arith.constant 0 : index
    %202 = vector.load %arg10[%c9_163, %c2_164, %c0_165] : memref<18x18x128xf32, #tpu.memory_space<vmem>>, vector<4x16x128xf32>
    %c1_166 = arith.constant 1 : index
    %c2_167 = arith.constant 2 : index
    %c0_168 = arith.constant 0 : index
    %203 = vector.load %arg5[%c1_166, %c2_167, %c0_168] : memref<3x3x128xf32, #tpu.memory_space<vmem>>, vector<1x1x128xf32>
    %204 = vector.shape_cast %203 : vector<1x1x128xf32> to vector<128xf32>
    %205 = vector.shape_cast %204 : vector<128xf32> to vector<1x1x128xf32>
    %206 = vector.broadcast %205 : vector<1x1x128xf32> to vector<4x16x128xf32>
    %207 = arith.mulf %202, %206 : vector<4x16x128xf32>
    %208 = arith.addf %201, %207 : vector<4x16x128xf32>
    %c10 = arith.constant 10 : index
    %c0_169 = arith.constant 0 : index
    %c0_170 = arith.constant 0 : index
    %209 = vector.load %arg10[%c10, %c0_169, %c0_170] : memref<18x18x128xf32, #tpu.memory_space<vmem>>, vector<4x16x128xf32>
    %c2_171 = arith.constant 2 : index
    %c0_172 = arith.constant 0 : index
    %c0_173 = arith.constant 0 : index
    %210 = vector.load %arg5[%c2_171, %c0_172, %c0_173] : memref<3x3x128xf32, #tpu.memory_space<vmem>>, vector<1x1x128xf32>
    %211 = vector.shape_cast %210 : vector<1x1x128xf32> to vector<128xf32>
    %212 = vector.shape_cast %211 : vector<128xf32> to vector<1x1x128xf32>
    %213 = vector.broadcast %212 : vector<1x1x128xf32> to vector<4x16x128xf32>
    %214 = arith.mulf %209, %213 : vector<4x16x128xf32>
    %215 = arith.addf %208, %214 : vector<4x16x128xf32>
    %c10_174 = arith.constant 10 : index
    %c1_175 = arith.constant 1 : index
    %c0_176 = arith.constant 0 : index
    %216 = vector.load %arg10[%c10_174, %c1_175, %c0_176] : memref<18x18x128xf32, #tpu.memory_space<vmem>>, vector<4x16x128xf32>
    %c2_177 = arith.constant 2 : index
    %c1_178 = arith.constant 1 : index
    %c0_179 = arith.constant 0 : index
    %217 = vector.load %arg5[%c2_177, %c1_178, %c0_179] : memref<3x3x128xf32, #tpu.memory_space<vmem>>, vector<1x1x128xf32>
    %218 = vector.shape_cast %217 : vector<1x1x128xf32> to vector<128xf32>
    %219 = vector.shape_cast %218 : vector<128xf32> to vector<1x1x128xf32>
    %220 = vector.broadcast %219 : vector<1x1x128xf32> to vector<4x16x128xf32>
    %221 = arith.mulf %216, %220 : vector<4x16x128xf32>
    %222 = arith.addf %215, %221 : vector<4x16x128xf32>
    %c10_180 = arith.constant 10 : index
    %c2_181 = arith.constant 2 : index
    %c0_182 = arith.constant 0 : index
    %223 = vector.load %arg10[%c10_180, %c2_181, %c0_182] : memref<18x18x128xf32, #tpu.memory_space<vmem>>, vector<4x16x128xf32>
    %c2_183 = arith.constant 2 : index
    %c2_184 = arith.constant 2 : index
    %c0_185 = arith.constant 0 : index
    %224 = vector.load %arg5[%c2_183, %c2_184, %c0_185] : memref<3x3x128xf32, #tpu.memory_space<vmem>>, vector<1x1x128xf32>
    %225 = vector.shape_cast %224 : vector<1x1x128xf32> to vector<128xf32>
    %226 = vector.shape_cast %225 : vector<128xf32> to vector<1x1x128xf32>
    %227 = vector.broadcast %226 : vector<1x1x128xf32> to vector<4x16x128xf32>
    %228 = arith.mulf %223, %227 : vector<4x16x128xf32>
    %229 = arith.addf %222, %228 : vector<4x16x128xf32>
    %cst_186 = arith.constant 0.000000e+00 : f32
    %cst_187 = arith.constant 6.000000e+00 : f32
    %230 = vector.broadcast %cst_186 : f32 to vector<4x16x128xf32>
    %231 = arith.maximumf %230, %229 : vector<4x16x128xf32>
    %232 = vector.broadcast %cst_187 : f32 to vector<4x16x128xf32>
    %233 = arith.minimumf %232, %231 : vector<4x16x128xf32>
    %c8_188 = arith.constant 8 : index
    %c0_189 = arith.constant 0 : index
    %c0_190 = arith.constant 0 : index
    %234 = vector.load %arg11[%c8_188, %c0_189, %c0_190] : memref<16x16x128xf32, #tpu.memory_space<vmem>>, vector<4x16x128xf32>
    tpu.vector_store %arg11[%c8_188, %c0_189, %c0_190], %233 {strides = array<i32>} : memref<16x16x128xf32, #tpu.memory_space<vmem>>, vector<4x16x128xf32>,
    %c12 = arith.constant 12 : index
    %c0_191 = arith.constant 0 : index
    %c0_192 = arith.constant 0 : index
    %235 = vector.load %arg10[%c12, %c0_191, %c0_192] : memref<18x18x128xf32, #tpu.memory_space<vmem>>, vector<4x16x128xf32>
    %c0_193 = arith.constant 0 : index
    %c0_194 = arith.constant 0 : index
    %c0_195 = arith.constant 0 : index
    %236 = vector.load %arg5[%c0_193, %c0_194, %c0_195] : memref<3x3x128xf32, #tpu.memory_space<vmem>>, vector<1x1x128xf32>
    %237 = vector.shape_cast %236 : vector<1x1x128xf32> to vector<128xf32>
    %238 = vector.shape_cast %237 : vector<128xf32> to vector<1x1x128xf32>
    %239 = vector.broadcast %238 : vector<1x1x128xf32> to vector<4x16x128xf32>
    %240 = arith.mulf %235, %239 : vector<4x16x128xf32>
    %241 = vector.broadcast %27 : vector<1x1x128xf32> to vector<4x16x128xf32>
    %242 = arith.addf %241, %240 : vector<4x16x128xf32>
    %c12_196 = arith.constant 12 : index
    %c1_197 = arith.constant 1 : index
    %c0_198 = arith.constant 0 : index
    %243 = vector.load %arg10[%c12_196, %c1_197, %c0_198] : memref<18x18x128xf32, #tpu.memory_space<vmem>>, vector<4x16x128xf32>
    %c0_199 = arith.constant 0 : index
    %c1_200 = arith.constant 1 : index
    %c0_201 = arith.constant 0 : index
    %244 = vector.load %arg5[%c0_199, %c1_200, %c0_201] : memref<3x3x128xf32, #tpu.memory_space<vmem>>, vector<1x1x128xf32>
    %245 = vector.shape_cast %244 : vector<1x1x128xf32> to vector<128xf32>
    %246 = vector.shape_cast %245 : vector<128xf32> to vector<1x1x128xf32>
    %247 = vector.broadcast %246 : vector<1x1x128xf32> to vector<4x16x128xf32>
    %248 = arith.mulf %243, %247 : vector<4x16x128xf32>
    %249 = arith.addf %242, %248 : vector<4x16x128xf32>
    %c12_202 = arith.constant 12 : index
    %c2_203 = arith.constant 2 : index
    %c0_204 = arith.constant 0 : index
    %250 = vector.load %arg10[%c12_202, %c2_203, %c0_204] : memref<18x18x128xf32, #tpu.memory_space<vmem>>, vector<4x16x128xf32>
    %c0_205 = arith.constant 0 : index
    %c2_206 = arith.constant 2 : index
    %c0_207 = arith.constant 0 : index
    %251 = vector.load %arg5[%c0_205, %c2_206, %c0_207] : memref<3x3x128xf32, #tpu.memory_space<vmem>>, vector<1x1x128xf32>
    %252 = vector.shape_cast %251 : vector<1x1x128xf32> to vector<128xf32>
    %253 = vector.shape_cast %252 : vector<128xf32> to vector<1x1x128xf32>
    %254 = vector.broadcast %253 : vector<1x1x128xf32> to vector<4x16x128xf32>
    %255 = arith.mulf %250, %254 : vector<4x16x128xf32>
    %256 = arith.addf %249, %255 : vector<4x16x128xf32>
    %c13 = arith.constant 13 : index
    %c0_208 = arith.constant 0 : index
    %c0_209 = arith.constant 0 : index
    %257 = vector.load %arg10[%c13, %c0_208, %c0_209] : memref<18x18x128xf32, #tpu.memory_space<vmem>>, vector<4x16x128xf32>
    %c1_210 = arith.constant 1 : index
    %c0_211 = arith.constant 0 : index
    %c0_212 = arith.constant 0 : index
    %258 = vector.load %arg5[%c1_210, %c0_211, %c0_212] : memref<3x3x128xf32, #tpu.memory_space<vmem>>, vector<1x1x128xf32>
    %259 = vector.shape_cast %258 : vector<1x1x128xf32> to vector<128xf32>
    %260 = vector.shape_cast %259 : vector<128xf32> to vector<1x1x128xf32>
    %261 = vector.broadcast %260 : vector<1x1x128xf32> to vector<4x16x128xf32>
    %262 = arith.mulf %257, %261 : vector<4x16x128xf32>
    %263 = arith.addf %256, %262 : vector<4x16x128xf32>
    %c13_213 = arith.constant 13 : index
    %c1_214 = arith.constant 1 : index
    %c0_215 = arith.constant 0 : index
    %264 = vector.load %arg10[%c13_213, %c1_214, %c0_215] : memref<18x18x128xf32, #tpu.memory_space<vmem>>, vector<4x16x128xf32>
    %c1_216 = arith.constant 1 : index
    %c1_217 = arith.constant 1 : index
    %c0_218 = arith.constant 0 : index
    %265 = vector.load %arg5[%c1_216, %c1_217, %c0_218] : memref<3x3x128xf32, #tpu.memory_space<vmem>>, vector<1x1x128xf32>
    %266 = vector.shape_cast %265 : vector<1x1x128xf32> to vector<128xf32>
    %267 = vector.shape_cast %266 : vector<128xf32> to vector<1x1x128xf32>
    %268 = vector.broadcast %267 : vector<1x1x128xf32> to vector<4x16x128xf32>
    %269 = arith.mulf %264, %268 : vector<4x16x128xf32>
    %270 = arith.addf %263, %269 : vector<4x16x128xf32>
    %c13_219 = arith.constant 13 : index
    %c2_220 = arith.constant 2 : index
    %c0_221 = arith.constant 0 : index
    %271 = vector.load %arg10[%c13_219, %c2_220, %c0_221] : memref<18x18x128xf32, #tpu.memory_space<vmem>>, vector<4x16x128xf32>
    %c1_222 = arith.constant 1 : index
    %c2_223 = arith.constant 2 : index
    %c0_224 = arith.constant 0 : index
    %272 = vector.load %arg5[%c1_222, %c2_223, %c0_224] : memref<3x3x128xf32, #tpu.memory_space<vmem>>, vector<1x1x128xf32>
    %273 = vector.shape_cast %272 : vector<1x1x128xf32> to vector<128xf32>
    %274 = vector.shape_cast %273 : vector<128xf32> to vector<1x1x128xf32>
    %275 = vector.broadcast %274 : vector<1x1x128xf32> to vector<4x16x128xf32>
    %276 = arith.mulf %271, %275 : vector<4x16x128xf32>
    %277 = arith.addf %270, %276 : vector<4x16x128xf32>
    %c14 = arith.constant 14 : index
    %c0_225 = arith.constant 0 : index
    %c0_226 = arith.constant 0 : index
    %278 = vector.load %arg10[%c14, %c0_225, %c0_226] : memref<18x18x128xf32, #tpu.memory_space<vmem>>, vector<4x16x128xf32>
    %c2_227 = arith.constant 2 : index
    %c0_228 = arith.constant 0 : index
    %c0_229 = arith.constant 0 : index
    %279 = vector.load %arg5[%c2_227, %c0_228, %c0_229] : memref<3x3x128xf32, #tpu.memory_space<vmem>>, vector<1x1x128xf32>
    %280 = vector.shape_cast %279 : vector<1x1x128xf32> to vector<128xf32>
    %281 = vector.shape_cast %280 : vector<128xf32> to vector<1x1x128xf32>
    %282 = vector.broadcast %281 : vector<1x1x128xf32> to vector<4x16x128xf32>
    %283 = arith.mulf %278, %282 : vector<4x16x128xf32>
    %284 = arith.addf %277, %283 : vector<4x16x128xf32>
    %c14_230 = arith.constant 14 : index
    %c1_231 = arith.constant 1 : index
    %c0_232 = arith.constant 0 : index
    %285 = vector.load %arg10[%c14_230, %c1_231, %c0_232] : memref<18x18x128xf32, #tpu.memory_space<vmem>>, vector<4x16x128xf32>
    %c2_233 = arith.constant 2 : index
    %c1_234 = arith.constant 1 : index
    %c0_235 = arith.constant 0 : index
    %286 = vector.load %arg5[%c2_233, %c1_234, %c0_235] : memref<3x3x128xf32, #tpu.memory_space<vmem>>, vector<1x1x128xf32>
    %287 = vector.shape_cast %286 : vector<1x1x128xf32> to vector<128xf32>
    %288 = vector.shape_cast %287 : vector<128xf32> to vector<1x1x128xf32>
    %289 = vector.broadcast %288 : vector<1x1x128xf32> to vector<4x16x128xf32>
    %290 = arith.mulf %285, %289 : vector<4x16x128xf32>
    %291 = arith.addf %284, %290 : vector<4x16x128xf32>
    %c14_236 = arith.constant 14 : index
    %c2_237 = arith.constant 2 : index
    %c0_238 = arith.constant 0 : index
    %292 = vector.load %arg10[%c14_236, %c2_237, %c0_238] : memref<18x18x128xf32, #tpu.memory_space<vmem>>, vector<4x16x128xf32>
    %c2_239 = arith.constant 2 : index
    %c2_240 = arith.constant 2 : index
    %c0_241 = arith.constant 0 : index
    %293 = vector.load %arg5[%c2_239, %c2_240, %c0_241] : memref<3x3x128xf32, #tpu.memory_space<vmem>>, vector<1x1x128xf32>
    %294 = vector.shape_cast %293 : vector<1x1x128xf32> to vector<128xf32>
    %295 = vector.shape_cast %294 : vector<128xf32> to vector<1x1x128xf32>
    %296 = vector.broadcast %295 : vector<1x1x128xf32> to vector<4x16x128xf32>
    %297 = arith.mulf %292, %296 : vector<4x16x128xf32>
    %298 = arith.addf %291, %297 : vector<4x16x128xf32>
    %cst_242 = arith.constant 0.000000e+00 : f32
    %cst_243 = arith.constant 6.000000e+00 : f32
    %299 = vector.broadcast %cst_242 : f32 to vector<4x16x128xf32>
    %300 = arith.maximumf %299, %298 : vector<4x16x128xf32>
    %301 = vector.broadcast %cst_243 : f32 to vector<4x16x128xf32>
    %302 = arith.minimumf %301, %300 : vector<4x16x128xf32>
    %c12_244 = arith.constant 12 : index
    %c0_245 = arith.constant 0 : index
    %c0_246 = arith.constant 0 : index
    %303 = vector.load %arg11[%c12_244, %c0_245, %c0_246] : memref<16x16x128xf32, #tpu.memory_space<vmem>>, vector<4x16x128xf32>
    tpu.vector_store %arg11[%c12_244, %c0_245, %c0_246], %302 {strides = array<i32>} : memref<16x16x128xf32, #tpu.memory_space<vmem>>, vector<4x16x128xf32>,
    %c0_247 = arith.constant 0 : index
    %c0_248 = arith.constant 0 : index
    %c0_249 = arith.constant 0 : index
    %304 = vector.load %arg11[%c0_247, %c0_248, %c0_249] : memref<16x16x128xf32, #tpu.memory_space<vmem>>, vector<16x16x128xf32>
    %305 = vector.shape_cast %304 : vector<16x16x128xf32> to vector<256x128xf32>
    %c0_250 = arith.constant 0 : index
    %c0_251 = arith.constant 0 : index
    %306 = vector.load %arg7[%c0_250, %c0_251] : memref<128x128xf32, #tpu.memory_space<vmem>>, vector<128x128xf32>
    %cst_252 = arith.constant dense<0.000000e+00> : vector<256x128xf32>
    %307 = tpu.matmul %305, %306, %cst_252 {dimension_numbers = #tpu.dot_dimension_numbers<[1], [0], [0], [1], [0, 0, 1, 1], [], []>} : vector<256x128xf32>, vector<128x128xf32>, vector<256x128xf32> -> vector<256x128xf32>
    %c0_253 = arith.constant 0 : index
    %c0_254 = arith.constant 0 : index
    %308 = vector.load %arg8[%c0_253, %c0_254] : memref<1x128xf32, #tpu.memory_space<vmem>>, vector<1x128xf32>
    %309 = vector.broadcast %308 : vector<1x128xf32> to vector<256x128xf32>
    %310 = arith.addf %307, %309 : vector<256x128xf32>
    %311 = vector.shape_cast %310 : vector<256x128xf32> to vector<16x16x128xf32>
    %c1_i32 = arith.constant 1 : i32
    %312 = arith.addi %1, %c1_i32 : i32
    %c0_255 = arith.constant 0 : index
    %313 = arith.index_cast %312 : i32 to index
    %c1_256 = arith.constant 1 : index
    %c0_257 = arith.constant 0 : index
    %314 = vector.load %arg2[%c0_255, %313, %c1_256, %c0_257] : memref<1x18x18x128xf32, #tpu.memory_space<vmem>>, vector<1x16x16x128xf32>
    %315 = vector.shape_cast %314 : vector<1x16x16x128xf32> to vector<16x16x128xf32>
    %316 = arith.addf %311, %315 : vector<16x16x128xf32>
    %c0_258 = arith.constant 0 : index
    %c0_259 = arith.constant 0 : index
    %c0_260 = arith.constant 0 : index
    %c0_261 = arith.constant 0 : index
    %317 = vector.load %arg9[%c0_258, %c0_259, %c0_260, %c0_261] : memref<1x16x16x128xf32, #tpu.memory_space<vmem>>, vector<1x16x16x128xf32>
    %318 = vector.shape_cast %317 : vector<1x16x16x128xf32> to vector<16x16x128xf32>
    %319 = vector.shape_cast %316 : vector<16x16x128xf32> to vector<1x16x16x128xf32>
    tpu.vector_store %arg9[%c0_258, %c0_259, %c0_260, %c0_261], %319 {strides = array<i32>} : memref<1x16x16x128xf32, #tpu.memory_space<vmem>>, vector<1x16x16x128xf32>,
    return
  }
  func.func @transform_0(%arg0: i32, %arg1: i32) -> (i32, i32, i32, i32) {
    %c0_i32 = arith.constant 0 : i32
    %c0_i32_0 = arith.constant 0 : i32
    %c0_i32_1 = arith.constant 0 : i32
    %c0_i32_2 = arith.constant 0 : i32
    return %arg0, %c0_i32, %c0_i32_0, %c0_i32_1 : i32, i32, i32, i32
  }
  func.func @transform_1(%arg0: i32, %arg1: i32) -> (i32, i32) {
    %c0_i32 = arith.constant 0 : i32
    %c0_i32_0 = arith.constant 0 : i32
    %c0_i32_1 = arith.constant 0 : i32
    return %c0_i32, %c0_i32_0 : i32, i32
  }
  func.func @transform_2(%arg0: i32, %arg1: i32) -> (i32, i32) {
    %c0_i32 = arith.constant 0 : i32
    %c0_i32_0 = arith.constant 0 : i32
    %c0_i32_1 = arith.constant 0 : i32
    return %c0_i32, %c0_i32_0 : i32, i32
  }
  func.func @transform_3(%arg0: i32, %arg1: i32) -> (i32, i32, i32) {
    %c0_i32 = arith.constant 0 : i32
    %c0_i32_0 = arith.constant 0 : i32
    %c0_i32_1 = arith.constant 0 : i32
    %c0_i32_2 = arith.constant 0 : i32
    return %c0_i32, %c0_i32_0, %c0_i32_1 : i32, i32, i32
  }
  func.func @transform_4(%arg0: i32, %arg1: i32) -> (i32, i32) {
    %c0_i32 = arith.constant 0 : i32
    %c0_i32_0 = arith.constant 0 : i32
    %c0_i32_1 = arith.constant 0 : i32
    return %c0_i32, %c0_i32_0 : i32, i32
  }
  func.func @transform_5(%arg0: i32, %arg1: i32) -> (i32, i32) {
    %c0_i32 = arith.constant 0 : i32
    %c0_i32_0 = arith.constant 0 : i32
    %c0_i32_1 = arith.constant 0 : i32
    return %c0_i32, %c0_i32_0 : i32, i32
  }
  func.func @transform_6(%arg0: i32, %arg1: i32) -> (i32, i32) {
    %c0_i32 = arith.constant 0 : i32
    %c0_i32_0 = arith.constant 0 : i32
    %c0_i32_1 = arith.constant 0 : i32
    return %c0_i32, %c0_i32_0 : i32, i32
  }
  func.func @transform_7(%arg0: i32, %arg1: i32) -> (i32, i32, i32, i32) {
    %c0_i32 = arith.constant 0 : i32
    %c0_i32_0 = arith.constant 0 : i32
    %c0_i32_1 = arith.constant 0 : i32
    return %arg0, %arg1, %c0_i32, %c0_i32_0 : i32, i32, i32, i32
  }
}

module attributes {stable_mosaic.version = 11 : i64} {
  func.func @_inverted_residual_kernel(%arg0: i32, %arg1: i32, %arg2: memref<1x18x18x128xf32, #tpu.memory_space<vmem>>, %arg3: memref<128x128xf32, #tpu.memory_space<vmem>>, %arg4: memref<1x128xf32, #tpu.memory_space<vmem>>, %arg5: memref<3x3x128xf32, #tpu.memory_space<vmem>>, %arg6: memref<1x128xf32, #tpu.memory_space<vmem>>, %arg7: memref<128x128xf32, #tpu.memory_space<vmem>>, %arg8: memref<1x128xf32, #tpu.memory_space<vmem>>, %arg9: memref<1x16x16x128xf32, #tpu.memory_space<vmem>>, %arg10: memref<18x18x128xf32, #tpu.memory_space<vmem>>, %arg11: memref<16x16x128xf32, #tpu.memory_space<vmem>>) attributes {dimension_semantics = [#tpu.dimension_semantics<parallel>, #tpu.dimension_semantics<parallel>], iteration_bounds = array<i64: 2, 1>, scalar_prefetch = 0 : i64, scratch_operands = 2 : i64, tpu.core_type = #tpu.core_type<tc>, window_params = [{transform_indices = @transform_0, window_bounds = array<i64: 1, 18, 18, 128>}, {pipeline_mode = #tpu.pipeline_mode<synchronous>, transform_indices = @transform_1, window_bounds = array<i64: 128, 128>}, {pipeline_mode = #tpu.pipeline_mode<synchronous>, transform_indices = @transform_2, window_bounds = array<i64: 1, 128>}, {pipeline_mode = #tpu.pipeline_mode<synchronous>, transform_indices = @transform_3, window_bounds = array<i64: 3, 3, 128>}, {pipeline_mode = #tpu.pipeline_mode<synchronous>, transform_indices = @transform_4, window_bounds = array<i64: 1, 128>}, {pipeline_mode = #tpu.pipeline_mode<synchronous>, transform_indices = @transform_5, window_bounds = array<i64: 128, 128>}, {pipeline_mode = #tpu.pipeline_mode<synchronous>, transform_indices = @transform_6, window_bounds = array<i64: 1, 128>}, {transform_indices = @transform_7, window_bounds = array<i64: 1, 16, 16, 128>}]} {
    %c16_i32 = arith.constant 16 : i32
    %0 = arith.muli %arg1, %c16_i32 : i32
    %1 = tpu.assume_multiple %0, 16 : i32
    %c0 = arith.constant 0 : index
    %2 = arith.index_cast %1 : i32 to index
    %c1 = arith.constant 1 : index
    %c0_0 = arith.constant 0 : index
    %3 = vector.load %arg2[%c0, %2, %c1, %c0_0] : memref<1x18x18x128xf32, #tpu.memory_space<vmem>>, vector<1x18x16x128xf32>
    %4 = vector.shape_cast %3 : vector<1x18x16x128xf32> to vector<18x16x128xf32>
    %5 = vector.shape_cast %4 : vector<18x16x128xf32> to vector<288x128xf32>
    %c0_1 = arith.constant 0 : index
    %c0_2 = arith.constant 0 : index
    %6 = vector.load %arg3[%c0_1, %c0_2] : memref<128x128xf32, #tpu.memory_space<vmem>>, vector<128x128xf32>
    %cst = arith.constant dense<0.000000e+00> : vector<288x128xf32>
    %7 = tpu.matmul %5, %6, %cst {dimension_numbers = #tpu.dot_dimension_numbers<[1], [0], [0], [1], [0, 0, 1, 1], [], []>} : vector<288x128xf32>, vector<128x128xf32>, vector<288x128xf32> -> vector<288x128xf32>
    %c0_3 = arith.constant 0 : index
    %c0_4 = arith.constant 0 : index
    %8 = vector.load %arg4[%c0_3, %c0_4] : memref<1x128xf32, #tpu.memory_space<vmem>>, vector<1x128xf32>
    %9 = vector.broadcast %8 : vector<1x128xf32> to vector<288x128xf32>
    %10 = arith.addf %7, %9 : vector<288x128xf32>
    %cst_5 = arith.constant 0.000000e+00 : f32
    %cst_6 = arith.constant 6.000000e+00 : f32
    %11 = vector.broadcast %cst_5 : f32 to vector<288x128xf32>
    %12 = arith.maximumf %11, %10 : vector<288x128xf32>
    %13 = vector.broadcast %cst_6 : f32 to vector<288x128xf32>
    %14 = arith.minimumf %13, %12 : vector<288x128xf32>
    %15 = vector.shape_cast %14 : vector<288x128xf32> to vector<18x16x128xf32>
    %c0_7 = arith.constant 0 : index
    %c1_8 = arith.constant 1 : index
    %c0_9 = arith.constant 0 : index
    %16 = vector.load %arg10[%c0_7, %c1_8, %c0_9] : memref<18x18x128xf32, #tpu.memory_space<vmem>>, vector<18x16x128xf32>
    tpu.vector_store %arg10[%c0_7, %c1_8, %c0_9], %15 {strides = array<i32>} : memref<18x18x128xf32, #tpu.memory_space<vmem>>, vector<18x16x128xf32>,
    %cst_10 = arith.constant 0.000000e+00 : f32
    %17 = vector.broadcast %cst_10 : f32 to vector<18x1x128xf32>
    %c0_11 = arith.constant 0 : index
    %c0_12 = arith.constant 0 : index
    %c0_13 = arith.constant 0 : index
    %18 = vector.load %arg10[%c0_11, %c0_12, %c0_13] : memref<18x18x128xf32, #tpu.memory_space<vmem>>, vector<18x1x128xf32>
    tpu.vector_store %arg10[%c0_11, %c0_12, %c0_13], %17 {strides = array<i32>} : memref<18x18x128xf32, #tpu.memory_space<vmem>>, vector<18x1x128xf32>,
    %c0_14 = arith.constant 0 : index
    %c17 = arith.constant 17 : index
    %c0_15 = arith.constant 0 : index
    %19 = vector.load %arg10[%c0_14, %c17, %c0_15] : memref<18x18x128xf32, #tpu.memory_space<vmem>>, vector<18x1x128xf32>
    tpu.vector_store %arg10[%c0_14, %c17, %c0_15], %17 {strides = array<i32>} : memref<18x18x128xf32, #tpu.memory_space<vmem>>, vector<18x1x128xf32>,
    %c0_i32 = arith.constant 0 : i32
    %20 = arith.cmpi eq, %arg1, %c0_i32 : i32
    %21 = arith.extui %20 : i1 to i32
    %c0_i32_16 = arith.constant 0 : i32
    %22 = arith.cmpi ne, %21, %c0_i32_16 : i32
    scf.if %22 {
      %cst_262 = arith.constant 0.000000e+00 : f32
      %320 = vector.broadcast %cst_262 : f32 to vector<1x18x128xf32>
      %c0_263 = arith.constant 0 : index
      %c0_264 = arith.constant 0 : index
      %c0_265 = arith.constant 0 : index
      %321 = vector.load %arg10[%c0_263, %c0_264, %c0_265] : memref<18x18x128xf32, #tpu.memory_space<vmem>>, vector<1x18x128xf32>
      tpu.vector_store %arg10[%c0_263, %c0_264, %c0_265], %320 {strides = array<i32>} : memref<18x18x128xf32, #tpu.memory_space<vmem>>, vector<1x18x128xf32>,
    } else {
    }
    %c0_i32_17 = arith.constant 0 : i32
    %23 = arith.cmpi eq, %arg1, %c0_i32_17 : i32
    %24 = arith.extui %23 : i1 to i32
    %c0_i32_18 = arith.constant 0 : i32
    %25 = arith.cmpi ne, %24, %c0_i32_18 : i32
    scf.if %25 {
      %cst_262 = arith.constant 0.000000e+00 : f32
      %320 = vector.broadcast %cst_262 : f32 to vector<1x18x128xf32>
      %c17_263 = arith.constant 17 : index
      %c0_264 = arith.constant 0 : index
      %c0_265 = arith.constant 0 : index
      %321 = vector.load %arg10[%c17_263, %c0_264, %c0_265] : memref<18x18x128xf32, #tpu.memory_space<vmem>>, vector<1x18x128xf32>
      tpu.vector_store %arg10[%c17_263, %c0_264, %c0_265], %320 {strides = array<i32>} : memref<18x18x128xf32, #tpu.memory_space<vmem>>, vector<1x18x128xf32>,
    } else {
    }
    %c0_19 = arith.constant 0 : index
    %c0_20 = arith.constant 0 : index
    %26 = vector.load %arg6[%c0_19, %c0_20] : memref<1x128xf32, #tpu.memory_space<vmem>>, vector<1x128xf32>
    %27 = vector.shape_cast %26 : vector<1x128xf32> to vector<1x1x128xf32>
    %c0_21 = arith.constant 0 : index
    %c0_22 = arith.constant 0 : index
    %c0_23 = arith.constant 0 : index
    %28 = vector.load %arg10[%c0_21, %c0_22, %c0_23] : memref<18x18x128xf32, #tpu.memory_space<vmem>>, vector<4x16x128xf32>
    %c0_24 = arith.constant 0 : index
    %c0_25 = arith.constant 0 : index
    %c0_26 = arith.constant 0 : index
    %29 = vector.load %arg5[%c0_24, %c0_25, %c0_26] : memref<3x3x128xf32, #tpu.memory_space<vmem>>, vector<1x1x128xf32>
    %30 = vector.shape_cast %29 : vector<1x1x128xf32> to vector<128xf32>
    %31 = vector.shape_cast %30 : vector<128xf32> to vector<1x1x128xf32>
    %32 = vector.broadcast %31 : vector<1x1x128xf32> to vector<4x16x128xf32>
    %33 = arith.mulf %28, %32 : vector<4x16x128xf32>
    %34 = vector.broadcast %27 : vector<1x1x128xf32> to vector<4x16x128xf32>
    %35 = arith.addf %34, %33 : vector<4x16x128xf32>
    %c0_27 = arith.constant 0 : index
    %c1_28 = arith.constant 1 : index
    %c0_29 = arith.constant 0 : index
    %36 = vector.load %arg10[%c0_27, %c1_28, %c0_29] : memref<18x18x128xf32, #tpu.memory_space<vmem>>, vector<4x16x128xf32>
    %c0_30 = arith.constant 0 : index
    %c1_31 = arith.constant 1 : index
    %c0_32 = arith.constant 0 : index
    %37 = vector.load %arg5[%c0_30, %c1_31, %c0_32] : memref<3x3x128xf32, #tpu.memory_space<vmem>>, vector<1x1x128xf32>
    %38 = vector.shape_cast %37 : vector<1x1x128xf32> to vector<128xf32>
    %39 = vector.shape_cast %38 : vector<128xf32> to vector<1x1x128xf32>
    %40 = vector.broadcast %39 : vector<1x1x128xf32> to vector<4x16x128xf32>
    %41 = arith.mulf %36, %40 : vector<4x16x128xf32>
    %42 = arith.addf %35, %41 : vector<4x16x128xf32>
    %c0_33 = arith.constant 0 : index
    %c2 = arith.constant 2 : index
    %c0_34 = arith.constant 0 : index
    %43 = vector.load %arg10[%c0_33, %c2, %c0_34] : memref<18x18x128xf32, #tpu.memory_space<vmem>>, vector<4x16x128xf32>
    %c0_35 = arith.constant 0 : index
    %c2_36 = arith.constant 2 : index
    %c0_37 = arith.constant 0 : index
    %44 = vector.load %arg5[%c0_35, %c2_36, %c0_37] : memref<3x3x128xf32, #tpu.memory_space<vmem>>, vector<1x1x128xf32>
    %45 = vector.shape_cast %44 : vector<1x1x128xf32> to vector<128xf32>
    %46 = vector.shape_cast %45 : vector<128xf32> to vector<1x1x128xf32>
    %47 = vector.broadcast %46 : vector<1x1x128xf32> to vector<4x16x128xf32>
    %48 = arith.mulf %43, %47 : vector<4x16x128xf32>
    %49 = arith.addf %42, %48 : vector<4x16x128xf32>
    %c1_38 = arith.constant 1 : index
    %c0_39 = arith.constant 0 : index
    %c0_40 = arith.constant 0 : index
    %50 = vector.load %arg10[%c1_38, %c0_39, %c0_40] : memref<18x18x128xf32, #tpu.memory_space<vmem>>, vector<4x16x128xf32>
    %c1_41 = arith.constant 1 : index
    %c0_42 = arith.constant 0 : index
    %c0_43 = arith.constant 0 : index
    %51 = vector.load %arg5[%c1_41, %c0_42, %c0_43] : memref<3x3x128xf32, #tpu.memory_space<vmem>>, vector<1x1x128xf32>
    %52 = vector.shape_cast %51 : vector<1x1x128xf32> to vector<128xf32>
    %53 = vector.shape_cast %52 : vector<128xf32> to vector<1x1x128xf32>
    %54 = vector.broadcast %53 : vector<1x1x128xf32> to vector<4x16x128xf32>
    %55 = arith.mulf %50, %54 : vector<4x16x128xf32>
    %56 = arith.addf %49, %55 : vector<4x16x128xf32>
    %c1_44 = arith.constant 1 : index
    %c1_45 = arith.constant 1 : index
    %c0_46 = arith.constant 0 : index
    %57 = vector.load %arg10[%c1_44, %c1_45, %c0_46] : memref<18x18x128xf32, #tpu.memory_space<vmem>>, vector<4x16x128xf32>
    %c1_47 = arith.constant 1 : index
    %c1_48 = arith.constant 1 : index
    %c0_49 = arith.constant 0 : index
    %58 = vector.load %arg5[%c1_47, %c1_48, %c0_49] : memref<3x3x128xf32, #tpu.memory_space<vmem>>, vector<1x1x128xf32>
    %59 = vector.shape_cast %58 : vector<1x1x128xf32> to vector<128xf32>
    %60 = vector.shape_cast %59 : vector<128xf32> to vector<1x1x128xf32>
    %61 = vector.broadcast %60 : vector<1x1x128xf32> to vector<4x16x128xf32>
    %62 = arith.mulf %57, %61 : vector<4x16x128xf32>
    %63 = arith.addf %56, %62 : vector<4x16x128xf32>
    %c1_50 = arith.constant 1 : index
    %c2_51 = arith.constant 2 : index
    %c0_52 = arith.constant 0 : index
    %64 = vector.load %arg10[%c1_50, %c2_51, %c0_52] : memref<18x18x128xf32, #tpu.memory_space<vmem>>, vector<4x16x128xf32>
    %c1_53 = arith.constant 1 : index
    %c2_54 = arith.constant 2 : index
    %c0_55 = arith.constant 0 : index
    %65 = vector.load %arg5[%c1_53, %c2_54, %c0_55] : memref<3x3x128xf32, #tpu.memory_space<vmem>>, vector<1x1x128xf32>
    %66 = vector.shape_cast %65 : vector<1x1x128xf32> to vector<128xf32>
    %67 = vector.shape_cast %66 : vector<128xf32> to vector<1x1x128xf32>
    %68 = vector.broadcast %67 : vector<1x1x128xf32> to vector<4x16x128xf32>
    %69 = arith.mulf %64, %68 : vector<4x16x128xf32>
    %70 = arith.addf %63, %69 : vector<4x16x128xf32>
    %c2_56 = arith.constant 2 : index
    %c0_57 = arith.constant 0 : index
    %c0_58 = arith.constant 0 : index
    %71 = vector.load %arg10[%c2_56, %c0_57, %c0_58] : memref<18x18x128xf32, #tpu.memory_space<vmem>>, vector<4x16x128xf32>
    %c2_59 = arith.constant 2 : index
    %c0_60 = arith.constant 0 : index
    %c0_61 = arith.constant 0 : index
    %72 = vector.load %arg5[%c2_59, %c0_60, %c0_61] : memref<3x3x128xf32, #tpu.memory_space<vmem>>, vector<1x1x128xf32>
    %73 = vector.shape_cast %72 : vector<1x1x128xf32> to vector<128xf32>
    %74 = vector.shape_cast %73 : vector<128xf32> to vector<1x1x128xf32>
    %75 = vector.broadcast %74 : vector<1x1x128xf32> to vector<4x16x128xf32>
    %76 = arith.mulf %71, %75 : vector<4x16x128xf32>
    %77 = arith.addf %70, %76 : vector<4x16x128xf32>
    %c2_62 = arith.constant 2 : index
    %c1_63 = arith.constant 1 : index
    %c0_64 = arith.constant 0 : index
    %78 = vector.load %arg10[%c2_62, %c1_63, %c0_64] : memref<18x18x128xf32, #tpu.memory_space<vmem>>, vector<4x16x128xf32>
    %c2_65 = arith.constant 2 : index
    %c1_66 = arith.constant 1 : index
    %c0_67 = arith.constant 0 : index
    %79 = vector.load %arg5[%c2_65, %c1_66, %c0_67] : memref<3x3x128xf32, #tpu.memory_space<vmem>>, vector<1x1x128xf32>
    %80 = vector.shape_cast %79 : vector<1x1x128xf32> to vector<128xf32>
    %81 = vector.shape_cast %80 : vector<128xf32> to vector<1x1x128xf32>
    %82 = vector.broadcast %81 : vector<1x1x128xf32> to vector<4x16x128xf32>
    %83 = arith.mulf %78, %82 : vector<4x16x128xf32>
    %84 = arith.addf %77, %83 : vector<4x16x128xf32>
    %c2_68 = arith.constant 2 : index
    %c2_69 = arith.constant 2 : index
    %c0_70 = arith.constant 0 : index
    %85 = vector.load %arg10[%c2_68, %c2_69, %c0_70] : memref<18x18x128xf32, #tpu.memory_space<vmem>>, vector<4x16x128xf32>
    %c2_71 = arith.constant 2 : index
    %c2_72 = arith.constant 2 : index
    %c0_73 = arith.constant 0 : index
    %86 = vector.load %arg5[%c2_71, %c2_72, %c0_73] : memref<3x3x128xf32, #tpu.memory_space<vmem>>, vector<1x1x128xf32>
    %87 = vector.shape_cast %86 : vector<1x1x128xf32> to vector<128xf32>
    %88 = vector.shape_cast %87 : vector<128xf32> to vector<1x1x128xf32>
    %89 = vector.broadcast %88 : vector<1x1x128xf32> to vector<4x16x128xf32>
    %90 = arith.mulf %85, %89 : vector<4x16x128xf32>
    %91 = arith.addf %84, %90 : vector<4x16x128xf32>
    %cst_74 = arith.constant 0.000000e+00 : f32
    %cst_75 = arith.constant 6.000000e+00 : f32
    %92 = vector.broadcast %cst_74 : f32 to vector<4x16x128xf32>
    %93 = arith.maximumf %92, %91 : vector<4x16x128xf32>
    %94 = vector.broadcast %cst_75 : f32 to vector<4x16x128xf32>
    %95 = arith.minimumf %94, %93 : vector<4x16x128xf32>
    %c0_76 = arith.constant 0 : index
    %c0_77 = arith.constant 0 : index
    %c0_78 = arith.constant 0 : index
    %96 = vector.load %arg11[%c0_76, %c0_77, %c0_78] : memref<16x16x128xf32, #tpu.memory_space<vmem>>, vector<4x16x128xf32>
    tpu.vector_store %arg11[%c0_76, %c0_77, %c0_78], %95 {strides = array<i32>} : memref<16x16x128xf32, #tpu.memory_space<vmem>>, vector<4x16x128xf32>,
    %c4 = arith.constant 4 : index
    %c0_79 = arith.constant 0 : index
    %c0_80 = arith.constant 0 : index
    %97 = vector.load %arg10[%c4, %c0_79, %c0_80] : memref<18x18x128xf32, #tpu.memory_space<vmem>>, vector<4x16x128xf32>
    %c0_81 = arith.constant 0 : index
    %c0_82 = arith.constant 0 : index
    %c0_83 = arith.constant 0 : index
    %98 = vector.load %arg5[%c0_81, %c0_82, %c0_83] : memref<3x3x128xf32, #tpu.memory_space<vmem>>, vector<1x1x128xf32>
    %99 = vector.shape_cast %98 : vector<1x1x128xf32> to vector<128xf32>
    %100 = vector.shape_cast %99 : vector<128xf32> to vector<1x1x128xf32>
    %101 = vector.broadcast %100 : vector<1x1x128xf32> to vector<4x16x128xf32>
    %102 = arith.mulf %97, %101 : vector<4x16x128xf32>
    %103 = vector.broadcast %27 : vector<1x1x128xf32> to vector<4x16x128xf32>
    %104 = arith.addf %103, %102 : vector<4x16x128xf32>
    %c4_84 = arith.constant 4 : index
    %c1_85 = arith.constant 1 : index
    %c0_86 = arith.constant 0 : index
    %105 = vector.load %arg10[%c4_84, %c1_85, %c0_86] : memref<18x18x128xf32, #tpu.memory_space<vmem>>, vector<4x16x128xf32>
    %c0_87 = arith.constant 0 : index
    %c1_88 = arith.constant 1 : index
    %c0_89 = arith.constant 0 : index
    %106 = vector.load %arg5[%c0_87, %c1_88, %c0_89] : memref<3x3x128xf32, #tpu.memory_space<vmem>>, vector<1x1x128xf32>
    %107 = vector.shape_cast %106 : vector<1x1x128xf32> to vector<128xf32>
    %108 = vector.shape_cast %107 : vector<128xf32> to vector<1x1x128xf32>
    %109 = vector.broadcast %108 : vector<1x1x128xf32> to vector<4x16x128xf32>
    %110 = arith.mulf %105, %109 : vector<4x16x128xf32>
    %111 = arith.addf %104, %110 : vector<4x16x128xf32>
    %c4_90 = arith.constant 4 : index
    %c2_91 = arith.constant 2 : index
    %c0_92 = arith.constant 0 : index
    %112 = vector.load %arg10[%c4_90, %c2_91, %c0_92] : memref<18x18x128xf32, #tpu.memory_space<vmem>>, vector<4x16x128xf32>
    %c0_93 = arith.constant 0 : index
    %c2_94 = arith.constant 2 : index
    %c0_95 = arith.constant 0 : index
    %113 = vector.load %arg5[%c0_93, %c2_94, %c0_95] : memref<3x3x128xf32, #tpu.memory_space<vmem>>, vector<1x1x128xf32>
    %114 = vector.shape_cast %113 : vector<1x1x128xf32> to vector<128xf32>
    %115 = vector.shape_cast %114 : vector<128xf32> to vector<1x1x128xf32>
    %116 = vector.broadcast %115 : vector<1x1x128xf32> to vector<4x16x128xf32>
    %117 = arith.mulf %112, %116 : vector<4x16x128xf32>
    %118 = arith.addf %111, %117 : vector<4x16x128xf32>
    %c5 = arith.constant 5 : index
    %c0_96 = arith.constant 0 : index
    %c0_97 = arith.constant 0 : index
    %119 = vector.load %arg10[%c5, %c0_96, %c0_97] : memref<18x18x128xf32, #tpu.memory_space<vmem>>, vector<4x16x128xf32>
    %c1_98 = arith.constant 1 : index
    %c0_99 = arith.constant 0 : index
    %c0_100 = arith.constant 0 : index
    %120 = vector.load %arg5[%c1_98, %c0_99, %c0_100] : memref<3x3x128xf32, #tpu.memory_space<vmem>>, vector<1x1x128xf32>
    %121 = vector.shape_cast %120 : vector<1x1x128xf32> to vector<128xf32>
    %122 = vector.shape_cast %121 : vector<128xf32> to vector<1x1x128xf32>
    %123 = vector.broadcast %122 : vector<1x1x128xf32> to vector<4x16x128xf32>
    %124 = arith.mulf %119, %123 : vector<4x16x128xf32>
    %125 = arith.addf %118, %124 : vector<4x16x128xf32>
    %c5_101 = arith.constant 5 : index
    %c1_102 = arith.constant 1 : index
    %c0_103 = arith.constant 0 : index
    %126 = vector.load %arg10[%c5_101, %c1_102, %c0_103] : memref<18x18x128xf32, #tpu.memory_space<vmem>>, vector<4x16x128xf32>
    %c1_104 = arith.constant 1 : index
    %c1_105 = arith.constant 1 : index
    %c0_106 = arith.constant 0 : index
    %127 = vector.load %arg5[%c1_104, %c1_105, %c0_106] : memref<3x3x128xf32, #tpu.memory_space<vmem>>, vector<1x1x128xf32>
    %128 = vector.shape_cast %127 : vector<1x1x128xf32> to vector<128xf32>
    %129 = vector.shape_cast %128 : vector<128xf32> to vector<1x1x128xf32>
    %130 = vector.broadcast %129 : vector<1x1x128xf32> to vector<4x16x128xf32>
    %131 = arith.mulf %126, %130 : vector<4x16x128xf32>
    %132 = arith.addf %125, %131 : vector<4x16x128xf32>
    %c5_107 = arith.constant 5 : index
    %c2_108 = arith.constant 2 : index
    %c0_109 = arith.constant 0 : index
    %133 = vector.load %arg10[%c5_107, %c2_108, %c0_109] : memref<18x18x128xf32, #tpu.memory_space<vmem>>, vector<4x16x128xf32>
    %c1_110 = arith.constant 1 : index
    %c2_111 = arith.constant 2 : index
    %c0_112 = arith.constant 0 : index
    %134 = vector.load %arg5[%c1_110, %c2_111, %c0_112] : memref<3x3x128xf32, #tpu.memory_space<vmem>>, vector<1x1x128xf32>
    %135 = vector.shape_cast %134 : vector<1x1x128xf32> to vector<128xf32>
    %136 = vector.shape_cast %135 : vector<128xf32> to vector<1x1x128xf32>
    %137 = vector.broadcast %136 : vector<1x1x128xf32> to vector<4x16x128xf32>
    %138 = arith.mulf %133, %137 : vector<4x16x128xf32>
    %139 = arith.addf %132, %138 : vector<4x16x128xf32>
    %c6 = arith.constant 6 : index
    %c0_113 = arith.constant 0 : index
    %c0_114 = arith.constant 0 : index
    %140 = vector.load %arg10[%c6, %c0_113, %c0_114] : memref<18x18x128xf32, #tpu.memory_space<vmem>>, vector<4x16x128xf32>
    %c2_115 = arith.constant 2 : index
    %c0_116 = arith.constant 0 : index
    %c0_117 = arith.constant 0 : index
    %141 = vector.load %arg5[%c2_115, %c0_116, %c0_117] : memref<3x3x128xf32, #tpu.memory_space<vmem>>, vector<1x1x128xf32>
    %142 = vector.shape_cast %141 : vector<1x1x128xf32> to vector<128xf32>
    %143 = vector.shape_cast %142 : vector<128xf32> to vector<1x1x128xf32>
    %144 = vector.broadcast %143 : vector<1x1x128xf32> to vector<4x16x128xf32>
    %145 = arith.mulf %140, %144 : vector<4x16x128xf32>
    %146 = arith.addf %139, %145 : vector<4x16x128xf32>
    %c6_118 = arith.constant 6 : index
    %c1_119 = arith.constant 1 : index
    %c0_120 = arith.constant 0 : index
    %147 = vector.load %arg10[%c6_118, %c1_119, %c0_120] : memref<18x18x128xf32, #tpu.memory_space<vmem>>, vector<4x16x128xf32>
    %c2_121 = arith.constant 2 : index
    %c1_122 = arith.constant 1 : index
    %c0_123 = arith.constant 0 : index
    %148 = vector.load %arg5[%c2_121, %c1_122, %c0_123] : memref<3x3x128xf32, #tpu.memory_space<vmem>>, vector<1x1x128xf32>
    %149 = vector.shape_cast %148 : vector<1x1x128xf32> to vector<128xf32>
    %150 = vector.shape_cast %149 : vector<128xf32> to vector<1x1x128xf32>
    %151 = vector.broadcast %150 : vector<1x1x128xf32> to vector<4x16x128xf32>
    %152 = arith.mulf %147, %151 : vector<4x16x128xf32>
    %153 = arith.addf %146, %152 : vector<4x16x128xf32>
    %c6_124 = arith.constant 6 : index
    %c2_125 = arith.constant 2 : index
    %c0_126 = arith.constant 0 : index
    %154 = vector.load %arg10[%c6_124, %c2_125, %c0_126] : memref<18x18x128xf32, #tpu.memory_space<vmem>>, vector<4x16x128xf32>
    %c2_127 = arith.constant 2 : index
    %c2_128 = arith.constant 2 : index
    %c0_129 = arith.constant 0 : index
    %155 = vector.load %arg5[%c2_127, %c2_128, %c0_129] : memref<3x3x128xf32, #tpu.memory_space<vmem>>, vector<1x1x128xf32>
    %156 = vector.shape_cast %155 : vector<1x1x128xf32> to vector<128xf32>
    %157 = vector.shape_cast %156 : vector<128xf32> to vector<1x1x128xf32>
    %158 = vector.broadcast %157 : vector<1x1x128xf32> to vector<4x16x128xf32>
    %159 = arith.mulf %154, %158 : vector<4x16x128xf32>
    %160 = arith.addf %153, %159 : vector<4x16x128xf32>
    %cst_130 = arith.constant 0.000000e+00 : f32
    %cst_131 = arith.constant 6.000000e+00 : f32
    %161 = vector.broadcast %cst_130 : f32 to vector<4x16x128xf32>
    %162 = arith.maximumf %161, %160 : vector<4x16x128xf32>
    %163 = vector.broadcast %cst_131 : f32 to vector<4x16x128xf32>
    %164 = arith.minimumf %163, %162 : vector<4x16x128xf32>
    %c4_132 = arith.constant 4 : index
    %c0_133 = arith.constant 0 : index
    %c0_134 = arith.constant 0 : index
    %165 = vector.load %arg11[%c4_132, %c0_133, %c0_134] : memref<16x16x128xf32, #tpu.memory_space<vmem>>, vector<4x16x128xf32>
    tpu.vector_store %arg11[%c4_132, %c0_133, %c0_134], %164 {strides = array<i32>} : memref<16x16x128xf32, #tpu.memory_space<vmem>>, vector<4x16x128xf32>,
    %c8 = arith.constant 8 : index
    %c0_135 = arith.constant 0 : index
    %c0_136 = arith.constant 0 : index
    %166 = vector.load %arg10[%c8, %c0_135, %c0_136] : memref<18x18x128xf32, #tpu.memory_space<vmem>>, vector<4x16x128xf32>
    %c0_137 = arith.constant 0 : index
    %c0_138 = arith.constant 0 : index
    %c0_139 = arith.constant 0 : index
    %167 = vector.load %arg5[%c0_137, %c0_138, %c0_139] : memref<3x3x128xf32, #tpu.memory_space<vmem>>, vector<1x1x128xf32>
    %168 = vector.shape_cast %167 : vector<1x1x128xf32> to vector<128xf32>
    %169 = vector.shape_cast %168 : vector<128xf32> to vector<1x1x128xf32>
    %170 = vector.broadcast %169 : vector<1x1x128xf32> to vector<4x16x128xf32>
    %171 = arith.mulf %166, %170 : vector<4x16x128xf32>
    %172 = vector.broadcast %27 : vector<1x1x128xf32> to vector<4x16x128xf32>
    %173 = arith.addf %172, %171 : vector<4x16x128xf32>
    %c8_140 = arith.constant 8 : index
    %c1_141 = arith.constant 1 : index
    %c0_142 = arith.constant 0 : index
    %174 = vector.load %arg10[%c8_140, %c1_141, %c0_142] : memref<18x18x128xf32, #tpu.memory_space<vmem>>, vector<4x16x128xf32>
    %c0_143 = arith.constant 0 : index
    %c1_144 = arith.constant 1 : index
    %c0_145 = arith.constant 0 : index
    %175 = vector.load %arg5[%c0_143, %c1_144, %c0_145] : memref<3x3x128xf32, #tpu.memory_space<vmem>>, vector<1x1x128xf32>
    %176 = vector.shape_cast %175 : vector<1x1x128xf32> to vector<128xf32>
    %177 = vector.shape_cast %176 : vector<128xf32> to vector<1x1x128xf32>
    %178 = vector.broadcast %177 : vector<1x1x128xf32> to vector<4x16x128xf32>
    %179 = arith.mulf %174, %178 : vector<4x16x128xf32>
    %180 = arith.addf %173, %179 : vector<4x16x128xf32>
    %c8_146 = arith.constant 8 : index
    %c2_147 = arith.constant 2 : index
    %c0_148 = arith.constant 0 : index
    %181 = vector.load %arg10[%c8_146, %c2_147, %c0_148] : memref<18x18x128xf32, #tpu.memory_space<vmem>>, vector<4x16x128xf32>
    %c0_149 = arith.constant 0 : index
    %c2_150 = arith.constant 2 : index
    %c0_151 = arith.constant 0 : index
    %182 = vector.load %arg5[%c0_149, %c2_150, %c0_151] : memref<3x3x128xf32, #tpu.memory_space<vmem>>, vector<1x1x128xf32>
    %183 = vector.shape_cast %182 : vector<1x1x128xf32> to vector<128xf32>
    %184 = vector.shape_cast %183 : vector<128xf32> to vector<1x1x128xf32>
    %185 = vector.broadcast %184 : vector<1x1x128xf32> to vector<4x16x128xf32>
    %186 = arith.mulf %181, %185 : vector<4x16x128xf32>
    %187 = arith.addf %180, %186 : vector<4x16x128xf32>
    %c9 = arith.constant 9 : index
    %c0_152 = arith.constant 0 : index
    %c0_153 = arith.constant 0 : index
    %188 = vector.load %arg10[%c9, %c0_152, %c0_153] : memref<18x18x128xf32, #tpu.memory_space<vmem>>, vector<4x16x128xf32>
    %c1_154 = arith.constant 1 : index
    %c0_155 = arith.constant 0 : index
    %c0_156 = arith.constant 0 : index
    %189 = vector.load %arg5[%c1_154, %c0_155, %c0_156] : memref<3x3x128xf32, #tpu.memory_space<vmem>>, vector<1x1x128xf32>
    %190 = vector.shape_cast %189 : vector<1x1x128xf32> to vector<128xf32>
    %191 = vector.shape_cast %190 : vector<128xf32> to vector<1x1x128xf32>
    %192 = vector.broadcast %191 : vector<1x1x128xf32> to vector<4x16x128xf32>
    %193 = arith.mulf %188, %192 : vector<4x16x128xf32>
    %194 = arith.addf %187, %193 : vector<4x16x128xf32>
    %c9_157 = arith.constant 9 : index
    %c1_158 = arith.constant 1 : index
    %c0_159 = arith.constant 0 : index
    %195 = vector.load %arg10[%c9_157, %c1_158, %c0_159] : memref<18x18x128xf32, #tpu.memory_space<vmem>>, vector<4x16x128xf32>
    %c1_160 = arith.constant 1 : index
    %c1_161 = arith.constant 1 : index
    %c0_162 = arith.constant 0 : index
    %196 = vector.load %arg5[%c1_160, %c1_161, %c0_162] : memref<3x3x128xf32, #tpu.memory_space<vmem>>, vector<1x1x128xf32>
    %197 = vector.shape_cast %196 : vector<1x1x128xf32> to vector<128xf32>
    %198 = vector.shape_cast %197 : vector<128xf32> to vector<1x1x128xf32>
    %199 = vector.broadcast %198 : vector<1x1x128xf32> to vector<4x16x128xf32>
    %200 = arith.mulf %195, %199 : vector<4x16x128xf32>
    %201 = arith.addf %194, %200 : vector<4x16x128xf32>
    %c9_163 = arith.constant 9 : index
    %c2_164 = arith.constant 2 : index
    %c0_165 = arith.constant 0 : index
    %202 = vector.load %arg10[%c9_163, %c2_164, %c0_165] : memref<18x18x128xf32, #tpu.memory_space<vmem>>, vector<4x16x128xf32>
    %c1_166 = arith.constant 1 : index
    %c2_167 = arith.constant 2 : index
    %c0_168 = arith.constant 0 : index
    %203 = vector.load %arg5[%c1_166, %c2_167, %c0_168] : memref<3x3x128xf32, #tpu.memory_space<vmem>>, vector<1x1x128xf32>
    %204 = vector.shape_cast %203 : vector<1x1x128xf32> to vector<128xf32>
    %205 = vector.shape_cast %204 : vector<128xf32> to vector<1x1x128xf32>
    %206 = vector.broadcast %205 : vector<1x1x128xf32> to vector<4x16x128xf32>
    %207 = arith.mulf %202, %206 : vector<4x16x128xf32>
    %208 = arith.addf %201, %207 : vector<4x16x128xf32>
    %c10 = arith.constant 10 : index
    %c0_169 = arith.constant 0 : index
    %c0_170 = arith.constant 0 : index
    %209 = vector.load %arg10[%c10, %c0_169, %c0_170] : memref<18x18x128xf32, #tpu.memory_space<vmem>>, vector<4x16x128xf32>
    %c2_171 = arith.constant 2 : index
    %c0_172 = arith.constant 0 : index
    %c0_173 = arith.constant 0 : index
    %210 = vector.load %arg5[%c2_171, %c0_172, %c0_173] : memref<3x3x128xf32, #tpu.memory_space<vmem>>, vector<1x1x128xf32>
    %211 = vector.shape_cast %210 : vector<1x1x128xf32> to vector<128xf32>
    %212 = vector.shape_cast %211 : vector<128xf32> to vector<1x1x128xf32>
    %213 = vector.broadcast %212 : vector<1x1x128xf32> to vector<4x16x128xf32>
    %214 = arith.mulf %209, %213 : vector<4x16x128xf32>
    %215 = arith.addf %208, %214 : vector<4x16x128xf32>
    %c10_174 = arith.constant 10 : index
    %c1_175 = arith.constant 1 : index
    %c0_176 = arith.constant 0 : index
    %216 = vector.load %arg10[%c10_174, %c1_175, %c0_176] : memref<18x18x128xf32, #tpu.memory_space<vmem>>, vector<4x16x128xf32>
    %c2_177 = arith.constant 2 : index
    %c1_178 = arith.constant 1 : index
    %c0_179 = arith.constant 0 : index
    %217 = vector.load %arg5[%c2_177, %c1_178, %c0_179] : memref<3x3x128xf32, #tpu.memory_space<vmem>>, vector<1x1x128xf32>
    %218 = vector.shape_cast %217 : vector<1x1x128xf32> to vector<128xf32>
    %219 = vector.shape_cast %218 : vector<128xf32> to vector<1x1x128xf32>
    %220 = vector.broadcast %219 : vector<1x1x128xf32> to vector<4x16x128xf32>
    %221 = arith.mulf %216, %220 : vector<4x16x128xf32>
    %222 = arith.addf %215, %221 : vector<4x16x128xf32>
    %c10_180 = arith.constant 10 : index
    %c2_181 = arith.constant 2 : index
    %c0_182 = arith.constant 0 : index
    %223 = vector.load %arg10[%c10_180, %c2_181, %c0_182] : memref<18x18x128xf32, #tpu.memory_space<vmem>>, vector<4x16x128xf32>
    %c2_183 = arith.constant 2 : index
    %c2_184 = arith.constant 2 : index
    %c0_185 = arith.constant 0 : index
    %224 = vector.load %arg5[%c2_183, %c2_184, %c0_185] : memref<3x3x128xf32, #tpu.memory_space<vmem>>, vector<1x1x128xf32>
    %225 = vector.shape_cast %224 : vector<1x1x128xf32> to vector<128xf32>
    %226 = vector.shape_cast %225 : vector<128xf32> to vector<1x1x128xf32>
    %227 = vector.broadcast %226 : vector<1x1x128xf32> to vector<4x16x128xf32>
    %228 = arith.mulf %223, %227 : vector<4x16x128xf32>
    %229 = arith.addf %222, %228 : vector<4x16x128xf32>
    %cst_186 = arith.constant 0.000000e+00 : f32
    %cst_187 = arith.constant 6.000000e+00 : f32
    %230 = vector.broadcast %cst_186 : f32 to vector<4x16x128xf32>
    %231 = arith.maximumf %230, %229 : vector<4x16x128xf32>
    %232 = vector.broadcast %cst_187 : f32 to vector<4x16x128xf32>
    %233 = arith.minimumf %232, %231 : vector<4x16x128xf32>
    %c8_188 = arith.constant 8 : index
    %c0_189 = arith.constant 0 : index
    %c0_190 = arith.constant 0 : index
    %234 = vector.load %arg11[%c8_188, %c0_189, %c0_190] : memref<16x16x128xf32, #tpu.memory_space<vmem>>, vector<4x16x128xf32>
    tpu.vector_store %arg11[%c8_188, %c0_189, %c0_190], %233 {strides = array<i32>} : memref<16x16x128xf32, #tpu.memory_space<vmem>>, vector<4x16x128xf32>,
    %c12 = arith.constant 12 : index
    %c0_191 = arith.constant 0 : index
    %c0_192 = arith.constant 0 : index
    %235 = vector.load %arg10[%c12, %c0_191, %c0_192] : memref<18x18x128xf32, #tpu.memory_space<vmem>>, vector<4x16x128xf32>
    %c0_193 = arith.constant 0 : index
    %c0_194 = arith.constant 0 : index
    %c0_195 = arith.constant 0 : index
    %236 = vector.load %arg5[%c0_193, %c0_194, %c0_195] : memref<3x3x128xf32, #tpu.memory_space<vmem>>, vector<1x1x128xf32>
    %237 = vector.shape_cast %236 : vector<1x1x128xf32> to vector<128xf32>
    %238 = vector.shape_cast %237 : vector<128xf32> to vector<1x1x128xf32>
    %239 = vector.broadcast %238 : vector<1x1x128xf32> to vector<4x16x128xf32>
    %240 = arith.mulf %235, %239 : vector<4x16x128xf32>
    %241 = vector.broadcast %27 : vector<1x1x128xf32> to vector<4x16x128xf32>
    %242 = arith.addf %241, %240 : vector<4x16x128xf32>
    %c12_196 = arith.constant 12 : index
    %c1_197 = arith.constant 1 : index
    %c0_198 = arith.constant 0 : index
    %243 = vector.load %arg10[%c12_196, %c1_197, %c0_198] : memref<18x18x128xf32, #tpu.memory_space<vmem>>, vector<4x16x128xf32>
    %c0_199 = arith.constant 0 : index
    %c1_200 = arith.constant 1 : index
    %c0_201 = arith.constant 0 : index
    %244 = vector.load %arg5[%c0_199, %c1_200, %c0_201] : memref<3x3x128xf32, #tpu.memory_space<vmem>>, vector<1x1x128xf32>
    %245 = vector.shape_cast %244 : vector<1x1x128xf32> to vector<128xf32>
    %246 = vector.shape_cast %245 : vector<128xf32> to vector<1x1x128xf32>
    %247 = vector.broadcast %246 : vector<1x1x128xf32> to vector<4x16x128xf32>
    %248 = arith.mulf %243, %247 : vector<4x16x128xf32>
    %249 = arith.addf %242, %248 : vector<4x16x128xf32>
    %c12_202 = arith.constant 12 : index
    %c2_203 = arith.constant 2 : index
    %c0_204 = arith.constant 0 : index
    %250 = vector.load %arg10[%c12_202, %c2_203, %c0_204] : memref<18x18x128xf32, #tpu.memory_space<vmem>>, vector<4x16x128xf32>
    %c0_205 = arith.constant 0 : index
    %c2_206 = arith.constant 2 : index
    %c0_207 = arith.constant 0 : index
    %251 = vector.load %arg5[%c0_205, %c2_206, %c0_207] : memref<3x3x128xf32, #tpu.memory_space<vmem>>, vector<1x1x128xf32>
    %252 = vector.shape_cast %251 : vector<1x1x128xf32> to vector<128xf32>
    %253 = vector.shape_cast %252 : vector<128xf32> to vector<1x1x128xf32>
    %254 = vector.broadcast %253 : vector<1x1x128xf32> to vector<4x16x128xf32>
    %255 = arith.mulf %250, %254 : vector<4x16x128xf32>
    %256 = arith.addf %249, %255 : vector<4x16x128xf32>
    %c13 = arith.constant 13 : index
    %c0_208 = arith.constant 0 : index
    %c0_209 = arith.constant 0 : index
    %257 = vector.load %arg10[%c13, %c0_208, %c0_209] : memref<18x18x128xf32, #tpu.memory_space<vmem>>, vector<4x16x128xf32>
    %c1_210 = arith.constant 1 : index
    %c0_211 = arith.constant 0 : index
    %c0_212 = arith.constant 0 : index
    %258 = vector.load %arg5[%c1_210, %c0_211, %c0_212] : memref<3x3x128xf32, #tpu.memory_space<vmem>>, vector<1x1x128xf32>
    %259 = vector.shape_cast %258 : vector<1x1x128xf32> to vector<128xf32>
    %260 = vector.shape_cast %259 : vector<128xf32> to vector<1x1x128xf32>
    %261 = vector.broadcast %260 : vector<1x1x128xf32> to vector<4x16x128xf32>
    %262 = arith.mulf %257, %261 : vector<4x16x128xf32>
    %263 = arith.addf %256, %262 : vector<4x16x128xf32>
    %c13_213 = arith.constant 13 : index
    %c1_214 = arith.constant 1 : index
    %c0_215 = arith.constant 0 : index
    %264 = vector.load %arg10[%c13_213, %c1_214, %c0_215] : memref<18x18x128xf32, #tpu.memory_space<vmem>>, vector<4x16x128xf32>
    %c1_216 = arith.constant 1 : index
    %c1_217 = arith.constant 1 : index
    %c0_218 = arith.constant 0 : index
    %265 = vector.load %arg5[%c1_216, %c1_217, %c0_218] : memref<3x3x128xf32, #tpu.memory_space<vmem>>, vector<1x1x128xf32>
    %266 = vector.shape_cast %265 : vector<1x1x128xf32> to vector<128xf32>
    %267 = vector.shape_cast %266 : vector<128xf32> to vector<1x1x128xf32>
    %268 = vector.broadcast %267 : vector<1x1x128xf32> to vector<4x16x128xf32>
    %269 = arith.mulf %264, %268 : vector<4x16x128xf32>
    %270 = arith.addf %263, %269 : vector<4x16x128xf32>
    %c13_219 = arith.constant 13 : index
    %c2_220 = arith.constant 2 : index
    %c0_221 = arith.constant 0 : index
    %271 = vector.load %arg10[%c13_219, %c2_220, %c0_221] : memref<18x18x128xf32, #tpu.memory_space<vmem>>, vector<4x16x128xf32>
    %c1_222 = arith.constant 1 : index
    %c2_223 = arith.constant 2 : index
    %c0_224 = arith.constant 0 : index
    %272 = vector.load %arg5[%c1_222, %c2_223, %c0_224] : memref<3x3x128xf32, #tpu.memory_space<vmem>>, vector<1x1x128xf32>
    %273 = vector.shape_cast %272 : vector<1x1x128xf32> to vector<128xf32>
    %274 = vector.shape_cast %273 : vector<128xf32> to vector<1x1x128xf32>
    %275 = vector.broadcast %274 : vector<1x1x128xf32> to vector<4x16x128xf32>
    %276 = arith.mulf %271, %275 : vector<4x16x128xf32>
    %277 = arith.addf %270, %276 : vector<4x16x128xf32>
    %c14 = arith.constant 14 : index
    %c0_225 = arith.constant 0 : index
    %c0_226 = arith.constant 0 : index
    %278 = vector.load %arg10[%c14, %c0_225, %c0_226] : memref<18x18x128xf32, #tpu.memory_space<vmem>>, vector<4x16x128xf32>
    %c2_227 = arith.constant 2 : index
    %c0_228 = arith.constant 0 : index
    %c0_229 = arith.constant 0 : index
    %279 = vector.load %arg5[%c2_227, %c0_228, %c0_229] : memref<3x3x128xf32, #tpu.memory_space<vmem>>, vector<1x1x128xf32>
    %280 = vector.shape_cast %279 : vector<1x1x128xf32> to vector<128xf32>
    %281 = vector.shape_cast %280 : vector<128xf32> to vector<1x1x128xf32>
    %282 = vector.broadcast %281 : vector<1x1x128xf32> to vector<4x16x128xf32>
    %283 = arith.mulf %278, %282 : vector<4x16x128xf32>
    %284 = arith.addf %277, %283 : vector<4x16x128xf32>
    %c14_230 = arith.constant 14 : index
    %c1_231 = arith.constant 1 : index
    %c0_232 = arith.constant 0 : index
    %285 = vector.load %arg10[%c14_230, %c1_231, %c0_232] : memref<18x18x128xf32, #tpu.memory_space<vmem>>, vector<4x16x128xf32>
    %c2_233 = arith.constant 2 : index
    %c1_234 = arith.constant 1 : index
    %c0_235 = arith.constant 0 : index
    %286 = vector.load %arg5[%c2_233, %c1_234, %c0_235] : memref<3x3x128xf32, #tpu.memory_space<vmem>>, vector<1x1x128xf32>
    %287 = vector.shape_cast %286 : vector<1x1x128xf32> to vector<128xf32>
    %288 = vector.shape_cast %287 : vector<128xf32> to vector<1x1x128xf32>
    %289 = vector.broadcast %288 : vector<1x1x128xf32> to vector<4x16x128xf32>
    %290 = arith.mulf %285, %289 : vector<4x16x128xf32>
    %291 = arith.addf %284, %290 : vector<4x16x128xf32>
    %c14_236 = arith.constant 14 : index
    %c2_237 = arith.constant 2 : index
    %c0_238 = arith.constant 0 : index
    %292 = vector.load %arg10[%c14_236, %c2_237, %c0_238] : memref<18x18x128xf32, #tpu.memory_space<vmem>>, vector<4x16x128xf32>
    %c2_239 = arith.constant 2 : index
    %c2_240 = arith.constant 2 : index
    %c0_241 = arith.constant 0 : index
    %293 = vector.load %arg5[%c2_239, %c2_240, %c0_241] : memref<3x3x128xf32, #tpu.memory_space<vmem>>, vector<1x1x128xf32>
    %294 = vector.shape_cast %293 : vector<1x1x128xf32> to vector<128xf32>
    %295 = vector.shape_cast %294 : vector<128xf32> to vector<1x1x128xf32>
    %296 = vector.broadcast %295 : vector<1x1x128xf32> to vector<4x16x128xf32>
    %297 = arith.mulf %292, %296 : vector<4x16x128xf32>
    %298 = arith.addf %291, %297 : vector<4x16x128xf32>
    %cst_242 = arith.constant 0.000000e+00 : f32
    %cst_243 = arith.constant 6.000000e+00 : f32
    %299 = vector.broadcast %cst_242 : f32 to vector<4x16x128xf32>
    %300 = arith.maximumf %299, %298 : vector<4x16x128xf32>
    %301 = vector.broadcast %cst_243 : f32 to vector<4x16x128xf32>
    %302 = arith.minimumf %301, %300 : vector<4x16x128xf32>
    %c12_244 = arith.constant 12 : index
    %c0_245 = arith.constant 0 : index
    %c0_246 = arith.constant 0 : index
    %303 = vector.load %arg11[%c12_244, %c0_245, %c0_246] : memref<16x16x128xf32, #tpu.memory_space<vmem>>, vector<4x16x128xf32>
    tpu.vector_store %arg11[%c12_244, %c0_245, %c0_246], %302 {strides = array<i32>} : memref<16x16x128xf32, #tpu.memory_space<vmem>>, vector<4x16x128xf32>,
    %c0_247 = arith.constant 0 : index
    %c0_248 = arith.constant 0 : index
    %c0_249 = arith.constant 0 : index
    %304 = vector.load %arg11[%c0_247, %c0_248, %c0_249] : memref<16x16x128xf32, #tpu.memory_space<vmem>>, vector<16x16x128xf32>
    %305 = vector.shape_cast %304 : vector<16x16x128xf32> to vector<256x128xf32>
    %c0_250 = arith.constant 0 : index
    %c0_251 = arith.constant 0 : index
    %306 = vector.load %arg7[%c0_250, %c0_251] : memref<128x128xf32, #tpu.memory_space<vmem>>, vector<128x128xf32>
    %cst_252 = arith.constant dense<0.000000e+00> : vector<256x128xf32>
    %307 = tpu.matmul %305, %306, %cst_252 {dimension_numbers = #tpu.dot_dimension_numbers<[1], [0], [0], [1], [0, 0, 1, 1], [], []>} : vector<256x128xf32>, vector<128x128xf32>, vector<256x128xf32> -> vector<256x128xf32>
    %c0_253 = arith.constant 0 : index
    %c0_254 = arith.constant 0 : index
    %308 = vector.load %arg8[%c0_253, %c0_254] : memref<1x128xf32, #tpu.memory_space<vmem>>, vector<1x128xf32>
    %309 = vector.broadcast %308 : vector<1x128xf32> to vector<256x128xf32>
    %310 = arith.addf %307, %309 : vector<256x128xf32>
    %311 = vector.shape_cast %310 : vector<256x128xf32> to vector<16x16x128xf32>
    %c1_i32 = arith.constant 1 : i32
    %312 = arith.addi %1, %c1_i32 : i32
    %c0_255 = arith.constant 0 : index
    %313 = arith.index_cast %312 : i32 to index
    %c1_256 = arith.constant 1 : index
    %c0_257 = arith.constant 0 : index
    %314 = vector.load %arg2[%c0_255, %313, %c1_256, %c0_257] : memref<1x18x18x128xf32, #tpu.memory_space<vmem>>, vector<1x16x16x128xf32>
    %315 = vector.shape_cast %314 : vector<1x16x16x128xf32> to vector<16x16x128xf32>
    %316 = arith.addf %311, %315 : vector<16x16x128xf32>
    %c0_258 = arith.constant 0 : index
    %c0_259 = arith.constant 0 : index
    %c0_260 = arith.constant 0 : index
    %c0_261 = arith.constant 0 : index
    %317 = vector.load %arg9[%c0_258, %c0_259, %c0_260, %c0_261] : memref<1x16x16x128xf32, #tpu.memory_space<vmem>>, vector<1x16x16x128xf32>
    %318 = vector.shape_cast %317 : vector<1x16x16x128xf32> to vector<16x16x128xf32>
    %319 = vector.shape_cast %316 : vector<16x16x128xf32> to vector<1x16x16x128xf32>
    tpu.vector_store %arg9[%c0_258, %c0_259, %c0_260, %c0_261], %319 {strides = array<i32>} : memref<1x16x16x128xf32, #tpu.memory_space<vmem>>, vector<1x16x16x128xf32>,
    return
  }
  func.func @transform_0(%arg0: i32, %arg1: i32) -> (i32, i32, i32, i32) {
    %c0_i32 = arith.constant 0 : i32
    %c0_i32_0 = arith.constant 0 : i32
    %c0_i32_1 = arith.constant 0 : i32
    %c0_i32_2 = arith.constant 0 : i32
    return %arg0, %c0_i32, %c0_i32_0, %c0_i32_1 : i32, i32, i32, i32
  }
  func.func @transform_1(%arg0: i32, %arg1: i32) -> (i32, i32) {
    %c0_i32 = arith.constant 0 : i32
    %c0_i32_0 = arith.constant 0 : i32
    %c0_i32_1 = arith.constant 0 : i32
    return %c0_i32, %c0_i32_0 : i32, i32
  }
  func.func @transform_2(%arg0: i32, %arg1: i32) -> (i32, i32) {
    %c0_i32 = arith.constant 0 : i32
    %c0_i32_0 = arith.constant 0 : i32
    %c0_i32_1 = arith.constant 0 : i32
    return %c0_i32, %c0_i32_0 : i32, i32
  }
  func.func @transform_3(%arg0: i32, %arg1: i32) -> (i32, i32, i32) {
    %c0_i32 = arith.constant 0 : i32
    %c0_i32_0 = arith.constant 0 : i32
    %c0_i32_1 = arith.constant 0 : i32
    %c0_i32_2 = arith.constant 0 : i32
    return %c0_i32, %c0_i32_0, %c0_i32_1 : i32, i32, i32
  }
  func.func @transform_4(%arg0: i32, %arg1: i32) -> (i32, i32) {
    %c0_i32 = arith.constant 0 : i32
    %c0_i32_0 = arith.constant 0 : i32
    %c0_i32_1 = arith.constant 0 : i32
    return %c0_i32, %c0_i32_0 : i32, i32
  }
  func.func @transform_5(%arg0: i32, %arg1: i32) -> (i32, i32) {
    %c0_i32 = arith.constant 0 : i32
    %c0_i32_0 = arith.constant 0 : i32
    %c0_i32_1 = arith.constant 0 : i32
    return %c0_i32, %c0_i32_0 : i32, i32
  }
  func.func @transform_6(%arg0: i32, %arg1: i32) -> (i32, i32) {
    %c0_i32 = arith.constant 0 : i32
    %c0_i32_0 = arith.constant 0 : i32
    %c0_i32_1 = arith.constant 0 : i32
    return %c0_i32, %c0_i32_0 : i32, i32
  }
  func.func @transform_7(%arg0: i32, %arg1: i32) -> (i32, i32, i32, i32) {
    %c0_i32 = arith.constant 0 : i32
    %c0_i32_0 = arith.constant 0 : i32
    %c0_i32_1 = arith.constant 0 : i32
    return %arg0, %arg1, %c0_i32, %c0_i32_0 : i32, i32, i32, i32
  }
}

</mosaic_0001>

<bundles_post_ra>
// kernel: tpu_custom_call.1
= control target key start
LH: loop header
LB: loop body
LE: loop exit
PB: predicated region body
PF: predicated region fallthrough
CT: control target
= control target key end

     0   :  { %12 = vsyncpa [#allocation5], 0  ;;  %s3770_s0 = inlined_call_operand.vmem [shape: f32[2,18,18,128], index: 0, kind: input, shape index: {}]   ;;  %s3771_s1 = inlined_call_operand.vmem [shape: f32[128,128], index: 1, kind: input, shape index: {}]   ;;  %s3772_s2 = inlined_call_operand.vmem [shape: f32[1,128], index: 2, kind: input, shape index: {}]   ;;  %s3773_s3 = inlined_call_operand.vmem [shape: f32[3,3,128], index: 3, kind: input, shape index: {}]   ;;  %s3774_s4 = inlined_call_operand.vmem [shape: f32[1,128], index: 4, kind: input, shape index: {}]   ;;  %s3775_s5 = inlined_call_operand.vmem [shape: f32[128,128], index: 5, kind: input, shape index: {}]   ;;  %s3776_s6 = inlined_call_operand.vmem [shape: f32[1,128], index: 6, kind: input, shape index: {}]   ;;  %s3777_s7 = inlined_call_operand.hbm [shape: f32[2,16,16,128], index: 7, kind: output, shape index: {}]  }
   0x1   :  { %14 = vsyncpa [#allocation5 + $0x1], 0  ;;  %s2379_s24 = smov 0   ;;  %s2381_s25 = smov 0  }
   0x2   :  { %s2383_s26 = smov 0   ;;  %s2385_s27 = smov 0  }
   0x3   :  { %s2387_s28 = smov 0   ;;  %s2389_s29 = smov 0  }
   0x4 LB: > { %s2045_s30 = sadd.s32 4294967295, %s2334_s29   ;;  %s2046_s8 = sadd.s32 4294967294, %s2334_s29   ;;  %s2334_s29 = sphi %s2389_s29, %s20_s29   ;;  %s2330_s28 = sphi %s2387_s28, %s3864_s28   ;;  %s2326_s27 = sphi %s2385_s27, %s3863_s27   ;;  %s2322_s26 = sphi %s2383_s26, %s3862_s26   ;;  %s2318_s25 = sphi %s2381_s25, %s3861_s25   ;;  %s2314_s24 = sphi %s2379_s24, %s3860_s24  }
   0x5   : > { %s32_s9 = sadd.s32 1, %s2330_s28  ;;  %s193_s10 = sadd.s32 1, %s2322_s26 }
   0x6   : > { %p34_p0 = scmp.ge.s32.totalorder %s32_s9, 2  ;;  %p203_p1 = scmp.ne.s32.totalorder %s2322_s26, %s2318_s25 }
   0x7   : > { %p204_p2 = scmp.eq.s32.totalorder %s2045_s30, 1  ;;  %p209_p3 = scmp.ne.s32.totalorder %s2318_s25, %s2314_s24 }
   0x8   : > { %s3866_s9 = smov (%p34_p0, %s32_s9), 0  ;;  %p210_p5 = scmp.eq.s32.totalorder %s2046_s8, 1 }
   0x9   : > { %p2419_p4 = por %p204_p2, %p203_p1  ;;  %s188_s12 = ssub.s32 %s2330_s28, %s3866_s9 }
   0xa   : > { %p2049_p6 = scmp.ge.s32.totalorder %s2334_s29, 1  ;;  %p191_p7 = scmp.eq.s32.totalorder %s188_s12, 0 }
   0xb   : > { %p2426_p8 = por %p210_p5, %p209_p3  ;;  %p254_p9 = scmp.lt.s32.totalorder %s2334_s29, 3 }
   0xc   : > { %s2432_s14 = scalar_select %p191_p7, %s2322_s26, %s193_s10  }
   0xd   : > { %p255_p10 = pnand %p2049_p6, %p254_p9 }
   0xf   : > { %258 = sbr.rel (%p255_p10) target bundleno = 543 (0x21f), region = 48 }
  0x14   : > { %v346_v0 = vld [vmem:[%s3771_s1 + $0x78] sm:$0xff]  ;;  %v345_v1 = vld [vmem:[%s3771_s1 + $0x70] sm:$0xff]  ;;  %v344_v2 = vld [vmem:[%s3771_s1 + $0x68] sm:$0xff]  ;;  %p286_p11 = scmp.lt.s32.totalorder %s2326_s27, 1  ;;  %v2336_v44 = vmov 0.0   ;;  %s283_s17 = sand.u32 1, %s2318_s25  }
  0x15   : > { %351 = vmatpush.msra.mxu0 %v346_v0  ;;  %2114 = vmatpush.msra.mxu2 %v346_v0  ;;  %v343_v3 = vld [vmem:[%s3771_s1 + $0x60] sm:$0xff]  ;;  %v342_v4 = vld [vmem:[%s3771_s1 + $0x58] sm:$0xff]  ;;  %v341_v5 = vld [vmem:[%s3771_s1 + $0x50] sm:$0xff]  ;;  %584 = vst [vmem:[#allocation2] sm:$0x1] %v2336_v44  ;;  %s3562_s20 = sshll.u32 %s283_s17, 8 }
  0x16   : > { %v340_v6 = vld [vmem:[%s3771_s1 + $0x48] sm:$0xff]  ;;  %v339_v7 = vld [vmem:[%s3771_s1 + $0x40] sm:$0xff]  ;;  %v338_v8 = vld [vmem:[%s3771_s1 + $0x38] sm:$0xff]  ;;  %s287_s30 = scalar_select %p286_p11, %s2326_s27, 1  ;;  %585 = vst [vmem:[#allocation2 + $0x18] sm:$0x1] %v2336_v44 }
  0x17   : > { %352 = vmatpush.msra.mxu0 %v345_v1  ;;  %2115 = vmatpush.msra.mxu2 %v345_v1  ;;  %v337_v9 = vld [vmem:[%s3771_s1 + $0x30] sm:$0xff]  ;;  %v336_v10 = vld [vmem:[%s3771_s1 + $0x28] sm:$0xff]  ;;  %v335_v11 = vld [vmem:[%s3771_s1 + $0x20] sm:$0xff]  ;;  %586 = vst [vmem:[#allocation2 + $0x30] sm:$0x1] %v2336_v44  ;;  %s3594_s15 = scalar_lea.vmem [#allocation4], %s3562_s20 }
  0x18   : > { %v334_v12 = vld [vmem:[%s3771_s1 + $0x18] sm:$0xff]  ;;  %s2146_s16 = smul.u32 432, %s287_s30  ;;  %v333_v13 = vld [vmem:[%s3771_s1 + $0x10] sm:$0xff]  ;;  %v332_v14 = vld [vmem:[%s3771_s1 + $0x8] sm:$0xff]  ;;  %587 = vst [vmem:[#allocation2 + $0x48] sm:$0x1] %v2336_v44 }
  0x19   : > { %353 = vmatpush.msra.mxu0 %v344_v2  ;;  %2116 = vmatpush.msra.mxu2 %v344_v2  ;;  %v331_v15 = vld [vmem:[%s3771_s1] sm:$0xff]  ;;  %588 = vst [vmem:[#allocation2 + $0x60] sm:$0x1] %v2336_v44  ;;  %v1730_v52 = vld [vmem:[%s3775_s5 + $0x78] sm:$0xff]  ;;  %v1729_v54 = vld [vmem:[%s3775_s5 + $0x70] sm:$0xff]  ;;  %s2113_s19 = sshll.u32 %s2326_s27, 8 }
  0x1a   : > { %s2484_s23 = scalar_lea.vmem %s3770_s0, %s2146_s16  ;;  %589 = vst [vmem:[#allocation2 + $0x78] sm:$0x1] %v2336_v44  ;;  %v2544_v49 = vld [vmem:[%s3772_s2] ss:$0 sm:$0xff]  ;;  %1735 = vmatpush.msra.mxu1 %v1730_v52  ;;  %2130 = vmatpush.msra.mxu3 %v1730_v52  ;;  %v1728_v56 = vld [vmem:[%s3775_s5 + $0x68] sm:$0xff]  ;;  %v1726_v63 = vld [vmem:[%s3775_s5 + $0x58] sm:$0xff]  ;;  %s1962_s22 = scalar_lea.hbm %s3777_s7, %s2113_s19 }
  0x1b   : > { %354 = vmatpush.msra.mxu0 %v343_v3  ;;  %2117 = vmatpush.msra.mxu2 %v343_v3  ;;  %v295_v16 = vld [vmem:[%s2484_s23 + $0x1] sm:$0xff]  ;;  %v296_v18 = vld [vmem:[%s2484_s23 + $0x9] sm:$0xff]  ;;  %v297_v20 = vld [vmem:[%s2484_s23 + $0x19] sm:$0xff]  ;;  %590 = vst [vmem:[#allocation2 + $0x90] sm:$0x1] %v2336_v44  ;;  %s1963_s30 = sshll.u32 %s3594_s15, 4  ;;  %s1964_s30 = int_to_ptr.vmem [resolvable:$true] %s1963_s30 }
  0x1c   : > { %v311_v17 = vld [vmem:[%s2484_s23 + $0xc1] sm:$0xff]  ;;  %v312_v19 = vld [vmem:[%s2484_s23 + $0xc9] sm:$0xff]  ;;  %v313_v21 = vld [vmem:[%s2484_s23 + $0xd9] sm:$0xff]  ;;  %591 = vst [vmem:[#allocation2 + $0xa8] sm:$0x1] %v2336_v44  ;;  %1736 = vmatpush.msra.mxu1 %v1729_v54  ;;  %2131 = vmatpush.msra.mxu3 %v1729_v54  ;;  %s1965_s8 = sshll.u32 %s1962_s22, 4  ;;  %s1966_s8 = int_to_ptr.hbm [resolvable:$true] %s1965_s8 }
  0x1d   : > { %355 = vmatpush.msra.mxu0 %v342_v4  ;;  %2118 = vmatpush.msra.mxu2 %v342_v4  ;;  %v298_v22 = vld [vmem:[%s2484_s23 + $0x21] sm:$0xff]  ;;  %v299_v24 = vld [vmem:[%s2484_s23 + $0x31] sm:$0xff]  ;;  %v300_v26 = vld [vmem:[%s2484_s23 + $0x39] sm:$0xff]  ;;  %592 = vst [vmem:[#allocation2 + $0xc0] sm:$0x1] %v2336_v44  ;;  %s1948_s10 = scalar_lea.sflag [#allocation5], %s283_s17 }
  0x1e   : > { %v314_v23 = vld [vmem:[%s2484_s23 + $0xe1] sm:$0xff]  ;;  %v315_v25 = vld [vmem:[%s2484_s23 + $0xf1] sm:$0xff]  ;;  %v316_v27 = vld [vmem:[%s2484_s23 + $0xf9] sm:$0xff]  ;;  %593 = vst [vmem:[#allocation2 + $0xd8] sm:$0x1] %v2336_v44  ;;  %1737 = vmatpush.msra.mxu1 %v1728_v56  ;;  %2132 = vmatpush.msra.mxu3 %v1728_v56  ;;  %s2270_s27 = sshra.s32 %s1966_s8, 4  ;;  %s2271_s27 = int_to_ptr.hbm [resolvable:$true] %s2270_s27 }
  0x1f   : > { %356 = vmatpush.msra.mxu0 %v341_v5  ;;  %2119 = vmatpush.msra.mxu2 %v341_v5  ;;  %v301_v28 = vld [vmem:[%s2484_s23 + $0x49] sm:$0xff]  ;;  %v302_v30 = vld [vmem:[%s2484_s23 + $0x51] sm:$0xff]  ;;  %v303_v32 = vld [vmem:[%s2484_s23 + $0x61] sm:$0xff]  ;;  %594 = vst [vmem:[#allocation2 + $0xf0] sm:$0x1] %v2336_v44  ;;  %s2272_s12 = scalar_lea.hbm %s2271_s27, 256  ;;  %p2277_p1 = scmp.lt.s32.totalorder %s2271_s27, %s3777_s7 }
  0x20   : > { %v317_v29 = vld [vmem:[%s2484_s23 + $0x109] sm:$0xff]  ;;  %v318_v31 = vld [vmem:[%s2484_s23 + $0x111] sm:$0xff]  ;;  %v319_v33 = vld [vmem:[%s2484_s23 + $0x121] sm:$0xff]  ;;  %595 = vst [vmem:[#allocation2 + $0x108] sm:$0x1] %v2336_v44  ;;  %p2273_p12 = scmp.ne.s32.totalorder %s2271_s27, %s2272_s12  ;;  %s2276_s19 = scalar_lea.hbm %s3777_s7, 512 }
  0x21   : > { %357 = vmatpush.msra.mxu0 %v340_v6  ;;  %2120 = vmatpush.msra.mxu2 %v340_v6  ;;  %v304_v34 = vld [vmem:[%s2484_s23 + $0x69] sm:$0xff]  ;;  %v305_v36 = vld [vmem:[%s2484_s23 + $0x79] sm:$0xff]  ;;  %v306_v38 = vld [vmem:[%s2484_s23 + $0x81] sm:$0xff]  ;;  %596 = vst [vmem:[#allocation2 + $0x120] sm:$0x1] %v2336_v44  ;;  %p2278_p2 = scmp.lt.s32.totalorder %s2276_s19, %s2272_s12 }
  0x22   : > { %v320_v35 = vld [vmem:[%s2484_s23 + $0x129] sm:$0xff]  ;;  %v321_v37 = vld [vmem:[%s2484_s23 + $0x139] sm:$0xff]  ;;  %v322_v39 = vld [vmem:[%s2484_s23 + $0x141] sm:$0xff]  ;;  %597 = vst [vmem:[#allocation2 + $0x138] sm:$0x1] %v2336_v44  ;;  %p2274_p13 = pnand %p2273_p12, %p2419_p4 }
  0x23   : > { %358 = vmatpush.msra.mxu0 %v339_v7  ;;  %2121 = vmatpush.msra.mxu2 %v339_v7  ;;  %v307_v40 = vld [vmem:[%s2484_s23 + $0x91] sm:$0xff]  ;;  %v308_v42 = vld [vmem:[%s2484_s23 + $0x99] sm:$0xff]  ;;  %v309_v45 = vld [vmem:[%s2484_s23 + $0xa9] sm:$0xff]  ;;  %598 = vst [vmem:[#allocation2 + $0x150] sm:$0x1] %v2336_v44  ;;  %p2279_p3 = por %p2278_p2, %p2277_p1 }
  0x24   : > { %v323_v41 = vld [vmem:[%s2484_s23 + $0x151] sm:$0xff]  ;;  %v324_v43 = vld [vmem:[%s2484_s23 + $0x159] sm:$0xff]  ;;  %v325_v46 = vld [vmem:[%s2484_s23 + $0x169] sm:$0xff]  ;;  %599 = vst [vmem:[#allocation2 + $0x168] sm:$0x1] %v2336_v44  ;;  %p2275_p0 = pneg %p2274_p13 }
  0x25   : > { %359 = vmatpush.msra.mxu0 %v338_v8  ;;  %2122 = vmatpush.msra.mxu2 %v338_v8  ;;  %v310_v47 = vld [vmem:[%s2484_s23 + $0xb1] sm:$0xff]  ;;  %600 = vst [vmem:[#allocation2 + $0x180] sm:$0x1] %v2336_v44  ;;  %v327_v51 = vld [vmem:[%s2484_s23 + $0x181] sm:$0xff]  ;;  %v328_v62 = vld [vmem:[%s2484_s23 + $0x189] sm:$0xff] }
  0x26   : > { %v326_v48 = vld [vmem:[%s2484_s23 + $0x171] sm:$0xff]  ;;  %602 = vst [vmem:[#allocation2 + $0x11] sm:$0x1] %v2336_v44  ;;  %v1727_v59 = vld [vmem:[%s3775_s5 + $0x60] sm:$0xff]  ;;  %v1724_v5 = vld [vmem:[%s3775_s5 + $0x48] sm:$0xff]  ;;  %p2280_p5 = pnand %p2279_p3, %p2275_p0 }
  0x27   : > { %360 = vmatpush.msra.mxu0 %v337_v9  ;;  %2123 = vmatpush.msra.mxu2 %v337_v9  ;;  %603 = vst [vmem:[#allocation2 + $0x29] sm:$0x1] %v2336_v44  ;;  %v1725_v2 = vld [vmem:[%s3775_s5 + $0x50] sm:$0xff]  ;;  %v1723_v8 = vld [vmem:[%s3775_s5 + $0x40] sm:$0xff] }
  0x28   : > { %604 = vst [vmem:[#allocation2 + $0x41] sm:$0x1] %v2336_v44  ;;  %1738 = vmatpush.msra.mxu1 %v1727_v59  ;;  %2133 = vmatpush.msra.mxu3 %v1727_v59  ;;  %v2594_v9 = vld [vmem:[%s3773_s3] ss:$0 sm:$0xff] }
  0x29   : > { %361 = vmatpush.msra.mxu0 %v336_v10  ;;  %2124 = vmatpush.msra.mxu2 %v336_v10  ;;  %605 = vst [vmem:[#allocation2 + $0x59] sm:$0x1] %v2336_v44 }
  0x2a   : > { %606 = vst [vmem:[#allocation2 + $0x71] sm:$0x1] %v2336_v44  ;;  %1739 = vmatpush.msra.mxu1 %v1726_v63  ;;  %2134 = vmatpush.msra.mxu3 %v1726_v63 }
  0x2b   : > { %362 = vmatpush.msra.mxu0 %v335_v11  ;;  %2125 = vmatpush.msra.mxu2 %v335_v11  ;;  %607 = vst [vmem:[#allocation2 + $0x89] sm:$0x1] %v2336_v44 }
  0x2c   : > { %608 = vst [vmem:[#allocation2 + $0xa1] sm:$0x1] %v2336_v44  ;;  %1740 = vmatpush.msra.mxu1 %v1725_v2  ;;  %2135 = vmatpush.msra.mxu3 %v1725_v2 }
  0x2d   : > { %363 = vmatpush.msra.mxu0 %v334_v12  ;;  %2126 = vmatpush.msra.mxu2 %v334_v12  ;;  %609 = vst [vmem:[#allocation2 + $0xb9] sm:$0x1] %v2336_v44  ;;  %v329_v12 = vld [vmem:[%s2484_s23 + $0x199] sm:$0xff] }
  0x2e   : > { %610 = vst [vmem:[#allocation2 + $0xd1] sm:$0x1] %v2336_v44  ;;  %1741 = vmatpush.msra.mxu1 %v1724_v5  ;;  %2136 = vmatpush.msra.mxu3 %v1724_v5 }
  0x2f   : > { %364 = vmatpush.msra.mxu0 %v333_v13  ;;  %2127 = vmatpush.msra.mxu2 %v333_v13  ;;  %611 = vst [vmem:[#allocation2 + $0xe9] sm:$0x1] %v2336_v44  ;;  %v1722_v13 = vld [vmem:[%s3775_s5 + $0x38] sm:$0xff] }
  0x30   : > { %612 = vst [vmem:[#allocation2 + $0x101] sm:$0x1] %v2336_v44  ;;  %1742 = vmatpush.msra.mxu1 %v1723_v8  ;;  %2137 = vmatpush.msra.mxu3 %v1723_v8 }
  0x31   : > { %365 = vmatpush.msra.mxu0 %v332_v14  ;;  %2128 = vmatpush.msra.mxu2 %v332_v14  ;;  %613 = vst [vmem:[#allocation2 + $0x119] sm:$0x1] %v2336_v44 }
  0x32   : > { %614 = vst [vmem:[#allocation2 + $0x131] sm:$0x1] %v2336_v44  ;;  %1743 = vmatpush.msra.mxu1 %v1722_v13  ;;  %2138 = vmatpush.msra.mxu3 %v1722_v13  ;;  %v2698_v13 = vld [vmem:[%s3773_s3 + $0x5] ss:$0 sm:$0xff] }
  0x33   : > { %366 = vmatpush.msra.mxu0 %v331_v15  ;;  %2129 = vmatpush.msra.mxu2 %v331_v15  ;;  %615 = vst [vmem:[#allocation2 + $0x149] sm:$0x1] %v2336_v44 }
  0x34   : > { %367 = vmatmul.f32.vlgmr.msra.gmra.mxu0 %v295_v16  ;;  %415 = vmatmul.f32.vlgmr.msra.gmra.mxu2 %v311_v17  ;;  %616 = vst [vmem:[#allocation2 + $0x161] sm:$0x1] %v2336_v44  ;;  %v1721_v16 = vld [vmem:[%s3775_s5 + $0x30] sm:$0xff]  ;;  %v642_v17 = vmul.f32 0.0, %v2594_v9 }
  0x35   : > { %617 = vst [vmem:[#allocation2 + $0x179] sm:$0x1] %v2336_v44  ;;  %1744 = vmatpush.msra.mxu1 %v1721_v16  ;;  %2139 = vmatpush.msra.mxu3 %v1721_v16 }
  0x36   : > { %618 = vst [vmem:[#allocation2 + $0x191] sm:$0x1] %v2336_v44 }
  0x37   : > { %619 = vst [vmem:[#allocation2 + $0x1a9] sm:$0x1] %v2336_v44 }
  0x3c   : > { %370 = vmatmul.f32.gmra.mxu0 %v296_v18  ;;  %418 = vmatmul.f32.gmra.mxu2 %v312_v19 }
  0x44   : > { %373 = vmatmul.f32.gmra.mxu0 %v297_v20  ;;  %421 = vmatmul.f32.gmra.mxu2 %v313_v21  ;;  %v1720_v20 = vld [vmem:[%s3775_s5 + $0x28] sm:$0xff]  ;;  %v2616_v21 = vld [vmem:[%s3774_s4] ss:$0 sm:$0xff] }
  0x45   : > { %1745 = vmatpush.msra.mxu1 %v1720_v20  ;;  %2140 = vmatpush.msra.mxu3 %v1720_v20 }
  0x4c   : > { %376 = vmatmul.f32.gmra.mxu0 %v298_v22  ;;  %424 = vmatmul.f32.gmra.mxu2 %v314_v23  ;;  %v2621_v22 = vld [vmem:[%s3773_s3 + $0x1] ss:$0 sm:$0xff] }
  0x4d   : > { %3814 = vst [vmem:[#allocation7_spill] sm:$0xff] %v2621_v22 }
  0x54   : > { %379 = vmatmul.f32.gmra.mxu0 %v299_v24  ;;  %427 = vmatmul.f32.gmra.mxu2 %v315_v25  ;;  %v1719_v25 = vld [vmem:[%s3775_s5 + $0x20] sm:$0xff] }
  0x55   : > { %1746 = vmatpush.msra.mxu1 %v1719_v25  ;;  %2141 = vmatpush.msra.mxu3 %v1719_v25 }
  0x5c   : > { %382 = vmatmul.f32.gmra.mxu0 %v300_v26  ;;  %430 = vmatmul.f32.gmra.mxu2 %v316_v27  ;;  %v653_v26 = vadd.f32 %v2616_v21, %v642_v17  ;;  %v2633_v27 = vld [vmem:[%s3773_s3 + $0x2] ss:$0 sm:$0xff] }
  0x64   : > { %385 = vmatmul.f32.gmra.mxu0 %v301_v28  ;;  %433 = vmatmul.f32.gmra.mxu2 %v317_v29 }
  0x6c   : > { %388 = vmatmul.f32.gmra.mxu0 %v302_v30  ;;  %436 = vmatmul.f32.gmra.mxu2 %v318_v31 }
  0x74   : > { %391 = vmatmul.f32.gmra.mxu0 %v303_v32  ;;  %439 = vmatmul.f32.gmra.mxu2 %v319_v33  ;;  %v330_v32 = vld [vmem:[%s2484_s23 + $0x1a1] sm:$0xff]  ;;  %v1718_v33 = vld [vmem:[%s3775_s5 + $0x18] sm:$0xff] }
  0x75   : > { %1747 = vmatpush.msra.mxu1 %v1718_v33  ;;  %2142 = vmatpush.msra.mxu3 %v1718_v33 }
  0x7c   : > { %394 = vmatmul.f32.gmra.mxu0 %v304_v34  ;;  %442 = vmatmul.f32.gmra.mxu2 %v320_v35 }
  0x84   : > { %397 = vmatmul.f32.gmra.mxu0 %v305_v36  ;;  %445 = vmatmul.f32.gmra.mxu2 %v321_v37  ;;  %v1717_v37 = vld [vmem:[%s3775_s5 + $0x10] sm:$0xff] }
  0x85   : > { %1748 = vmatpush.msra.mxu1 %v1717_v37  ;;  %2143 = vmatpush.msra.mxu3 %v1717_v37 }
  0x8c   : > { %400 = vmatmul.f32.gmra.mxu0 %v306_v38  ;;  %448 = vmatmul.f32.gmra.mxu2 %v322_v39 }
  0x94   : > { %403 = vmatmul.f32.gmra.mxu0 %v307_v40  ;;  %451 = vmatmul.f32.gmra.mxu2 %v323_v41 }
  0x9c   : > { %406 = vmatmul.f32.gmra.mxu0 %v308_v42  ;;  %454 = vmatmul.f32.gmra.mxu2 %v324_v43  ;;  %v2650_v43 = vld [vmem:[%s3773_s3 + $0x4] ss:$0 sm:$0xff] }
  0xa4   : > { %409 = vmatmul.f32.gmra.mxu0 %v309_v45  ;;  %457 = vmatmul.f32.gmra.mxu2 %v325_v46  ;;  %v1716_v45 = vld [vmem:[%s3775_s5 + $0x8] sm:$0xff] }
  0xa5   : > { %1749 = vmatpush.msra.mxu1 %v1716_v45  ;;  %2144 = vmatpush.msra.mxu3 %v1716_v45 }
  0xac   : > { %412 = vmatmul.f32.gmra.mxu0 %v310_v47  ;;  %460 = vmatmul.f32.gmra.mxu2 %v326_v48  ;;  %v2663_v47 = vld [vmem:[%s3773_s3 + $0x1] ss:$0 sm:$0xff] }
  0xb1   : > { %v368_v50 = vpop.f32.mrf.mxu0 }
  0xb2   : > { %v369_v53 = vadd.f32 %v2544_v49, %v368_v50 }
  0xb4   : > { %v476_v55 = vmax.f32 %v369_v53, 0.0  ;;  %463 = vmatmul.f32.gmra.mxu2 %v327_v51  ;;  %v1715_v53 = vld [vmem:[%s3775_s5] sm:$0xff] }
  0xb5   : > { %1750 = vmatpush.msra.mxu1 %v1715_v53  ;;  %2145 = vmatpush.msra.mxu3 %v1715_v53 }
  0xb6   : > { %v512_v57 = vmin.f32 %v476_v55, 6.0 }
  0xb7   : > { %v416_v58 = vpop.f32.mrf.mxu2 }
  0xb8   : > { %548 = vst [vmem:[#allocation2 + $0x1] sm:$0xff] %v512_v57  ;;  %v417_v60 = vadd.f32 %v2544_v49, %v416_v58 }
  0xb9   : > { %624 = vst [vmem:[#allocation2] sm:$0xff] %v2336_v44  ;;  %v371_v61 = vpop.f32.mrf.mxu0 }
  0xba   : > { %v492_v0 = vmax.f32 %v417_v60, 0.0  ;;  %v372_v1 = vadd.f32 %v2544_v49, %v371_v61  ;;  %v2675_v60 = vld [vmem:[%s3773_s3 + $0x5] ss:$0 sm:$0xff] }
  0xbc   : > { %v528_v3 = vmin.f32 %v492_v0, 6.0  ;;  %v477_v4 = vmax.f32 %v372_v1, 0.0  ;;  %466 = vmatmul.f32.gmra.mxu2 %v328_v62 }
  0xbe   : > { %v513_v6 = vmin.f32 %v477_v4, 6.0  ;;  %564 = vst [vmem:[#allocation2 + $0xc1] sm:$0xff] %v528_v3  ;;  %v2686_v4 = vld [vmem:[%s3773_s3 + $0x2] ss:$0 sm:$0xff] }
  0xbf   : > { %v419_v7 = vpop.f32.mrf.mxu2 }
  0xc0   : > { %549 = vst [vmem:[#allocation2 + $0x9] sm:$0xff] %v513_v6  ;;  %v420_v10 = vadd.f32 %v2544_v49, %v419_v7 }
  0xc1   : > { %625 = vst [vmem:[#allocation2 + $0x8] sm:$0xff] %v2336_v44  ;;  %v374_v11 = vpop.f32.mrf.mxu0 }
  0xc2   : > { %626 = vst [vmem:[#allocation2 + $0x10] sm:$0x3] %v2336_v44  ;;  %v493_v14 = vmax.f32 %v420_v10, 0.0  ;;  %v375_v15 = vadd.f32 %v2544_v49, %v374_v11  ;;  %v2655_v44 = vld [vmem:[%s3773_s3] ss:$0 sm:$0xff] }
  0xc3   : > { %v2691_v10 = vld [vmem:[%s3773_s3 + $0x6] ss:$0 sm:$0xff] }
  0xc4   : > { %v2608_v18 = vmin.f32 %v493_v14, 6.0  ;;  %v478_v19 = vmax.f32 %v375_v15, 0.0  ;;  %469 = vmatmul.f32.gmra.mxu2 %v329_v12 }
  0xc6   : > { %565 = vst [vmem:[#allocation2 + $0xc9] sm:$0xff] %v2608_v18  ;;  %v2624_v23 = vmin.f32 %v478_v19, 6.0  ;;  %v1197_v62 = vmul.f32 %v2663_v47, %v2608_v18  ;;  %v2706_v18 = vld [vmem:[%s3773_s3 + $0x9] ss:$0 sm:$0xff] }
  0xc7   : > { %v422_v24 = vpop.f32.mrf.mxu2 }
  0xc8   : > { %550 = vst [vmem:[#allocation2 + $0x19] sm:$0xff] %v2624_v23  ;;  %v423_v28 = vadd.f32 %v2544_v49, %v422_v24  ;;  %v661_v29 = vld [vmem:[#allocation2 + $0x1] sm:$0xff]  ;;  %v751_v12 = vmul.f32 %v2675_v60, %v2624_v23  ;;  %v673_v15 = vmul.f32 %v2621_v22, %v2624_v23 }
  0xc9   : > { %v687_v30 = vld [vmem:[#allocation2 + $0x2] sm:$0xff]  ;;  %v377_v31 = vpop.f32.mrf.mxu0  ;;  %v671_v34 = vmul.f32 %v2621_v22, %v661_v29  ;;  %v688_v56 = vld [vmem:[#allocation2 + $0xa] sm:$0xff] }
  0xca   : > { %v494_v35 = vmax.f32 %v423_v28, 0.0  ;;  %v378_v36 = vadd.f32 %v2544_v49, %v377_v31  ;;  %v697_v39 = vmul.f32 %v2633_v27, %v687_v30  ;;  %v662_v40 = vld [vmem:[#allocation2 + $0x9] sm:$0xff]  ;;  %v698_v3 = vmul.f32 %v2633_v27, %v688_v56 }
  0xcb   : > { %v679_v38 = vadd.f32 %v671_v34, %v653_v26  ;;  %v672_v50 = vmul.f32 %v2621_v22, %v662_v40 }
  0xcc   : > { %v530_v41 = vmin.f32 %v494_v35, 6.0  ;;  %v479_v42 = vmax.f32 %v378_v36, 0.0  ;;  %472 = vmatmul.f32.gmra.mxu2 %v330_v32 }
  0xcd   : > { %v1161_v46 = vld [vmem:[#allocation2 + $0xc8] sm:$0xff]  ;;  %v705_v54 = vadd.f32 %v697_v39, %v679_v38  ;;  %v680_v2 = vadd.f32 %v672_v50, %v653_v26 }
  0xce   : > { %566 = vst [vmem:[#allocation2 + $0xd9] sm:$0xff] %v530_v41  ;;  %v515_v48 = vmin.f32 %v479_v42, 6.0  ;;  %v1171_v51 = vmul.f32 %v2655_v44, %v1161_v46  ;;  %v1213_v6 = vld [vmem:[#allocation2 + $0xca] sm:$0xff]  ;;  %v1198_v31 = vmul.f32 %v2663_v47, %v530_v41 }
  0xcf   : > { %v425_v52 = vpop.f32.mrf.mxu2  ;;  %v714_v55 = vld [vmem:[#allocation2 + $0x18] sm:$0xff]  ;;  %v706_v19 = vadd.f32 %v698_v3, %v680_v2  ;;  %v1223_v20 = vmul.f32 %v2686_v4, %v1213_v6 }
  0xd0   : > { %551 = vst [vmem:[#allocation2 + $0x21] sm:$0xff] %v515_v48  ;;  %v426_v57 = vadd.f32 %v2544_v49, %v425_v52  ;;  %v725_v58 = vmul.f32 %v2650_v43, %v714_v55  ;;  %v1179_v61 = vadd.f32 %v2616_v21, %v1171_v51  ;;  %v644_v63 = vmul.f32 %v2594_v9, %v714_v55  ;;  %v2725_v51 = vld [vmem:[%s3773_s3 + $0x6] ss:$0 sm:$0xff] }
  0xd1   : > { %v380_v59 = vpop.f32.mrf.mxu0  ;;  %v752_v30 = vmul.f32 %v2675_v60, %v515_v48  ;;  %v674_v32 = vmul.f32 %v2621_v22, %v515_v48 }
  0xd2   : > { %v495_v0 = vmax.f32 %v426_v57, 0.0  ;;  %v381_v1 = vadd.f32 %v2544_v49, %v380_v59  ;;  %v733_v5 = vadd.f32 %v725_v58, %v705_v54  ;;  %v1205_v11 = vadd.f32 %v1197_v62, %v1179_v61  ;;  %v2733_v58 = vld [vmem:[%s3773_s3 + $0x8] ss:$0 sm:$0xff]  ;;  %v2738_v61 = vld [vmem:[%s3773_s3 + $0x4] ss:$0 sm:$0xff] }
  0xd3   : > { %v655_v14 = vadd.f32 %v2616_v21, %v644_v63 }
  0xd4   : > { %v531_v7 = vmin.f32 %v495_v0, 6.0  ;;  %v480_v8 = vmax.f32 %v381_v1, 0.0  ;;  %v759_v26 = vadd.f32 %v751_v12, %v733_v5  ;;  %v1231_v36 = vadd.f32 %v1223_v20, %v1205_v11 }
  0xd5   : > { %v1162_v16 = vld [vmem:[#allocation2 + $0xd8] sm:$0xff]  ;;  %v681_v39 = vadd.f32 %v673_v15, %v655_v14 }
  0xd6   : > { %567 = vst [vmem:[#allocation2 + $0xe1] sm:$0xff] %v531_v7  ;;  %v516_v17 = vmin.f32 %v480_v8, 6.0  ;;  %v1172_v24 = vmul.f32 %v2655_v44, %v1162_v16  ;;  %v1276_v38 = vmul.f32 %v2698_v13, %v531_v7  ;;  %v1199_v54 = vmul.f32 %v2663_v47, %v531_v7 }
  0xd7   : > { %v428_v25 = vpop.f32.mrf.mxu2  ;;  %v767_v28 = vld [vmem:[#allocation2 + $0x1a] sm:$0xff]  ;;  %v768_v23 = vld [vmem:[#allocation2 + $0x22] sm:$0xff] }
  0xd8   : > { %v715_v29 = vld [vmem:[#allocation2 + $0x20] sm:$0xff]  ;;  %552 = vst [vmem:[#allocation2 + $0x31] sm:$0xff] %v516_v17  ;;  %v429_v33 = vadd.f32 %v2544_v49, %v428_v25  ;;  %v777_v34 = vmul.f32 %v2691_v10, %v767_v28  ;;  %v699_v40 = vmul.f32 %v2633_v27, %v767_v28  ;;  %v1180_v42 = vadd.f32 %v2616_v21, %v1172_v24 }
  0xd9   : > { %v726_v35 = vmul.f32 %v2650_v43, %v715_v29  ;;  %v383_v37 = vpop.f32.mrf.mxu0  ;;  %v778_v48 = vmul.f32 %v2691_v10, %v768_v23  ;;  %v831_v50 = vmul.f32 %v2706_v18, %v516_v17  ;;  %v753_v52 = vmul.f32 %v2675_v60, %v516_v17 }
  0xda   : > { %v496_v45 = vmax.f32 %v429_v33, 0.0  ;;  %v384_v41 = vadd.f32 %v2544_v49, %v383_v37  ;;  %v645_v53 = vmul.f32 %v2594_v9, %v715_v29  ;;  %v785_v57 = vadd.f32 %v777_v34, %v759_v26  ;;  %v2758_v37 = vld [vmem:[%s3773_s3 + $0x9] ss:$0 sm:$0xff] }
  0xdb   : > { %v734_v46 = vadd.f32 %v726_v35, %v706_v19  ;;  %v707_v0 = vadd.f32 %v699_v40, %v681_v39  ;;  %v1206_v1 = vadd.f32 %v1198_v31, %v1180_v42  ;;  %v700_v5 = vmul.f32 %v2633_v27, %v768_v23 }
  0xdc   : > { %v532_v55 = vmin.f32 %v496_v45, 6.0  ;;  %v481_v56 = vmax.f32 %v384_v41, 0.0  ;;  %v656_v3 = vadd.f32 %v2616_v21, %v645_v53  ;;  %v675_v11 = vmul.f32 %v2621_v22, %v516_v17 }
  0xdd   : > { %v760_v59 = vadd.f32 %v752_v30, %v734_v46  ;;  %v1240_v62 = vld [vmem:[#allocation2 + $0xe0] sm:$0xff] }
  0xde   : > { %v1292_v63 = vld [vmem:[#allocation2 + $0xe2] sm:$0xff]  ;;  %v1214_v2 = vld [vmem:[#allocation2 + $0xda] sm:$0xff]  ;;  %568 = vst [vmem:[#allocation2 + $0xf1] sm:$0xff] %v532_v55  ;;  %v517_v6 = vmin.f32 %v481_v56, 6.0  ;;  %v1250_v8 = vmul.f32 %v2738_v61, %v1240_v62  ;;  %v682_v19 = vadd.f32 %v674_v32, %v656_v3  ;;  %v1173_v20 = vmul.f32 %v2655_v44, %v1240_v62 }
  0xdf   : > { %v2742_v7 = vadd.f32 %v778_v48, %v760_v59  ;;  %v431_v12 = vpop.f32.mrf.mxu2  ;;  %v794_v14 = vld [vmem:[#allocation2 + $0x30] sm:$0xff]  ;;  %v1302_v15 = vmul.f32 %v2725_v51, %v1292_v63  ;;  %v1224_v16 = vmul.f32 %v2686_v4, %v1214_v2  ;;  %v1277_v28 = vmul.f32 %v2698_v13, %v532_v55 }
  0xe0   : > { %553 = vst [vmem:[#allocation2 + $0x39] sm:$0xff] %v517_v6  ;;  %v432_v24 = vadd.f32 %v2544_v49, %v431_v12  ;;  %v805_v25 = vmul.f32 %v2733_v58, %v794_v14  ;;  %v1258_v26 = vadd.f32 %v1250_v8, %v1231_v36  ;;  %v832_v17 = vmul.f32 %v2706_v18, %v517_v6 }
  0xe1   : > { %v386_v29 = vpop.f32.mrf.mxu0  ;;  %v727_v30 = vmul.f32 %v2650_v43, %v794_v14  ;;  %v1232_v23 = vadd.f32 %v1224_v16, %v1206_v1  ;;  %v708_v31 = vadd.f32 %v700_v5, %v682_v19  ;;  %v754_v39 = vmul.f32 %v2675_v60, %v517_v6 }
  0xe2   : > { %v497_v33 = vmax.f32 %v432_v24, 0.0  ;;  %v387_v32 = vadd.f32 %v2544_v49, %v386_v29  ;;  %v813_v34 = vadd.f32 %v805_v25, %v785_v57  ;;  %v1284_v35 = vadd.f32 %v1276_v38, %v1258_v26  ;;  %v2768_v38 = vld [vmem:[%s3773_s3 + $0xa] ss:$0 sm:$0xff] }
  0xe3   : > { %v735_v36 = vadd.f32 %v727_v30, %v707_v0  ;;  %v1181_v40 = vadd.f32 %v2616_v21, %v1173_v20  ;;  %v646_v42 = vmul.f32 %v2594_v9, %v794_v14  ;;  %v1225_v48 = vmul.f32 %v2686_v4, %v1292_v63 }
  0xe4   : > { %v2763_v45 = vmin.f32 %v497_v33, 6.0  ;;  %v482_v41 = vmax.f32 %v387_v32, 0.0  ;;  %v839_v46 = vadd.f32 %v831_v50, %v813_v34  ;;  %v2771_v53 = vadd.f32 %v1302_v15, %v1284_v35 }
  0xe5   : > { %v761_v56 = vadd.f32 %v753_v52, %v735_v36  ;;  %v1241_v57 = vld [vmem:[#allocation2 + $0xf0] sm:$0xff]  ;;  %v1207_v59 = vadd.f32 %v1199_v54, %v1181_v40  ;;  %v657_v62 = vadd.f32 %v2616_v21, %v646_v42  ;;  %v2783_v2 = vmul.f32 %v2663_v47, %v532_v55 }
  0xe6   : > { %569 = vst [vmem:[#allocation2 + $0xf9] sm:$0xff] %v2763_v45  ;;  %v2775_v0 = vmin.f32 %v482_v41, 6.0  ;;  %v2779_v50 = vmul.f32 %v2758_v37, %v2763_v45  ;;  %v1251_v1 = vmul.f32 %v2738_v61, %v1241_v57  ;;  %v2791_v8 = vmul.f32 %v2698_v13, %v2763_v45 }
  0xe7   : > { %v434_v63 = vpop.f32.mrf.mxu2  ;;  %v847_v3 = vld [vmem:[#allocation2 + $0x32] sm:$0xff]  ;;  %v2787_v54 = vld [vmem:[#allocation2 + $0x3a] sm:$0xff]  ;;  %v1233_v5 = vadd.f32 %v1225_v48, %v1207_v59  ;;  %v683_v12 = vadd.f32 %v675_v11, %v657_v62  ;;  %v1174_v14 = vmul.f32 %v2655_v44, %v1241_v57  ;;  %v2800_v19 = vmul.f32 %v2621_v22, %v517_v6  ;;  %v2812_v6 = vld [vmem:[%s3773_s3 + $0xa] ss:$0 sm:$0xff] }
  0xe8   : > { %v2785_v52 = vld [vmem:[#allocation2 + $0x38] sm:$0xff]  ;;  %554 = vst [vmem:[#allocation2 + $0x49] sm:$0xff] %v2775_v0  ;;  %v435_v15 = vadd.f32 %v2544_v49, %v434_v63  ;;  %v857_v55 = vmul.f32 %v2768_v38, %v847_v3  ;;  %v858_v24 = vmul.f32 %v2768_v38, %v2787_v54  ;;  %v779_v11 = vmul.f32 %v2691_v10, %v847_v3 }
  0xe9   : > { %v806_v16 = vmul.f32 %v2733_v58, %v2785_v52  ;;  %v389_v20 = vpop.f32.mrf.mxu0  ;;  %v1259_v25 = vadd.f32 %v1251_v1, %v1232_v23  ;;  %v728_v26 = vmul.f32 %v2650_v43, %v2785_v52  ;;  %v833_v35 = vmul.f32 %v2706_v18, %v2775_v0 }
  0xea   : > { %v498_v29 = vmax.f32 %v435_v15, 0.0  ;;  %v390_v30 = vadd.f32 %v2544_v49, %v389_v20  ;;  %v865_v33 = vadd.f32 %v857_v55, %v839_v46  ;;  %v787_v34 = vadd.f32 %v779_v11, %v761_v56 }
  0xeb   : > { %v814_v32 = vadd.f32 %v806_v16, %v2742_v7  ;;  %v1285_v36 = vadd.f32 %v1277_v28, %v1259_v25  ;;  %v736_v23 = vadd.f32 %v728_v26, %v708_v31  ;;  %v2821_v7 = vld [vmem:[%s3773_s3 + $0x8] ss:$0 sm:$0xff]  ;;  %v780_v28 = vmul.f32 %v2691_v10, %v2787_v54 }
  0xec   : > { %v2816_v40 = vmin.f32 %v498_v29, 6.0  ;;  %v483_v42 = vmax.f32 %v390_v30, 0.0  ;;  %v873_v41 = vmax.f32 %v865_v33, 0.0  ;;  %v701_v31 = vmul.f32 %v2633_v27, %v847_v3 }
  0xed   : > { %v840_v48 = vadd.f32 %v832_v17, %v814_v32  ;;  %v2823_v46 = vld [vmem:[#allocation2 + $0xf8] sm:$0xff]  ;;  %v762_v59 = vadd.f32 %v754_v39, %v736_v23  ;;  %v755_v62 = vmul.f32 %v2675_v60, %v2775_v0  ;;  %v1182_v11 = vadd.f32 %v2616_v21, %v1174_v14 }
  0xee   : > { %3815 = vst [vmem:[#allocation8_spill] sm:$0xff] %v2816_v40  ;;  %v2825_v57 = vld [vmem:[#allocation2 + $0xfa] sm:$0xff]  ;;  %v1293_v56 = vld [vmem:[#allocation2 + $0xf2] sm:$0xff]  ;;  %v2833_v17 = vmin.f32 %v483_v42, 6.0  ;;  %v881_v1 = vmin.f32 %v873_v41, 6.0  ;;  %v1329_v15 = vmul.f32 %v2821_v7, %v2823_v46  ;;  %v1356_v20 = vmul.f32 %v2758_v37, %v2816_v40 }
  0xef   : > { %570 = vst [vmem:[#allocation2 + $0x109] sm:$0xff] %v2816_v40  ;;  %v866_v63 = vadd.f32 %v858_v24, %v840_v48  ;;  %v437_v55 = vpop.f32.mrf.mxu2  ;;  %v1381_v39 = vmul.f32 %v2812_v6, %v2825_v57  ;;  %v2839_v16 = vld [vmem:[#allocation2 + $0x48] sm:$0xff]  ;;  %v1303_v3 = vmul.f32 %v2725_v51, %v1293_v56  ;;  %v788_v32 = vadd.f32 %v780_v28, %v762_v59 }
  0xf0   : > { %555 = vst [vmem:[#allocation2 + $0x51] sm:$0xff] %v2833_v17  ;;  %v438_v24 = vadd.f32 %v2544_v49, %v437_v55  ;;  %1751 = vmatmul.f32.vlgmr.msra.gmra.mxu1 %v881_v1  ;;  %v1337_v26 = vadd.f32 %v1329_v15, %v2771_v53  ;;  %v807_v29 = vmul.f32 %v2733_v58, %v2839_v16 }
  0xf1   : > { %v874_v25 = vmax.f32 %v866_v63, 0.0  ;;  %v392_v30 = vpop.f32.mrf.mxu0  ;;  %v1311_v33 = vadd.f32 %v1303_v3, %v1285_v36  ;;  %v834_v23 = vmul.f32 %v2706_v18, %v2833_v17  ;;  %v1252_v14 = vmul.f32 %v2738_v61, %v2823_v46 }
  0xf2   : > { %v499_v42 = vmax.f32 %v438_v24, 0.0  ;;  %v393_v41 = vadd.f32 %v2544_v49, %v392_v30  ;;  %v1363_v48 = vadd.f32 %v2779_v50, %v1337_v26  ;;  %v1304_v53 = vmul.f32 %v2725_v51, %v2825_v57 }
  0xf3   : > { %v815_v1 = vadd.f32 %v807_v29, %v787_v34  ;;  %v1260_v63 = vadd.f32 %v1252_v14, %v1233_v5  ;;  %v709_v15 = vadd.f32 %v701_v31, %v683_v12  ;;  %v729_v36 = vmul.f32 %v2650_v43, %v2839_v16 }
  0xf4   : > { %v2860_v59 = vmin.f32 %v499_v42, 6.0  ;;  %v484_v28 = vmax.f32 %v393_v41, 0.0  ;;  %v882_v55 = vmin.f32 %v874_v25, 6.0  ;;  %v1389_v3 = vadd.f32 %v1381_v39, %v1363_v48 }
  0xf5   : > { %v1286_v24 = vadd.f32 %v2791_v8, %v1260_v63  ;;  %v737_v30 = vadd.f32 %v729_v36, %v709_v15  ;;  %v1208_v50 = vadd.f32 %v2783_v2, %v1182_v11  ;;  %v1226_v26 = vmul.f32 %v2686_v4, %v1293_v56 }
  0xf6   : > { %v2862_v22 = vld [vmem:[#allocation2 + $0x108] sm:$0xff]  ;;  %571 = vst [vmem:[#allocation2 + $0x111] sm:$0xff] %v2860_v59  ;;  %v2868_v5 = vmin.f32 %v484_v28, 6.0  ;;  %v1397_v12 = vmax.f32 %v1389_v3, 0.0  ;;  %v841_v34 = vadd.f32 %v833_v35, %v815_v1  ;;  %v1357_v2 = vmul.f32 %v2758_v37, %v2860_v59 }
  0xf7   : > { %3816 = vst [vmem:[#allocation9_spill] sm:$0xff] %v2862_v22  ;;  %v1330_v31 = vmul.f32 %v2821_v7, %v2862_v22  ;;  %v440_v25 = vpop.f32.mrf.mxu2  ;;  %v2872_v39 = vld [vmem:[#allocation2 + $0x4a] sm:$0xff]  ;;  %v2876_v8 = vld [vmem:[#allocation2 + $0x52] sm:$0xff]  ;;  %v1312_v14 = vadd.f32 %v1304_v53, %v1286_v24  ;;  %v763_v56 = vadd.f32 %v755_v62, %v737_v30  ;;  %v1253_v11 = vmul.f32 %v2738_v61, %v2862_v22 }
  0xf8   : > { %3817 = vst [vmem:[#allocation10_spill] sm:$0xff] %v2868_v5  ;;  %v2874_v29 = vld [vmem:[#allocation2 + $0x50] sm:$0xff]  ;;  %v441_v35 = vadd.f32 %v2544_v49, %v440_v25  ;;  %1754 = vmatmul.f32.gmra.mxu1 %v882_v55  ;;  %v1405_v42 = vmin.f32 %v1397_v12, 6.0  ;;  %v859_v41 = vmul.f32 %v2768_v38, %v2872_v39  ;;  %v860_v62 = vmul.f32 %v2768_v38, %v2876_v8 }
  0xf9   : > { %3818 = vst [vmem:[#allocation11_spill] sm:$0xff] %v2872_v39  ;;  %v1338_v48 = vadd.f32 %v1330_v31, %v1311_v33  ;;  %v395_v1 = vpop.f32.mrf.mxu0  ;;  %v808_v53 = vmul.f32 %v2733_v58, %v2874_v29  ;;  %v781_v63 = vmul.f32 %v2691_v10, %v2872_v39  ;;  %v1234_v15 = vadd.f32 %v1226_v26, %v1208_v50 }
  0xfa   : > { %3819 = vst [vmem:[#allocation12_spill] sm:$0xff] %v2874_v29  ;;  %v500_v36 = vmax.f32 %v441_v35, 0.0  ;;  %v396_v28 = vadd.f32 %v2544_v49, %v395_v1  ;;  %1802 = vmatmul.f32.vlgmr.msra.gmra.mxu3 %v1405_v42  ;;  %v867_v55 = vadd.f32 %v859_v41, %v841_v34  ;;  %v835_v3 = vmul.f32 %v2706_v18, %v2868_v5 }
  0xfb   : > { %556 = vst [vmem:[#allocation2 + $0x61] sm:$0xff] %v2868_v5  ;;  %v1364_v33 = vadd.f32 %v1356_v20, %v1338_v48  ;;  %v816_v24 = vadd.f32 %v808_v53, %v788_v32  ;;  %v1261_v30 = vadd.f32 %v1253_v11, %v1234_v15  ;;  %v1279_v12 = vmul.f32 %v2698_v13, %v2816_v40 }
  0xfc   : > { %v2897_v31 = vmin.f32 %v500_v36, 6.0  ;;  %v485_v25 = vmax.f32 %v396_v28, 0.0  ;;  %v875_v22 = vmax.f32 %v867_v55, 0.0  ;;  %v789_v39 = vadd.f32 %v781_v63, %v763_v56 }
  0xfd   : > { %v2899_v50 = vld [vmem:[#allocation2 + $0x10a] sm:$0xff]  ;;  %v842_v26 = vadd.f32 %v834_v23, %v816_v24  ;;  %v2903_v34 = vld [vmem:[#allocation2 + $0x112] sm:$0xff]  ;;  %v1287_v42 = vadd.f32 %v1279_v12, %v1261_v30  ;;  %v647_v20 = vmul.f32 %v2594_v9, %v2785_v52  ;;  %v702_v32 = vmul.f32 %v2633_v27, %v2787_v54 }
  0xfe   : > { %3820 = vst [vmem:[#allocation13_spill] sm:$0xff] %v2897_v31  ;;  %v2901_v35 = vld [vmem:[#allocation2 + $0x110] sm:$0xff]  ;;  %v2910_v11 = vmin.f32 %v485_v25, 6.0  ;;  %v883_v41 = vmin.f32 %v875_v22, 6.0  ;;  %v1382_v56 = vmul.f32 %v2812_v6, %v2899_v50  ;;  %v1383_v53 = vmul.f32 %v2812_v6, %v2903_v34 }
  0xff   : > { %3821 = vst [vmem:[#allocation14_spill] sm:$0xff] %v2899_v50  ;;  %v1331_v23 = vmul.f32 %v2821_v7, %v2901_v35  ;;  %v443_v48 = vpop.f32.mrf.mxu2  ;;  %v868_v1 = vadd.f32 %v860_v62, %v842_v26  ;;  %v1305_v54 = vmul.f32 %v2725_v51, %v2899_v50  ;;  %v730_v63 = vmul.f32 %v2650_v43, %v2874_v29 }
 0x100   : > { %572 = vst [vmem:[#allocation2 + $0x121] sm:$0xff] %v2897_v31  ;;  %v444_v22 = vadd.f32 %v2544_v49, %v443_v48  ;;  %1757 = vmatmul.f32.gmra.mxu1 %v883_v41  ;;  %v1390_v15 = vadd.f32 %v1382_v56, %v1364_v33  ;;  %v1358_v24 = vmul.f32 %v2758_v37, %v2897_v31 }
 0x101   : > { %557 = vst [vmem:[#allocation2 + $0x69] sm:$0xff] %v2910_v11  ;;  %v1339_v36 = vadd.f32 %v1331_v23, %v1312_v14  ;;  %v398_v28 = vpop.f32.mrf.mxu0  ;;  %v876_v62 = vmax.f32 %v868_v1, 0.0  ;;  %v658_v30 = vadd.f32 %v2616_v21, %v647_v20  ;;  %v1313_v41 = vadd.f32 %v1305_v54, %v1287_v42 }
 0x102   : > { %v2918_v52 = vld [vmem:[#allocation2 + $0x60] sm:$0xff]  ;;  %v501_v12 = vmax.f32 %v444_v22, 0.0  ;;  %v399_v25 = vadd.f32 %v2544_v49, %v398_v28  ;;  %v1398_v26 = vmax.f32 %v1390_v15, 0.0  ;;  %v756_v20 = vmul.f32 %v2675_v60, %v2833_v17 }
 0x103   : > { %v809_v55 = vmul.f32 %v2733_v58, %v2918_v52  ;;  %v1365_v29 = vadd.f32 %v1357_v2, %v1339_v36  ;;  %v884_v50 = vmin.f32 %v876_v62, 6.0  ;;  %v684_v14 = vadd.f32 %v2800_v19, %v658_v30 }
 0x104   : > { %v2933_v33 = vmin.f32 %v501_v12, 6.0  ;;  %v486_v56 = vmax.f32 %v399_v25, 0.0  ;;  %v1406_v23 = vmin.f32 %v1398_v26, 6.0  ;;  %v782_v2 = vmul.f32 %v2691_v10, %v2876_v8 }
 0x105   : > { %v817_v48 = vadd.f32 %v809_v55, %v789_v39  ;;  %v1391_v1 = vadd.f32 %v1383_v53, %v1365_v29  ;;  %v710_v31 = vadd.f32 %v702_v32, %v684_v14  ;;  %v1175_v29 = vmul.f32 %v2655_v44, %v2823_v46 }
 0x106   : > { %573 = vst [vmem:[#allocation2 + $0x129] sm:$0xff] %v2933_v33  ;;  %v2942_v39 = vmin.f32 %v486_v56, 6.0  ;;  %1805 = vmatmul.f32.gmra.mxu3 %v1406_v23  ;;  %v836_v54 = vmul.f32 %v2706_v18, %v2910_v11  ;;  %v1201_v22 = vmul.f32 %v2663_v47, %v2763_v45  ;;  %v1227_v15 = vmul.f32 %v2686_v4, %v2825_v57 }
 0x107   : > { %v843_v40 = vadd.f32 %v835_v3, %v817_v48  ;;  %v2935_v5 = vld [vmem:[#allocation2 + $0x120] sm:$0xff]  ;;  %v1399_v19 = vmax.f32 %v1391_v1, 0.0  ;;  %v446_v3 = vpop.f32.mrf.mxu2  ;;  %v738_v53 = vadd.f32 %v730_v63, %v710_v31  ;;  %v1183_v45 = vadd.f32 %v2616_v21, %v1175_v29 }
 0x108   : > { %3822 = vst [vmem:[#allocation15_spill] sm:$0xff] %v2935_v5  ;;  %v1332_v42 = vmul.f32 %v2821_v7, %v2935_v5  ;;  %v2948_v32 = vld [vmem:[#allocation2 + $0x62] sm:$0xff]  ;;  %v447_v36 = vadd.f32 %v2544_v49, %v446_v3  ;;  %1760 = vmatmul.f32.gmra.mxu1 %v884_v50  ;;  %v2962_v63 = vld [vmem:[#allocation2 + $0x6a] sm:$0xff]  ;;  %v1254_v57 = vmul.f32 %v2738_v61, %v2901_v35 }
 0x109   : > { %v2950_v17 = vld [vmem:[#allocation2 + $0x68] sm:$0xff]  ;;  %558 = vst [vmem:[#allocation2 + $0x79] sm:$0xff] %v2942_v39  ;;  %v861_v46 = vmul.f32 %v2768_v38, %v2948_v32  ;;  %v401_v28 = vpop.f32.mrf.mxu0  ;;  %v764_v62 = vadd.f32 %v756_v20, %v738_v53  ;;  %v1407_v50 = vmin.f32 %v1399_v19, 6.0  ;;  %v1209_v14 = vadd.f32 %v1201_v22, %v1183_v45  ;;  %v3823_v22 = vld [vmem:[#allocation7_spill] sm:$0xff] }
 0x10a   : > { %v1340_v31 = vadd.f32 %v1332_v42, %v1313_v41  ;;  %v810_v55 = vmul.f32 %v2733_v58, %v2950_v17  ;;  %v502_v30 = vmax.f32 %v447_v36, 0.0  ;;  %v402_v12 = vadd.f32 %v2544_v49, %v401_v28  ;;  %v3824_v45 = vld [vmem:[#allocation11_spill] sm:$0xff] }
 0x10b   : > { %v869_v25 = vadd.f32 %v861_v46, %v843_v40  ;;  %v790_v48 = vadd.f32 %v782_v2, %v764_v62  ;;  %v862_v41 = vmul.f32 %v2768_v38, %v2962_v63  ;;  %v1280_v20 = vmul.f32 %v2698_v13, %v2860_v59 }
 0x10c   : > { %v1366_v26 = vadd.f32 %v1358_v24, %v1340_v31  ;;  %v2972_v56 = vmin.f32 %v502_v30, 6.0  ;;  %v487_v23 = vmax.f32 %v402_v12, 0.0  ;;  %v1235_v3 = vadd.f32 %v1227_v15, %v1209_v14 }
 0x10d   : > { %v877_v1 = vmax.f32 %v869_v25, 0.0  ;;  %v2976_v42 = vld [vmem:[#allocation2 + $0x122] sm:$0xff]  ;;  %v818_v29 = vadd.f32 %v810_v55, %v790_v48  ;;  %v1306_v40 = vmul.f32 %v2725_v51, %v2903_v34  ;;  %v648_v2 = vmul.f32 %v2594_v9, %v2839_v16 }
 0x10e   : > { %v2980_v24 = vld [vmem:[#allocation2 + $0x128] sm:$0xff]  ;;  %574 = vst [vmem:[#allocation2 + $0x139] sm:$0xff] %v2972_v56  ;;  %v2985_v19 = vmin.f32 %v487_v23, 6.0  ;;  %1808 = vmatmul.f32.gmra.mxu3 %v1407_v50  ;;  %v1384_v59 = vmul.f32 %v2812_v6, %v2976_v42  ;;  %v677_v15 = vmul.f32 %v3823_v22, %v2775_v0  ;;  %v1262_v31 = vadd.f32 %v1254_v57, %v1235_v3 }
 0x10f   : > { %v885_v53 = vmin.f32 %v877_v1, 6.0  ;;  %v449_v36 = vpop.f32.mrf.mxu2  ;;  %v844_v46 = vadd.f32 %v836_v54, %v818_v29  ;;  %v1333_v28 = vmul.f32 %v2821_v7, %v2980_v24  ;;  %v659_v16 = vadd.f32 %v2616_v21, %v648_v2  ;;  %v3001_v29 = vld [vmem:[#allocation2 + $0x12a] sm:$0xff] }
 0x110   : > { %559 = vst [vmem:[#allocation2 + $0x81] sm:$0xff] %v2985_v19  ;;  %v450_v62 = vadd.f32 %v2544_v49, %v449_v36  ;;  %v1392_v55 = vadd.f32 %v1384_v59, %v1366_v26  ;;  %v703_v30 = vmul.f32 %v2633_v27, %v3824_v45  ;;  %v1288_v0 = vadd.f32 %v1280_v20, %v1262_v31  ;;  %v3007_v20 = vld [vmem:[#allocation2 + $0x78] sm:$0xff]  ;;  %v3825_v36 = vld [vmem:[#allocation10_spill] sm:$0xff] }
 0x111   : > { %1763 = vmatmul.f32.gmra.mxu1 %v885_v53  ;;  %v404_v12 = vpop.f32.mrf.mxu0  ;;  %v870_v50 = vadd.f32 %v862_v41, %v844_v46  ;;  %v685_v25 = vadd.f32 %v677_v15, %v659_v16  ;;  %v731_v54 = vmul.f32 %v2650_v43, %v2918_v52  ;;  %v1359_v41 = vmul.f32 %v2758_v37, %v2933_v33 }
 0x112   : > { %v503_v57 = vmax.f32 %v450_v62, 0.0  ;;  %v405_v48 = vadd.f32 %v2544_v49, %v404_v12  ;;  %v1400_v14 = vmax.f32 %v1392_v55, 0.0  ;;  %v1314_v1 = vadd.f32 %v1306_v40, %v1288_v0  ;;  %v3827_v55 = vld [vmem:[#allocation9_spill] sm:$0xff] }
 0x113   : > { %v878_v23 = vmax.f32 %v870_v50, 0.0  ;;  %v711_v3 = vadd.f32 %v703_v30, %v685_v25  ;;  %v757_v46 = vmul.f32 %v2675_v60, %v3825_v36  ;;  %v783_v40 = vmul.f32 %v2691_v10, %v2948_v32  ;;  %v3828_v25 = vld [vmem:[#allocation8_spill] sm:$0xff] }
 0x114   : > { %v3003_v26 = vmin.f32 %v503_v57, 6.0  ;;  %v488_v2 = vmax.f32 %v405_v48, 0.0  ;;  %v1408_v53 = vmin.f32 %v1400_v14, 6.0  ;;  %v1341_v59 = vadd.f32 %v1333_v28, %v1314_v1  ;;  %v3829_v14 = vld [vmem:[#allocation14_spill] sm:$0xff]  ;;  %v668_v1 = vld [vmem:[#allocation2 + $0x51] sm:$0xff] }
 0x115   : > { %v739_v15 = vadd.f32 %v731_v54, %v711_v3  ;;  %v886_v16 = vmin.f32 %v878_v23, 6.0  ;;  %v1385_v62 = vmul.f32 %v2812_v6, %v3001_v29  ;;  %v1176_v45 = vmul.f32 %v2655_v44, %v3827_v55 }
 0x116   : > { %575 = vst [vmem:[#allocation2 + $0x141] sm:$0xff] %v3003_v26  ;;  %v3014_v31 = vmin.f32 %v488_v2, 6.0  ;;  %1811 = vmatmul.f32.gmra.mxu3 %v1408_v53  ;;  %v1367_v30 = vadd.f32 %v1359_v41, %v1341_v59  ;;  %v811_v50 = vmul.f32 %v2733_v58, %v3007_v20  ;;  %v1202_v54 = vmul.f32 %v2663_v47, %v3828_v25  ;;  %v3831_v25 = vld [vmem:[#allocation12_spill] sm:$0xff] }
 0x117   : > { %v452_v28 = vpop.f32.mrf.mxu2  ;;  %v765_v12 = vadd.f32 %v757_v46, %v739_v15  ;;  %v3022_v0 = vld [vmem:[#allocation2 + $0x7a] sm:$0xff]  ;;  %v1184_v48 = vadd.f32 %v2616_v21, %v1176_v45  ;;  %v1228_v23 = vmul.f32 %v2686_v4, %v3829_v14  ;;  %v837_v41 = vmul.f32 %v2706_v18, %v2942_v39 }
 0x118   : > { %3826 = vst [vmem:[#allocation7_spill] sm:$0xff] %v3014_v31  ;;  %v453_v57 = vadd.f32 %v2544_v49, %v452_v28  ;;  %v1393_v2 = vadd.f32 %v1385_v62, %v1367_v30  ;;  %v1255_v59 = vmul.f32 %v2738_v61, %v2935_v5  ;;  %v863_v46 = vmul.f32 %v2768_v38, %v3022_v0  ;;  %v3038_v28 = vld [vmem:[#allocation2 + $0x138] sm:$0xff] }
 0x119   : > { %560 = vst [vmem:[#allocation2 + $0x91] sm:$0xff] %v3014_v31  ;;  %1766 = vmatmul.f32.gmra.mxu1 %v886_v16  ;;  %v407_v3 = vpop.f32.mrf.mxu0  ;;  %v791_v53 = vadd.f32 %v783_v40, %v765_v12  ;;  %v1210_v16 = vadd.f32 %v1202_v54, %v1184_v48  ;;  %v649_v40 = vmul.f32 %v2594_v9, %v3831_v25 }
 0x11a   : > { %v504_v15 = vmax.f32 %v453_v57, 0.0  ;;  %v408_v36 = vadd.f32 %v2544_v49, %v407_v3  ;;  %v1401_v55 = vmax.f32 %v1393_v2, 0.0  ;;  %3830 = vst [vmem:[#allocation11_spill] sm:$0xff] %v3038_v28  ;;  %v678_v62 = vmul.f32 %v3823_v22, %v668_v1  ;;  %v3832_v57 = vld [vmem:[#allocation13_spill] sm:$0xff] }
 0x11b   : > { %v819_v45 = vadd.f32 %v811_v50, %v791_v53  ;;  %v1236_v14 = vadd.f32 %v1228_v23, %v1210_v16  ;;  %v1281_v49 = vmul.f32 %v2698_v13, %v3832_v57  ;;  %v660_v50 = vadd.f32 %v2616_v21, %v649_v40  ;;  %v1193_v16 = vld [vmem:[#allocation2 + $0x111] sm:$0xff] }
 0x11c   : > { %v3043_v30 = vmin.f32 %v504_v15, 6.0  ;;  %v489_v12 = vmax.f32 %v408_v36, 0.0  ;;  %v1409_v3 = vmin.f32 %v1401_v55, 6.0  ;;  %v704_v54 = vmul.f32 %v2633_v27, %v2876_v8  ;;  %v3063_v8 = vld [vmem:[#allocation2 + $0x80] sm:$0xff] }
 0x11d   : > { %v845_v31 = vadd.f32 %v837_v41, %v819_v45  ;;  %v3047_v5 = vld [vmem:[#allocation2 + $0x13a] sm:$0xff]  ;;  %v1263_v22 = vadd.f32 %v1255_v59, %v1236_v14  ;;  %v1307_v48 = vmul.f32 %v2725_v51, %v2976_v42  ;;  %v1334_v23 = vmul.f32 %v2821_v7, %v3038_v28 }
 0x11e   : > { %576 = vst [vmem:[#allocation2 + $0x151] sm:$0xff] %v3043_v30  ;;  %v3053_v9 = vmin.f32 %v489_v12, 6.0  ;;  %1814 = vmatmul.f32.gmra.mxu3 %v1409_v3  ;;  %v1360_v53 = vmul.f32 %v2758_v37, %v2972_v56  ;;  %v686_v41 = vadd.f32 %v678_v62, %v660_v50  ;;  %v732_v27 = vmul.f32 %v2650_v43, %v2950_v17  ;;  %v3069_v59 = vld [vmem:[%s3772_s2] ss:$0 sm:$0xff] }
 0x11f   : > { %v455_v1 = vpop.f32.mrf.mxu2  ;;  %v871_v2 = vadd.f32 %v863_v46, %v845_v31  ;;  %v1289_v36 = vadd.f32 %v1281_v49, %v1263_v22  ;;  %v1386_v31 = vmul.f32 %v2812_v6, %v3047_v5  ;;  %v758_v46 = vmul.f32 %v2675_v60, %v2910_v11  ;;  %v3083_v60 = vld [vmem:[#allocation2 + $0x82] sm:$0xff] }
 0x120   : > { %561 = vst [vmem:[#allocation2 + $0x99] sm:$0xff] %v3053_v9  ;;  %v456_v15 = vadd.f32 %v3069_v59, %v455_v1  ;;  %v712_v45 = vadd.f32 %v704_v54, %v686_v41  ;;  %v784_v25 = vmul.f32 %v2691_v10, %v2962_v63  ;;  %v1177_v40 = vmul.f32 %v2655_v44, %v2901_v35  ;;  %v3090_v10 = vld [vmem:[%s3773_s3] ss:$0 sm:$0xff]  ;;  %v3095_v44 = vld [vmem:[%s3773_s3 + $0x1] ss:$0 sm:$0xff] }
 0x121   : > { %v879_v43 = vmax.f32 %v871_v2, 0.0  ;;  %v410_v55 = vpop.f32.mrf.mxu0  ;;  %v1315_v14 = vadd.f32 %v1307_v48, %v1289_v36  ;;  %v812_v57 = vmul.f32 %v2733_v58, %v3063_v8  ;;  %3833 = vst [vmem:[#allocation10_spill] sm:$0xff] %v3083_v60  ;;  %v1203_v50 = vmul.f32 %v2663_v47, %v1193_v16  ;;  %v924_v48 = vld [vmem:[#allocation2 + $0x61] sm:$0xff] }
 0x122   : > { %v505_v62 = vmax.f32 %v456_v15, 0.0  ;;  %v411_v12 = vadd.f32 %v3069_v59, %v410_v55  ;;  %v740_v3 = vadd.f32 %v732_v27, %v712_v45  ;;  %v1185_v11 = vadd.f32 %v2616_v21, %v1177_v40  ;;  %v3105_v27 = vld [vmem:[#allocation2 + $0x140] sm:$0xff] }
 0x123   : > { %v887_v49 = vmin.f32 %v879_v43, 6.0  ;;  %v1342_v54 = vadd.f32 %v1334_v23, %v1315_v14  ;;  %v838_v22 = vmul.f32 %v2706_v18, %v2985_v19  ;;  %v1229_v2 = vmul.f32 %v2686_v4, %v2903_v34  ;;  %v3110_v15 = vld [vmem:[%s3773_s3 + $0x2] ss:$0 sm:$0xff] }
 0x124   : > { %v3097_v35 = vmin.f32 %v505_v62, 6.0  ;;  %v490_v58 = vmax.f32 %v411_v12, 0.0  ;;  %v766_v47 = vadd.f32 %v758_v46, %v740_v3  ;;  %v1211_v1 = vadd.f32 %v1203_v50, %v1185_v11  ;;  %v3128_v40 = vld [vmem:[#allocation2 + $0x142] sm:$0xff] }
 0x125   : > { %1769 = vmatmul.f32.gmra.mxu1 %v887_v49  ;;  %v1256_v41 = vmul.f32 %v2738_v61, %v2980_v24  ;;  %v1368_v23 = vadd.f32 %v1360_v53, %v1342_v54  ;;  %v864_v36 = vmul.f32 %v2768_v38, %v3083_v60  ;;  %v1282_v4 = vmul.f32 %v2698_v13, %v2933_v33  ;;  %v3168_v54 = vld [vmem:[%s3773_s3 + $0x1] ss:$0 sm:$0xff] }
 0x126   : > { %577 = vst [vmem:[#allocation2 + $0x159] sm:$0xff] %v3097_v35  ;;  %v3113_v18 = vmin.f32 %v490_v58, 6.0  ;;  %v792_v61 = vadd.f32 %v784_v25, %v766_v47  ;;  %v1237_v46 = vadd.f32 %v1229_v2, %v1211_v1  ;;  %v908_v16 = vmul.f32 %v3090_v10, %v2918_v52  ;;  %v3163_v58 = vld [vmem:[#allocation2 + $0x90] sm:$0xff]  ;;  %v3177_v2 = vld [vmem:[%s3773_s3 + $0x2] ss:$0 sm:$0xff] }
 0x127   : > { %v458_v34 = vpop.f32.mrf.mxu2  ;;  %v934_v43 = vmul.f32 %v3095_v44, %v924_v48  ;;  %v1394_v55 = vadd.f32 %v1386_v31, %v1368_v23  ;;  %v1308_v53 = vmul.f32 %v2725_v51, %v3001_v29  ;;  %v1335_v38 = vmul.f32 %v2821_v7, %v3105_v27  ;;  %v3136_v31 = vld [vmem:[%s3773_s3 + $0x4] ss:$0 sm:$0xff]  ;;  %v3141_v51 = vld [vmem:[%s3773_s3 + $0x5] ss:$0 sm:$0xff] }
 0x128   : > { %3834 = vst [vmem:[#allocation9_spill] sm:$0xff] %v3113_v18  ;;  %v459_v45 = vadd.f32 %v3069_v59, %v458_v34  ;;  %v820_v13 = vadd.f32 %v812_v57, %v792_v61  ;;  %v1264_v25 = vadd.f32 %v1256_v41, %v1237_v46  ;;  %v916_v52 = vadd.f32 %v2616_v21, %v908_v16  ;;  %v3154_v57 = vld [vmem:[%s3773_s3] ss:$0 sm:$0xff]  ;;  %v3184_v61 = vld [vmem:[%s3773_s3 + $0x9] ss:$0 sm:$0xff]  ;;  %v1448_v46 = vld [vmem:[#allocation2 + $0x121] sm:$0xff] }
 0x129   : > { %562 = vst [vmem:[#allocation2 + $0xa9] sm:$0xff] %v3113_v18  ;;  %v413_v33 = vpop.f32.mrf.mxu0  ;;  %v960_v62 = vmul.f32 %v3110_v15, %v2948_v32  ;;  %v1402_v7 = vmax.f32 %v1394_v55, 0.0  ;;  %v1361_v21 = vmul.f32 %v2758_v37, %v3003_v26  ;;  %v3149_v32 = vld [vmem:[%s3773_s3 + $0x8] ss:$0 sm:$0xff]  ;;  %v987_v50 = vmul.f32 %v3136_v31, %v3007_v20  ;;  %v3161_v37 = vld [vmem:[%s3773_s3 + $0x6] ss:$0 sm:$0xff] }
 0x12a   : > { %v506_v12 = vmax.f32 %v459_v45, 0.0  ;;  %v414_v14 = vadd.f32 %v3069_v59, %v413_v33  ;;  %3835 = vst [vmem:[#allocation8_spill] sm:$0xff] %v3149_v32  ;;  %v846_v49 = vadd.f32 %v838_v22, %v820_v13  ;;  %v1290_v3 = vadd.f32 %v1282_v4, %v1264_v25  ;;  %v3839_v55 = vld [vmem:[#allocation15_spill] sm:$0xff] }
 0x12b   : > { %v942_v11 = vadd.f32 %v934_v43, %v916_v52  ;;  %v1410_v48 = vmin.f32 %v1402_v7, 6.0  ;;  %v1387_v1 = vmul.f32 %v2812_v6, %v3128_v40  ;;  %v1013_v34 = vmul.f32 %v3141_v51, %v2942_v39  ;;  %3837 = vst [vmem:[#allocation12_spill] sm:$0xff] %v3184_v61  ;;  %v3189_v6 = vld [vmem:[%s3773_s3 + $0x5] ss:$0 sm:$0xff]  ;;  %v3198_v43 = vld [vmem:[#allocation2 + $0x92] sm:$0xff] }
 0x12c   : > { %v3170_v47 = vmin.f32 %v506_v12, 6.0  ;;  %v491_v22 = vmax.f32 %v414_v14, 0.0  ;;  %v872_v41 = vadd.f32 %v864_v36, %v846_v49  ;;  %v1316_v23 = vadd.f32 %v1308_v53, %v1290_v3  ;;  %v3205_v53 = vld [vmem:[%s3773_s3 + $0x4] ss:$0 sm:$0xff]  ;;  %v3212_v12 = vld [vmem:[%s3773_s3 + $0xa] ss:$0 sm:$0xff] }
 0x12d   : > { %v968_v4 = vadd.f32 %v960_v62, %v942_v11  ;;  %1817 = vmatmul.f32.gmra.mxu3 %v1410_v48  ;;  %v1039_v16 = vmul.f32 %v3161_v37, %v3022_v0  ;;  %v1066_v39 = vmul.f32 %v3149_v32, %v3163_v58  ;;  %v1432_v45 = vmul.f32 %v3154_v57, %v3839_v55  ;;  %v3840_v62 = vld [vmem:[#allocation7_spill] sm:$0xff]  ;;  %v3219_v49 = vld [vmem:[%s3774_s4] ss:$0 sm:$0xff]  ;;  %v3233_v48 = vld [vmem:[%s3773_s3 + $0x8] ss:$0 sm:$0xff] }
 0x12e   : > { %3836 = vst [vmem:[#allocation14_spill] sm:$0xff] %v3170_v47  ;;  %v3192_v36 = vmin.f32 %v491_v22, 6.0  ;;  %v880_v13 = vmax.f32 %v872_v41, 0.0  ;;  %v1343_v33 = vadd.f32 %v1335_v38, %v1316_v23  ;;  %v1092_v7 = vmul.f32 %v3184_v61, %v3840_v62  ;;  %v925_v22 = vld [vmem:[#allocation2 + $0x69] sm:$0xff] }
 0x12f   : > { %578 = vst [vmem:[#allocation2 + $0x169] sm:$0xff] %v3170_v47  ;;  %v461_v25 = vpop.f32.mrf.mxu2  ;;  %v995_v52 = vadd.f32 %v987_v50, %v968_v4  ;;  %v1440_v38 = vadd.f32 %v3219_v49, %v1432_v45  ;;  %v1458_v3 = vmul.f32 %v3168_v54, %v1448_v46  ;;  %v1484_v11 = vmul.f32 %v3177_v2, %v2976_v42  ;;  %v3228_v50 = vld [vmem:[%s3773_s3 + $0x6] ss:$0 sm:$0xff]  ;;  %v3237_v55 = vld [vmem:[#allocation2 + $0x150] sm:$0xff]  ;;  %v3246_v47 = vld [vmem:[%s3773_s3 + $0x9] ss:$0 sm:$0xff] }
 0x130   : > { %3838 = vst [vmem:[#allocation13_spill] sm:$0xff] %v3192_v36  ;;  %v462_v14 = vadd.f32 %v3069_v59, %v461_v25  ;;  %v888_v41 = vmin.f32 %v880_v13, 6.0  ;;  %v1369_v23 = vadd.f32 %v1361_v21, %v1343_v33  ;;  %v1118_v46 = vmul.f32 %v3212_v12, %v3198_v43  ;;  %v3251_v21 = vld [vmem:[%s3773_s3 + $0xa] ss:$0 sm:$0xff]  ;;  %v3253_v33 = vld [vmem:[#allocation2 + $0x152] sm:$0xff] }
 0x131   : > { %563 = vst [vmem:[#allocation2 + $0xb1] sm:$0xff] %v3192_v36  ;;  %v1021_v4 = vadd.f32 %v1013_v34, %v995_v52  ;;  %v1466_v45 = vadd.f32 %v1458_v3, %v1440_v38  ;;  %v1511_v25 = vmul.f32 %v3205_v53, %v3038_v28  ;;  %v1537_v36 = vmul.f32 %v3189_v6, %v2972_v56 }
 0x132   : > { %v507_v42 = vmax.f32 %v462_v14, 0.0  ;;  %1772 = vmatmul.f32.gmra.mxu1 %v888_v41  ;;  %v1395_v34 = vadd.f32 %v1387_v1, %v1369_v23  ;;  %3841 = vst [vmem:[#allocation15_spill] sm:$0xff] %v3253_v33  ;;  %v909_v52 = vmul.f32 %v3090_v10, %v2950_v17  ;;  %v935_v56 = vmul.f32 %v3095_v44, %v925_v22 }
 0x133   : > { %v1047_v13 = vadd.f32 %v1039_v16, %v1021_v4  ;;  %v1492_v38 = vadd.f32 %v1484_v11, %v1466_v45  ;;  %v1563_v3 = vmul.f32 %v3228_v50, %v3047_v5  ;;  %v1590_v18 = vmul.f32 %v3233_v48, %v3237_v55  ;;  %v3274_v4 = vld [vmem:[#allocation2 + $0x98] sm:$0xff] }
 0x134   : > { %v3258_v14 = vmin.f32 %v507_v42, 6.0  ;;  %v1403_v28 = vmax.f32 %v1395_v34, 0.0  ;;  %v917_v1 = vadd.f32 %v3219_v49, %v909_v52  ;;  %v961_v16 = vmul.f32 %v3110_v15, %v2962_v63 }
 0x135   : > { %v1074_v41 = vadd.f32 %v1066_v39, %v1047_v13  ;;  %v1519_v17 = vadd.f32 %v1511_v25, %v1492_v38  ;;  %v1616_v22 = vmul.f32 %v3246_v47, %v3043_v30  ;;  %v1642_v11 = vmul.f32 %v3251_v21, %v3253_v33  ;;  %v1449_v13 = vld [vmem:[#allocation2 + $0x129] sm:$0xff] }
 0x136   : > { %3842 = vst [vmem:[#allocation7_spill] sm:$0xff] %v3258_v14  ;;  %v988_v23 = vmul.f32 %v3136_v31, %v3063_v8  ;;  %v1411_v39 = vmin.f32 %v1403_v28, 6.0  ;;  %v943_v34 = vadd.f32 %v935_v56, %v917_v1  ;;  %v1014_v63 = vmul.f32 %v3141_v51, %v2985_v19 }
 0x137   : > { %579 = vst [vmem:[#allocation2 + $0x171] sm:$0xff] %v3258_v14  ;;  %v1100_v42 = vadd.f32 %v1092_v7, %v1074_v41  ;;  %v464_v45 = vpop.f32.mrf.mxu2  ;;  %v1545_v25 = vadd.f32 %v1537_v36, %v1519_v17  ;;  %v1040_v38 = vmul.f32 %v3161_v37, %v3083_v60  ;;  %v3281_v14 = vld [vmem:[#allocation2 + $0x9a] sm:$0xff]  ;;  %v1433_v33 = vmul.f32 %v3154_v57, %v2980_v24 }
 0x138   : > { %v465_v52 = vadd.f32 %v3069_v59, %v464_v45  ;;  %1820 = vmatmul.f32.gmra.mxu3 %v1411_v39  ;;  %v969_v7 = vadd.f32 %v961_v16, %v943_v34  ;;  %v1067_v56 = vmul.f32 %v3149_v32, %v3274_v4  ;;  %v1093_v19 = vmul.f32 %v3184_v61, %v3053_v9  ;;  %v926_v16 = vld [vmem:[#allocation2 + $0x79] sm:$0xff] }
 0x139   : > { %v1126_v28 = vadd.f32 %v1118_v46, %v1100_v42  ;;  %v1571_v36 = vadd.f32 %v1563_v3, %v1545_v25  ;;  %v1441_v1 = vadd.f32 %v3219_v49, %v1433_v33  ;;  %v1459_v17 = vmul.f32 %v3168_v54, %v1449_v13  ;;  %v3299_v25 = vld [vmem:[#allocation2 + $0x158] sm:$0xff] }
 0x13a   : > { %v508_v41 = vmax.f32 %v465_v52, 0.0  ;;  %v996_v60 = vadd.f32 %v988_v23, %v969_v7  ;;  %v1119_v24 = vmul.f32 %v3212_v12, %v3281_v14  ;;  %v1485_v46 = vmul.f32 %v3177_v2, %v3001_v29  ;;  %v3308_v7 = vld [vmem:[#allocation2 + $0x15a] sm:$0xff] }
 0x13b   : > { %v1134_v45 = vmax.f32 %v1126_v28, 0.0  ;;  %v1598_v39 = vadd.f32 %v1590_v18, %v1571_v36  ;;  %v1467_v34 = vadd.f32 %v1459_v17, %v1441_v1  ;;  %v1512_v3 = vmul.f32 %v3205_v53, %v3105_v27 }
 0x13c   : > { %v3295_v42 = vmin.f32 %v508_v41, 6.0  ;;  %v1022_v13 = vadd.f32 %v1014_v63, %v996_v60  ;;  %v1538_v23 = vmul.f32 %v3189_v6, %v3003_v26  ;;  %v910_v52 = vmul.f32 %v3090_v10, %v3007_v20 }
 0x13d   : > { %v1142_v33 = vmin.f32 %v1134_v45, 6.0  ;;  %v1624_v28 = vadd.f32 %v1616_v22, %v1598_v39  ;;  %v1493_v29 = vadd.f32 %v1485_v46, %v1467_v34  ;;  %v1564_v18 = vmul.f32 %v3228_v50, %v3128_v40  ;;  %v1450_v34 = vld [vmem:[#allocation2 + $0x139] sm:$0xff] }
 0x13e   : > { %580 = vst [vmem:[#allocation2 + $0x181] sm:$0xff] %v3295_v42  ;;  %v936_v36 = vmul.f32 %v3095_v44, %v926_v16  ;;  %v1048_v41 = vadd.f32 %v1040_v38, %v1022_v13  ;;  %v1591_v60 = vmul.f32 %v3233_v48, %v3299_v25  ;;  %v918_v63 = vadd.f32 %v3219_v49, %v910_v52 }
 0x13f   : > { %1775 = vmatmul.f32.gmra.mxu1 %v1142_v33  ;;  %v467_v26 = vpop.f32.mrf.mxu2  ;;  %v962_v20 = vmul.f32 %v3110_v15, %v3022_v0  ;;  %v1650_v22 = vadd.f32 %v1642_v11, %v1624_v28  ;;  %v1520_v1 = vadd.f32 %v1512_v3, %v1493_v29  ;;  %v1617_v17 = vmul.f32 %v3246_v47, %v3097_v35  ;;  %v3843_v29 = vld [vmem:[#allocation11_spill] sm:$0xff] }
 0x140   : > { %v468_v45 = vadd.f32 %v3069_v59, %v467_v26  ;;  %v1075_v46 = vadd.f32 %v1067_v56, %v1048_v41  ;;  %v1643_v38 = vmul.f32 %v3251_v21, %v3308_v7  ;;  %v944_v16 = vadd.f32 %v936_v36, %v918_v63  ;;  %v3327_v56 = vld [vmem:[#allocation2 + $0xa8] sm:$0xff] }
 0x141   : > { %v989_v39 = vmul.f32 %v3136_v31, %v3163_v58  ;;  %v1658_v33 = vmax.f32 %v1650_v22, 0.0  ;;  %v1546_v13 = vadd.f32 %v1538_v23, %v1520_v1  ;;  %v1015_v0 = vmul.f32 %v3141_v51, %v3840_v62 }
 0x142   : > { %v509_v52 = vmax.f32 %v468_v45, 0.0  ;;  %v1101_v11 = vadd.f32 %v1093_v19, %v1075_v46  ;;  %v970_v3 = vadd.f32 %v962_v20, %v944_v16  ;;  %v1041_v28 = vmul.f32 %v3161_v37, %v3198_v43  ;;  %v3334_v45 = vld [vmem:[#allocation2 + $0xaa] sm:$0xff]  ;;  %v3845_v46 = vld [vmem:[#allocation9_spill] sm:$0xff] }
 0x143   : > { %v1434_v36 = vmul.f32 %v3154_v57, %v3843_v29  ;;  %v1666_v41 = vmin.f32 %v1658_v33, 6.0  ;;  %v1572_v26 = vadd.f32 %v1564_v18, %v1546_v13  ;;  %v1460_v23 = vmul.f32 %v3168_v54, %v1450_v34 }
 0x144   : > { %v3331_v63 = vmin.f32 %v509_v52, 6.0  ;;  %v1127_v22 = vadd.f32 %v1119_v24, %v1101_v11  ;;  %v997_v1 = vadd.f32 %v989_v39, %v970_v3  ;;  %v1486_v19 = vmul.f32 %v3177_v2, %v3047_v5  ;;  %v927_v52 = vld [vmem:[#allocation2 + $0x81] sm:$0xff] }
 0x145   : > { %v1442_v62 = vadd.f32 %v3219_v49, %v1434_v36  ;;  %1823 = vmatmul.f32.gmra.mxu3 %v1666_v41  ;;  %v1599_v20 = vadd.f32 %v1591_v60, %v1572_v26  ;;  %v1068_v18 = vmul.f32 %v3149_v32, %v3327_v56  ;;  %v1094_v16 = vmul.f32 %v3184_v61, %v3845_v46  ;;  %v3351_v26 = vld [vmem:[#allocation2 + $0x168] sm:$0xff] }
 0x146   : > { %3844 = vst [vmem:[#allocation11_spill] sm:$0xff] %v3331_v63  ;;  %v1135_v34 = vmax.f32 %v1127_v22, 0.0  ;;  %v1023_v24 = vadd.f32 %v1015_v0, %v997_v1  ;;  %v1513_v33 = vmul.f32 %v3205_v53, %v3237_v55  ;;  %v1120_v5 = vmul.f32 %v3212_v12, %v3334_v45 }
 0x147   : > { %581 = vst [vmem:[#allocation2 + $0x189] sm:$0xff] %v3331_v63  ;;  %v1468_v39 = vadd.f32 %v1460_v23, %v1442_v62  ;;  %v470_v13 = vpop.f32.mrf.mxu2  ;;  %v1625_v11 = vadd.f32 %v1617_v17, %v1599_v20  ;;  %v1539_v60 = vmul.f32 %v3189_v6, %v3043_v30  ;;  %v911_v0 = vmul.f32 %v3090_v10, %v3063_v8  ;;  %v3355_v23 = vld [vmem:[#allocation2 + $0xc0] sm:$0xff]  ;;  %v3847_v17 = vld [vmem:[#allocation15_spill] sm:$0xff] }
 0x148   : > { %v471_v3 = vadd.f32 %v3069_v59, %v470_v13  ;;  %v1143_v29 = vmin.f32 %v1135_v34, 6.0  ;;  %v1049_v36 = vadd.f32 %v1041_v28, %v1023_v24  ;;  %3846 = vst [vmem:[#allocation9_spill] sm:$0xff] %v3355_v23  ;;  %v1565_v1 = vmul.f32 %v3228_v50, %v3847_v17  ;;  %v3363_v24 = vld [vmem:[#allocation2 + $0xc1] sm:$0xff]  ;;  %v3398_v63 = vld [vmem:[#allocation2 + $0xb2] sm:$0xff] }
 0x149   : > { %v1494_v41 = vadd.f32 %v1486_v19, %v1468_v39  ;;  %v1651_v22 = vadd.f32 %v1643_v38, %v1625_v11  ;;  %v937_v20 = vmul.f32 %v3095_v44, %v927_v52  ;;  %v919_v28 = vadd.f32 %v3219_v49, %v911_v0  ;;  %v3848_v19 = vld [vmem:[#allocation10_spill] sm:$0xff]  ;;  %3849 = vst [vmem:[#allocation15_spill] sm:$0xff] %v3363_v24 }
 0x14a   : > { %v510_v62 = vmax.f32 %v471_v3, 0.0  ;;  %1778 = vmatmul.f32.gmra.mxu1 %v1143_v29  ;;  %v1076_v30 = vadd.f32 %v1068_v18, %v1049_v36  ;;  %v963_v34 = vmul.f32 %v3110_v15, %v3848_v19  ;;  %v1592_v38 = vmul.f32 %v3233_v48, %v3351_v26  ;;  %v3367_v39 = vld [vmem:[#allocation2 + $0x16a] sm:$0xff]  ;;  %v1451_v36 = vld [vmem:[#allocation2 + $0x141] sm:$0xff] }
 0x14b   : > { %v1521_v13 = vadd.f32 %v1513_v33, %v1494_v41  ;;  %v1659_v8 = vmax.f32 %v1651_v22, 0.0  ;;  %v3371_v52 = vmul.f32 %v3149_v32, %v3355_v23  ;;  %v945_v3 = vadd.f32 %v937_v20, %v919_v28  ;;  %v3850_v0 = vld [vmem:[#allocation14_spill] sm:$0xff]  ;;  %v3377_v19 = vld [vmem:[#allocation2 + $0xb0] sm:$0xff] }
 0x14c   : > { %v546_v11 = vmin.f32 %v510_v62, 6.0  ;;  %v1102_v18 = vadd.f32 %v1094_v16, %v1076_v30  ;;  %v990_v29 = vmul.f32 %v3136_v31, %v3274_v4  ;;  %v1618_v22 = vmul.f32 %v3246_v47, %v3850_v0  ;;  %v3387_v30 = vld [vmem:[#allocation2] sm:$0xff] }
 0x14d   : > { %v1547_v33 = vadd.f32 %v1539_v60, %v1521_v13  ;;  %v1667_v41 = vmin.f32 %v1659_v8, 6.0  ;;  %v1435_v62 = vmul.f32 %v3154_v57, %v3105_v27  ;;  %v3383_v23 = vmul.f32 %v3184_v61, %v3363_v24 }
 0x14e   : > { %582 = vst [vmem:[#allocation2 + $0x199] sm:$0xff] %v546_v11  ;;  %v1128_v16 = vadd.f32 %v1120_v5, %v1102_v18  ;;  %v1644_v20 = vmul.f32 %v3251_v21, %v3367_v39  ;;  %v971_v13 = vadd.f32 %v963_v34, %v945_v3  ;;  %v1016_v28 = vmul.f32 %v3141_v51, %v3053_v9  ;;  %v928_v34 = vld [vmem:[#allocation2 + $0x91] sm:$0xff]  ;;  %v3852_v3 = vld [vmem:[#allocation13_spill] sm:$0xff] }
 0x14f   : > { %3851 = vst [vmem:[#allocation10_spill] sm:$0xff] %v3383_v23  ;;  %v1573_v60 = vadd.f32 %v1565_v1, %v1547_v33  ;;  %1826 = vmatmul.f32.gmra.mxu3 %v1667_v41  ;;  %v1042_v27 = vmul.f32 %v3161_v37, %v3281_v14  ;;  %v1443_v8 = vadd.f32 %v3219_v49, %v1435_v62  ;;  %v473_v1 = vpop.f32.mrf.mxu2 }
 0x150   : > { %628 = vst [vmem:[#allocation2 + $0x198] sm:$0xff] %v3387_v30  ;;  %v1461_v5 = vmul.f32 %v3168_v54, %v1451_v36  ;;  %v1136_v11 = vmax.f32 %v1128_v16, 0.0  ;;  %v998_v33 = vadd.f32 %v990_v29, %v971_v13  ;;  %v1069_v24 = vmul.f32 %v3149_v32, %v3377_v19  ;;  %v3409_v32 = vld [vmem:[#allocation2 + $0x170] sm:$0xff] }
 0x151   : > { %v1600_v18 = vadd.f32 %v1592_v38, %v1573_v60  ;;  %v1095_v9 = vmul.f32 %v3184_v61, %v3852_v3  ;;  %v1487_v23 = vmul.f32 %v3177_v2, %v3128_v40  ;;  %v1514_v36 = vmul.f32 %v3205_v53, %v3299_v25 }
 0x152   : > { %v1469_v41 = vadd.f32 %v1461_v5, %v1443_v8  ;;  %v1144_v62 = vmin.f32 %v1136_v11, 6.0  ;;  %v1024_v38 = vadd.f32 %v1016_v28, %v998_v33  ;;  %v474_v29 = vadd.f32 %v3069_v59, %v473_v1 }
 0x153   : > { %v1626_v16 = vadd.f32 %v1618_v22, %v1600_v18  ;;  %v1121_v60 = vmul.f32 %v3212_v12, %v3398_v63  ;;  %v912_v8 = vmul.f32 %v3090_v10, %v3163_v58  ;;  %v938_v5 = vmul.f32 %v3095_v44, %v928_v34  ;;  %v1452_v18 = vld [vmem:[#allocation2 + $0x151] sm:$0xff] }
 0x154   : > { %v1495_v13 = vadd.f32 %v1487_v23, %v1469_v41  ;;  %1781 = vmatmul.f32.gmra.mxu1 %v1144_v62  ;;  %v1050_v61 = vadd.f32 %v1042_v27, %v1024_v38  ;;  %v1540_v22 = vmul.f32 %v3189_v6, %v3097_v35  ;;  %v511_v28 = vmax.f32 %v474_v29, 0.0  ;;  %v3853_v38 = vld [vmem:[#allocation7_spill] sm:$0xff] }
 0x155   : > { %v1652_v40 = vadd.f32 %v1644_v20, %v1626_v16  ;;  %v1566_v59 = vmul.f32 %v3228_v50, %v3308_v7  ;;  %v920_v23 = vadd.f32 %v3219_v49, %v912_v8  ;;  %v964_v1 = vmul.f32 %v3110_v15, %v3198_v43  ;;  %v3430_v29 = vld [vmem:[#allocation2 + $0x172] sm:$0xff] }
 0x156   : > { %v1522_v11 = vadd.f32 %v1514_v36, %v1495_v13  ;;  %v1077_v33 = vadd.f32 %v1069_v24, %v1050_v61  ;;  %v1593_v20 = vmul.f32 %v3233_v48, %v3409_v32  ;;  %v547_v27 = vmin.f32 %v511_v28, 6.0  ;;  %v3441_v28 = vld [vmem:[#allocation2 + $0xc2] sm:$0xff] }
 0x157   : > { %v1660_v58 = vmax.f32 %v1652_v40, 0.0  ;;  %v946_v41 = vadd.f32 %v938_v5, %v920_v23  ;;  %v991_v35 = vmul.f32 %v3136_v31, %v3327_v56  ;;  %v1436_v36 = vmul.f32 %v3154_v57, %v3237_v55  ;;  %v929_v55 = vld [vmem:[#allocation2 + $0x99] sm:$0xff] }
 0x158   : > { %v1548_v34 = vadd.f32 %v1540_v22, %v1522_v11  ;;  %v1103_v16 = vadd.f32 %v1095_v9, %v1077_v33  ;;  %v1619_v43 = vmul.f32 %v3246_v47, %v3853_v38  ;;  %583 = vst [vmem:[#allocation2 + $0x1a1] sm:$0xff] %v547_v27  ;;  %v1462_v61 = vmul.f32 %v3168_v54, %v1452_v18 }
 0x159   : > { %v1668_v62 = vmin.f32 %v1660_v58, 6.0  ;;  %629 = vst [vmem:[#allocation2 + $0x1a0] sm:$0xff] %v3387_v30  ;;  %v972_v13 = vadd.f32 %v964_v1, %v946_v41  ;;  %v1444_v8 = vadd.f32 %v3219_v49, %v1436_v36  ;;  %v1488_v5 = vmul.f32 %v3177_v2, %v3847_v17 }
 0x15a   : > { %v1574_v24 = vadd.f32 %v1566_v59, %v1548_v34  ;;  %v1129_v9 = vadd.f32 %v1121_v60, %v1103_v16  ;;  %630 = vst [vmem:[#allocation2 + $0x1a8] sm:$0x3] %v3387_v30  ;;  %v1017_v40 = vmul.f32 %v3141_v51, %v3845_v46  ;;  %v1043_v22 = vmul.f32 %v3161_v37, %v3334_v45  ;;  %v3452_v34 = vld [vmem:[#allocation2 + $0x180] sm:$0xff] }
 0x15b   : > { %1829 = vmatmul.f32.gmra.mxu3 %v1668_v62  ;;  %v999_v59 = vadd.f32 %v991_v35, %v972_v13  ;;  %v1470_v23 = vadd.f32 %v1462_v61, %v1444_v8  ;;  %v1515_v1 = vmul.f32 %v3205_v53, %v3351_v26  ;;  %v1645_v60 = vmul.f32 %v3251_v21, %v3430_v29  ;;  %v1453_v13 = vld [vmem:[#allocation2 + $0x159] sm:$0xff] }
 0x15c   : > { %v1601_v11 = vadd.f32 %v1593_v20, %v1574_v24  ;;  %v1137_v17 = vmax.f32 %v1129_v9, 0.0  ;;  %v913_v18 = vmul.f32 %v3090_v10, %v3274_v4  ;;  %v939_v46 = vmul.f32 %v3095_v44, %v929_v55  ;;  %v3461_v24 = vld [vmem:[#allocation2 + $0x182] sm:$0xff] }
 0x15d   : > { %v1025_v33 = vadd.f32 %v1017_v40, %v999_v59  ;;  %v1122_v27 = vmul.f32 %v3212_v12, %v3441_v28  ;;  %v1496_v20 = vadd.f32 %v1488_v5, %v1470_v23  ;;  %v1541_v35 = vmul.f32 %v3189_v6, %v3850_v0 }
 0x15e   : > { %v1627_v58 = vadd.f32 %v1619_v43, %v1601_v11  ;;  %v1145_v41 = vmin.f32 %v1137_v17, 6.0  ;;  %v921_v36 = vadd.f32 %v3219_v49, %v913_v18  ;;  %v965_v62 = vmul.f32 %v3110_v15, %v3281_v14  ;;  %v3854_v18 = vld [vmem:[#allocation10_spill] sm:$0xff] }
 0x15f   : > { %v1051_v16 = vadd.f32 %v1043_v22, %v1025_v33  ;;  %v1523_v61 = vadd.f32 %v1515_v1, %v1496_v20  ;;  %v1567_v43 = vmul.f32 %v3228_v50, %v3367_v39  ;;  %v1594_v8 = vmul.f32 %v3233_v48, %v3452_v34  ;;  %v3470_v22 = vld [vmem:[#allocation2 + $0xc8] sm:$0xff] }
 0x160   : > { %v1653_v4 = vadd.f32 %v1645_v60, %v1627_v58  ;;  %1784 = vmatmul.f32.gmra.mxu1 %v1145_v41  ;;  %v1620_v0 = vmul.f32 %v3246_v47, %v3295_v42  ;;  %v947_v5 = vadd.f32 %v939_v46, %v921_v36  ;;  %v992_v14 = vmul.f32 %v3136_v31, %v3377_v19  ;;  %v930_v20 = vld [vmem:[#allocation2 + $0xa9] sm:$0xff] }
 0x161   : > { %v1078_v9 = vadd.f32 %v3371_v52, %v1051_v16  ;;  %v1549_v40 = vadd.f32 %v1541_v35, %v1523_v61  ;;  %v1437_v11 = vmul.f32 %v3154_v57, %v3299_v25  ;;  %v1646_v59 = vmul.f32 %v3251_v21, %v3461_v24  ;;  %v3480_v52 = vld [vmem:[#allocation2 + $0xc9] sm:$0xff]  ;;  %v3855_v35 = vld [vmem:[#allocation8_spill] sm:$0xff] }
 0x162   : > { %v1661_v55 = vmax.f32 %v1653_v4, 0.0  ;;  %v973_v23 = vadd.f32 %v965_v62, %v947_v5  ;;  %v1018_v1 = vmul.f32 %v3141_v51, %v3852_v3  ;;  %v1463_v17 = vmul.f32 %v3168_v54, %v1453_v13  ;;  %v3487_v62 = vld [vmem:[#allocation2 + $0xca] sm:$0xff] }
 0x163   : > { %v1104_v46 = vadd.f32 %v3854_v18, %v1078_v9  ;;  %v1575_v58 = vadd.f32 %v1567_v43, %v1549_v40  ;;  %v1445_v33 = vadd.f32 %v3219_v49, %v1437_v11  ;;  %v1044_v25 = vmul.f32 %v3161_v37, %v3398_v63 }
 0x164   : > { %v1669_v60 = vmin.f32 %v1661_v55, 6.0  ;;  %v1000_v41 = vadd.f32 %v992_v14, %v973_v23  ;;  %v1071_v36 = vmul.f32 %v3855_v35, %v3470_v22  ;;  %v1489_v4 = vmul.f32 %v3177_v2, %v3308_v7  ;;  %v3856_v14 = vld [vmem:[#allocation12_spill] sm:$0xff] }
 0x165   : > { %v1130_v16 = vadd.f32 %v1122_v27, %v1104_v46  ;;  %v1602_v61 = vadd.f32 %v1594_v8, %v1575_v58  ;;  %v1471_v43 = vadd.f32 %v1463_v17, %v1445_v33  ;;  %v1516_v13 = vmul.f32 %v3205_v53, %v3409_v32  ;;  %v3500_v8 = vld [vmem:[#allocation2 + $0x188] sm:$0xff] }
 0x166   : > { %1832 = vmatmul.f32.gmra.mxu3 %v1669_v60  ;;  %v1026_v5 = vadd.f32 %v1018_v1, %v1000_v41  ;;  %v1097_v55 = vmul.f32 %v3856_v14, %v3480_v52  ;;  %v914_v9 = vmul.f32 %v3090_v10, %v3327_v56  ;;  %v940_v40 = vmul.f32 %v3095_v44, %v930_v20  ;;  %v3504_v60 = vld [vmem:[#allocation2 + $0x18a] sm:$0xff] }
 0x167   : > { %v1138_v11 = vmax.f32 %v1130_v16, 0.0  ;;  %v1628_v23 = vadd.f32 %v1620_v0, %v1602_v61  ;;  %v1123_v7 = vmul.f32 %v3212_v12, %v3487_v62  ;;  %v1497_v27 = vadd.f32 %v1489_v4, %v1471_v43 }
 0x168   : > { %v1052_v17 = vadd.f32 %v1044_v25, %v1026_v5  ;;  %v1542_v1 = vmul.f32 %v3189_v6, %v3853_v38  ;;  %v922_v18 = vadd.f32 %v3219_v49, %v914_v9  ;;  %v966_v56 = vmul.f32 %v3110_v15, %v3334_v45  ;;  %v3857_v25 = vld [vmem:[#allocation11_spill] sm:$0xff]  ;;  %v3858_v5 = vld [vmem:[#allocation9_spill] sm:$0xff]  ;;  %v3521_v9 = vld [vmem:[#allocation2 + $0xd8] sm:$0xff] }
 0x169   : > { %v1146_v46 = vmin.f32 %v1138_v11, 6.0  ;;  %v1654_v58 = vadd.f32 %v1646_v59, %v1628_v23  ;;  %v1524_v0 = vadd.f32 %v1516_v13, %v1497_v27  ;;  %v1568_v33 = vmul.f32 %v3228_v50, %v3430_v29  ;;  %v3523_v11 = vld [vmem:[#allocation2 + $0xd9] sm:$0xff] }
 0x16a   : > { %v1079_v20 = vadd.f32 %v1071_v36, %v1052_v17  ;;  %v1595_v41 = vmul.f32 %v3233_v48, %v3500_v8  ;;  %v1621_v38 = vmul.f32 %v3246_v47, %v3857_v25  ;;  %v948_v4 = vadd.f32 %v940_v40, %v922_v18 }
 0x16b   : > { %1787 = vmatmul.f32.gmra.mxu1 %v1146_v46  ;;  %v1662_v16 = vmax.f32 %v1654_v58, 0.0  ;;  %v1550_v61 = vadd.f32 %v1542_v1, %v1524_v0  ;;  %v1647_v45 = vmul.f32 %v3251_v21, %v3504_v60  ;;  %v915_v59 = vmul.f32 %v3090_v10, %v3377_v19  ;;  %v3527_v1 = vld [vmem:[#allocation2 + $0xda] sm:$0xff] }
 0x16c   : > { %v1105_v43 = vadd.f32 %v1097_v55, %v1079_v20  ;;  %v974_v13 = vadd.f32 %v966_v56, %v948_v4  ;;  %v993_v36 = vmul.f32 %v3136_v31, %v3858_v5  ;;  %v941_v40 = vmul.f32 %v3095_v44, %v3852_v3  ;;  %v3859_v56 = vld [vmem:[#allocation15_spill] sm:$0xff] }
 0x16d   : > { %v1752_v23 = vpop.f32.mrf.mxu1  ;;  %v1670_v27 = vmin.f32 %v1662_v16, 6.0  ;;  %v1576_v17 = vadd.f32 %v1568_v33, %v1550_v61  ;;  %v923_v18 = vadd.f32 %v3219_v49, %v915_v59  ;;  %v967_v10 = vmul.f32 %v3110_v15, %v3398_v63  ;;  %v1454_v44 = vld [vmem:[#allocation2 + $0x169] sm:$0xff]  ;;  %v1063_v59 = vld [vmem:[#allocation2 + $0xe0] sm:$0xff] }
 0x16e   : > { %v1131_v19 = vadd.f32 %v1123_v7, %v1105_v43  ;;  %v1001_v55 = vadd.f32 %v993_v36, %v974_v13  ;;  %v1019_v46 = vmul.f32 %v3141_v51, %v3859_v56  ;;  %v1045_v58 = vmul.f32 %v3161_v37, %v3441_v28  ;;  %v3551_v13 = vld [vmem:[%s3776_s6] ss:$0 sm:$0xff] }
 0x16f   : > { %1835 = vmatmul.f32.gmra.mxu3 %v1670_v27  ;;  %v1603_v3 = vadd.f32 %v1595_v41, %v1576_v17  ;;  %v1072_v0 = vmul.f32 %v3855_v35, %v3521_v9  ;;  %v1098_v33 = vmul.f32 %v3856_v14, %v3523_v11  ;;  %v949_v20 = vadd.f32 %v941_v40, %v923_v18 }
 0x170   : > { %v1139_v4 = vmax.f32 %v1131_v19, 0.0  ;;  %v1027_v15 = vadd.f32 %v1019_v46, %v1001_v55  ;;  %v1124_v63 = vmul.f32 %v3212_v12, %v3527_v1  ;;  %v1438_v7 = vmul.f32 %v3154_v57, %v3351_v26 }
 0x171   : > { %v1629_v16 = vadd.f32 %v1621_v38, %v1603_v3  ;;  %v975_v61 = vadd.f32 %v967_v10, %v949_v20  ;;  %v994_v41 = vmul.f32 %v3136_v31, %v3470_v22  ;;  %v1464_v43 = vmul.f32 %v3168_v54, %v1454_v44 }
 0x172   : > { %v1147_v36 = vmin.f32 %v1139_v4, 6.0  ;;  %v1053_v40 = vadd.f32 %v1045_v58, %v1027_v15  ;;  %v1446_v26 = vadd.f32 %v3219_v49, %v1438_v7  ;;  %v1490_v38 = vmul.f32 %v3177_v2, %v3367_v39  ;;  %v2076_v39 = vld [vmem:[%s2484_s23 + $0x19] sm:$0xff]  ;;  %v1115_v15 = vld [vmem:[#allocation2 + $0xe2] sm:$0xff] }
 0x173   : > { %v1655_v27 = vadd.f32 %v1647_v45, %v1629_v16  ;;  %v1002_v17 = vadd.f32 %v994_v41, %v975_v61  ;;  %v1020_v31 = vmul.f32 %v3141_v51, %v3480_v52  ;;  %v1046_v22 = vmul.f32 %v3161_v37, %v3487_v62  ;;  %v1089_v62 = vld [vmem:[#allocation2 + $0xe1] sm:$0xff] }
 0x174   : > { %1790 = vmatmul.f32.gmra.mxu1 %v1147_v36  ;;  %v1080_v18 = vadd.f32 %v1072_v0, %v1053_v40  ;;  %v1073_v10 = vmul.f32 %v3855_v35, %v1063_v59  ;;  %v1472_v19 = vadd.f32 %v1464_v43, %v1446_v26  ;;  %v1517_v55 = vmul.f32 %v3205_v53, %v3452_v34  ;;  %v2247_v34 = vld [vmem:[%s3773_s3] ss:$0 sm:$0xff] }
 0x175   : > { %v3568_v45 = vpop.f32.mrf.mxu1  ;;  %v1663_v46 = vmax.f32 %v1655_v27, 0.0  ;;  %v1028_v58 = vadd.f32 %v1020_v31, %v1002_v17  ;;  %v1543_v51 = vmul.f32 %v3189_v6, %v3295_v42  ;;  %v1753_v37 = vadd.f32 %v3551_v13, %v1752_v23  ;;  %v2248_v42 = vld [vmem:[%s3773_s3 + $0x1] ss:$0 sm:$0xff] }
 0x176   : > { %v1106_v52 = vadd.f32 %v1098_v33, %v1080_v18  ;;  %v1498_v44 = vadd.f32 %v1490_v38, %v1472_v19  ;;  %v1569_v35 = vmul.f32 %v3228_v50, %v3461_v24  ;;  %v1170_v3 = vmul.f32 %v2247_v34, %v3858_v5  ;;  %v1612_v24 = vld [vmem:[#allocation2 + $0x199] sm:$0xff]  ;;  %v2249_v5 = vld [vmem:[%s3773_s3 + $0x2] ss:$0 sm:$0xff]  ;;  %v1455_v38 = vld [vmem:[#allocation2 + $0x171] sm:$0xff] }
 0x177   : > { %v1671_v0 = vmin.f32 %v1663_v46, 6.0  ;;  %v1054_v20 = vadd.f32 %v1046_v22, %v1028_v58  ;;  %v1883_v4 = vadd.f32 %v2076_v39, %v1753_v37  ;;  %v1196_v23 = vmul.f32 %v2248_v42, %v3859_v56  ;;  %v1638_v56 = vld [vmem:[#allocation2 + $0x19a] sm:$0xff]  ;;  %v2252_v58 = vld [vmem:[%s3773_s3 + $0x6] ss:$0 sm:$0xff]  ;;  %v2078_v34 = vld [vmem:[%s2484_s23 + $0x31] sm:$0xff] }
 0x178   : > { %v1132_v33 = vadd.f32 %v1124_v63, %v1106_v52  ;;  %v1525_v7 = vadd.f32 %v1517_v55, %v1498_v44  ;;  %v1178_v16 = vadd.f32 %v3219_v49, %v1170_v3  ;;  %v1222_v61 = vmul.f32 %v2249_v5, %v3441_v28  ;;  %v2250_v28 = vld [vmem:[%s3773_s3 + $0x4] ss:$0 sm:$0xff] }
 0x179   : > { %1838 = vmatmul.f32.gmra.mxu3 %v1671_v0  ;;  %v1081_v41 = vadd.f32 %v1073_v10, %v1054_v20  ;;  %v1099_v59 = vmul.f32 %v3856_v14, %v1089_v62  ;;  %v3591_v43 = vmul.f32 %v3387_v30, %v3233_v48  ;;  %1915 = vst [vmem:[%s3594_s15] sm:$0xff] %v1883_v4  ;;  %v1318_v30 = vld [vmem:[#allocation2 + $0xf0] sm:$0xff]  ;;  %v2093_v42 = vld [vmem:[%s2484_s23 + $0xe1] sm:$0xff] }
 0x17a   : > { %v1140_v63 = vmax.f32 %v1132_v33, 0.0  ;;  %v1551_v36 = vadd.f32 %v1543_v51, %v1525_v7  ;;  %v1204_v40 = vadd.f32 %v1196_v23, %v1178_v16  ;;  %v1249_v26 = vmul.f32 %v2250_v28, %v3521_v9  ;;  %v2251_v9 = vld [vmem:[%s3773_s3 + $0x5] ss:$0 sm:$0xff]  ;;  %v1344_v20 = vld [vmem:[#allocation2 + $0xf1] sm:$0xff]  ;;  %v2254_v7 = vld [vmem:[%s3773_s3 + $0x9] ss:$0 sm:$0xff] }
 0x17b   : > { %v1107_v14 = vadd.f32 %v1099_v59, %v1081_v41  ;;  %v1125_v27 = vmul.f32 %v3212_v12, %v1115_v15  ;;  %v1622_v48 = vmul.f32 %v3246_v47, %v1612_v24  ;;  %v1439_v17 = vmul.f32 %v3154_v57, %v3409_v32  ;;  %v1370_v23 = vld [vmem:[#allocation2 + $0xf2] sm:$0xff] }
 0x17c   : > { %v1148_v31 = vmin.f32 %v1140_v63, 6.0  ;;  %v1577_v22 = vadd.f32 %v1569_v35, %v1551_v36  ;;  %v1648_v18 = vmul.f32 %v3251_v21, %v1638_v56  ;;  %v1230_v10 = vadd.f32 %v1222_v61, %v1204_v40  ;;  %v2077_v35 = vld [vmem:[%s2484_s23 + $0x21] sm:$0xff]  ;;  %v2255_v56 = vld [vmem:[%s3773_s3 + $0xa] ss:$0 sm:$0xff]  ;;  %v2079_v28 = vld [vmem:[%s2484_s23 + $0x39] sm:$0xff] }
 0x17d   : > { %v1758_v19 = vpop.f32.mrf.mxu1  ;;  %v1133_v55 = vadd.f32 %v1125_v27, %v1107_v14  ;;  %v1275_v12 = vmul.f32 %v2251_v9, %v3523_v11  ;;  %v1447_v39 = vadd.f32 %v3219_v49, %v1439_v17  ;;  %v1465_v46 = vmul.f32 %v3168_v54, %v1455_v38  ;;  %v2253_v11 = vld [vmem:[%s3773_s3 + $0x8] ss:$0 sm:$0xff]  ;;  %v1803_v52 = vpop.f32.mrf.mxu3 }
 0x17e   : > { %1793 = vmatmul.f32.gmra.mxu1 %v1148_v31  ;;  %v1604_v32 = vadd.f32 %v3591_v43, %v1577_v22  ;;  %v1257_v57 = vadd.f32 %v1249_v26, %v1230_v10  ;;  %v1301_v51 = vmul.f32 %v2252_v58, %v3527_v1  ;;  %v1328_v37 = vmul.f32 %v2253_v11, %v1318_v30  ;;  %v1613_v36 = vld [vmem:[#allocation2 + $0x1a1] sm:$0xff]  ;;  %v2095_v58 = vld [vmem:[%s2484_s23 + $0xf9] sm:$0xff] }
 0x17f   : > { %v1141_v49 = vmax.f32 %v1133_v55, 0.0  ;;  %v1473_v62 = vadd.f32 %v1465_v46, %v1447_v39  ;;  %v1491_v54 = vmul.f32 %v3177_v2, %v3430_v29  ;;  %v1518_v44 = vmul.f32 %v3205_v53, %v3500_v8  ;;  %v1639_v27 = vld [vmem:[#allocation2 + $0x1a2] sm:$0xff] }
 0x180   : > { %v1630_v3 = vadd.f32 %v1622_v48, %v1604_v32  ;;  %v1283_v0 = vadd.f32 %v1275_v12, %v1257_v57  ;;  %v1756_v1 = vadd.f32 %v3551_v13, %v3568_v45  ;;  %v1759_v4 = vadd.f32 %v3551_v13, %v1758_v19  ;;  %v2080_v39 = vld [vmem:[%s2484_s23 + $0x49] sm:$0xff] }
 0x181   : > { %v1499_v33 = vadd.f32 %v1491_v54, %v1473_v62  ;;  %v1804_v15 = vadd.f32 %v3551_v13, %v1803_v52  ;;  %v1354_v24 = vmul.f32 %v2254_v7, %v1344_v20  ;;  %v1544_v16 = vmul.f32 %v3189_v6, %v3857_v25  ;;  %v2082_v20 = vld [vmem:[%s2484_s23 + $0x61] sm:$0xff] }
 0x182   : > { %v1656_v2 = vadd.f32 %v1648_v18, %v1630_v3  ;;  %v1309_v29 = vadd.f32 %v1301_v51, %v1283_v0  ;;  %v1884_v53 = vadd.f32 %v2077_v35, %v1756_v1  ;;  %v1885_v8 = vadd.f32 %v2078_v34, %v1759_v4  ;;  %v2094_v18 = vld [vmem:[%s2484_s23 + $0xf1] sm:$0xff]  ;;  %v2096_v35 = vld [vmem:[%s2484_s23 + $0x109] sm:$0xff]  ;;  %v2098_v7 = vld [vmem:[%s2484_s23 + $0x121] sm:$0xff] }
 0x183   : > { %v1526_v45 = vadd.f32 %v1518_v44, %v1499_v33  ;;  %v1900_v5 = vadd.f32 %v2093_v42, %v1804_v15  ;;  %v1149_v61 = vmin.f32 %v1141_v49, 6.0  ;;  %v1380_v63 = vmul.f32 %v2255_v56, %v1370_v23  ;;  %v2081_v49 = vld [vmem:[%s2484_s23 + $0x51] sm:$0xff] }
 0x184   : > { %v1664_v41 = vmax.f32 %v1656_v2, 0.0  ;;  %v1336_v59 = vadd.f32 %v1328_v37, %v1309_v29  ;;  %1916 = vst [vmem:[%s3594_s15 + $0x8] sm:$0xff] %v1884_v53  ;;  %v1570_v38 = vmul.f32 %v3228_v50, %v3504_v60  ;;  %v1623_v30 = vmul.f32 %v3246_v47, %v1613_v36  ;;  %v2097_v4 = vld [vmem:[%s2484_s23 + $0x111] sm:$0xff]  ;;  %v2083_v29 = vld [vmem:[%s2484_s23 + $0x69] sm:$0xff] }
 0x185   : > { %v1761_v40 = vpop.f32.mrf.mxu1  ;;  %v1552_v26 = vadd.f32 %v1544_v16, %v1526_v45  ;;  %1917 = vst [vmem:[%s3594_s15 + $0x10] sm:$0xff] %v1885_v8  ;;  %v1649_v60 = vmul.f32 %v3251_v21, %v1639_v27 }
 0x186   : > { %v1762_v6 = vadd.f32 %v3551_v13, %v1761_v40  ;;  %1796 = vmatmul.f32.gmra.mxu1 %v1149_v61  ;;  %v1672_v25 = vmin.f32 %v1664_v41, 6.0  ;;  %v1362_v14 = vadd.f32 %v1354_v24, %v1336_v59  ;;  %1932 = vst [vmem:[%s3594_s15 + $0x88] sm:$0xff] %v1900_v5  ;;  %v2084_v61 = vld [vmem:[%s2484_s23 + $0x79] sm:$0xff]  ;;  %v2099_v59 = vld [vmem:[%s2484_s23 + $0x129] sm:$0xff] }
 0x187   : > { %v1578_v48 = vadd.f32 %v1570_v38, %v1552_v26  ;;  %v2085_v26 = vld [vmem:[%s2484_s23 + $0x81] sm:$0xff] }
 0x188   : > { %v1886_v17 = vadd.f32 %v2079_v28, %v1762_v6  ;;  %1841 = vmatmul.f32.gmra.mxu3 %v1672_v25  ;;  %v1388_v31 = vadd.f32 %v1380_v63, %v1362_v14  ;;  %v2100_v25 = vld [vmem:[%s2484_s23 + $0x139] sm:$0xff] }
 0x189   : > { %v1806_v22 = vpop.f32.mrf.mxu3  ;;  %v1605_v50 = vadd.f32 %v3591_v43, %v1578_v48 }
 0x18a   : > { %1918 = vst [vmem:[%s3594_s15 + $0x18] sm:$0xff] %v1886_v17  ;;  %v1807_v10 = vadd.f32 %v3551_v13, %v1806_v22  ;;  %v1396_v19 = vmax.f32 %v1388_v31, 0.0  ;;  %v2086_v17 = vld [vmem:[%s2484_s23 + $0x91] sm:$0xff] }
 0x18b   : > { %v1631_v55 = vadd.f32 %v1623_v30, %v1605_v50 }
 0x18c   : > { %v1901_v9 = vadd.f32 %v2094_v18, %v1807_v10  ;;  %v1404_v12 = vmin.f32 %v1396_v19, 6.0  ;;  %v2101_v18 = vld [vmem:[%s2484_s23 + $0x141] sm:$0xff] }
 0x18d   : > { %v1657_v46 = vadd.f32 %v1649_v60, %v1631_v55  ;;  %v2087_v55 = vld [vmem:[%s2484_s23 + $0x99] sm:$0xff] }
 0x18e   : > { %v1764_v47 = vpop.f32.mrf.mxu1  ;;  %1933 = vst [vmem:[%s3594_s15 + $0x90] sm:$0xff] %v1901_v9  ;;  %1799 = vmatmul.f32.gmra.mxu1 %v1404_v12  ;;  %v2102_v12 = vld [vmem:[%s2484_s23 + $0x151] sm:$0xff] }
 0x18f   : > { %v1765_v32 = vadd.f32 %v3551_v13, %v1764_v47  ;;  %v1665_v21 = vmax.f32 %v1657_v46, 0.0 }
 0x191   : > { %v1887_v43 = vadd.f32 %v2080_v39, %v1765_v32  ;;  %v1809_v57 = vpop.f32.mrf.mxu3  ;;  %v1673_v51 = vmin.f32 %v1665_v21, 6.0 }
 0x192   : > { %v1810_v11 = vadd.f32 %v3551_v13, %v1809_v57 }
 0x193   : > { %1919 = vst [vmem:[%s3594_s15 + $0x20] sm:$0xff] %v1887_v43  ;;  %1844 = vmatmul.f32.gmra.mxu3 %v1673_v51  ;;  %v2088_v43 = vld [vmem:[%s2484_s23 + $0xa9] sm:$0xff] }
 0x194   : > { %v1902_v37 = vadd.f32 %v2095_v58, %v1810_v11  ;;  %v2103_v58 = vld [vmem:[%s2484_s23 + $0x159] sm:$0xff] }
 0x196   : > { %v1767_v52 = vpop.f32.mrf.mxu1  ;;  %1934 = vst [vmem:[%s3594_s15 + $0x98] sm:$0xff] %v1902_v37 }
 0x197   : > { %v1768_v62 = vadd.f32 %v3551_v13, %v1767_v52 }
 0x199   : > { %v1888_v54 = vadd.f32 %v2081_v49, %v1768_v62  ;;  %v1812_v44 = vpop.f32.mrf.mxu3  ;;  %v2089_v62 = vld [vmem:[%s2484_s23 + $0xb1] sm:$0xff] }
 0x19a   : > { %v1813_v34 = vadd.f32 %v3551_v13, %v1812_v44 }
 0x19b   : > { %1920 = vst [vmem:[%s3594_s15 + $0x28] sm:$0xff] %v1888_v54 }
 0x19c   : > { %v1903_v3 = vadd.f32 %v2096_v35, %v1813_v34  ;;  %v2104_v35 = vld [vmem:[%s2484_s23 + $0x169] sm:$0xff] }
 0x19e   : > { %1935 = vst [vmem:[%s3594_s15 + $0xa0] sm:$0xff] %v1903_v3 }
 0x1a1   : > { %v1815_v1 = vpop.f32.mrf.mxu3 }
 0x1a2   : > { %v1770_v0 = vpop.f32.mrf.mxu1  ;;  %v1816_v23 = vadd.f32 %v3551_v13, %v1815_v1  ;;  %v2090_v1 = vld [vmem:[%s2484_s23 + $0xc1] sm:$0xff] }
 0x1a3   : > { %v1771_v42 = vadd.f32 %v3551_v13, %v1770_v0 }
 0x1a4   : > { %v1904_v15 = vadd.f32 %v2097_v4, %v1816_v23  ;;  %v2105_v23 = vld [vmem:[%s2484_s23 + $0x171] sm:$0xff] }
 0x1a5   : > { %v1889_v33 = vadd.f32 %v2082_v20, %v1771_v42 }
 0x1a6   : > { %1936 = vst [vmem:[%s3594_s15 + $0xa8] sm:$0xff] %v1904_v15 }
 0x1a7   : > { %1921 = vst [vmem:[%s3594_s15 + $0x30] sm:$0xff] %v1889_v33 }
 0x1af   : > { %v1773_v2 = vpop.f32.mrf.mxu1 }
 0x1b0   : > { %v1774_v53 = vadd.f32 %v3551_v13, %v1773_v2  ;;  %v1818_v8 = vpop.f32.mrf.mxu3 }
 0x1b1   : > { %v1819_v24 = vadd.f32 %v3551_v13, %v1818_v8 }
 0x1b2   : > { %v1890_v45 = vadd.f32 %v2083_v29, %v1774_v53  ;;  %v2091_v53 = vld [vmem:[%s2484_s23 + $0xc9] sm:$0xff] }
 0x1b3   : > { %v1905_v16 = vadd.f32 %v2098_v7, %v1819_v24 }
 0x1b4   : > { %1922 = vst [vmem:[%s3594_s15 + $0x38] sm:$0xff] %v1890_v45  ;;  %v2106_v45 = vld [vmem:[%s2484_s23 + $0x181] sm:$0xff] }
 0x1b5   : > { %1937 = vst [vmem:[%s3594_s15 + $0xb0] sm:$0xff] %v1905_v16 }
 0x1bb   : > { %v1821_v41 = vpop.f32.mrf.mxu3 }
 0x1bc   : > { %v1776_v5 = vpop.f32.mrf.mxu1  ;;  %v1822_v63 = vadd.f32 %v3551_v13, %v1821_v41 }
 0x1bd   : > { %v1777_v56 = vadd.f32 %v3551_v13, %v1776_v5  ;;  %v2092_v5 = vld [vmem:[%s2484_s23 + $0xd9] sm:$0xff] }
 0x1be   : > { %v1906_v40 = vadd.f32 %v2099_v59, %v1822_v63 }
 0x1bf   : > { %v1891_v36 = vadd.f32 %v2084_v61, %v1777_v56 }
 0x1c0   : > { %1938 = vst [vmem:[%s3594_s15 + $0xb8] sm:$0xff] %v1906_v40 }
 0x1c1   : > { %1923 = vst [vmem:[%s3594_s15 + $0x40] sm:$0xff] %v1891_v36  ;;  %v2107_v36 = vld [vmem:[%s2484_s23 + $0x189] sm:$0xff] }
 0x1c7   : > { %v1779_v28 = vpop.f32.mrf.mxu1 }
 0x1c8   : > { %v1780_v38 = vadd.f32 %v3551_v13, %v1779_v28  ;;  %v1824_v6 = vpop.f32.mrf.mxu3 }
 0x1c9   : > { %v1825_v14 = vadd.f32 %v3551_v13, %v1824_v6 }
 0x1ca   : > { %v1892_v27 = vadd.f32 %v2085_v26, %v1780_v38 }
 0x1cb   : > { %v1907_v48 = vadd.f32 %v2100_v25, %v1825_v14 }
 0x1cc   : > { %1924 = vst [vmem:[%s3594_s15 + $0x48] sm:$0xff] %v1892_v27 }
 0x1cd   : > { %1939 = vst [vmem:[%s3594_s15 + $0xc0] sm:$0xff] %v1907_v48 }
 0x1d1   : > { %v1782_v30 = vpop.f32.mrf.mxu1 }
 0x1d2   : > { %v1783_v31 = vadd.f32 %v3551_v13, %v1782_v30  ;;  %v1827_v22 = vpop.f32.mrf.mxu3 }
 0x1d3   : > { %v1828_v50 = vadd.f32 %v3551_v13, %v1827_v22 }
 0x1d4   : > { %v1893_v60 = vadd.f32 %v2086_v17, %v1783_v31 }
 0x1d5   : > { %v1908_v10 = vadd.f32 %v2101_v18, %v1828_v50 }
 0x1d6   : > { %1925 = vst [vmem:[%s3594_s15 + $0x50] sm:$0xff] %v1893_v60 }
 0x1d7   : > { %1940 = vst [vmem:[%s3594_s15 + $0xc8] sm:$0xff] %v1908_v10 }
 0x1dd   : > { %v1785_v19 = vpop.f32.mrf.mxu1 }
 0x1de   : > { %v1830_v9 = vpop.f32.mrf.mxu3  ;;  %v1786_v47 = vadd.f32 %v3551_v13, %v1785_v19 }
 0x1df   : > { %v1831_v39 = vadd.f32 %v3551_v13, %v1830_v9 }
 0x1e0   : > { %v1894_v46 = vadd.f32 %v2087_v55, %v1786_v47 }
 0x1e1   : > { %v1909_v32 = vadd.f32 %v2102_v12, %v1831_v39 }
 0x1e2   : > { %1926 = vst [vmem:[%s3594_s15 + $0x58] sm:$0xff] %v1894_v46 }
 0x1e3   : > { %1941 = vst [vmem:[%s3594_s15 + $0xd0] sm:$0xff] %v1909_v32 }
 0x1e8   : > { %v1788_v21 = vpop.f32.mrf.mxu1 }
 0x1e9   : > { %v1833_v57 = vpop.f32.mrf.mxu3  ;;  %v1789_v51 = vadd.f32 %v3551_v13, %v1788_v21 }
 0x1ea   : > { %v1834_v11 = vadd.f32 %v3551_v13, %v1833_v57 }
 0x1eb   : > { %v1895_v37 = vadd.f32 %v2088_v43, %v1789_v51 }
 0x1ec   : > { %v1910_v52 = vadd.f32 %v2103_v58, %v1834_v11 }
 0x1ed   : > { %1927 = vst [vmem:[%s3594_s15 + $0x60] sm:$0xff] %v1895_v37 }
 0x1ee   : > { %1942 = vst [vmem:[%s3594_s15 + $0xd8] sm:$0xff] %v1910_v52 }
 0x1f1   : > { %v1791_v49 = vpop.f32.mrf.mxu1 }
 0x1f2   : > { %v1792_v54 = vadd.f32 %v3551_v13, %v1791_v49  ;;  %v1836_v44 = vpop.f32.mrf.mxu3 }
 0x1f3   : > { %v1837_v34 = vadd.f32 %v3551_v13, %v1836_v44 }
 0x1f4   : > { %v1896_v3 = vadd.f32 %v2089_v62, %v1792_v54 }
 0x1f5   : > { %v1911_v0 = vadd.f32 %v2104_v35, %v1837_v34 }
 0x1f6   : > { %1928 = vst [vmem:[%s3594_s15 + $0x68] sm:$0xff] %v1896_v3 }
 0x1f7   : > { %1943 = vst [vmem:[%s3594_s15 + $0xe0] sm:$0xff] %v1911_v0 }
 0x1fb   : > { %v1794_v20 = vpop.f32.mrf.mxu1 }
 0x1fc   : > { %v1795_v4 = vadd.f32 %v3551_v13, %v1794_v20  ;;  %v1839_v42 = vpop.f32.mrf.mxu3 }
 0x1fd   : > { %v1840_v33 = vadd.f32 %v3551_v13, %v1839_v42 }
 0x1fe   : > { %v1897_v15 = vadd.f32 %v2090_v1, %v1795_v4 }
 0x1ff   : > { %v1912_v2 = vadd.f32 %v2105_v23, %v1840_v33 }
 0x200   : > { %1929 = vst [vmem:[%s3594_s15 + $0x70] sm:$0xff] %v1897_v15 }
 0x201   : > { %1944 = vst [vmem:[%s3594_s15 + $0xe8] sm:$0xff] %v1912_v2 }
 0x203   : > { %v1797_v29 = vpop.f32.mrf.mxu1 }
 0x204   : > { %v1798_v8 = vadd.f32 %v3551_v13, %v1797_v29 }
 0x206   : > { %v1898_v7 = vadd.f32 %v2091_v53, %v1798_v8 }
 0x208   : > { %1930 = vst [vmem:[%s3594_s15 + $0x78] sm:$0xff] %v1898_v7 }
 0x20b   : > { %v1842_v24 = vpop.f32.mrf.mxu3  ;;  %v1800_v16 = vpop.f32.mrf.mxu1 }
 0x20c   : > { %v1843_v61 = vadd.f32 %v3551_v13, %v1842_v24  ;;  %v1801_v41 = vadd.f32 %v3551_v13, %v1800_v16 }
 0x20e   : > { %v1913_v59 = vadd.f32 %v2106_v45, %v1843_v61  ;;  %v1899_v56 = vadd.f32 %v2092_v5, %v1801_v41 }
 0x210   : > { %1945 = vst [vmem:[%s3594_s15 + $0xf0] sm:$0xff] %v1913_v59 }
 0x211   : > { %1931 = vst [vmem:[%s3594_s15 + $0x80] sm:$0xff] %v1899_v56 }
 0x216   : > { %v1845_v63 = vpop.f32.mrf.mxu3 }
 0x217   : > { %v1846_v40 = vadd.f32 %v3551_v13, %v1845_v63 }
 0x219   : > { %v1914_v28 = vadd.f32 %v2107_v36, %v1846_v40 }
 0x21b   : > { %1946 = vst [vmem:[%s3594_s15 + $0xf8] sm:$0xff] %v1914_v28 }
 0x21c   : > { %2283 = shalt.err (!%p2280_p5)
}
 0x21d   : > { %s2337_s17 = smov 128   ;;  %s2338_s15 = smov 8  }
 0x21e   : > { %2147 = dma.vmem_to_hbm [thread:$0]  (%p2419_p4), %s1964_s30, 4096, %s1966_s8, %s1948_s10, %s2337_s17, %s2337_s17, %s2338_s15  }
 0x21f PF: > { %p2153_p6 = scmp.ge.s32.totalorder %s2334_s29, 2  ;;  %s1980_s21 = sand.u32 1, %s2314_s24  }
 0x220   : > { %s1981_s22 = scalar_lea.sflag [#allocation5], %s1980_s21 }
 0x221   : > { %p2150_p7 = pnand %p2153_p6, %p2426_p8 }
 0x223   : > { %p2151_p9 = pneg %p2150_p7 }
 0x225   : > { %2309 = dma.done.wait (%p2151_p9), %s1981_s22, 4096  }
 0x226   : > { %2311 = vsyncadd (%p2151_p9), %s1981_s22, 4294963200  ;;  %s20_s29 = sadd.s32 1, %s2334_s29   ;;  %s3860_s24 = smov %s2318_s25 }
 0x227   : > { %p17_p10 = scmp.ge.s32.totalorder %s20_s29, 4   ;;  %s3861_s25 = smov %s2322_s26 }
 0x228   : > { %s3862_s26 = smov %s2432_s14  ;;  %s3863_s27 = smov %s2330_s28 }
 0x229   : > { %s3864_s28 = smov %s3866_s9  ;;  %19 = sbr.rel (!%p17_p10) target bundleno = 4 (0x4), region = 106 }
 0x22e   :  { %1987 = vsyncpa [#allocation5], 1 }
 0x22f   :  { %1989 = vsyncpa [#allocation5 + $0x1], 1 }

// kernel: tpu_custom_call.1
= control target key start
LH: loop header
LB: loop body
LE: loop exit
PB: predicated region body
PF: predicated region fallthrough
CT: control target
= control target key end

     0   :  { %12 = vsyncpa [#allocation5], 0  ;;  %s3770_s0 = inlined_call_operand.vmem [shape: f32[2,18,18,128], index: 0, kind: input, shape index: {}]   ;;  %s3771_s1 = inlined_call_operand.vmem [shape: f32[128,128], index: 1, kind: input, shape index: {}]   ;;  %s3772_s2 = inlined_call_operand.vmem [shape: f32[1,128], index: 2, kind: input, shape index: {}]   ;;  %s3773_s3 = inlined_call_operand.vmem [shape: f32[3,3,128], index: 3, kind: input, shape index: {}]   ;;  %s3774_s4 = inlined_call_operand.vmem [shape: f32[1,128], index: 4, kind: input, shape index: {}]   ;;  %s3775_s5 = inlined_call_operand.vmem [shape: f32[128,128], index: 5, kind: input, shape index: {}]   ;;  %s3776_s6 = inlined_call_operand.vmem [shape: f32[1,128], index: 6, kind: input, shape index: {}]   ;;  %s3777_s7 = inlined_call_operand.hbm [shape: f32[2,16,16,128], index: 7, kind: output, shape index: {}]  }
   0x1   :  { %14 = vsyncpa [#allocation5 + $0x1], 0  ;;  %s2379_s24 = smov 0   ;;  %s2381_s25 = smov 0  }
   0x2   :  { %s2383_s26 = smov 0   ;;  %s2385_s27 = smov 0  }
   0x3   :  { %s2387_s28 = smov 0   ;;  %s2389_s29 = smov 0  }
   0x4 LB: > { %s2045_s30 = sadd.s32 4294967295, %s2334_s29   ;;  %s2046_s8 = sadd.s32 4294967294, %s2334_s29   ;;  %s2334_s29 = sphi %s2389_s29, %s20_s29   ;;  %s2330_s28 = sphi %s2387_s28, %s3864_s28   ;;  %s2326_s27 = sphi %s2385_s27, %s3863_s27   ;;  %s2322_s26 = sphi %s2383_s26, %s3862_s26   ;;  %s2318_s25 = sphi %s2381_s25, %s3861_s25   ;;  %s2314_s24 = sphi %s2379_s24, %s3860_s24  }
   0x5   : > { %s32_s9 = sadd.s32 1, %s2330_s28  ;;  %s193_s10 = sadd.s32 1, %s2322_s26 }
   0x6   : > { %p34_p0 = scmp.ge.s32.totalorder %s32_s9, 2  ;;  %p203_p1 = scmp.ne.s32.totalorder %s2322_s26, %s2318_s25 }
   0x7   : > { %p204_p2 = scmp.eq.s32.totalorder %s2045_s30, 1  ;;  %p209_p3 = scmp.ne.s32.totalorder %s2318_s25, %s2314_s24 }
   0x8   : > { %s3866_s9 = smov (%p34_p0, %s32_s9), 0  ;;  %p210_p5 = scmp.eq.s32.totalorder %s2046_s8, 1 }
   0x9   : > { %p2419_p4 = por %p204_p2, %p203_p1  ;;  %s188_s12 = ssub.s32 %s2330_s28, %s3866_s9 }
   0xa   : > { %p2049_p6 = scmp.ge.s32.totalorder %s2334_s29, 1  ;;  %p191_p7 = scmp.eq.s32.totalorder %s188_s12, 0 }
   0xb   : > { %p2426_p8 = por %p210_p5, %p209_p3  ;;  %p254_p9 = scmp.lt.s32.totalorder %s2334_s29, 3 }
   0xc   : > { %s2432_s14 = scalar_select %p191_p7, %s2322_s26, %s193_s10  }
   0xd   : > { %p255_p10 = pnand %p2049_p6, %p254_p9 }
   0xf   : > { %258 = sbr.rel (%p255_p10) target bundleno = 543 (0x21f), region = 48 }
  0x14   : > { %v346_v0 = vld [vmem:[%s3771_s1 + $0x78] sm:$0xff]  ;;  %v345_v1 = vld [vmem:[%s3771_s1 + $0x70] sm:$0xff]  ;;  %v344_v2 = vld [vmem:[%s3771_s1 + $0x68] sm:$0xff]  ;;  %p286_p11 = scmp.lt.s32.totalorder %s2326_s27, 1  ;;  %v2336_v44 = vmov 0.0   ;;  %s283_s17 = sand.u32 1, %s2318_s25  }
  0x15   : > { %351 = vmatpush.msra.mxu0 %v346_v0  ;;  %2114 = vmatpush.msra.mxu2 %v346_v0  ;;  %v343_v3 = vld [vmem:[%s3771_s1 + $0x60] sm:$0xff]  ;;  %v342_v4 = vld [vmem:[%s3771_s1 + $0x58] sm:$0xff]  ;;  %v341_v5 = vld [vmem:[%s3771_s1 + $0x50] sm:$0xff]  ;;  %584 = vst [vmem:[#allocation2] sm:$0x1] %v2336_v44  ;;  %s3562_s20 = sshll.u32 %s283_s17, 8 }
  0x16   : > { %v340_v6 = vld [vmem:[%s3771_s1 + $0x48] sm:$0xff]  ;;  %v339_v7 = vld [vmem:[%s3771_s1 + $0x40] sm:$0xff]  ;;  %v338_v8 = vld [vmem:[%s3771_s1 + $0x38] sm:$0xff]  ;;  %s287_s30 = scalar_select %p286_p11, %s2326_s27, 1  ;;  %585 = vst [vmem:[#allocation2 + $0x18] sm:$0x1] %v2336_v44 }
  0x17   : > { %352 = vmatpush.msra.mxu0 %v345_v1  ;;  %2115 = vmatpush.msra.mxu2 %v345_v1  ;;  %v337_v9 = vld [vmem:[%s3771_s1 + $0x30] sm:$0xff]  ;;  %v336_v10 = vld [vmem:[%s3771_s1 + $0x28] sm:$0xff]  ;;  %v335_v11 = vld [vmem:[%s3771_s1 + $0x20] sm:$0xff]  ;;  %586 = vst [vmem:[#allocation2 + $0x30] sm:$0x1] %v2336_v44  ;;  %s3594_s15 = scalar_lea.vmem [#allocation4], %s3562_s20 }
  0x18   : > { %v334_v12 = vld [vmem:[%s3771_s1 + $0x18] sm:$0xff]  ;;  %s2146_s16 = smul.u32 432, %s287_s30  ;;  %v333_v13 = vld [vmem:[%s3771_s1 + $0x10] sm:$0xff]  ;;  %v332_v14 = vld [vmem:[%s3771_s1 + $0x8] sm:$0xff]  ;;  %587 = vst [vmem:[#allocation2 + $0x48] sm:$0x1] %v2336_v44 }
  0x19   : > { %353 = vmatpush.msra.mxu0 %v344_v2  ;;  %2116 = vmatpush.msra.mxu2 %v344_v2  ;;  %v331_v15 = vld [vmem:[%s3771_s1] sm:$0xff]  ;;  %588 = vst [vmem:[#allocation2 + $0x60] sm:$0x1] %v2336_v44  ;;  %v1730_v52 = vld [vmem:[%s3775_s5 + $0x78] sm:$0xff]  ;;  %v1729_v54 = vld [vmem:[%s3775_s5 + $0x70] sm:$0xff]  ;;  %s2113_s19 = sshll.u32 %s2326_s27, 8 }
  0x1a   : > { %s2484_s23 = scalar_lea.vmem %s3770_s0, %s2146_s16  ;;  %589 = vst [vmem:[#allocation2 + $0x78] sm:$0x1] %v2336_v44  ;;  %v2544_v49 = vld [vmem:[%s3772_s2] ss:$0 sm:$0xff]  ;;  %1735 = vmatpush.msra.mxu1 %v1730_v52  ;;  %2130 = vmatpush.msra.mxu3 %v1730_v52  ;;  %v1728_v56 = vld [vmem:[%s3775_s5 + $0x68] sm:$0xff]  ;;  %v1726_v63 = vld [vmem:[%s3775_s5 + $0x58] sm:$0xff]  ;;  %s1962_s22 = scalar_lea.hbm %s3777_s7, %s2113_s19 }
  0x1b   : > { %354 = vmatpush.msra.mxu0 %v343_v3  ;;  %2117 = vmatpush.msra.mxu2 %v343_v3  ;;  %v295_v16 = vld [vmem:[%s2484_s23 + $0x1] sm:$0xff]  ;;  %v296_v18 = vld [vmem:[%s2484_s23 + $0x9] sm:$0xff]  ;;  %v297_v20 = vld [vmem:[%s2484_s23 + $0x19] sm:$0xff]  ;;  %590 = vst [vmem:[#allocation2 + $0x90] sm:$0x1] %v2336_v44  ;;  %s1963_s30 = sshll.u32 %s3594_s15, 4  ;;  %s1964_s30 = int_to_ptr.vmem [resolvable:$true] %s1963_s30 }
  0x1c   : > { %v311_v17 = vld [vmem:[%s2484_s23 + $0xc1] sm:$0xff]  ;;  %v312_v19 = vld [vmem:[%s2484_s23 + $0xc9] sm:$0xff]  ;;  %v313_v21 = vld [vmem:[%s2484_s23 + $0xd9] sm:$0xff]  ;;  %591 = vst [vmem:[#allocation2 + $0xa8] sm:$0x1] %v2336_v44  ;;  %1736 = vmatpush.msra.mxu1 %v1729_v54  ;;  %2131 = vmatpush.msra.mxu3 %v1729_v54  ;;  %s1965_s8 = sshll.u32 %s1962_s22, 4  ;;  %s1966_s8 = int_to_ptr.hbm [resolvable:$true] %s1965_s8 }
  0x1d   : > { %355 = vmatpush.msra.mxu0 %v342_v4  ;;  %2118 = vmatpush.msra.mxu2 %v342_v4  ;;  %v298_v22 = vld [vmem:[%s2484_s23 + $0x21] sm:$0xff]  ;;  %v299_v24 = vld [vmem:[%s2484_s23 + $0x31] sm:$0xff]  ;;  %v300_v26 = vld [vmem:[%s2484_s23 + $0x39] sm:$0xff]  ;;  %592 = vst [vmem:[#allocation2 + $0xc0] sm:$0x1] %v2336_v44  ;;  %s1948_s10 = scalar_lea.sflag [#allocation5], %s283_s17 }
  0x1e   : > { %v314_v23 = vld [vmem:[%s2484_s23 + $0xe1] sm:$0xff]  ;;  %v315_v25 = vld [vmem:[%s2484_s23 + $0xf1] sm:$0xff]  ;;  %v316_v27 = vld [vmem:[%s2484_s23 + $0xf9] sm:$0xff]  ;;  %593 = vst [vmem:[#allocation2 + $0xd8] sm:$0x1] %v2336_v44  ;;  %1737 = vmatpush.msra.mxu1 %v1728_v56  ;;  %2132 = vmatpush.msra.mxu3 %v1728_v56  ;;  %s2270_s27 = sshra.s32 %s1966_s8, 4  ;;  %s2271_s27 = int_to_ptr.hbm [resolvable:$true] %s2270_s27 }
  0x1f   : > { %356 = vmatpush.msra.mxu0 %v341_v5  ;;  %2119 = vmatpush.msra.mxu2 %v341_v5  ;;  %v301_v28 = vld [vmem:[%s2484_s23 + $0x49] sm:$0xff]  ;;  %v302_v30 = vld [vmem:[%s2484_s23 + $0x51] sm:$0xff]  ;;  %v303_v32 = vld [vmem:[%s2484_s23 + $0x61] sm:$0xff]  ;;  %594 = vst [vmem:[#allocation2 + $0xf0] sm:$0x1] %v2336_v44  ;;  %s2272_s12 = scalar_lea.hbm %s2271_s27, 256  ;;  %p2277_p1 = scmp.lt.s32.totalorder %s2271_s27, %s3777_s7 }
  0x20   : > { %v317_v29 = vld [vmem:[%s2484_s23 + $0x109] sm:$0xff]  ;;  %v318_v31 = vld [vmem:[%s2484_s23 + $0x111] sm:$0xff]  ;;  %v319_v33 = vld [vmem:[%s2484_s23 + $0x121] sm:$0xff]  ;;  %595 = vst [vmem:[#allocation2 + $0x108] sm:$0x1] %v2336_v44  ;;  %p2273_p12 = scmp.ne.s32.totalorder %s2271_s27, %s2272_s12  ;;  %s2276_s19 = scalar_lea.hbm %s3777_s7, 512 }
  0x21   : > { %357 = vmatpush.msra.mxu0 %v340_v6  ;;  %2120 = vmatpush.msra.mxu2 %v340_v6  ;;  %v304_v34 = vld [vmem:[%s2484_s23 + $0x69] sm:$0xff]  ;;  %v305_v36 = vld [vmem:[%s2484_s23 + $0x79] sm:$0xff]  ;;  %v306_v38 = vld [vmem:[%s2484_s23 + $0x81] sm:$0xff]  ;;  %596 = vst [vmem:[#allocation2 + $0x120] sm:$0x1] %v2336_v44  ;;  %p2278_p2 = scmp.lt.s32.totalorder %s2276_s19, %s2272_s12 }
  0x22   : > { %v320_v35 = vld [vmem:[%s2484_s23 + $0x129] sm:$0xff]  ;;  %v321_v37 = vld [vmem:[%s2484_s23 + $0x139] sm:$0xff]  ;;  %v322_v39 = vld [vmem:[%s2484_s23 + $0x141] sm:$0xff]  ;;  %597 = vst [vmem:[#allocation2 + $0x138] sm:$0x1] %v2336_v44  ;;  %p2274_p13 = pnand %p2273_p12, %p2419_p4 }
  0x23   : > { %358 = vmatpush.msra.mxu0 %v339_v7  ;;  %2121 = vmatpush.msra.mxu2 %v339_v7  ;;  %v307_v40 = vld [vmem:[%s2484_s23 + $0x91] sm:$0xff]  ;;  %v308_v42 = vld [vmem:[%s2484_s23 + $0x99] sm:$0xff]  ;;  %v309_v45 = vld [vmem:[%s2484_s23 + $0xa9] sm:$0xff]  ;;  %598 = vst [vmem:[#allocation2 + $0x150] sm:$0x1] %v2336_v44  ;;  %p2279_p3 = por %p2278_p2, %p2277_p1 }
  0x24   : > { %v323_v41 = vld [vmem:[%s2484_s23 + $0x151] sm:$0xff]  ;;  %v324_v43 = vld [vmem:[%s2484_s23 + $0x159] sm:$0xff]  ;;  %v325_v46 = vld [vmem:[%s2484_s23 + $0x169] sm:$0xff]  ;;  %599 = vst [vmem:[#allocation2 + $0x168] sm:$0x1] %v2336_v44  ;;  %p2275_p0 = pneg %p2274_p13 }
  0x25   : > { %359 = vmatpush.msra.mxu0 %v338_v8  ;;  %2122 = vmatpush.msra.mxu2 %v338_v8  ;;  %v310_v47 = vld [vmem:[%s2484_s23 + $0xb1] sm:$0xff]  ;;  %600 = vst [vmem:[#allocation2 + $0x180] sm:$0x1] %v2336_v44  ;;  %v327_v51 = vld [vmem:[%s2484_s23 + $0x181] sm:$0xff]  ;;  %v328_v62 = vld [vmem:[%s2484_s23 + $0x189] sm:$0xff] }
  0x26   : > { %v326_v48 = vld [vmem:[%s2484_s23 + $0x171] sm:$0xff]  ;;  %602 = vst [vmem:[#allocation2 + $0x11] sm:$0x1] %v2336_v44  ;;  %v1727_v59 = vld [vmem:[%s3775_s5 + $0x60] sm:$0xff]  ;;  %v1724_v5 = vld [vmem:[%s3775_s5 + $0x48] sm:$0xff]  ;;  %p2280_p5 = pnand %p2279_p3, %p2275_p0 }
  0x27   : > { %360 = vmatpush.msra.mxu0 %v337_v9  ;;  %2123 = vmatpush.msra.mxu2 %v337_v9  ;;  %603 = vst [vmem:[#allocation2 + $0x29] sm:$0x1] %v2336_v44  ;;  %v1725_v2 = vld [vmem:[%s3775_s5 + $0x50] sm:$0xff]  ;;  %v1723_v8 = vld [vmem:[%s3775_s5 + $0x40] sm:$0xff] }
  0x28   : > { %604 = vst [vmem:[#allocation2 + $0x41] sm:$0x1] %v2336_v44  ;;  %1738 = vmatpush.msra.mxu1 %v1727_v59  ;;  %2133 = vmatpush.msra.mxu3 %v1727_v59  ;;  %v2594_v9 = vld [vmem:[%s3773_s3] ss:$0 sm:$0xff] }
  0x29   : > { %361 = vmatpush.msra.mxu0 %v336_v10  ;;  %2124 = vmatpush.msra.mxu2 %v336_v10  ;;  %605 = vst [vmem:[#allocation2 + $0x59] sm:$0x1] %v2336_v44 }
  0x2a   : > { %606 = vst [vmem:[#allocation2 + $0x71] sm:$0x1] %v2336_v44  ;;  %1739 = vmatpush.msra.mxu1 %v1726_v63  ;;  %2134 = vmatpush.msra.mxu3 %v1726_v63 }
  0x2b   : > { %362 = vmatpush.msra.mxu0 %v335_v11  ;;  %2125 = vmatpush.msra.mxu2 %v335_v11  ;;  %607 = vst [vmem:[#allocation2 + $0x89] sm:$0x1] %v2336_v44 }
  0x2c   : > { %608 = vst [vmem:[#allocation2 + $0xa1] sm:$0x1] %v2336_v44  ;;  %1740 = vmatpush.msra.mxu1 %v1725_v2  ;;  %2135 = vmatpush.msra.mxu3 %v1725_v2 }
  0x2d   : > { %363 = vmatpush.msra.mxu0 %v334_v12  ;;  %2126 = vmatpush.msra.mxu2 %v334_v12  ;;  %609 = vst [vmem:[#allocation2 + $0xb9] sm:$0x1] %v2336_v44  ;;  %v329_v12 = vld [vmem:[%s2484_s23 + $0x199] sm:$0xff] }
  0x2e   : > { %610 = vst [vmem:[#allocation2 + $0xd1] sm:$0x1] %v2336_v44  ;;  %1741 = vmatpush.msra.mxu1 %v1724_v5  ;;  %2136 = vmatpush.msra.mxu3 %v1724_v5 }
  0x2f   : > { %364 = vmatpush.msra.mxu0 %v333_v13  ;;  %2127 = vmatpush.msra.mxu2 %v333_v13  ;;  %611 = vst [vmem:[#allocation2 + $0xe9] sm:$0x1] %v2336_v44  ;;  %v1722_v13 = vld [vmem:[%s3775_s5 + $0x38] sm:$0xff] }
  0x30   : > { %612 = vst [vmem:[#allocation2 + $0x101] sm:$0x1] %v2336_v44  ;;  %1742 = vmatpush.msra.mxu1 %v1723_v8  ;;  %2137 = vmatpush.msra.mxu3 %v1723_v8 }
  0x31   : > { %365 = vmatpush.msra.mxu0 %v332_v14  ;;  %2128 = vmatpush.msra.mxu2 %v332_v14  ;;  %613 = vst [vmem:[#allocation2 + $0x119] sm:$0x1] %v2336_v44 }
  0x32   : > { %614 = vst [vmem:[#allocation2 + $0x131] sm:$0x1] %v2336_v44  ;;  %1743 = vmatpush.msra.mxu1 %v1722_v13  ;;  %2138 = vmatpush.msra.mxu3 %v1722_v13  ;;  %v2698_v13 = vld [vmem:[%s3773_s3 + $0x5] ss:$0 sm:$0xff] }
  0x33   : > { %366 = vmatpush.msra.mxu0 %v331_v15  ;;  %2129 = vmatpush.msra.mxu2 %v331_v15  ;;  %615 = vst [vmem:[#allocation2 + $0x149] sm:$0x1] %v2336_v44 }
  0x34   : > { %367 = vmatmul.f32.vlgmr.msra.gmra.mxu0 %v295_v16  ;;  %415 = vmatmul.f32.vlgmr.msra.gmra.mxu2 %v311_v17  ;;  %616 = vst [vmem:[#allocation2 + $0x161] sm:$0x1] %v2336_v44  ;;  %v1721_v16 = vld [vmem:[%s3775_s5 + $0x30] sm:$0xff]  ;;  %v642_v17 = vmul.f32 0.0, %v2594_v9 }
  0x35   : > { %617 = vst [vmem:[#allocation2 + $0x179] sm:$0x1] %v2336_v44  ;;  %1744 = vmatpush.msra.mxu1 %v1721_v16  ;;  %2139 = vmatpush.msra.mxu3 %v1721_v16 }
  0x36   : > { %618 = vst [vmem:[#allocation2 + $0x191] sm:$0x1] %v2336_v44 }
  0x37   : > { %619 = vst [vmem:[#allocation2 + $0x1a9] sm:$0x1] %v2336_v44 }
  0x3c   : > { %370 = vmatmul.f32.gmra.mxu0 %v296_v18  ;;  %418 = vmatmul.f32.gmra.mxu2 %v312_v19 }
  0x44   : > { %373 = vmatmul.f32.gmra.mxu0 %v297_v20  ;;  %421 = vmatmul.f32.gmra.mxu2 %v313_v21  ;;  %v1720_v20 = vld [vmem:[%s3775_s5 + $0x28] sm:$0xff]  ;;  %v2616_v21 = vld [vmem:[%s3774_s4] ss:$0 sm:$0xff] }
  0x45   : > { %1745 = vmatpush.msra.mxu1 %v1720_v20  ;;  %2140 = vmatpush.msra.mxu3 %v1720_v20 }
  0x4c   : > { %376 = vmatmul.f32.gmra.mxu0 %v298_v22  ;;  %424 = vmatmul.f32.gmra.mxu2 %v314_v23  ;;  %v2621_v22 = vld [vmem:[%s3773_s3 + $0x1] ss:$0 sm:$0xff] }
  0x4d   : > { %3814 = vst [vmem:[#allocation7_spill] sm:$0xff] %v2621_v22 }
  0x54   : > { %379 = vmatmul.f32.gmra.mxu0 %v299_v24  ;;  %427 = vmatmul.f32.gmra.mxu2 %v315_v25  ;;  %v1719_v25 = vld [vmem:[%s3775_s5 + $0x20] sm:$0xff] }
  0x55   : > { %1746 = vmatpush.msra.mxu1 %v1719_v25  ;;  %2141 = vmatpush.msra.mxu3 %v1719_v25 }
  0x5c   : > { %382 = vmatmul.f32.gmra.mxu0 %v300_v26  ;;  %430 = vmatmul.f32.gmra.mxu2 %v316_v27  ;;  %v653_v26 = vadd.f32 %v2616_v21, %v642_v17  ;;  %v2633_v27 = vld [vmem:[%s3773_s3 + $0x2] ss:$0 sm:$0xff] }
  0x64   : > { %385 = vmatmul.f32.gmra.mxu0 %v301_v28  ;;  %433 = vmatmul.f32.gmra.mxu2 %v317_v29 }
  0x6c   : > { %388 = vmatmul.f32.gmra.mxu0 %v302_v30  ;;  %436 = vmatmul.f32.gmra.mxu2 %v318_v31 }
  0x74   : > { %391 = vmatmul.f32.gmra.mxu0 %v303_v32  ;;  %439 = vmatmul.f32.gmra.mxu2 %v319_v33  ;;  %v330_v32 = vld [vmem:[%s2484_s23 + $0x1a1] sm:$0xff]  ;;  %v1718_v33 = vld [vmem:[%s3775_s5 + $0x18] sm:$0xff] }
  0x75   : > { %1747 = vmatpush.msra.mxu1 %v1718_v33  ;;  %2142 = vmatpush.msra.mxu3 %v1718_v33 }
  0x7c   : > { %394 = vmatmul.f32.gmra.mxu0 %v304_v34  ;;  %442 = vmatmul.f32.gmra.mxu2 %v320_v35 }
  0x84   : > { %397 = vmatmul.f32.gmra.mxu0 %v305_v36  ;;  %445 = vmatmul.f32.gmra.mxu2 %v321_v37  ;;  %v1717_v37 = vld [vmem:[%s3775_s5 + $0x10] sm:$0xff] }
  0x85   : > { %1748 = vmatpush.msra.mxu1 %v1717_v37  ;;  %2143 = vmatpush.msra.mxu3 %v1717_v37 }
  0x8c   : > { %400 = vmatmul.f32.gmra.mxu0 %v306_v38  ;;  %448 = vmatmul.f32.gmra.mxu2 %v322_v39 }
  0x94   : > { %403 = vmatmul.f32.gmra.mxu0 %v307_v40  ;;  %451 = vmatmul.f32.gmra.mxu2 %v323_v41 }
  0x9c   : > { %406 = vmatmul.f32.gmra.mxu0 %v308_v42  ;;  %454 = vmatmul.f32.gmra.mxu2 %v324_v43  ;;  %v2650_v43 = vld [vmem:[%s3773_s3 + $0x4] ss:$0 sm:$0xff] }
  0xa4   : > { %409 = vmatmul.f32.gmra.mxu0 %v309_v45  ;;  %457 = vmatmul.f32.gmra.mxu2 %v325_v46  ;;  %v1716_v45 = vld [vmem:[%s3775_s5 + $0x8] sm:$0xff] }
  0xa5   : > { %1749 = vmatpush.msra.mxu1 %v1716_v45  ;;  %2144 = vmatpush.msra.mxu3 %v1716_v45 }
  0xac   : > { %412 = vmatmul.f32.gmra.mxu0 %v310_v47  ;;  %460 = vmatmul.f32.gmra.mxu2 %v326_v48  ;;  %v2663_v47 = vld [vmem:[%s3773_s3 + $0x1] ss:$0 sm:$0xff] }
  0xb1   : > { %v368_v50 = vpop.f32.mrf.mxu0 }
  0xb2   : > { %v369_v53 = vadd.f32 %v2544_v49, %v368_v50 }
  0xb4   : > { %v476_v55 = vmax.f32 %v369_v53, 0.0  ;;  %463 = vmatmul.f32.gmra.mxu2 %v327_v51  ;;  %v1715_v53 = vld [vmem:[%s3775_s5] sm:$0xff] }
  0xb5   : > { %1750 = vmatpush.msra.mxu1 %v1715_v53  ;;  %2145 = vmatpush.msra.mxu3 %v1715_v53 }
  0xb6   : > { %v512_v57 = vmin.f32 %v476_v55, 6.0 }
  0xb7   : > { %v416_v58 = vpop.f32.mrf.mxu2 }
  0xb8   : > { %548 = vst [vmem:[#allocation2 + $0x1] sm:$0xff] %v512_v57  ;;  %v417_v60 = vadd.f32 %v2544_v49, %v416_v58 }
  0xb9   : > { %624 = vst [vmem:[#allocation2] sm:$0xff] %v2336_v44  ;;  %v371_v61 = vpop.f32.mrf.mxu0 }
  0xba   : > { %v492_v0 = vmax.f32 %v417_v60, 0.0  ;;  %v372_v1 = vadd.f32 %v2544_v49, %v371_v61  ;;  %v2675_v60 = vld [vmem:[%s3773_s3 + $0x5] ss:$0 sm:$0xff] }
  0xbc   : > { %v528_v3 = vmin.f32 %v492_v0, 6.0  ;;  %v477_v4 = vmax.f32 %v372_v1, 0.0  ;;  %466 = vmatmul.f32.gmra.mxu2 %v328_v62 }
  0xbe   : > { %v513_v6 = vmin.f32 %v477_v4, 6.0  ;;  %564 = vst [vmem:[#allocation2 + $0xc1] sm:$0xff] %v528_v3  ;;  %v2686_v4 = vld [vmem:[%s3773_s3 + $0x2] ss:$0 sm:$0xff] }
  0xbf   : > { %v419_v7 = vpop.f32.mrf.mxu2 }
  0xc0   : > { %549 = vst [vmem:[#allocation2 + $0x9] sm:$0xff] %v513_v6  ;;  %v420_v10 = vadd.f32 %v2544_v49, %v419_v7 }
  0xc1   : > { %625 = vst [vmem:[#allocation2 + $0x8] sm:$0xff] %v2336_v44  ;;  %v374_v11 = vpop.f32.mrf.mxu0 }
  0xc2   : > { %626 = vst [vmem:[#allocation2 + $0x10] sm:$0x3] %v2336_v44  ;;  %v493_v14 = vmax.f32 %v420_v10, 0.0  ;;  %v375_v15 = vadd.f32 %v2544_v49, %v374_v11  ;;  %v2655_v44 = vld [vmem:[%s3773_s3] ss:$0 sm:$0xff] }
  0xc3   : > { %v2691_v10 = vld [vmem:[%s3773_s3 + $0x6] ss:$0 sm:$0xff] }
  0xc4   : > { %v2608_v18 = vmin.f32 %v493_v14, 6.0  ;;  %v478_v19 = vmax.f32 %v375_v15, 0.0  ;;  %469 = vmatmul.f32.gmra.mxu2 %v329_v12 }
  0xc6   : > { %565 = vst [vmem:[#allocation2 + $0xc9] sm:$0xff] %v2608_v18  ;;  %v2624_v23 = vmin.f32 %v478_v19, 6.0  ;;  %v1197_v62 = vmul.f32 %v2663_v47, %v2608_v18  ;;  %v2706_v18 = vld [vmem:[%s3773_s3 + $0x9] ss:$0 sm:$0xff] }
  0xc7   : > { %v422_v24 = vpop.f32.mrf.mxu2 }
  0xc8   : > { %550 = vst [vmem:[#allocation2 + $0x19] sm:$0xff] %v2624_v23  ;;  %v423_v28 = vadd.f32 %v2544_v49, %v422_v24  ;;  %v661_v29 = vld [vmem:[#allocation2 + $0x1] sm:$0xff]  ;;  %v751_v12 = vmul.f32 %v2675_v60, %v2624_v23  ;;  %v673_v15 = vmul.f32 %v2621_v22, %v2624_v23 }
  0xc9   : > { %v687_v30 = vld [vmem:[#allocation2 + $0x2] sm:$0xff]  ;;  %v377_v31 = vpop.f32.mrf.mxu0  ;;  %v671_v34 = vmul.f32 %v2621_v22, %v661_v29  ;;  %v688_v56 = vld [vmem:[#allocation2 + $0xa] sm:$0xff] }
  0xca   : > { %v494_v35 = vmax.f32 %v423_v28, 0.0  ;;  %v378_v36 = vadd.f32 %v2544_v49, %v377_v31  ;;  %v697_v39 = vmul.f32 %v2633_v27, %v687_v30  ;;  %v662_v40 = vld [vmem:[#allocation2 + $0x9] sm:$0xff]  ;;  %v698_v3 = vmul.f32 %v2633_v27, %v688_v56 }
  0xcb   : > { %v679_v38 = vadd.f32 %v671_v34, %v653_v26  ;;  %v672_v50 = vmul.f32 %v2621_v22, %v662_v40 }
  0xcc   : > { %v530_v41 = vmin.f32 %v494_v35, 6.0  ;;  %v479_v42 = vmax.f32 %v378_v36, 0.0  ;;  %472 = vmatmul.f32.gmra.mxu2 %v330_v32 }
  0xcd   : > { %v1161_v46 = vld [vmem:[#allocation2 + $0xc8] sm:$0xff]  ;;  %v705_v54 = vadd.f32 %v697_v39, %v679_v38  ;;  %v680_v2 = vadd.f32 %v672_v50, %v653_v26 }
  0xce   : > { %566 = vst [vmem:[#allocation2 + $0xd9] sm:$0xff] %v530_v41  ;;  %v515_v48 = vmin.f32 %v479_v42, 6.0  ;;  %v1171_v51 = vmul.f32 %v2655_v44, %v1161_v46  ;;  %v1213_v6 = vld [vmem:[#allocation2 + $0xca] sm:$0xff]  ;;  %v1198_v31 = vmul.f32 %v2663_v47, %v530_v41 }
  0xcf   : > { %v425_v52 = vpop.f32.mrf.mxu2  ;;  %v714_v55 = vld [vmem:[#allocation2 + $0x18] sm:$0xff]  ;;  %v706_v19 = vadd.f32 %v698_v3, %v680_v2  ;;  %v1223_v20 = vmul.f32 %v2686_v4, %v1213_v6 }
  0xd0   : > { %551 = vst [vmem:[#allocation2 + $0x21] sm:$0xff] %v515_v48  ;;  %v426_v57 = vadd.f32 %v2544_v49, %v425_v52  ;;  %v725_v58 = vmul.f32 %v2650_v43, %v714_v55  ;;  %v1179_v61 = vadd.f32 %v2616_v21, %v1171_v51  ;;  %v644_v63 = vmul.f32 %v2594_v9, %v714_v55  ;;  %v2725_v51 = vld [vmem:[%s3773_s3 + $0x6] ss:$0 sm:$0xff] }
  0xd1   : > { %v380_v59 = vpop.f32.mrf.mxu0  ;;  %v752_v30 = vmul.f32 %v2675_v60, %v515_v48  ;;  %v674_v32 = vmul.f32 %v2621_v22, %v515_v48 }
  0xd2   : > { %v495_v0 = vmax.f32 %v426_v57, 0.0  ;;  %v381_v1 = vadd.f32 %v2544_v49, %v380_v59  ;;  %v733_v5 = vadd.f32 %v725_v58, %v705_v54  ;;  %v1205_v11 = vadd.f32 %v1197_v62, %v1179_v61  ;;  %v2733_v58 = vld [vmem:[%s3773_s3 + $0x8] ss:$0 sm:$0xff]  ;;  %v2738_v61 = vld [vmem:[%s3773_s3 + $0x4] ss:$0 sm:$0xff] }
  0xd3   : > { %v655_v14 = vadd.f32 %v2616_v21, %v644_v63 }
  0xd4   : > { %v531_v7 = vmin.f32 %v495_v0, 6.0  ;;  %v480_v8 = vmax.f32 %v381_v1, 0.0  ;;  %v759_v26 = vadd.f32 %v751_v12, %v733_v5  ;;  %v1231_v36 = vadd.f32 %v1223_v20, %v1205_v11 }
  0xd5   : > { %v1162_v16 = vld [vmem:[#allocation2 + $0xd8] sm:$0xff]  ;;  %v681_v39 = vadd.f32 %v673_v15, %v655_v14 }
  0xd6   : > { %567 = vst [vmem:[#allocation2 + $0xe1] sm:$0xff] %v531_v7  ;;  %v516_v17 = vmin.f32 %v480_v8, 6.0  ;;  %v1172_v24 = vmul.f32 %v2655_v44, %v1162_v16  ;;  %v1276_v38 = vmul.f32 %v2698_v13, %v531_v7  ;;  %v1199_v54 = vmul.f32 %v2663_v47, %v531_v7 }
  0xd7   : > { %v428_v25 = vpop.f32.mrf.mxu2  ;;  %v767_v28 = vld [vmem:[#allocation2 + $0x1a] sm:$0xff]  ;;  %v768_v23 = vld [vmem:[#allocation2 + $0x22] sm:$0xff] }
  0xd8   : > { %v715_v29 = vld [vmem:[#allocation2 + $0x20] sm:$0xff]  ;;  %552 = vst [vmem:[#allocation2 + $0x31] sm:$0xff] %v516_v17  ;;  %v429_v33 = vadd.f32 %v2544_v49, %v428_v25  ;;  %v777_v34 = vmul.f32 %v2691_v10, %v767_v28  ;;  %v699_v40 = vmul.f32 %v2633_v27, %v767_v28  ;;  %v1180_v42 = vadd.f32 %v2616_v21, %v1172_v24 }
  0xd9   : > { %v726_v35 = vmul.f32 %v2650_v43, %v715_v29  ;;  %v383_v37 = vpop.f32.mrf.mxu0  ;;  %v778_v48 = vmul.f32 %v2691_v10, %v768_v23  ;;  %v831_v50 = vmul.f32 %v2706_v18, %v516_v17  ;;  %v753_v52 = vmul.f32 %v2675_v60, %v516_v17 }
  0xda   : > { %v496_v45 = vmax.f32 %v429_v33, 0.0  ;;  %v384_v41 = vadd.f32 %v2544_v49, %v383_v37  ;;  %v645_v53 = vmul.f32 %v2594_v9, %v715_v29  ;;  %v785_v57 = vadd.f32 %v777_v34, %v759_v26  ;;  %v2758_v37 = vld [vmem:[%s3773_s3 + $0x9] ss:$0 sm:$0xff] }
  0xdb   : > { %v734_v46 = vadd.f32 %v726_v35, %v706_v19  ;;  %v707_v0 = vadd.f32 %v699_v40, %v681_v39  ;;  %v1206_v1 = vadd.f32 %v1198_v31, %v1180_v42  ;;  %v700_v5 = vmul.f32 %v2633_v27, %v768_v23 }
  0xdc   : > { %v532_v55 = vmin.f32 %v496_v45, 6.0  ;;  %v481_v56 = vmax.f32 %v384_v41, 0.0  ;;  %v656_v3 = vadd.f32 %v2616_v21, %v645_v53  ;;  %v675_v11 = vmul.f32 %v2621_v22, %v516_v17 }
  0xdd   : > { %v760_v59 = vadd.f32 %v752_v30, %v734_v46  ;;  %v1240_v62 = vld [vmem:[#allocation2 + $0xe0] sm:$0xff] }
  0xde   : > { %v1292_v63 = vld [vmem:[#allocation2 + $0xe2] sm:$0xff]  ;;  %v1214_v2 = vld [vmem:[#allocation2 + $0xda] sm:$0xff]  ;;  %568 = vst [vmem:[#allocation2 + $0xf1] sm:$0xff] %v532_v55  ;;  %v517_v6 = vmin.f32 %v481_v56, 6.0  ;;  %v1250_v8 = vmul.f32 %v2738_v61, %v1240_v62  ;;  %v682_v19 = vadd.f32 %v674_v32, %v656_v3  ;;  %v1173_v20 = vmul.f32 %v2655_v44, %v1240_v62 }
  0xdf   : > { %v2742_v7 = vadd.f32 %v778_v48, %v760_v59  ;;  %v431_v12 = vpop.f32.mrf.mxu2  ;;  %v794_v14 = vld [vmem:[#allocation2 + $0x30] sm:$0xff]  ;;  %v1302_v15 = vmul.f32 %v2725_v51, %v1292_v63  ;;  %v1224_v16 = vmul.f32 %v2686_v4, %v1214_v2  ;;  %v1277_v28 = vmul.f32 %v2698_v13, %v532_v55 }
  0xe0   : > { %553 = vst [vmem:[#allocation2 + $0x39] sm:$0xff] %v517_v6  ;;  %v432_v24 = vadd.f32 %v2544_v49, %v431_v12  ;;  %v805_v25 = vmul.f32 %v2733_v58, %v794_v14  ;;  %v1258_v26 = vadd.f32 %v1250_v8, %v1231_v36  ;;  %v832_v17 = vmul.f32 %v2706_v18, %v517_v6 }
  0xe1   : > { %v386_v29 = vpop.f32.mrf.mxu0  ;;  %v727_v30 = vmul.f32 %v2650_v43, %v794_v14  ;;  %v1232_v23 = vadd.f32 %v1224_v16, %v1206_v1  ;;  %v708_v31 = vadd.f32 %v700_v5, %v682_v19  ;;  %v754_v39 = vmul.f32 %v2675_v60, %v517_v6 }
  0xe2   : > { %v497_v33 = vmax.f32 %v432_v24, 0.0  ;;  %v387_v32 = vadd.f32 %v2544_v49, %v386_v29  ;;  %v813_v34 = vadd.f32 %v805_v25, %v785_v57  ;;  %v1284_v35 = vadd.f32 %v1276_v38, %v1258_v26  ;;  %v2768_v38 = vld [vmem:[%s3773_s3 + $0xa] ss:$0 sm:$0xff] }
  0xe3   : > { %v735_v36 = vadd.f32 %v727_v30, %v707_v0  ;;  %v1181_v40 = vadd.f32 %v2616_v21, %v1173_v20  ;;  %v646_v42 = vmul.f32 %v2594_v9, %v794_v14  ;;  %v1225_v48 = vmul.f32 %v2686_v4, %v1292_v63 }
  0xe4   : > { %v2763_v45 = vmin.f32 %v497_v33, 6.0  ;;  %v482_v41 = vmax.f32 %v387_v32, 0.0  ;;  %v839_v46 = vadd.f32 %v831_v50, %v813_v34  ;;  %v2771_v53 = vadd.f32 %v1302_v15, %v1284_v35 }
  0xe5   : > { %v761_v56 = vadd.f32 %v753_v52, %v735_v36  ;;  %v1241_v57 = vld [vmem:[#allocation2 + $0xf0] sm:$0xff]  ;;  %v1207_v59 = vadd.f32 %v1199_v54, %v1181_v40  ;;  %v657_v62 = vadd.f32 %v2616_v21, %v646_v42  ;;  %v2783_v2 = vmul.f32 %v2663_v47, %v532_v55 }
  0xe6   : > { %569 = vst [vmem:[#allocation2 + $0xf9] sm:$0xff] %v2763_v45  ;;  %v2775_v0 = vmin.f32 %v482_v41, 6.0  ;;  %v2779_v50 = vmul.f32 %v2758_v37, %v2763_v45  ;;  %v1251_v1 = vmul.f32 %v2738_v61, %v1241_v57  ;;  %v2791_v8 = vmul.f32 %v2698_v13, %v2763_v45 }
  0xe7   : > { %v434_v63 = vpop.f32.mrf.mxu2  ;;  %v847_v3 = vld [vmem:[#allocation2 + $0x32] sm:$0xff]  ;;  %v2787_v54 = vld [vmem:[#allocation2 + $0x3a] sm:$0xff]  ;;  %v1233_v5 = vadd.f32 %v1225_v48, %v1207_v59  ;;  %v683_v12 = vadd.f32 %v675_v11, %v657_v62  ;;  %v1174_v14 = vmul.f32 %v2655_v44, %v1241_v57  ;;  %v2800_v19 = vmul.f32 %v2621_v22, %v517_v6  ;;  %v2812_v6 = vld [vmem:[%s3773_s3 + $0xa] ss:$0 sm:$0xff] }
  0xe8   : > { %v2785_v52 = vld [vmem:[#allocation2 + $0x38] sm:$0xff]  ;;  %554 = vst [vmem:[#allocation2 + $0x49] sm:$0xff] %v2775_v0  ;;  %v435_v15 = vadd.f32 %v2544_v49, %v434_v63  ;;  %v857_v55 = vmul.f32 %v2768_v38, %v847_v3  ;;  %v858_v24 = vmul.f32 %v2768_v38, %v2787_v54  ;;  %v779_v11 = vmul.f32 %v2691_v10, %v847_v3 }
  0xe9   : > { %v806_v16 = vmul.f32 %v2733_v58, %v2785_v52  ;;  %v389_v20 = vpop.f32.mrf.mxu0  ;;  %v1259_v25 = vadd.f32 %v1251_v1, %v1232_v23  ;;  %v728_v26 = vmul.f32 %v2650_v43, %v2785_v52  ;;  %v833_v35 = vmul.f32 %v2706_v18, %v2775_v0 }
  0xea   : > { %v498_v29 = vmax.f32 %v435_v15, 0.0  ;;  %v390_v30 = vadd.f32 %v2544_v49, %v389_v20  ;;  %v865_v33 = vadd.f32 %v857_v55, %v839_v46  ;;  %v787_v34 = vadd.f32 %v779_v11, %v761_v56 }
  0xeb   : > { %v814_v32 = vadd.f32 %v806_v16, %v2742_v7  ;;  %v1285_v36 = vadd.f32 %v1277_v28, %v1259_v25  ;;  %v736_v23 = vadd.f32 %v728_v26, %v708_v31  ;;  %v2821_v7 = vld [vmem:[%s3773_s3 + $0x8] ss:$0 sm:$0xff]  ;;  %v780_v28 = vmul.f32 %v2691_v10, %v2787_v54 }
  0xec   : > { %v2816_v40 = vmin.f32 %v498_v29, 6.0  ;;  %v483_v42 = vmax.f32 %v390_v30, 0.0  ;;  %v873_v41 = vmax.f32 %v865_v33, 0.0  ;;  %v701_v31 = vmul.f32 %v2633_v27, %v847_v3 }
  0xed   : > { %v840_v48 = vadd.f32 %v832_v17, %v814_v32  ;;  %v2823_v46 = vld [vmem:[#allocation2 + $0xf8] sm:$0xff]  ;;  %v762_v59 = vadd.f32 %v754_v39, %v736_v23  ;;  %v755_v62 = vmul.f32 %v2675_v60, %v2775_v0  ;;  %v1182_v11 = vadd.f32 %v2616_v21, %v1174_v14 }
  0xee   : > { %3815 = vst [vmem:[#allocation8_spill] sm:$0xff] %v2816_v40  ;;  %v2825_v57 = vld [vmem:[#allocation2 + $0xfa] sm:$0xff]  ;;  %v1293_v56 = vld [vmem:[#allocation2 + $0xf2] sm:$0xff]  ;;  %v2833_v17 = vmin.f32 %v483_v42, 6.0  ;;  %v881_v1 = vmin.f32 %v873_v41, 6.0  ;;  %v1329_v15 = vmul.f32 %v2821_v7, %v2823_v46  ;;  %v1356_v20 = vmul.f32 %v2758_v37, %v2816_v40 }
  0xef   : > { %570 = vst [vmem:[#allocation2 + $0x109] sm:$0xff] %v2816_v40  ;;  %v866_v63 = vadd.f32 %v858_v24, %v840_v48  ;;  %v437_v55 = vpop.f32.mrf.mxu2  ;;  %v1381_v39 = vmul.f32 %v2812_v6, %v2825_v57  ;;  %v2839_v16 = vld [vmem:[#allocation2 + $0x48] sm:$0xff]  ;;  %v1303_v3 = vmul.f32 %v2725_v51, %v1293_v56  ;;  %v788_v32 = vadd.f32 %v780_v28, %v762_v59 }
  0xf0   : > { %555 = vst [vmem:[#allocation2 + $0x51] sm:$0xff] %v2833_v17  ;;  %v438_v24 = vadd.f32 %v2544_v49, %v437_v55  ;;  %1751 = vmatmul.f32.vlgmr.msra.gmra.mxu1 %v881_v1  ;;  %v1337_v26 = vadd.f32 %v1329_v15, %v2771_v53  ;;  %v807_v29 = vmul.f32 %v2733_v58, %v2839_v16 }
  0xf1   : > { %v874_v25 = vmax.f32 %v866_v63, 0.0  ;;  %v392_v30 = vpop.f32.mrf.mxu0  ;;  %v1311_v33 = vadd.f32 %v1303_v3, %v1285_v36  ;;  %v834_v23 = vmul.f32 %v2706_v18, %v2833_v17  ;;  %v1252_v14 = vmul.f32 %v2738_v61, %v2823_v46 }
  0xf2   : > { %v499_v42 = vmax.f32 %v438_v24, 0.0  ;;  %v393_v41 = vadd.f32 %v2544_v49, %v392_v30  ;;  %v1363_v48 = vadd.f32 %v2779_v50, %v1337_v26  ;;  %v1304_v53 = vmul.f32 %v2725_v51, %v2825_v57 }
  0xf3   : > { %v815_v1 = vadd.f32 %v807_v29, %v787_v34  ;;  %v1260_v63 = vadd.f32 %v1252_v14, %v1233_v5  ;;  %v709_v15 = vadd.f32 %v701_v31, %v683_v12  ;;  %v729_v36 = vmul.f32 %v2650_v43, %v2839_v16 }
  0xf4   : > { %v2860_v59 = vmin.f32 %v499_v42, 6.0  ;;  %v484_v28 = vmax.f32 %v393_v41, 0.0  ;;  %v882_v55 = vmin.f32 %v874_v25, 6.0  ;;  %v1389_v3 = vadd.f32 %v1381_v39, %v1363_v48 }
  0xf5   : > { %v1286_v24 = vadd.f32 %v2791_v8, %v1260_v63  ;;  %v737_v30 = vadd.f32 %v729_v36, %v709_v15  ;;  %v1208_v50 = vadd.f32 %v2783_v2, %v1182_v11  ;;  %v1226_v26 = vmul.f32 %v2686_v4, %v1293_v56 }
  0xf6   : > { %v2862_v22 = vld [vmem:[#allocation2 + $0x108] sm:$0xff]  ;;  %571 = vst [vmem:[#allocation2 + $0x111] sm:$0xff] %v2860_v59  ;;  %v2868_v5 = vmin.f32 %v484_v28, 6.0  ;;  %v1397_v12 = vmax.f32 %v1389_v3, 0.0  ;;  %v841_v34 = vadd.f32 %v833_v35, %v815_v1  ;;  %v1357_v2 = vmul.f32 %v2758_v37, %v2860_v59 }
  0xf7   : > { %3816 = vst [vmem:[#allocation9_spill] sm:$0xff] %v2862_v22  ;;  %v1330_v31 = vmul.f32 %v2821_v7, %v2862_v22  ;;  %v440_v25 = vpop.f32.mrf.mxu2  ;;  %v2872_v39 = vld [vmem:[#allocation2 + $0x4a] sm:$0xff]  ;;  %v2876_v8 = vld [vmem:[#allocation2 + $0x52] sm:$0xff]  ;;  %v1312_v14 = vadd.f32 %v1304_v53, %v1286_v24  ;;  %v763_v56 = vadd.f32 %v755_v62, %v737_v30  ;;  %v1253_v11 = vmul.f32 %v2738_v61, %v2862_v22 }
  0xf8   : > { %3817 = vst [vmem:[#allocation10_spill] sm:$0xff] %v2868_v5  ;;  %v2874_v29 = vld [vmem:[#allocation2 + $0x50] sm:$0xff]  ;;  %v441_v35 = vadd.f32 %v2544_v49, %v440_v25  ;;  %1754 = vmatmul.f32.gmra.mxu1 %v882_v55  ;;  %v1405_v42 = vmin.f32 %v1397_v12, 6.0  ;;  %v859_v41 = vmul.f32 %v2768_v38, %v2872_v39  ;;  %v860_v62 = vmul.f32 %v2768_v38, %v2876_v8 }
  0xf9   : > { %3818 = vst [vmem:[#allocation11_spill] sm:$0xff] %v2872_v39  ;;  %v1338_v48 = vadd.f32 %v1330_v31, %v1311_v33  ;;  %v395_v1 = vpop.f32.mrf.mxu0  ;;  %v808_v53 = vmul.f32 %v2733_v58, %v2874_v29  ;;  %v781_v63 = vmul.f32 %v2691_v10, %v2872_v39  ;;  %v1234_v15 = vadd.f32 %v1226_v26, %v1208_v50 }
  0xfa   : > { %3819 = vst [vmem:[#allocation12_spill] sm:$0xff] %v2874_v29  ;;  %v500_v36 = vmax.f32 %v441_v35, 0.0  ;;  %v396_v28 = vadd.f32 %v2544_v49, %v395_v1  ;;  %1802 = vmatmul.f32.vlgmr.msra.gmra.mxu3 %v1405_v42  ;;  %v867_v55 = vadd.f32 %v859_v41, %v841_v34  ;;  %v835_v3 = vmul.f32 %v2706_v18, %v2868_v5 }
  0xfb   : > { %556 = vst [vmem:[#allocation2 + $0x61] sm:$0xff] %v2868_v5  ;;  %v1364_v33 = vadd.f32 %v1356_v20, %v1338_v48  ;;  %v816_v24 = vadd.f32 %v808_v53, %v788_v32  ;;  %v1261_v30 = vadd.f32 %v1253_v11, %v1234_v15  ;;  %v1279_v12 = vmul.f32 %v2698_v13, %v2816_v40 }
  0xfc   : > { %v2897_v31 = vmin.f32 %v500_v36, 6.0  ;;  %v485_v25 = vmax.f32 %v396_v28, 0.0  ;;  %v875_v22 = vmax.f32 %v867_v55, 0.0  ;;  %v789_v39 = vadd.f32 %v781_v63, %v763_v56 }
  0xfd   : > { %v2899_v50 = vld [vmem:[#allocation2 + $0x10a] sm:$0xff]  ;;  %v842_v26 = vadd.f32 %v834_v23, %v816_v24  ;;  %v2903_v34 = vld [vmem:[#allocation2 + $0x112] sm:$0xff]  ;;  %v1287_v42 = vadd.f32 %v1279_v12, %v1261_v30  ;;  %v647_v20 = vmul.f32 %v2594_v9, %v2785_v52  ;;  %v702_v32 = vmul.f32 %v2633_v27, %v2787_v54 }
  0xfe   : > { %3820 = vst [vmem:[#allocation13_spill] sm:$0xff] %v2897_v31  ;;  %v2901_v35 = vld [vmem:[#allocation2 + $0x110] sm:$0xff]  ;;  %v2910_v11 = vmin.f32 %v485_v25, 6.0  ;;  %v883_v41 = vmin.f32 %v875_v22, 6.0  ;;  %v1382_v56 = vmul.f32 %v2812_v6, %v2899_v50  ;;  %v1383_v53 = vmul.f32 %v2812_v6, %v2903_v34 }
  0xff   : > { %3821 = vst [vmem:[#allocation14_spill] sm:$0xff] %v2899_v50  ;;  %v1331_v23 = vmul.f32 %v2821_v7, %v2901_v35  ;;  %v443_v48 = vpop.f32.mrf.mxu2  ;;  %v868_v1 = vadd.f32 %v860_v62, %v842_v26  ;;  %v1305_v54 = vmul.f32 %v2725_v51, %v2899_v50  ;;  %v730_v63 = vmul.f32 %v2650_v43, %v2874_v29 }
 0x100   : > { %572 = vst [vmem:[#allocation2 + $0x121] sm:$0xff] %v2897_v31  ;;  %v444_v22 = vadd.f32 %v2544_v49, %v443_v48  ;;  %1757 = vmatmul.f32.gmra.mxu1 %v883_v41  ;;  %v1390_v15 = vadd.f32 %v1382_v56, %v1364_v33  ;;  %v1358_v24 = vmul.f32 %v2758_v37, %v2897_v31 }
 0x101   : > { %557 = vst [vmem:[#allocation2 + $0x69] sm:$0xff] %v2910_v11  ;;  %v1339_v36 = vadd.f32 %v1331_v23, %v1312_v14  ;;  %v398_v28 = vpop.f32.mrf.mxu0  ;;  %v876_v62 = vmax.f32 %v868_v1, 0.0  ;;  %v658_v30 = vadd.f32 %v2616_v21, %v647_v20  ;;  %v1313_v41 = vadd.f32 %v1305_v54, %v1287_v42 }
 0x102   : > { %v2918_v52 = vld [vmem:[#allocation2 + $0x60] sm:$0xff]  ;;  %v501_v12 = vmax.f32 %v444_v22, 0.0  ;;  %v399_v25 = vadd.f32 %v2544_v49, %v398_v28  ;;  %v1398_v26 = vmax.f32 %v1390_v15, 0.0  ;;  %v756_v20 = vmul.f32 %v2675_v60, %v2833_v17 }
 0x103   : > { %v809_v55 = vmul.f32 %v2733_v58, %v2918_v52  ;;  %v1365_v29 = vadd.f32 %v1357_v2, %v1339_v36  ;;  %v884_v50 = vmin.f32 %v876_v62, 6.0  ;;  %v684_v14 = vadd.f32 %v2800_v19, %v658_v30 }
 0x104   : > { %v2933_v33 = vmin.f32 %v501_v12, 6.0  ;;  %v486_v56 = vmax.f32 %v399_v25, 0.0  ;;  %v1406_v23 = vmin.f32 %v1398_v26, 6.0  ;;  %v782_v2 = vmul.f32 %v2691_v10, %v2876_v8 }
 0x105   : > { %v817_v48 = vadd.f32 %v809_v55, %v789_v39  ;;  %v1391_v1 = vadd.f32 %v1383_v53, %v1365_v29  ;;  %v710_v31 = vadd.f32 %v702_v32, %v684_v14  ;;  %v1175_v29 = vmul.f32 %v2655_v44, %v2823_v46 }
 0x106   : > { %573 = vst [vmem:[#allocation2 + $0x129] sm:$0xff] %v2933_v33  ;;  %v2942_v39 = vmin.f32 %v486_v56, 6.0  ;;  %1805 = vmatmul.f32.gmra.mxu3 %v1406_v23  ;;  %v836_v54 = vmul.f32 %v2706_v18, %v2910_v11  ;;  %v1201_v22 = vmul.f32 %v2663_v47, %v2763_v45  ;;  %v1227_v15 = vmul.f32 %v2686_v4, %v2825_v57 }
 0x107   : > { %v843_v40 = vadd.f32 %v835_v3, %v817_v48  ;;  %v2935_v5 = vld [vmem:[#allocation2 + $0x120] sm:$0xff]  ;;  %v1399_v19 = vmax.f32 %v1391_v1, 0.0  ;;  %v446_v3 = vpop.f32.mrf.mxu2  ;;  %v738_v53 = vadd.f32 %v730_v63, %v710_v31  ;;  %v1183_v45 = vadd.f32 %v2616_v21, %v1175_v29 }
 0x108   : > { %3822 = vst [vmem:[#allocation15_spill] sm:$0xff] %v2935_v5  ;;  %v1332_v42 = vmul.f32 %v2821_v7, %v2935_v5  ;;  %v2948_v32 = vld [vmem:[#allocation2 + $0x62] sm:$0xff]  ;;  %v447_v36 = vadd.f32 %v2544_v49, %v446_v3  ;;  %1760 = vmatmul.f32.gmra.mxu1 %v884_v50  ;;  %v2962_v63 = vld [vmem:[#allocation2 + $0x6a] sm:$0xff]  ;;  %v1254_v57 = vmul.f32 %v2738_v61, %v2901_v35 }
 0x109   : > { %v2950_v17 = vld [vmem:[#allocation2 + $0x68] sm:$0xff]  ;;  %558 = vst [vmem:[#allocation2 + $0x79] sm:$0xff] %v2942_v39  ;;  %v861_v46 = vmul.f32 %v2768_v38, %v2948_v32  ;;  %v401_v28 = vpop.f32.mrf.mxu0  ;;  %v764_v62 = vadd.f32 %v756_v20, %v738_v53  ;;  %v1407_v50 = vmin.f32 %v1399_v19, 6.0  ;;  %v1209_v14 = vadd.f32 %v1201_v22, %v1183_v45  ;;  %v3823_v22 = vld [vmem:[#allocation7_spill] sm:$0xff] }
 0x10a   : > { %v1340_v31 = vadd.f32 %v1332_v42, %v1313_v41  ;;  %v810_v55 = vmul.f32 %v2733_v58, %v2950_v17  ;;  %v502_v30 = vmax.f32 %v447_v36, 0.0  ;;  %v402_v12 = vadd.f32 %v2544_v49, %v401_v28  ;;  %v3824_v45 = vld [vmem:[#allocation11_spill] sm:$0xff] }
 0x10b   : > { %v869_v25 = vadd.f32 %v861_v46, %v843_v40  ;;  %v790_v48 = vadd.f32 %v782_v2, %v764_v62  ;;  %v862_v41 = vmul.f32 %v2768_v38, %v2962_v63  ;;  %v1280_v20 = vmul.f32 %v2698_v13, %v2860_v59 }
 0x10c   : > { %v1366_v26 = vadd.f32 %v1358_v24, %v1340_v31  ;;  %v2972_v56 = vmin.f32 %v502_v30, 6.0  ;;  %v487_v23 = vmax.f32 %v402_v12, 0.0  ;;  %v1235_v3 = vadd.f32 %v1227_v15, %v1209_v14 }
 0x10d   : > { %v877_v1 = vmax.f32 %v869_v25, 0.0  ;;  %v2976_v42 = vld [vmem:[#allocation2 + $0x122] sm:$0xff]  ;;  %v818_v29 = vadd.f32 %v810_v55, %v790_v48  ;;  %v1306_v40 = vmul.f32 %v2725_v51, %v2903_v34  ;;  %v648_v2 = vmul.f32 %v2594_v9, %v2839_v16 }
 0x10e   : > { %v2980_v24 = vld [vmem:[#allocation2 + $0x128] sm:$0xff]  ;;  %574 = vst [vmem:[#allocation2 + $0x139] sm:$0xff] %v2972_v56  ;;  %v2985_v19 = vmin.f32 %v487_v23, 6.0  ;;  %1808 = vmatmul.f32.gmra.mxu3 %v1407_v50  ;;  %v1384_v59 = vmul.f32 %v2812_v6, %v2976_v42  ;;  %v677_v15 = vmul.f32 %v3823_v22, %v2775_v0  ;;  %v1262_v31 = vadd.f32 %v1254_v57, %v1235_v3 }
 0x10f   : > { %v885_v53 = vmin.f32 %v877_v1, 6.0  ;;  %v449_v36 = vpop.f32.mrf.mxu2  ;;  %v844_v46 = vadd.f32 %v836_v54, %v818_v29  ;;  %v1333_v28 = vmul.f32 %v2821_v7, %v2980_v24  ;;  %v659_v16 = vadd.f32 %v2616_v21, %v648_v2  ;;  %v3001_v29 = vld [vmem:[#allocation2 + $0x12a] sm:$0xff] }
 0x110   : > { %559 = vst [vmem:[#allocation2 + $0x81] sm:$0xff] %v2985_v19  ;;  %v450_v62 = vadd.f32 %v2544_v49, %v449_v36  ;;  %v1392_v55 = vadd.f32 %v1384_v59, %v1366_v26  ;;  %v703_v30 = vmul.f32 %v2633_v27, %v3824_v45  ;;  %v1288_v0 = vadd.f32 %v1280_v20, %v1262_v31  ;;  %v3007_v20 = vld [vmem:[#allocation2 + $0x78] sm:$0xff]  ;;  %v3825_v36 = vld [vmem:[#allocation10_spill] sm:$0xff] }
 0x111   : > { %1763 = vmatmul.f32.gmra.mxu1 %v885_v53  ;;  %v404_v12 = vpop.f32.mrf.mxu0  ;;  %v870_v50 = vadd.f32 %v862_v41, %v844_v46  ;;  %v685_v25 = vadd.f32 %v677_v15, %v659_v16  ;;  %v731_v54 = vmul.f32 %v2650_v43, %v2918_v52  ;;  %v1359_v41 = vmul.f32 %v2758_v37, %v2933_v33 }
 0x112   : > { %v503_v57 = vmax.f32 %v450_v62, 0.0  ;;  %v405_v48 = vadd.f32 %v2544_v49, %v404_v12  ;;  %v1400_v14 = vmax.f32 %v1392_v55, 0.0  ;;  %v1314_v1 = vadd.f32 %v1306_v40, %v1288_v0  ;;  %v3827_v55 = vld [vmem:[#allocation9_spill] sm:$0xff] }
 0x113   : > { %v878_v23 = vmax.f32 %v870_v50, 0.0  ;;  %v711_v3 = vadd.f32 %v703_v30, %v685_v25  ;;  %v757_v46 = vmul.f32 %v2675_v60, %v3825_v36  ;;  %v783_v40 = vmul.f32 %v2691_v10, %v2948_v32  ;;  %v3828_v25 = vld [vmem:[#allocation8_spill] sm:$0xff] }
 0x114   : > { %v3003_v26 = vmin.f32 %v503_v57, 6.0  ;;  %v488_v2 = vmax.f32 %v405_v48, 0.0  ;;  %v1408_v53 = vmin.f32 %v1400_v14, 6.0  ;;  %v1341_v59 = vadd.f32 %v1333_v28, %v1314_v1  ;;  %v3829_v14 = vld [vmem:[#allocation14_spill] sm:$0xff]  ;;  %v668_v1 = vld [vmem:[#allocation2 + $0x51] sm:$0xff] }
 0x115   : > { %v739_v15 = vadd.f32 %v731_v54, %v711_v3  ;;  %v886_v16 = vmin.f32 %v878_v23, 6.0  ;;  %v1385_v62 = vmul.f32 %v2812_v6, %v3001_v29  ;;  %v1176_v45 = vmul.f32 %v2655_v44, %v3827_v55 }
 0x116   : > { %575 = vst [vmem:[#allocation2 + $0x141] sm:$0xff] %v3003_v26  ;;  %v3014_v31 = vmin.f32 %v488_v2, 6.0  ;;  %1811 = vmatmul.f32.gmra.mxu3 %v1408_v53  ;;  %v1367_v30 = vadd.f32 %v1359_v41, %v1341_v59  ;;  %v811_v50 = vmul.f32 %v2733_v58, %v3007_v20  ;;  %v1202_v54 = vmul.f32 %v2663_v47, %v3828_v25  ;;  %v3831_v25 = vld [vmem:[#allocation12_spill] sm:$0xff] }
 0x117   : > { %v452_v28 = vpop.f32.mrf.mxu2  ;;  %v765_v12 = vadd.f32 %v757_v46, %v739_v15  ;;  %v3022_v0 = vld [vmem:[#allocation2 + $0x7a] sm:$0xff]  ;;  %v1184_v48 = vadd.f32 %v2616_v21, %v1176_v45  ;;  %v1228_v23 = vmul.f32 %v2686_v4, %v3829_v14  ;;  %v837_v41 = vmul.f32 %v2706_v18, %v2942_v39 }
 0x118   : > { %3826 = vst [vmem:[#allocation7_spill] sm:$0xff] %v3014_v31  ;;  %v453_v57 = vadd.f32 %v2544_v49, %v452_v28  ;;  %v1393_v2 = vadd.f32 %v1385_v62, %v1367_v30  ;;  %v1255_v59 = vmul.f32 %v2738_v61, %v2935_v5  ;;  %v863_v46 = vmul.f32 %v2768_v38, %v3022_v0  ;;  %v3038_v28 = vld [vmem:[#allocation2 + $0x138] sm:$0xff] }
 0x119   : > { %560 = vst [vmem:[#allocation2 + $0x91] sm:$0xff] %v3014_v31  ;;  %1766 = vmatmul.f32.gmra.mxu1 %v886_v16  ;;  %v407_v3 = vpop.f32.mrf.mxu0  ;;  %v791_v53 = vadd.f32 %v783_v40, %v765_v12  ;;  %v1210_v16 = vadd.f32 %v1202_v54, %v1184_v48  ;;  %v649_v40 = vmul.f32 %v2594_v9, %v3831_v25 }
 0x11a   : > { %v504_v15 = vmax.f32 %v453_v57, 0.0  ;;  %v408_v36 = vadd.f32 %v2544_v49, %v407_v3  ;;  %v1401_v55 = vmax.f32 %v1393_v2, 0.0  ;;  %3830 = vst [vmem:[#allocation11_spill] sm:$0xff] %v3038_v28  ;;  %v678_v62 = vmul.f32 %v3823_v22, %v668_v1  ;;  %v3832_v57 = vld [vmem:[#allocation13_spill] sm:$0xff] }
 0x11b   : > { %v819_v45 = vadd.f32 %v811_v50, %v791_v53  ;;  %v1236_v14 = vadd.f32 %v1228_v23, %v1210_v16  ;;  %v1281_v49 = vmul.f32 %v2698_v13, %v3832_v57  ;;  %v660_v50 = vadd.f32 %v2616_v21, %v649_v40  ;;  %v1193_v16 = vld [vmem:[#allocation2 + $0x111] sm:$0xff] }
 0x11c   : > { %v3043_v30 = vmin.f32 %v504_v15, 6.0  ;;  %v489_v12 = vmax.f32 %v408_v36, 0.0  ;;  %v1409_v3 = vmin.f32 %v1401_v55, 6.0  ;;  %v704_v54 = vmul.f32 %v2633_v27, %v2876_v8  ;;  %v3063_v8 = vld [vmem:[#allocation2 + $0x80] sm:$0xff] }
 0x11d   : > { %v845_v31 = vadd.f32 %v837_v41, %v819_v45  ;;  %v3047_v5 = vld [vmem:[#allocation2 + $0x13a] sm:$0xff]  ;;  %v1263_v22 = vadd.f32 %v1255_v59, %v1236_v14  ;;  %v1307_v48 = vmul.f32 %v2725_v51, %v2976_v42  ;;  %v1334_v23 = vmul.f32 %v2821_v7, %v3038_v28 }
 0x11e   : > { %576 = vst [vmem:[#allocation2 + $0x151] sm:$0xff] %v3043_v30  ;;  %v3053_v9 = vmin.f32 %v489_v12, 6.0  ;;  %1814 = vmatmul.f32.gmra.mxu3 %v1409_v3  ;;  %v1360_v53 = vmul.f32 %v2758_v37, %v2972_v56  ;;  %v686_v41 = vadd.f32 %v678_v62, %v660_v50  ;;  %v732_v27 = vmul.f32 %v2650_v43, %v2950_v17  ;;  %v3069_v59 = vld [vmem:[%s3772_s2] ss:$0 sm:$0xff] }
 0x11f   : > { %v455_v1 = vpop.f32.mrf.mxu2  ;;  %v871_v2 = vadd.f32 %v863_v46, %v845_v31  ;;  %v1289_v36 = vadd.f32 %v1281_v49, %v1263_v22  ;;  %v1386_v31 = vmul.f32 %v2812_v6, %v3047_v5  ;;  %v758_v46 = vmul.f32 %v2675_v60, %v2910_v11  ;;  %v3083_v60 = vld [vmem:[#allocation2 + $0x82] sm:$0xff] }
 0x120   : > { %561 = vst [vmem:[#allocation2 + $0x99] sm:$0xff] %v3053_v9  ;;  %v456_v15 = vadd.f32 %v3069_v59, %v455_v1  ;;  %v712_v45 = vadd.f32 %v704_v54, %v686_v41  ;;  %v784_v25 = vmul.f32 %v2691_v10, %v2962_v63  ;;  %v1177_v40 = vmul.f32 %v2655_v44, %v2901_v35  ;;  %v3090_v10 = vld [vmem:[%s3773_s3] ss:$0 sm:$0xff]  ;;  %v3095_v44 = vld [vmem:[%s3773_s3 + $0x1] ss:$0 sm:$0xff] }
 0x121   : > { %v879_v43 = vmax.f32 %v871_v2, 0.0  ;;  %v410_v55 = vpop.f32.mrf.mxu0  ;;  %v1315_v14 = vadd.f32 %v1307_v48, %v1289_v36  ;;  %v812_v57 = vmul.f32 %v2733_v58, %v3063_v8  ;;  %3833 = vst [vmem:[#allocation10_spill] sm:$0xff] %v3083_v60  ;;  %v1203_v50 = vmul.f32 %v2663_v47, %v1193_v16  ;;  %v924_v48 = vld [vmem:[#allocation2 + $0x61] sm:$0xff] }
 0x122   : > { %v505_v62 = vmax.f32 %v456_v15, 0.0  ;;  %v411_v12 = vadd.f32 %v3069_v59, %v410_v55  ;;  %v740_v3 = vadd.f32 %v732_v27, %v712_v45  ;;  %v1185_v11 = vadd.f32 %v2616_v21, %v1177_v40  ;;  %v3105_v27 = vld [vmem:[#allocation2 + $0x140] sm:$0xff] }
 0x123   : > { %v887_v49 = vmin.f32 %v879_v43, 6.0  ;;  %v1342_v54 = vadd.f32 %v1334_v23, %v1315_v14  ;;  %v838_v22 = vmul.f32 %v2706_v18, %v2985_v19  ;;  %v1229_v2 = vmul.f32 %v2686_v4, %v2903_v34  ;;  %v3110_v15 = vld [vmem:[%s3773_s3 + $0x2] ss:$0 sm:$0xff] }
 0x124   : > { %v3097_v35 = vmin.f32 %v505_v62, 6.0  ;;  %v490_v58 = vmax.f32 %v411_v12, 0.0  ;;  %v766_v47 = vadd.f32 %v758_v46, %v740_v3  ;;  %v1211_v1 = vadd.f32 %v1203_v50, %v1185_v11  ;;  %v3128_v40 = vld [vmem:[#allocation2 + $0x142] sm:$0xff] }
 0x125   : > { %1769 = vmatmul.f32.gmra.mxu1 %v887_v49  ;;  %v1256_v41 = vmul.f32 %v2738_v61, %v2980_v24  ;;  %v1368_v23 = vadd.f32 %v1360_v53, %v1342_v54  ;;  %v864_v36 = vmul.f32 %v2768_v38, %v3083_v60  ;;  %v1282_v4 = vmul.f32 %v2698_v13, %v2933_v33  ;;  %v3168_v54 = vld [vmem:[%s3773_s3 + $0x1] ss:$0 sm:$0xff] }
 0x126   : > { %577 = vst [vmem:[#allocation2 + $0x159] sm:$0xff] %v3097_v35  ;;  %v3113_v18 = vmin.f32 %v490_v58, 6.0  ;;  %v792_v61 = vadd.f32 %v784_v25, %v766_v47  ;;  %v1237_v46 = vadd.f32 %v1229_v2, %v1211_v1  ;;  %v908_v16 = vmul.f32 %v3090_v10, %v2918_v52  ;;  %v3163_v58 = vld [vmem:[#allocation2 + $0x90] sm:$0xff]  ;;  %v3177_v2 = vld [vmem:[%s3773_s3 + $0x2] ss:$0 sm:$0xff] }
 0x127   : > { %v458_v34 = vpop.f32.mrf.mxu2  ;;  %v934_v43 = vmul.f32 %v3095_v44, %v924_v48  ;;  %v1394_v55 = vadd.f32 %v1386_v31, %v1368_v23  ;;  %v1308_v53 = vmul.f32 %v2725_v51, %v3001_v29  ;;  %v1335_v38 = vmul.f32 %v2821_v7, %v3105_v27  ;;  %v3136_v31 = vld [vmem:[%s3773_s3 + $0x4] ss:$0 sm:$0xff]  ;;  %v3141_v51 = vld [vmem:[%s3773_s3 + $0x5] ss:$0 sm:$0xff] }
 0x128   : > { %3834 = vst [vmem:[#allocation9_spill] sm:$0xff] %v3113_v18  ;;  %v459_v45 = vadd.f32 %v3069_v59, %v458_v34  ;;  %v820_v13 = vadd.f32 %v812_v57, %v792_v61  ;;  %v1264_v25 = vadd.f32 %v1256_v41, %v1237_v46  ;;  %v916_v52 = vadd.f32 %v2616_v21, %v908_v16  ;;  %v3154_v57 = vld [vmem:[%s3773_s3] ss:$0 sm:$0xff]  ;;  %v3184_v61 = vld [vmem:[%s3773_s3 + $0x9] ss:$0 sm:$0xff]  ;;  %v1448_v46 = vld [vmem:[#allocation2 + $0x121] sm:$0xff] }
 0x129   : > { %562 = vst [vmem:[#allocation2 + $0xa9] sm:$0xff] %v3113_v18  ;;  %v413_v33 = vpop.f32.mrf.mxu0  ;;  %v960_v62 = vmul.f32 %v3110_v15, %v2948_v32  ;;  %v1402_v7 = vmax.f32 %v1394_v55, 0.0  ;;  %v1361_v21 = vmul.f32 %v2758_v37, %v3003_v26  ;;  %v3149_v32 = vld [vmem:[%s3773_s3 + $0x8] ss:$0 sm:$0xff]  ;;  %v987_v50 = vmul.f32 %v3136_v31, %v3007_v20  ;;  %v3161_v37 = vld [vmem:[%s3773_s3 + $0x6] ss:$0 sm:$0xff] }
 0x12a   : > { %v506_v12 = vmax.f32 %v459_v45, 0.0  ;;  %v414_v14 = vadd.f32 %v3069_v59, %v413_v33  ;;  %3835 = vst [vmem:[#allocation8_spill] sm:$0xff] %v3149_v32  ;;  %v846_v49 = vadd.f32 %v838_v22, %v820_v13  ;;  %v1290_v3 = vadd.f32 %v1282_v4, %v1264_v25  ;;  %v3839_v55 = vld [vmem:[#allocation15_spill] sm:$0xff] }
 0x12b   : > { %v942_v11 = vadd.f32 %v934_v43, %v916_v52  ;;  %v1410_v48 = vmin.f32 %v1402_v7, 6.0  ;;  %v1387_v1 = vmul.f32 %v2812_v6, %v3128_v40  ;;  %v1013_v34 = vmul.f32 %v3141_v51, %v2942_v39  ;;  %3837 = vst [vmem:[#allocation12_spill] sm:$0xff] %v3184_v61  ;;  %v3189_v6 = vld [vmem:[%s3773_s3 + $0x5] ss:$0 sm:$0xff]  ;;  %v3198_v43 = vld [vmem:[#allocation2 + $0x92] sm:$0xff] }
 0x12c   : > { %v3170_v47 = vmin.f32 %v506_v12, 6.0  ;;  %v491_v22 = vmax.f32 %v414_v14, 0.0  ;;  %v872_v41 = vadd.f32 %v864_v36, %v846_v49  ;;  %v1316_v23 = vadd.f32 %v1308_v53, %v1290_v3  ;;  %v3205_v53 = vld [vmem:[%s3773_s3 + $0x4] ss:$0 sm:$0xff]  ;;  %v3212_v12 = vld [vmem:[%s3773_s3 + $0xa] ss:$0 sm:$0xff] }
 0x12d   : > { %v968_v4 = vadd.f32 %v960_v62, %v942_v11  ;;  %1817 = vmatmul.f32.gmra.mxu3 %v1410_v48  ;;  %v1039_v16 = vmul.f32 %v3161_v37, %v3022_v0  ;;  %v1066_v39 = vmul.f32 %v3149_v32, %v3163_v58  ;;  %v1432_v45 = vmul.f32 %v3154_v57, %v3839_v55  ;;  %v3840_v62 = vld [vmem:[#allocation7_spill] sm:$0xff]  ;;  %v3219_v49 = vld [vmem:[%s3774_s4] ss:$0 sm:$0xff]  ;;  %v3233_v48 = vld [vmem:[%s3773_s3 + $0x8] ss:$0 sm:$0xff] }
 0x12e   : > { %3836 = vst [vmem:[#allocation14_spill] sm:$0xff] %v3170_v47  ;;  %v3192_v36 = vmin.f32 %v491_v22, 6.0  ;;  %v880_v13 = vmax.f32 %v872_v41, 0.0  ;;  %v1343_v33 = vadd.f32 %v1335_v38, %v1316_v23  ;;  %v1092_v7 = vmul.f32 %v3184_v61, %v3840_v62  ;;  %v925_v22 = vld [vmem:[#allocation2 + $0x69] sm:$0xff] }
 0x12f   : > { %578 = vst [vmem:[#allocation2 + $0x169] sm:$0xff] %v3170_v47  ;;  %v461_v25 = vpop.f32.mrf.mxu2  ;;  %v995_v52 = vadd.f32 %v987_v50, %v968_v4  ;;  %v1440_v38 = vadd.f32 %v3219_v49, %v1432_v45  ;;  %v1458_v3 = vmul.f32 %v3168_v54, %v1448_v46  ;;  %v1484_v11 = vmul.f32 %v3177_v2, %v2976_v42  ;;  %v3228_v50 = vld [vmem:[%s3773_s3 + $0x6] ss:$0 sm:$0xff]  ;;  %v3237_v55 = vld [vmem:[#allocation2 + $0x150] sm:$0xff]  ;;  %v3246_v47 = vld [vmem:[%s3773_s3 + $0x9] ss:$0 sm:$0xff] }
 0x130   : > { %3838 = vst [vmem:[#allocation13_spill] sm:$0xff] %v3192_v36  ;;  %v462_v14 = vadd.f32 %v3069_v59, %v461_v25  ;;  %v888_v41 = vmin.f32 %v880_v13, 6.0  ;;  %v1369_v23 = vadd.f32 %v1361_v21, %v1343_v33  ;;  %v1118_v46 = vmul.f32 %v3212_v12, %v3198_v43  ;;  %v3251_v21 = vld [vmem:[%s3773_s3 + $0xa] ss:$0 sm:$0xff]  ;;  %v3253_v33 = vld [vmem:[#allocation2 + $0x152] sm:$0xff] }
 0x131   : > { %563 = vst [vmem:[#allocation2 + $0xb1] sm:$0xff] %v3192_v36  ;;  %v1021_v4 = vadd.f32 %v1013_v34, %v995_v52  ;;  %v1466_v45 = vadd.f32 %v1458_v3, %v1440_v38  ;;  %v1511_v25 = vmul.f32 %v3205_v53, %v3038_v28  ;;  %v1537_v36 = vmul.f32 %v3189_v6, %v2972_v56 }
 0x132   : > { %v507_v42 = vmax.f32 %v462_v14, 0.0  ;;  %1772 = vmatmul.f32.gmra.mxu1 %v888_v41  ;;  %v1395_v34 = vadd.f32 %v1387_v1, %v1369_v23  ;;  %3841 = vst [vmem:[#allocation15_spill] sm:$0xff] %v3253_v33  ;;  %v909_v52 = vmul.f32 %v3090_v10, %v2950_v17  ;;  %v935_v56 = vmul.f32 %v3095_v44, %v925_v22 }
 0x133   : > { %v1047_v13 = vadd.f32 %v1039_v16, %v1021_v4  ;;  %v1492_v38 = vadd.f32 %v1484_v11, %v1466_v45  ;;  %v1563_v3 = vmul.f32 %v3228_v50, %v3047_v5  ;;  %v1590_v18 = vmul.f32 %v3233_v48, %v3237_v55  ;;  %v3274_v4 = vld [vmem:[#allocation2 + $0x98] sm:$0xff] }
 0x134   : > { %v3258_v14 = vmin.f32 %v507_v42, 6.0  ;;  %v1403_v28 = vmax.f32 %v1395_v34, 0.0  ;;  %v917_v1 = vadd.f32 %v3219_v49, %v909_v52  ;;  %v961_v16 = vmul.f32 %v3110_v15, %v2962_v63 }
 0x135   : > { %v1074_v41 = vadd.f32 %v1066_v39, %v1047_v13  ;;  %v1519_v17 = vadd.f32 %v1511_v25, %v1492_v38  ;;  %v1616_v22 = vmul.f32 %v3246_v47, %v3043_v30  ;;  %v1642_v11 = vmul.f32 %v3251_v21, %v3253_v33  ;;  %v1449_v13 = vld [vmem:[#allocation2 + $0x129] sm:$0xff] }
 0x136   : > { %3842 = vst [vmem:[#allocation7_spill] sm:$0xff] %v3258_v14  ;;  %v988_v23 = vmul.f32 %v3136_v31, %v3063_v8  ;;  %v1411_v39 = vmin.f32 %v1403_v28, 6.0  ;;  %v943_v34 = vadd.f32 %v935_v56, %v917_v1  ;;  %v1014_v63 = vmul.f32 %v3141_v51, %v2985_v19 }
 0x137   : > { %579 = vst [vmem:[#allocation2 + $0x171] sm:$0xff] %v3258_v14  ;;  %v1100_v42 = vadd.f32 %v1092_v7, %v1074_v41  ;;  %v464_v45 = vpop.f32.mrf.mxu2  ;;  %v1545_v25 = vadd.f32 %v1537_v36, %v1519_v17  ;;  %v1040_v38 = vmul.f32 %v3161_v37, %v3083_v60  ;;  %v3281_v14 = vld [vmem:[#allocation2 + $0x9a] sm:$0xff]  ;;  %v1433_v33 = vmul.f32 %v3154_v57, %v2980_v24 }
 0x138   : > { %v465_v52 = vadd.f32 %v3069_v59, %v464_v45  ;;  %1820 = vmatmul.f32.gmra.mxu3 %v1411_v39  ;;  %v969_v7 = vadd.f32 %v961_v16, %v943_v34  ;;  %v1067_v56 = vmul.f32 %v3149_v32, %v3274_v4  ;;  %v1093_v19 = vmul.f32 %v3184_v61, %v3053_v9  ;;  %v926_v16 = vld [vmem:[#allocation2 + $0x79] sm:$0xff] }
 0x139   : > { %v1126_v28 = vadd.f32 %v1118_v46, %v1100_v42  ;;  %v1571_v36 = vadd.f32 %v1563_v3, %v1545_v25  ;;  %v1441_v1 = vadd.f32 %v3219_v49, %v1433_v33  ;;  %v1459_v17 = vmul.f32 %v3168_v54, %v1449_v13  ;;  %v3299_v25 = vld [vmem:[#allocation2 + $0x158] sm:$0xff] }
 0x13a   : > { %v508_v41 = vmax.f32 %v465_v52, 0.0  ;;  %v996_v60 = vadd.f32 %v988_v23, %v969_v7  ;;  %v1119_v24 = vmul.f32 %v3212_v12, %v3281_v14  ;;  %v1485_v46 = vmul.f32 %v3177_v2, %v3001_v29  ;;  %v3308_v7 = vld [vmem:[#allocation2 + $0x15a] sm:$0xff] }
 0x13b   : > { %v1134_v45 = vmax.f32 %v1126_v28, 0.0  ;;  %v1598_v39 = vadd.f32 %v1590_v18, %v1571_v36  ;;  %v1467_v34 = vadd.f32 %v1459_v17, %v1441_v1  ;;  %v1512_v3 = vmul.f32 %v3205_v53, %v3105_v27 }
 0x13c   : > { %v3295_v42 = vmin.f32 %v508_v41, 6.0  ;;  %v1022_v13 = vadd.f32 %v1014_v63, %v996_v60  ;;  %v1538_v23 = vmul.f32 %v3189_v6, %v3003_v26  ;;  %v910_v52 = vmul.f32 %v3090_v10, %v3007_v20 }
 0x13d   : > { %v1142_v33 = vmin.f32 %v1134_v45, 6.0  ;;  %v1624_v28 = vadd.f32 %v1616_v22, %v1598_v39  ;;  %v1493_v29 = vadd.f32 %v1485_v46, %v1467_v34  ;;  %v1564_v18 = vmul.f32 %v3228_v50, %v3128_v40  ;;  %v1450_v34 = vld [vmem:[#allocation2 + $0x139] sm:$0xff] }
 0x13e   : > { %580 = vst [vmem:[#allocation2 + $0x181] sm:$0xff] %v3295_v42  ;;  %v936_v36 = vmul.f32 %v3095_v44, %v926_v16  ;;  %v1048_v41 = vadd.f32 %v1040_v38, %v1022_v13  ;;  %v1591_v60 = vmul.f32 %v3233_v48, %v3299_v25  ;;  %v918_v63 = vadd.f32 %v3219_v49, %v910_v52 }
 0x13f   : > { %1775 = vmatmul.f32.gmra.mxu1 %v1142_v33  ;;  %v467_v26 = vpop.f32.mrf.mxu2  ;;  %v962_v20 = vmul.f32 %v3110_v15, %v3022_v0  ;;  %v1650_v22 = vadd.f32 %v1642_v11, %v1624_v28  ;;  %v1520_v1 = vadd.f32 %v1512_v3, %v1493_v29  ;;  %v1617_v17 = vmul.f32 %v3246_v47, %v3097_v35  ;;  %v3843_v29 = vld [vmem:[#allocation11_spill] sm:$0xff] }
 0x140   : > { %v468_v45 = vadd.f32 %v3069_v59, %v467_v26  ;;  %v1075_v46 = vadd.f32 %v1067_v56, %v1048_v41  ;;  %v1643_v38 = vmul.f32 %v3251_v21, %v3308_v7  ;;  %v944_v16 = vadd.f32 %v936_v36, %v918_v63  ;;  %v3327_v56 = vld [vmem:[#allocation2 + $0xa8] sm:$0xff] }
 0x141   : > { %v989_v39 = vmul.f32 %v3136_v31, %v3163_v58  ;;  %v1658_v33 = vmax.f32 %v1650_v22, 0.0  ;;  %v1546_v13 = vadd.f32 %v1538_v23, %v1520_v1  ;;  %v1015_v0 = vmul.f32 %v3141_v51, %v3840_v62 }
 0x142   : > { %v509_v52 = vmax.f32 %v468_v45, 0.0  ;;  %v1101_v11 = vadd.f32 %v1093_v19, %v1075_v46  ;;  %v970_v3 = vadd.f32 %v962_v20, %v944_v16  ;;  %v1041_v28 = vmul.f32 %v3161_v37, %v3198_v43  ;;  %v3334_v45 = vld [vmem:[#allocation2 + $0xaa] sm:$0xff]  ;;  %v3845_v46 = vld [vmem:[#allocation9_spill] sm:$0xff] }
 0x143   : > { %v1434_v36 = vmul.f32 %v3154_v57, %v3843_v29  ;;  %v1666_v41 = vmin.f32 %v1658_v33, 6.0  ;;  %v1572_v26 = vadd.f32 %v1564_v18, %v1546_v13  ;;  %v1460_v23 = vmul.f32 %v3168_v54, %v1450_v34 }
 0x144   : > { %v3331_v63 = vmin.f32 %v509_v52, 6.0  ;;  %v1127_v22 = vadd.f32 %v1119_v24, %v1101_v11  ;;  %v997_v1 = vadd.f32 %v989_v39, %v970_v3  ;;  %v1486_v19 = vmul.f32 %v3177_v2, %v3047_v5  ;;  %v927_v52 = vld [vmem:[#allocation2 + $0x81] sm:$0xff] }
 0x145   : > { %v1442_v62 = vadd.f32 %v3219_v49, %v1434_v36  ;;  %1823 = vmatmul.f32.gmra.mxu3 %v1666_v41  ;;  %v1599_v20 = vadd.f32 %v1591_v60, %v1572_v26  ;;  %v1068_v18 = vmul.f32 %v3149_v32, %v3327_v56  ;;  %v1094_v16 = vmul.f32 %v3184_v61, %v3845_v46  ;;  %v3351_v26 = vld [vmem:[#allocation2 + $0x168] sm:$0xff] }
 0x146   : > { %3844 = vst [vmem:[#allocation11_spill] sm:$0xff] %v3331_v63  ;;  %v1135_v34 = vmax.f32 %v1127_v22, 0.0  ;;  %v1023_v24 = vadd.f32 %v1015_v0, %v997_v1  ;;  %v1513_v33 = vmul.f32 %v3205_v53, %v3237_v55  ;;  %v1120_v5 = vmul.f32 %v3212_v12, %v3334_v45 }
 0x147   : > { %581 = vst [vmem:[#allocation2 + $0x189] sm:$0xff] %v3331_v63  ;;  %v1468_v39 = vadd.f32 %v1460_v23, %v1442_v62  ;;  %v470_v13 = vpop.f32.mrf.mxu2  ;;  %v1625_v11 = vadd.f32 %v1617_v17, %v1599_v20  ;;  %v1539_v60 = vmul.f32 %v3189_v6, %v3043_v30  ;;  %v911_v0 = vmul.f32 %v3090_v10, %v3063_v8  ;;  %v3355_v23 = vld [vmem:[#allocation2 + $0xc0] sm:$0xff]  ;;  %v3847_v17 = vld [vmem:[#allocation15_spill] sm:$0xff] }
 0x148   : > { %v471_v3 = vadd.f32 %v3069_v59, %v470_v13  ;;  %v1143_v29 = vmin.f32 %v1135_v34, 6.0  ;;  %v1049_v36 = vadd.f32 %v1041_v28, %v1023_v24  ;;  %3846 = vst [vmem:[#allocation9_spill] sm:$0xff] %v3355_v23  ;;  %v1565_v1 = vmul.f32 %v3228_v50, %v3847_v17  ;;  %v3363_v24 = vld [vmem:[#allocation2 + $0xc1] sm:$0xff]  ;;  %v3398_v63 = vld [vmem:[#allocation2 + $0xb2] sm:$0xff] }
 0x149   : > { %v1494_v41 = vadd.f32 %v1486_v19, %v1468_v39  ;;  %v1651_v22 = vadd.f32 %v1643_v38, %v1625_v11  ;;  %v937_v20 = vmul.f32 %v3095_v44, %v927_v52  ;;  %v919_v28 = vadd.f32 %v3219_v49, %v911_v0  ;;  %v3848_v19 = vld [vmem:[#allocation10_spill] sm:$0xff]  ;;  %3849 = vst [vmem:[#allocation15_spill] sm:$0xff] %v3363_v24 }
 0x14a   : > { %v510_v62 = vmax.f32 %v471_v3, 0.0  ;;  %1778 = vmatmul.f32.gmra.mxu1 %v1143_v29  ;;  %v1076_v30 = vadd.f32 %v1068_v18, %v1049_v36  ;;  %v963_v34 = vmul.f32 %v3110_v15, %v3848_v19  ;;  %v1592_v38 = vmul.f32 %v3233_v48, %v3351_v26  ;;  %v3367_v39 = vld [vmem:[#allocation2 + $0x16a] sm:$0xff]  ;;  %v1451_v36 = vld [vmem:[#allocation2 + $0x141] sm:$0xff] }
 0x14b   : > { %v1521_v13 = vadd.f32 %v1513_v33, %v1494_v41  ;;  %v1659_v8 = vmax.f32 %v1651_v22, 0.0  ;;  %v3371_v52 = vmul.f32 %v3149_v32, %v3355_v23  ;;  %v945_v3 = vadd.f32 %v937_v20, %v919_v28  ;;  %v3850_v0 = vld [vmem:[#allocation14_spill] sm:$0xff]  ;;  %v3377_v19 = vld [vmem:[#allocation2 + $0xb0] sm:$0xff] }
 0x14c   : > { %v546_v11 = vmin.f32 %v510_v62, 6.0  ;;  %v1102_v18 = vadd.f32 %v1094_v16, %v1076_v30  ;;  %v990_v29 = vmul.f32 %v3136_v31, %v3274_v4  ;;  %v1618_v22 = vmul.f32 %v3246_v47, %v3850_v0  ;;  %v3387_v30 = vld [vmem:[#allocation2] sm:$0xff] }
 0x14d   : > { %v1547_v33 = vadd.f32 %v1539_v60, %v1521_v13  ;;  %v1667_v41 = vmin.f32 %v1659_v8, 6.0  ;;  %v1435_v62 = vmul.f32 %v3154_v57, %v3105_v27  ;;  %v3383_v23 = vmul.f32 %v3184_v61, %v3363_v24 }
 0x14e   : > { %582 = vst [vmem:[#allocation2 + $0x199] sm:$0xff] %v546_v11  ;;  %v1128_v16 = vadd.f32 %v1120_v5, %v1102_v18  ;;  %v1644_v20 = vmul.f32 %v3251_v21, %v3367_v39  ;;  %v971_v13 = vadd.f32 %v963_v34, %v945_v3  ;;  %v1016_v28 = vmul.f32 %v3141_v51, %v3053_v9  ;;  %v928_v34 = vld [vmem:[#allocation2 + $0x91] sm:$0xff]  ;;  %v3852_v3 = vld [vmem:[#allocation13_spill] sm:$0xff] }
 0x14f   : > { %3851 = vst [vmem:[#allocation10_spill] sm:$0xff] %v3383_v23  ;;  %v1573_v60 = vadd.f32 %v1565_v1, %v1547_v33  ;;  %1826 = vmatmul.f32.gmra.mxu3 %v1667_v41  ;;  %v1042_v27 = vmul.f32 %v3161_v37, %v3281_v14  ;;  %v1443_v8 = vadd.f32 %v3219_v49, %v1435_v62  ;;  %v473_v1 = vpop.f32.mrf.mxu2 }
 0x150   : > { %628 = vst [vmem:[#allocation2 + $0x198] sm:$0xff] %v3387_v30  ;;  %v1461_v5 = vmul.f32 %v3168_v54, %v1451_v36  ;;  %v1136_v11 = vmax.f32 %v1128_v16, 0.0  ;;  %v998_v33 = vadd.f32 %v990_v29, %v971_v13  ;;  %v1069_v24 = vmul.f32 %v3149_v32, %v3377_v19  ;;  %v3409_v32 = vld [vmem:[#allocation2 + $0x170] sm:$0xff] }
 0x151   : > { %v1600_v18 = vadd.f32 %v1592_v38, %v1573_v60  ;;  %v1095_v9 = vmul.f32 %v3184_v61, %v3852_v3  ;;  %v1487_v23 = vmul.f32 %v3177_v2, %v3128_v40  ;;  %v1514_v36 = vmul.f32 %v3205_v53, %v3299_v25 }
 0x152   : > { %v1469_v41 = vadd.f32 %v1461_v5, %v1443_v8  ;;  %v1144_v62 = vmin.f32 %v1136_v11, 6.0  ;;  %v1024_v38 = vadd.f32 %v1016_v28, %v998_v33  ;;  %v474_v29 = vadd.f32 %v3069_v59, %v473_v1 }
 0x153   : > { %v1626_v16 = vadd.f32 %v1618_v22, %v1600_v18  ;;  %v1121_v60 = vmul.f32 %v3212_v12, %v3398_v63  ;;  %v912_v8 = vmul.f32 %v3090_v10, %v3163_v58  ;;  %v938_v5 = vmul.f32 %v3095_v44, %v928_v34  ;;  %v1452_v18 = vld [vmem:[#allocation2 + $0x151] sm:$0xff] }
 0x154   : > { %v1495_v13 = vadd.f32 %v1487_v23, %v1469_v41  ;;  %1781 = vmatmul.f32.gmra.mxu1 %v1144_v62  ;;  %v1050_v61 = vadd.f32 %v1042_v27, %v1024_v38  ;;  %v1540_v22 = vmul.f32 %v3189_v6, %v3097_v35  ;;  %v511_v28 = vmax.f32 %v474_v29, 0.0  ;;  %v3853_v38 = vld [vmem:[#allocation7_spill] sm:$0xff] }
 0x155   : > { %v1652_v40 = vadd.f32 %v1644_v20, %v1626_v16  ;;  %v1566_v59 = vmul.f32 %v3228_v50, %v3308_v7  ;;  %v920_v23 = vadd.f32 %v3219_v49, %v912_v8  ;;  %v964_v1 = vmul.f32 %v3110_v15, %v3198_v43  ;;  %v3430_v29 = vld [vmem:[#allocation2 + $0x172] sm:$0xff] }
 0x156   : > { %v1522_v11 = vadd.f32 %v1514_v36, %v1495_v13  ;;  %v1077_v33 = vadd.f32 %v1069_v24, %v1050_v61  ;;  %v1593_v20 = vmul.f32 %v3233_v48, %v3409_v32  ;;  %v547_v27 = vmin.f32 %v511_v28, 6.0  ;;  %v3441_v28 = vld [vmem:[#allocation2 + $0xc2] sm:$0xff] }
 0x157   : > { %v1660_v58 = vmax.f32 %v1652_v40, 0.0  ;;  %v946_v41 = vadd.f32 %v938_v5, %v920_v23  ;;  %v991_v35 = vmul.f32 %v3136_v31, %v3327_v56  ;;  %v1436_v36 = vmul.f32 %v3154_v57, %v3237_v55  ;;  %v929_v55 = vld [vmem:[#allocation2 + $0x99] sm:$0xff] }
 0x158   : > { %v1548_v34 = vadd.f32 %v1540_v22, %v1522_v11  ;;  %v1103_v16 = vadd.f32 %v1095_v9, %v1077_v33  ;;  %v1619_v43 = vmul.f32 %v3246_v47, %v3853_v38  ;;  %583 = vst [vmem:[#allocation2 + $0x1a1] sm:$0xff] %v547_v27  ;;  %v1462_v61 = vmul.f32 %v3168_v54, %v1452_v18 }
 0x159   : > { %v1668_v62 = vmin.f32 %v1660_v58, 6.0  ;;  %629 = vst [vmem:[#allocation2 + $0x1a0] sm:$0xff] %v3387_v30  ;;  %v972_v13 = vadd.f32 %v964_v1, %v946_v41  ;;  %v1444_v8 = vadd.f32 %v3219_v49, %v1436_v36  ;;  %v1488_v5 = vmul.f32 %v3177_v2, %v3847_v17 }
 0x15a   : > { %v1574_v24 = vadd.f32 %v1566_v59, %v1548_v34  ;;  %v1129_v9 = vadd.f32 %v1121_v60, %v1103_v16  ;;  %630 = vst [vmem:[#allocation2 + $0x1a8] sm:$0x3] %v3387_v30  ;;  %v1017_v40 = vmul.f32 %v3141_v51, %v3845_v46  ;;  %v1043_v22 = vmul.f32 %v3161_v37, %v3334_v45  ;;  %v3452_v34 = vld [vmem:[#allocation2 + $0x180] sm:$0xff] }
 0x15b   : > { %1829 = vmatmul.f32.gmra.mxu3 %v1668_v62  ;;  %v999_v59 = vadd.f32 %v991_v35, %v972_v13  ;;  %v1470_v23 = vadd.f32 %v1462_v61, %v1444_v8  ;;  %v1515_v1 = vmul.f32 %v3205_v53, %v3351_v26  ;;  %v1645_v60 = vmul.f32 %v3251_v21, %v3430_v29  ;;  %v1453_v13 = vld [vmem:[#allocation2 + $0x159] sm:$0xff] }
 0x15c   : > { %v1601_v11 = vadd.f32 %v1593_v20, %v1574_v24  ;;  %v1137_v17 = vmax.f32 %v1129_v9, 0.0  ;;  %v913_v18 = vmul.f32 %v3090_v10, %v3274_v4  ;;  %v939_v46 = vmul.f32 %v3095_v44, %v929_v55  ;;  %v3461_v24 = vld [vmem:[#allocation2 + $0x182] sm:$0xff] }
 0x15d   : > { %v1025_v33 = vadd.f32 %v1017_v40, %v999_v59  ;;  %v1122_v27 = vmul.f32 %v3212_v12, %v3441_v28  ;;  %v1496_v20 = vadd.f32 %v1488_v5, %v1470_v23  ;;  %v1541_v35 = vmul.f32 %v3189_v6, %v3850_v0 }
 0x15e   : > { %v1627_v58 = vadd.f32 %v1619_v43, %v1601_v11  ;;  %v1145_v41 = vmin.f32 %v1137_v17, 6.0  ;;  %v921_v36 = vadd.f32 %v3219_v49, %v913_v18  ;;  %v965_v62 = vmul.f32 %v3110_v15, %v3281_v14  ;;  %v3854_v18 = vld [vmem:[#allocation10_spill] sm:$0xff] }
 0x15f   : > { %v1051_v16 = vadd.f32 %v1043_v22, %v1025_v33  ;;  %v1523_v61 = vadd.f32 %v1515_v1, %v1496_v20  ;;  %v1567_v43 = vmul.f32 %v3228_v50, %v3367_v39  ;;  %v1594_v8 = vmul.f32 %v3233_v48, %v3452_v34  ;;  %v3470_v22 = vld [vmem:[#allocation2 + $0xc8] sm:$0xff] }
 0x160   : > { %v1653_v4 = vadd.f32 %v1645_v60, %v1627_v58  ;;  %1784 = vmatmul.f32.gmra.mxu1 %v1145_v41  ;;  %v1620_v0 = vmul.f32 %v3246_v47, %v3295_v42  ;;  %v947_v5 = vadd.f32 %v939_v46, %v921_v36  ;;  %v992_v14 = vmul.f32 %v3136_v31, %v3377_v19  ;;  %v930_v20 = vld [vmem:[#allocation2 + $0xa9] sm:$0xff] }
 0x161   : > { %v1078_v9 = vadd.f32 %v3371_v52, %v1051_v16  ;;  %v1549_v40 = vadd.f32 %v1541_v35, %v1523_v61  ;;  %v1437_v11 = vmul.f32 %v3154_v57, %v3299_v25  ;;  %v1646_v59 = vmul.f32 %v3251_v21, %v3461_v24  ;;  %v3480_v52 = vld [vmem:[#allocation2 + $0xc9] sm:$0xff]  ;;  %v3855_v35 = vld [vmem:[#allocation8_spill] sm:$0xff] }
 0x162   : > { %v1661_v55 = vmax.f32 %v1653_v4, 0.0  ;;  %v973_v23 = vadd.f32 %v965_v62, %v947_v5  ;;  %v1018_v1 = vmul.f32 %v3141_v51, %v3852_v3  ;;  %v1463_v17 = vmul.f32 %v3168_v54, %v1453_v13  ;;  %v3487_v62 = vld [vmem:[#allocation2 + $0xca] sm:$0xff] }
 0x163   : > { %v1104_v46 = vadd.f32 %v3854_v18, %v1078_v9  ;;  %v1575_v58 = vadd.f32 %v1567_v43, %v1549_v40  ;;  %v1445_v33 = vadd.f32 %v3219_v49, %v1437_v11  ;;  %v1044_v25 = vmul.f32 %v3161_v37, %v3398_v63 }
 0x164   : > { %v1669_v60 = vmin.f32 %v1661_v55, 6.0  ;;  %v1000_v41 = vadd.f32 %v992_v14, %v973_v23  ;;  %v1071_v36 = vmul.f32 %v3855_v35, %v3470_v22  ;;  %v1489_v4 = vmul.f32 %v3177_v2, %v3308_v7  ;;  %v3856_v14 = vld [vmem:[#allocation12_spill] sm:$0xff] }
 0x165   : > { %v1130_v16 = vadd.f32 %v1122_v27, %v1104_v46  ;;  %v1602_v61 = vadd.f32 %v1594_v8, %v1575_v58  ;;  %v1471_v43 = vadd.f32 %v1463_v17, %v1445_v33  ;;  %v1516_v13 = vmul.f32 %v3205_v53, %v3409_v32  ;;  %v3500_v8 = vld [vmem:[#allocation2 + $0x188] sm:$0xff] }
 0x166   : > { %1832 = vmatmul.f32.gmra.mxu3 %v1669_v60  ;;  %v1026_v5 = vadd.f32 %v1018_v1, %v1000_v41  ;;  %v1097_v55 = vmul.f32 %v3856_v14, %v3480_v52  ;;  %v914_v9 = vmul.f32 %v3090_v10, %v3327_v56  ;;  %v940_v40 = vmul.f32 %v3095_v44, %v930_v20  ;;  %v3504_v60 = vld [vmem:[#allocation2 + $0x18a] sm:$0xff] }
 0x167   : > { %v1138_v11 = vmax.f32 %v1130_v16, 0.0  ;;  %v1628_v23 = vadd.f32 %v1620_v0, %v1602_v61  ;;  %v1123_v7 = vmul.f32 %v3212_v12, %v3487_v62  ;;  %v1497_v27 = vadd.f32 %v1489_v4, %v1471_v43 }
 0x168   : > { %v1052_v17 = vadd.f32 %v1044_v25, %v1026_v5  ;;  %v1542_v1 = vmul.f32 %v3189_v6, %v3853_v38  ;;  %v922_v18 = vadd.f32 %v3219_v49, %v914_v9  ;;  %v966_v56 = vmul.f32 %v3110_v15, %v3334_v45  ;;  %v3857_v25 = vld [vmem:[#allocation11_spill] sm:$0xff]  ;;  %v3858_v5 = vld [vmem:[#allocation9_spill] sm:$0xff]  ;;  %v3521_v9 = vld [vmem:[#allocation2 + $0xd8] sm:$0xff] }
 0x169   : > { %v1146_v46 = vmin.f32 %v1138_v11, 6.0  ;;  %v1654_v58 = vadd.f32 %v1646_v59, %v1628_v23  ;;  %v1524_v0 = vadd.f32 %v1516_v13, %v1497_v27  ;;  %v1568_v33 = vmul.f32 %v3228_v50, %v3430_v29  ;;  %v3523_v11 = vld [vmem:[#allocation2 + $0xd9] sm:$0xff] }
 0x16a   : > { %v1079_v20 = vadd.f32 %v1071_v36, %v1052_v17  ;;  %v1595_v41 = vmul.f32 %v3233_v48, %v3500_v8  ;;  %v1621_v38 = vmul.f32 %v3246_v47, %v3857_v25  ;;  %v948_v4 = vadd.f32 %v940_v40, %v922_v18 }
 0x16b   : > { %1787 = vmatmul.f32.gmra.mxu1 %v1146_v46  ;;  %v1662_v16 = vmax.f32 %v1654_v58, 0.0  ;;  %v1550_v61 = vadd.f32 %v1542_v1, %v1524_v0  ;;  %v1647_v45 = vmul.f32 %v3251_v21, %v3504_v60  ;;  %v915_v59 = vmul.f32 %v3090_v10, %v3377_v19  ;;  %v3527_v1 = vld [vmem:[#allocation2 + $0xda] sm:$0xff] }
 0x16c   : > { %v1105_v43 = vadd.f32 %v1097_v55, %v1079_v20  ;;  %v974_v13 = vadd.f32 %v966_v56, %v948_v4  ;;  %v993_v36 = vmul.f32 %v3136_v31, %v3858_v5  ;;  %v941_v40 = vmul.f32 %v3095_v44, %v3852_v3  ;;  %v3859_v56 = vld [vmem:[#allocation15_spill] sm:$0xff] }
 0x16d   : > { %v1752_v23 = vpop.f32.mrf.mxu1  ;;  %v1670_v27 = vmin.f32 %v1662_v16, 6.0  ;;  %v1576_v17 = vadd.f32 %v1568_v33, %v1550_v61  ;;  %v923_v18 = vadd.f32 %v3219_v49, %v915_v59  ;;  %v967_v10 = vmul.f32 %v3110_v15, %v3398_v63  ;;  %v1454_v44 = vld [vmem:[#allocation2 + $0x169] sm:$0xff]  ;;  %v1063_v59 = vld [vmem:[#allocation2 + $0xe0] sm:$0xff] }
 0x16e   : > { %v1131_v19 = vadd.f32 %v1123_v7, %v1105_v43  ;;  %v1001_v55 = vadd.f32 %v993_v36, %v974_v13  ;;  %v1019_v46 = vmul.f32 %v3141_v51, %v3859_v56  ;;  %v1045_v58 = vmul.f32 %v3161_v37, %v3441_v28  ;;  %v3551_v13 = vld [vmem:[%s3776_s6] ss:$0 sm:$0xff] }
 0x16f   : > { %1835 = vmatmul.f32.gmra.mxu3 %v1670_v27  ;;  %v1603_v3 = vadd.f32 %v1595_v41, %v1576_v17  ;;  %v1072_v0 = vmul.f32 %v3855_v35, %v3521_v9  ;;  %v1098_v33 = vmul.f32 %v3856_v14, %v3523_v11  ;;  %v949_v20 = vadd.f32 %v941_v40, %v923_v18 }
 0x170   : > { %v1139_v4 = vmax.f32 %v1131_v19, 0.0  ;;  %v1027_v15 = vadd.f32 %v1019_v46, %v1001_v55  ;;  %v1124_v63 = vmul.f32 %v3212_v12, %v3527_v1  ;;  %v1438_v7 = vmul.f32 %v3154_v57, %v3351_v26 }
 0x171   : > { %v1629_v16 = vadd.f32 %v1621_v38, %v1603_v3  ;;  %v975_v61 = vadd.f32 %v967_v10, %v949_v20  ;;  %v994_v41 = vmul.f32 %v3136_v31, %v3470_v22  ;;  %v1464_v43 = vmul.f32 %v3168_v54, %v1454_v44 }
 0x172   : > { %v1147_v36 = vmin.f32 %v1139_v4, 6.0  ;;  %v1053_v40 = vadd.f32 %v1045_v58, %v1027_v15  ;;  %v1446_v26 = vadd.f32 %v3219_v49, %v1438_v7  ;;  %v1490_v38 = vmul.f32 %v3177_v2, %v3367_v39  ;;  %v2076_v39 = vld [vmem:[%s2484_s23 + $0x19] sm:$0xff]  ;;  %v1115_v15 = vld [vmem:[#allocation2 + $0xe2] sm:$0xff] }
 0x173   : > { %v1655_v27 = vadd.f32 %v1647_v45, %v1629_v16  ;;  %v1002_v17 = vadd.f32 %v994_v41, %v975_v61  ;;  %v1020_v31 = vmul.f32 %v3141_v51, %v3480_v52  ;;  %v1046_v22 = vmul.f32 %v3161_v37, %v3487_v62  ;;  %v1089_v62 = vld [vmem:[#allocation2 + $0xe1] sm:$0xff] }
 0x174   : > { %1790 = vmatmul.f32.gmra.mxu1 %v1147_v36  ;;  %v1080_v18 = vadd.f32 %v1072_v0, %v1053_v40  ;;  %v1073_v10 = vmul.f32 %v3855_v35, %v1063_v59  ;;  %v1472_v19 = vadd.f32 %v1464_v43, %v1446_v26  ;;  %v1517_v55 = vmul.f32 %v3205_v53, %v3452_v34  ;;  %v2247_v34 = vld [vmem:[%s3773_s3] ss:$0 sm:$0xff] }
 0x175   : > { %v3568_v45 = vpop.f32.mrf.mxu1  ;;  %v1663_v46 = vmax.f32 %v1655_v27, 0.0  ;;  %v1028_v58 = vadd.f32 %v1020_v31, %v1002_v17  ;;  %v1543_v51 = vmul.f32 %v3189_v6, %v3295_v42  ;;  %v1753_v37 = vadd.f32 %v3551_v13, %v1752_v23  ;;  %v2248_v42 = vld [vmem:[%s3773_s3 + $0x1] ss:$0 sm:$0xff] }
 0x176   : > { %v1106_v52 = vadd.f32 %v1098_v33, %v1080_v18  ;;  %v1498_v44 = vadd.f32 %v1490_v38, %v1472_v19  ;;  %v1569_v35 = vmul.f32 %v3228_v50, %v3461_v24  ;;  %v1170_v3 = vmul.f32 %v2247_v34, %v3858_v5  ;;  %v1612_v24 = vld [vmem:[#allocation2 + $0x199] sm:$0xff]  ;;  %v2249_v5 = vld [vmem:[%s3773_s3 + $0x2] ss:$0 sm:$0xff]  ;;  %v1455_v38 = vld [vmem:[#allocation2 + $0x171] sm:$0xff] }
 0x177   : > { %v1671_v0 = vmin.f32 %v1663_v46, 6.0  ;;  %v1054_v20 = vadd.f32 %v1046_v22, %v1028_v58  ;;  %v1883_v4 = vadd.f32 %v2076_v39, %v1753_v37  ;;  %v1196_v23 = vmul.f32 %v2248_v42, %v3859_v56  ;;  %v1638_v56 = vld [vmem:[#allocation2 + $0x19a] sm:$0xff]  ;;  %v2252_v58 = vld [vmem:[%s3773_s3 + $0x6] ss:$0 sm:$0xff]  ;;  %v2078_v34 = vld [vmem:[%s2484_s23 + $0x31] sm:$0xff] }
 0x178   : > { %v1132_v33 = vadd.f32 %v1124_v63, %v1106_v52  ;;  %v1525_v7 = vadd.f32 %v1517_v55, %v1498_v44  ;;  %v1178_v16 = vadd.f32 %v3219_v49, %v1170_v3  ;;  %v1222_v61 = vmul.f32 %v2249_v5, %v3441_v28  ;;  %v2250_v28 = vld [vmem:[%s3773_s3 + $0x4] ss:$0 sm:$0xff] }
 0x179   : > { %1838 = vmatmul.f32.gmra.mxu3 %v1671_v0  ;;  %v1081_v41 = vadd.f32 %v1073_v10, %v1054_v20  ;;  %v1099_v59 = vmul.f32 %v3856_v14, %v1089_v62  ;;  %v3591_v43 = vmul.f32 %v3387_v30, %v3233_v48  ;;  %1915 = vst [vmem:[%s3594_s15] sm:$0xff] %v1883_v4  ;;  %v1318_v30 = vld [vmem:[#allocation2 + $0xf0] sm:$0xff]  ;;  %v2093_v42 = vld [vmem:[%s2484_s23 + $0xe1] sm:$0xff] }
 0x17a   : > { %v1140_v63 = vmax.f32 %v1132_v33, 0.0  ;;  %v1551_v36 = vadd.f32 %v1543_v51, %v1525_v7  ;;  %v1204_v40 = vadd.f32 %v1196_v23, %v1178_v16  ;;  %v1249_v26 = vmul.f32 %v2250_v28, %v3521_v9  ;;  %v2251_v9 = vld [vmem:[%s3773_s3 + $0x5] ss:$0 sm:$0xff]  ;;  %v1344_v20 = vld [vmem:[#allocation2 + $0xf1] sm:$0xff]  ;;  %v2254_v7 = vld [vmem:[%s3773_s3 + $0x9] ss:$0 sm:$0xff] }
 0x17b   : > { %v1107_v14 = vadd.f32 %v1099_v59, %v1081_v41  ;;  %v1125_v27 = vmul.f32 %v3212_v12, %v1115_v15  ;;  %v1622_v48 = vmul.f32 %v3246_v47, %v1612_v24  ;;  %v1439_v17 = vmul.f32 %v3154_v57, %v3409_v32  ;;  %v1370_v23 = vld [vmem:[#allocation2 + $0xf2] sm:$0xff] }
 0x17c   : > { %v1148_v31 = vmin.f32 %v1140_v63, 6.0  ;;  %v1577_v22 = vadd.f32 %v1569_v35, %v1551_v36  ;;  %v1648_v18 = vmul.f32 %v3251_v21, %v1638_v56  ;;  %v1230_v10 = vadd.f32 %v1222_v61, %v1204_v40  ;;  %v2077_v35 = vld [vmem:[%s2484_s23 + $0x21] sm:$0xff]  ;;  %v2255_v56 = vld [vmem:[%s3773_s3 + $0xa] ss:$0 sm:$0xff]  ;;  %v2079_v28 = vld [vmem:[%s2484_s23 + $0x39] sm:$0xff] }
 0x17d   : > { %v1758_v19 = vpop.f32.mrf.mxu1  ;;  %v1133_v55 = vadd.f32 %v1125_v27, %v1107_v14  ;;  %v1275_v12 = vmul.f32 %v2251_v9, %v3523_v11  ;;  %v1447_v39 = vadd.f32 %v3219_v49, %v1439_v17  ;;  %v1465_v46 = vmul.f32 %v3168_v54, %v1455_v38  ;;  %v2253_v11 = vld [vmem:[%s3773_s3 + $0x8] ss:$0 sm:$0xff]  ;;  %v1803_v52 = vpop.f32.mrf.mxu3 }
 0x17e   : > { %1793 = vmatmul.f32.gmra.mxu1 %v1148_v31  ;;  %v1604_v32 = vadd.f32 %v3591_v43, %v1577_v22  ;;  %v1257_v57 = vadd.f32 %v1249_v26, %v1230_v10  ;;  %v1301_v51 = vmul.f32 %v2252_v58, %v3527_v1  ;;  %v1328_v37 = vmul.f32 %v2253_v11, %v1318_v30  ;;  %v1613_v36 = vld [vmem:[#allocation2 + $0x1a1] sm:$0xff]  ;;  %v2095_v58 = vld [vmem:[%s2484_s23 + $0xf9] sm:$0xff] }
 0x17f   : > { %v1141_v49 = vmax.f32 %v1133_v55, 0.0  ;;  %v1473_v62 = vadd.f32 %v1465_v46, %v1447_v39  ;;  %v1491_v54 = vmul.f32 %v3177_v2, %v3430_v29  ;;  %v1518_v44 = vmul.f32 %v3205_v53, %v3500_v8  ;;  %v1639_v27 = vld [vmem:[#allocation2 + $0x1a2] sm:$0xff] }
 0x180   : > { %v1630_v3 = vadd.f32 %v1622_v48, %v1604_v32  ;;  %v1283_v0 = vadd.f32 %v1275_v12, %v1257_v57  ;;  %v1756_v1 = vadd.f32 %v3551_v13, %v3568_v45  ;;  %v1759_v4 = vadd.f32 %v3551_v13, %v1758_v19  ;;  %v2080_v39 = vld [vmem:[%s2484_s23 + $0x49] sm:$0xff] }
 0x181   : > { %v1499_v33 = vadd.f32 %v1491_v54, %v1473_v62  ;;  %v1804_v15 = vadd.f32 %v3551_v13, %v1803_v52  ;;  %v1354_v24 = vmul.f32 %v2254_v7, %v1344_v20  ;;  %v1544_v16 = vmul.f32 %v3189_v6, %v3857_v25  ;;  %v2082_v20 = vld [vmem:[%s2484_s23 + $0x61] sm:$0xff] }
 0x182   : > { %v1656_v2 = vadd.f32 %v1648_v18, %v1630_v3  ;;  %v1309_v29 = vadd.f32 %v1301_v51, %v1283_v0  ;;  %v1884_v53 = vadd.f32 %v2077_v35, %v1756_v1  ;;  %v1885_v8 = vadd.f32 %v2078_v34, %v1759_v4  ;;  %v2094_v18 = vld [vmem:[%s2484_s23 + $0xf1] sm:$0xff]  ;;  %v2096_v35 = vld [vmem:[%s2484_s23 + $0x109] sm:$0xff]  ;;  %v2098_v7 = vld [vmem:[%s2484_s23 + $0x121] sm:$0xff] }
 0x183   : > { %v1526_v45 = vadd.f32 %v1518_v44, %v1499_v33  ;;  %v1900_v5 = vadd.f32 %v2093_v42, %v1804_v15  ;;  %v1149_v61 = vmin.f32 %v1141_v49, 6.0  ;;  %v1380_v63 = vmul.f32 %v2255_v56, %v1370_v23  ;;  %v2081_v49 = vld [vmem:[%s2484_s23 + $0x51] sm:$0xff] }
 0x184   : > { %v1664_v41 = vmax.f32 %v1656_v2, 0.0  ;;  %v1336_v59 = vadd.f32 %v1328_v37, %v1309_v29  ;;  %1916 = vst [vmem:[%s3594_s15 + $0x8] sm:$0xff] %v1884_v53  ;;  %v1570_v38 = vmul.f32 %v3228_v50, %v3504_v60  ;;  %v1623_v30 = vmul.f32 %v3246_v47, %v1613_v36  ;;  %v2097_v4 = vld [vmem:[%s2484_s23 + $0x111] sm:$0xff]  ;;  %v2083_v29 = vld [vmem:[%s2484_s23 + $0x69] sm:$0xff] }
 0x185   : > { %v1761_v40 = vpop.f32.mrf.mxu1  ;;  %v1552_v26 = vadd.f32 %v1544_v16, %v1526_v45  ;;  %1917 = vst [vmem:[%s3594_s15 + $0x10] sm:$0xff] %v1885_v8  ;;  %v1649_v60 = vmul.f32 %v3251_v21, %v1639_v27 }
 0x186   : > { %v1762_v6 = vadd.f32 %v3551_v13, %v1761_v40  ;;  %1796 = vmatmul.f32.gmra.mxu1 %v1149_v61  ;;  %v1672_v25 = vmin.f32 %v1664_v41, 6.0  ;;  %v1362_v14 = vadd.f32 %v1354_v24, %v1336_v59  ;;  %1932 = vst [vmem:[%s3594_s15 + $0x88] sm:$0xff] %v1900_v5  ;;  %v2084_v61 = vld [vmem:[%s2484_s23 + $0x79] sm:$0xff]  ;;  %v2099_v59 = vld [vmem:[%s2484_s23 + $0x129] sm:$0xff] }
 0x187   : > { %v1578_v48 = vadd.f32 %v1570_v38, %v1552_v26  ;;  %v2085_v26 = vld [vmem:[%s2484_s23 + $0x81] sm:$0xff] }
 0x188   : > { %v1886_v17 = vadd.f32 %v2079_v28, %v1762_v6  ;;  %1841 = vmatmul.f32.gmra.mxu3 %v1672_v25  ;;  %v1388_v31 = vadd.f32 %v1380_v63, %v1362_v14  ;;  %v2100_v25 = vld [vmem:[%s2484_s23 + $0x139] sm:$0xff] }
 0x189   : > { %v1806_v22 = vpop.f32.mrf.mxu3  ;;  %v1605_v50 = vadd.f32 %v3591_v43, %v1578_v48 }
 0x18a   : > { %1918 = vst [vmem:[%s3594_s15 + $0x18] sm:$0xff] %v1886_v17  ;;  %v1807_v10 = vadd.f32 %v3551_v13, %v1806_v22  ;;  %v1396_v19 = vmax.f32 %v1388_v31, 0.0  ;;  %v2086_v17 = vld [vmem:[%s2484_s23 + $0x91] sm:$0xff] }
 0x18b   : > { %v1631_v55 = vadd.f32 %v1623_v30, %v1605_v50 }
 0x18c   : > { %v1901_v9 = vadd.f32 %v2094_v18, %v1807_v10  ;;  %v1404_v12 = vmin.f32 %v1396_v19, 6.0  ;;  %v2101_v18 = vld [vmem:[%s2484_s23 + $0x141] sm:$0xff] }
 0x18d   : > { %v1657_v46 = vadd.f32 %v1649_v60, %v1631_v55  ;;  %v2087_v55 = vld [vmem:[%s2484_s23 + $0x99] sm:$0xff] }
 0x18e   : > { %v1764_v47 = vpop.f32.mrf.mxu1  ;;  %1933 = vst [vmem:[%s3594_s15 + $0x90] sm:$0xff] %v1901_v9  ;;  %1799 = vmatmul.f32.gmra.mxu1 %v1404_v12  ;;  %v2102_v12 = vld [vmem:[%s2484_s23 + $0x151] sm:$0xff] }
 0x18f   : > { %v1765_v32 = vadd.f32 %v3551_v13, %v1764_v47  ;;  %v1665_v21 = vmax.f32 %v1657_v46, 0.0 }
 0x191   : > { %v1887_v43 = vadd.f32 %v2080_v39, %v1765_v32  ;;  %v1809_v57 = vpop.f32.mrf.mxu3  ;;  %v1673_v51 = vmin.f32 %v1665_v21, 6.0 }
 0x192   : > { %v1810_v11 = vadd.f32 %v3551_v13, %v1809_v57 }
 0x193   : > { %1919 = vst [vmem:[%s3594_s15 + $0x20] sm:$0xff] %v1887_v43  ;;  %1844 = vmatmul.f32.gmra.mxu3 %v1673_v51  ;;  %v2088_v43 = vld [vmem:[%s2484_s23 + $0xa9] sm:$0xff] }
 0x194   : > { %v1902_v37 = vadd.f32 %v2095_v58, %v1810_v11  ;;  %v2103_v58 = vld [vmem:[%s2484_s23 + $0x159] sm:$0xff] }
 0x196   : > { %v1767_v52 = vpop.f32.mrf.mxu1  ;;  %1934 = vst [vmem:[%s3594_s15 + $0x98] sm:$0xff] %v1902_v37 }
 0x197   : > { %v1768_v62 = vadd.f32 %v3551_v13, %v1767_v52 }
 0x199   : > { %v1888_v54 = vadd.f32 %v2081_v49, %v1768_v62  ;;  %v1812_v44 = vpop.f32.mrf.mxu3  ;;  %v2089_v62 = vld [vmem:[%s2484_s23 + $0xb1] sm:$0xff] }
 0x19a   : > { %v1813_v34 = vadd.f32 %v3551_v13, %v1812_v44 }
 0x19b   : > { %1920 = vst [vmem:[%s3594_s15 + $0x28] sm:$0xff] %v1888_v54 }
 0x19c   : > { %v1903_v3 = vadd.f32 %v2096_v35, %v1813_v34  ;;  %v2104_v35 = vld [vmem:[%s2484_s23 + $0x169] sm:$0xff] }
 0x19e   : > { %1935 = vst [vmem:[%s3594_s15 + $0xa0] sm:$0xff] %v1903_v3 }
 0x1a1   : > { %v1815_v1 = vpop.f32.mrf.mxu3 }
 0x1a2   : > { %v1770_v0 = vpop.f32.mrf.mxu1  ;;  %v1816_v23 = vadd.f32 %v3551_v13, %v1815_v1  ;;  %v2090_v1 = vld [vmem:[%s2484_s23 + $0xc1] sm:$0xff] }
 0x1a3   : > { %v1771_v42 = vadd.f32 %v3551_v13, %v1770_v0 }
 0x1a4   : > { %v1904_v15 = vadd.f32 %v2097_v4, %v1816_v23  ;;  %v2105_v23 = vld [vmem:[%s2484_s23 + $0x171] sm:$0xff] }
 0x1a5   : > { %v1889_v33 = vadd.f32 %v2082_v20, %v1771_v42 }
 0x1a6   : > { %1936 = vst [vmem:[%s3594_s15 + $0xa8] sm:$0xff] %v1904_v15 }
 0x1a7   : > { %1921 = vst [vmem:[%s3594_s15 + $0x30] sm:$0xff] %v1889_v33 }
 0x1af   : > { %v1773_v2 = vpop.f32.mrf.mxu1 }
 0x1b0   : > { %v1774_v53 = vadd.f32 %v3551_v13, %v1773_v2  ;;  %v1818_v8 = vpop.f32.mrf.mxu3 }
 0x1b1   : > { %v1819_v24 = vadd.f32 %v3551_v13, %v1818_v8 }
 0x1b2   : > { %v1890_v45 = vadd.f32 %v2083_v29, %v1774_v53  ;;  %v2091_v53 = vld [vmem:[%s2484_s23 + $0xc9] sm:$0xff] }
 0x1b3   : > { %v1905_v16 = vadd.f32 %v2098_v7, %v1819_v24 }
 0x1b4   : > { %1922 = vst [vmem:[%s3594_s15 + $0x38] sm:$0xff] %v1890_v45  ;;  %v2106_v45 = vld [vmem:[%s2484_s23 + $0x181] sm:$0xff] }
 0x1b5   : > { %1937 = vst [vmem:[%s3594_s15 + $0xb0] sm:$0xff] %v1905_v16 }
 0x1bb   : > { %v1821_v41 = vpop.f32.mrf.mxu3 }
 0x1bc   : > { %v1776_v5 = vpop.f32.mrf.mxu1  ;;  %v1822_v63 = vadd.f32 %v3551_v13, %v1821_v41 }
 0x1bd   : > { %v1777_v56 = vadd.f32 %v3551_v13, %v1776_v5  ;;  %v2092_v5 = vld [vmem:[%s2484_s23 + $0xd9] sm:$0xff] }
 0x1be   : > { %v1906_v40 = vadd.f32 %v2099_v59, %v1822_v63 }
 0x1bf   : > { %v1891_v36 = vadd.f32 %v2084_v61, %v1777_v56 }
 0x1c0   : > { %1938 = vst [vmem:[%s3594_s15 + $0xb8] sm:$0xff] %v1906_v40 }
 0x1c1   : > { %1923 = vst [vmem:[%s3594_s15 + $0x40] sm:$0xff] %v1891_v36  ;;  %v2107_v36 = vld [vmem:[%s2484_s23 + $0x189] sm:$0xff] }
 0x1c7   : > { %v1779_v28 = vpop.f32.mrf.mxu1 }
 0x1c8   : > { %v1780_v38 = vadd.f32 %v3551_v13, %v1779_v28  ;;  %v1824_v6 = vpop.f32.mrf.mxu3 }
 0x1c9   : > { %v1825_v14 = vadd.f32 %v3551_v13, %v1824_v6 }
 0x1ca   : > { %v1892_v27 = vadd.f32 %v2085_v26, %v1780_v38 }
 0x1cb   : > { %v1907_v48 = vadd.f32 %v2100_v25, %v1825_v14 }
 0x1cc   : > { %1924 = vst [vmem:[%s3594_s15 + $0x48] sm:$0xff] %v1892_v27 }
 0x1cd   : > { %1939 = vst [vmem:[%s3594_s15 + $0xc0] sm:$0xff] %v1907_v48 }
 0x1d1   : > { %v1782_v30 = vpop.f32.mrf.mxu1 }
 0x1d2   : > { %v1783_v31 = vadd.f32 %v3551_v13, %v1782_v30  ;;  %v1827_v22 = vpop.f32.mrf.mxu3 }
 0x1d3   : > { %v1828_v50 = vadd.f32 %v3551_v13, %v1827_v22 }
 0x1d4   : > { %v1893_v60 = vadd.f32 %v2086_v17, %v1783_v31 }
 0x1d5   : > { %v1908_v10 = vadd.f32 %v2101_v18, %v1828_v50 }
 0x1d6   : > { %1925 = vst [vmem:[%s3594_s15 + $0x50] sm:$0xff] %v1893_v60 }
 0x1d7   : > { %1940 = vst [vmem:[%s3594_s15 + $0xc8] sm:$0xff] %v1908_v10 }
 0x1dd   : > { %v1785_v19 = vpop.f32.mrf.mxu1 }
 0x1de   : > { %v1830_v9 = vpop.f32.mrf.mxu3  ;;  %v1786_v47 = vadd.f32 %v3551_v13, %v1785_v19 }
 0x1df   : > { %v1831_v39 = vadd.f32 %v3551_v13, %v1830_v9 }
 0x1e0   : > { %v1894_v46 = vadd.f32 %v2087_v55, %v1786_v47 }
 0x1e1   : > { %v1909_v32 = vadd.f32 %v2102_v12, %v1831_v39 }
 0x1e2   : > { %1926 = vst [vmem:[%s3594_s15 + $0x58] sm:$0xff] %v1894_v46 }
 0x1e3   : > { %1941 = vst [vmem:[%s3594_s15 + $0xd0] sm:$0xff] %v1909_v32 }
 0x1e8   : > { %v1788_v21 = vpop.f32.mrf.mxu1 }
 0x1e9   : > { %v1833_v57 = vpop.f32.mrf.mxu3  ;;  %v1789_v51 = vadd.f32 %v3551_v13, %v1788_v21 }
 0x1ea   : > { %v1834_v11 = vadd.f32 %v3551_v13, %v1833_v57 }
 0x1eb   : > { %v1895_v37 = vadd.f32 %v2088_v43, %v1789_v51 }
 0x1ec   : > { %v1910_v52 = vadd.f32 %v2103_v58, %v1834_v11 }
 0x1ed   : > { %1927 = vst [vmem:[%s3594_s15 + $0x60] sm:$0xff] %v1895_v37 }
 0x1ee   : > { %1942 = vst [vmem:[%s3594_s15 + $0xd8] sm:$0xff] %v1910_v52 }
 0x1f1   : > { %v1791_v49 = vpop.f32.mrf.mxu1 }
 0x1f2   : > { %v1792_v54 = vadd.f32 %v3551_v13, %v1791_v49  ;;  %v1836_v44 = vpop.f32.mrf.mxu3 }
 0x1f3   : > { %v1837_v34 = vadd.f32 %v3551_v13, %v1836_v44 }
 0x1f4   : > { %v1896_v3 = vadd.f32 %v2089_v62, %v1792_v54 }
 0x1f5   : > { %v1911_v0 = vadd.f32 %v2104_v35, %v1837_v34 }
 0x1f6   : > { %1928 = vst [vmem:[%s3594_s15 + $0x68] sm:$0xff] %v1896_v3 }
 0x1f7   : > { %1943 = vst [vmem:[%s3594_s15 + $0xe0] sm:$0xff] %v1911_v0 }
 0x1fb   : > { %v1794_v20 = vpop.f32.mrf.mxu1 }
 0x1fc   : > { %v1795_v4 = vadd.f32 %v3551_v13, %v1794_v20  ;;  %v1839_v42 = vpop.f32.mrf.mxu3 }
 0x1fd   : > { %v1840_v33 = vadd.f32 %v3551_v13, %v1839_v42 }
 0x1fe   : > { %v1897_v15 = vadd.f32 %v2090_v1, %v1795_v4 }
 0x1ff   : > { %v1912_v2 = vadd.f32 %v2105_v23, %v1840_v33 }
 0x200   : > { %1929 = vst [vmem:[%s3594_s15 + $0x70] sm:$0xff] %v1897_v15 }
 0x201   : > { %1944 = vst [vmem:[%s3594_s15 + $0xe8] sm:$0xff] %v1912_v2 }
 0x203   : > { %v1797_v29 = vpop.f32.mrf.mxu1 }
 0x204   : > { %v1798_v8 = vadd.f32 %v3551_v13, %v1797_v29 }
 0x206   : > { %v1898_v7 = vadd.f32 %v2091_v53, %v1798_v8 }
 0x208   : > { %1930 = vst [vmem:[%s3594_s15 + $0x78] sm:$0xff] %v1898_v7 }
 0x20b   : > { %v1842_v24 = vpop.f32.mrf.mxu3  ;;  %v1800_v16 = vpop.f32.mrf.mxu1 }
 0x20c   : > { %v1843_v61 = vadd.f32 %v3551_v13, %v1842_v24  ;;  %v1801_v41 = vadd.f32 %v3551_v13, %v1800_v16 }
 0x20e   : > { %v1913_v59 = vadd.f32 %v2106_v45, %v1843_v61  ;;  %v1899_v56 = vadd.f32 %v2092_v5, %v1801_v41 }
 0x210   : > { %1945 = vst [vmem:[%s3594_s15 + $0xf0] sm:$0xff] %v1913_v59 }
 0x211   : > { %1931 = vst [vmem:[%s3594_s15 + $0x80] sm:$0xff] %v1899_v56 }
 0x216   : > { %v1845_v63 = vpop.f32.mrf.mxu3 }
 0x217   : > { %v1846_v40 = vadd.f32 %v3551_v13, %v1845_v63 }
 0x219   : > { %v1914_v28 = vadd.f32 %v2107_v36, %v1846_v40 }
 0x21b   : > { %1946 = vst [vmem:[%s3594_s15 + $0xf8] sm:$0xff] %v1914_v28 }
 0x21c   : > { %2283 = shalt.err (!%p2280_p5)
}
 0x21d   : > { %s2337_s17 = smov 128   ;;  %s2338_s15 = smov 8  }
 0x21e   : > { %2147 = dma.vmem_to_hbm [thread:$0]  (%p2419_p4), %s1964_s30, 4096, %s1966_s8, %s1948_s10, %s2337_s17, %s2337_s17, %s2338_s15  }
 0x21f PF: > { %p2153_p6 = scmp.ge.s32.totalorder %s2334_s29, 2  ;;  %s1980_s21 = sand.u32 1, %s2314_s24  }
 0x220   : > { %s1981_s22 = scalar_lea.sflag [#allocation5], %s1980_s21 }
 0x221   : > { %p2150_p7 = pnand %p2153_p6, %p2426_p8 }
 0x223   : > { %p2151_p9 = pneg %p2150_p7 }
 0x225   : > { %2309 = dma.done.wait (%p2151_p9), %s1981_s22, 4096  }
 0x226   : > { %2311 = vsyncadd (%p2151_p9), %s1981_s22, 4294963200  ;;  %s20_s29 = sadd.s32 1, %s2334_s29   ;;  %s3860_s24 = smov %s2318_s25 }
 0x227   : > { %p17_p10 = scmp.ge.s32.totalorder %s20_s29, 4   ;;  %s3861_s25 = smov %s2322_s26 }
 0x228   : > { %s3862_s26 = smov %s2432_s14  ;;  %s3863_s27 = smov %s2330_s28 }
 0x229   : > { %s3864_s28 = smov %s3866_s9  ;;  %19 = sbr.rel (!%p17_p10) target bundleno = 4 (0x4), region = 106 }
 0x22e   :  { %1987 = vsyncpa [#allocation5], 1 }
 0x22f   :  { %1989 = vsyncpa [#allocation5 + $0x1], 1 }

</bundles_post_ra>
